<compile_context>
chip_gen: v5e
topology: v5e:2x2
jax: 0.10.0
libtpu: 0.0.40
codegen_flags: <defaults>
</compile_context>

<pallas_src>
import functools

import jax
import jax.numpy as jnp
from jax.experimental import pallas as pl
from jax.experimental.pallas import tpu as pltpu


NUM_CLASSES = 18        # self.num_classes
FEAT_DIM = 2048         # inception.fc.in_features
STEM_CH = 32            # stand-in stem width (Inception Conv2d_1a_3x3 width)
K_RAW = 3 * 3 * 3       # 3x3 conv over 3 input channels = 27
K_PAD = 32              # pad contraction dim 27 -> 32 (sublane aligned, zero-padded)
TILE_S = 512            # spatial rows per grid step (fits all generations' VMEM)


# ----------------------------------------------------------------------------
# Fused Pallas kernel: stem -> ReLU -> 1x1 proj -> ReLU -> GAP -> Linear head
# ----------------------------------------------------------------------------
def _fused_kernel(cols_ref, w_stem_ref, b_stem_ref, w_proj_ref, b_proj_ref,
                  w_head_ref, b_head_ref, out_ref, acc_ref,
                  *, s_true, tile_s, has_pad):
    """One grid step = one (tile_s, K_PAD) slab of im2col patches for one image."""
    s_idx = pl.program_id(1)
    n_s = pl.num_programs(1)

    @pl.when(s_idx == 0)
    def _init():
        acc_ref[...] = jnp.zeros_like(acc_ref)

    # --- stem 3x3/s2 conv as matmul (bf16 MXU, f32 accumulation) + ReLU ---------
    x = cols_ref[0]                                            # (tile_s, K_PAD) bf16
    h = jnp.dot(x, w_stem_ref[...], preferred_element_type=jnp.float32)
    h = jnp.maximum(h + b_stem_ref[...], 0.0)                  # (tile_s, STEM_CH) f32

    # --- 1x1 projection to FEAT_DIM channels + ReLU (stays in vregs/VMEM) -------
    h = jnp.dot(h.astype(jnp.bfloat16), w_proj_ref[...],
                preferred_element_type=jnp.float32)
    h = jnp.maximum(h + b_proj_ref[...], 0.0)                  # (tile_s, FEAT_DIM) f32

    # --- global-average-pool: running sum in f32 scratch -------------------------
    # Padded spatial rows exist only in the LAST tile (and only if S % tile_s != 0);
    # pay the (tile_s, FEAT_DIM) masking select only there.
    if has_pad:
        @pl.when(s_idx != n_s - 1)
        def _sum_full():
            acc_ref[...] += jnp.sum(h, axis=0, keepdims=True)

        @pl.when(s_idx == n_s - 1)
        def _sum_masked():
            row = s_idx * tile_s + jax.lax.broadcasted_iota(jnp.int32, (tile_s, 1), 0)
            acc_ref[...] += jnp.sum(jnp.where(row < s_true, h, 0.0),
                                    axis=0, keepdims=True)
    else:
        acc_ref[...] += jnp.sum(h, axis=0, keepdims=True)

    # --- finalize: mean over the TRUE spatial size, then trainable head ---------
    @pl.when(s_idx == n_s - 1)
    def _finalize():
        feats = acc_ref[...] * (1.0 / s_true)                  # (1, FEAT_DIM)
        logits = jnp.dot(feats, w_head_ref[...],
                         preferred_element_type=jnp.float32) + b_head_ref[...]
        out_ref[0] = logits.astype(out_ref.dtype)              # (1, NUM_CLASSES)


# ----------------------------------------------------------------------------
# Glue (reshapes / patch extraction) + parameter setup
# ----------------------------------------------------------------------------
def _im2col(x_nhwc, kh, kw, stride):
    """Valid-padding patch extraction (pure reshape/slice glue)."""
    B, H, W, C = x_nhwc.shape
    oh = (H - kh) // stride + 1
    ow = (W - kw) // stride + 1
    cols = []
    for i in range(kh):
        for j in range(kw):
            cols.append(x_nhwc[:, i:i + stride * oh:stride,
                               j:j + stride * ow:stride, :])
    p = jnp.stack(cols, axis=3)                  # (B, oh, ow, kh*kw, C)
    return p.reshape(B, oh, ow, kh * kw * C), oh, ow


def init_params(key):
    k1, k2, k3, k4 = jax.random.split(key, 4)
    p = {}
    # stand-in backbone (frozen in the original module) -> bf16 weights, f32 biases
    w_stem = 0.1 * jax.random.normal(k1, (K_RAW, STEM_CH), jnp.float32)
    p["w_stem"] = jnp.pad(w_stem, ((0, K_PAD - K_RAW), (0, 0))).astype(jnp.bfloat16)
    p["b_stem"] = jnp.zeros((1, STEM_CH), jnp.float32)
    p["w_proj"] = (0.05 * jax.random.normal(
        k2, (STEM_CH, FEAT_DIM), jnp.float32)).astype(jnp.bfloat16)
    p["b_proj"] = jnp.zeros((1, FEAT_DIM), jnp.float32)
    # trainable head: torch.nn.Linear(2048, 18): out = x @ W.T + b
    bound = 1.0 / (FEAT_DIM ** 0.5)
    w_head = jax.random.uniform(k3, (NUM_CLASSES, FEAT_DIM), jnp.float32, -bound, bound)
    p["w_head_t"] = w_head.T                     # pre-transposed once: (2048, 18) f32
    p["b_head"] = jax.random.uniform(k4, (1, NUM_CLASSES), jnp.float32, -bound, bound)
    return p


def classifier_forward(params, image_nchw, *, tile_s=TILE_S):
    """Mirrors Classifier.forward: features = backbone(image); last_layer(features).view(-1)."""
    x = jnp.transpose(image_nchw, (0, 2, 3, 1))                # NCHW -> NHWC
    B = x.shape[0]

    # TODO(synk): im2col still materializes patches in HBM; an in-kernel unfold
    # (index_map over overlapping image rows) would remove that extra traffic.
    cols, oh, ow = _im2col(x, 3, 3, 2)                         # 3x3 stride-2 stem conv
    S = oh * ow
    cols = cols.reshape(B, S, K_RAW)

    n_s = -(-S // tile_s)                                      # ceil-div, Python int
    s_pad = n_s * tile_s
    has_pad = (s_pad != S)
    cols = jnp.pad(cols, ((0, 0), (0, s_pad - S), (0, K_PAD - K_RAW)))
    cols = cols.astype(jnp.bfloat16)

    kernel = functools.partial(_fused_kernel, s_true=S, tile_s=tile_s, has_pad=has_pad)

    out = pl.pallas_call(
        kernel,
        out_shape=jax.ShapeDtypeStruct((B, 1, NUM_CLASSES), jnp.float32),
        grid=(B, n_s),
        in_specs=[
            pl.BlockSpec((1, tile_s, K_PAD), lambda b, s: (b, s, 0)),   # im2col patches
            pl.BlockSpec((K_PAD, STEM_CH), lambda b, s: (0, 0)),        # w_stem (bf16)
            pl.BlockSpec((1, STEM_CH), lambda b, s: (0, 0)),            # b_stem
            pl.BlockSpec((STEM_CH, FEAT_DIM), lambda b, s: (0, 0)),     # w_proj (bf16)
            pl.BlockSpec((1, FEAT_DIM), lambda b, s: (0, 0)),           # b_proj
            pl.BlockSpec((FEAT_DIM, NUM_CLASSES), lambda b, s: (0, 0)), # w_head (f32)
            pl.BlockSpec((1, NUM_CLASSES), lambda b, s: (0, 0)),        # b_head
        ],
        out_specs=pl.BlockSpec((1, 1, NUM_CLASSES), lambda b, s: (b, 0, 0)),
        scratch_shapes=[pltpu.VMEM((1, FEAT_DIM), jnp.float32)],        # GAP accumulator
        compiler_params=pltpu.CompilerParams(
            dimension_semantics=("parallel", "arbitrary"),   # batch across TCs (v7x)
            vmem_limit_bytes=48 * 1024 * 1024),
    )(cols, params["w_stem"], params["b_stem"], params["w_proj"],
      params["b_proj"], params["w_head_t"], params["b_head"])

    return out.reshape(-1)                                     # (B * NUM_CLASSES,)


# ----------------------------------------------------------------------------
# Pure-jnp reference of the same stand-in forward (validation only)
# ----------------------------------------------------------------------------
def _reference_forward(params, image_nchw):
    x = jnp.transpose(image_nchw, (0, 2, 3, 1))
    B = x.shape[0]
    cols, oh, ow = _im2col(x, 3, 3, 2)
    cols = cols.reshape(B, oh * ow, K_RAW)
    cols = jnp.pad(cols, ((0, 0), (0, 0), (0, K_PAD - K_RAW)))
    cols = cols.astype(jnp.bfloat16).astype(jnp.float32)       # match kernel input rounding
    w_stem = params["w_stem"].astype(jnp.float32)
    w_proj = params["w_proj"].astype(jnp.float32)
    h = jnp.maximum(cols @ w_stem + params["b_stem"], 0.0)
    h = jnp.maximum(h.astype(jnp.bfloat16).astype(jnp.float32) @ w_proj
                    + params["b_proj"], 0.0)
    feats = jnp.mean(h, axis=1)                                # (B, FEAT_DIM)
    logits = feats @ params["w_head_t"] + params["b_head"]
    return logits.reshape(-1)


if __name__ == "__main__":
    key = jax.random.PRNGKey(0)
    kp, kx = jax.random.split(key)
    params = init_params(kp)
    # small stand-in for a 299x299 Inception input; NCHW like torch
    image = jax.random.normal(kx, (2, 3, 32, 32), dtype=jnp.float32)

    # tile_s=128 at this small size exercises multi-tile GAP accumulation + the
    # masked-last-tile path (S = 225, n_s = 2, padded last tile).
    fwd = jax.jit(functools.partial(classifier_forward, tile_s=128))
    out = jax.block_until_ready(fwd(params, image))

    assert out.shape == (2 * NUM_CLASSES,), out.shape
    assert out.dtype == jnp.float32

    ref = jax.block_until_ready(jax.jit(_reference_forward)(params, image))
    assert jnp.allclose(out, ref, rtol=2e-2, atol=2e-2), float(jnp.max(jnp.abs(out - ref)))

    print("KERNEL_OK")
</pallas_src>

<mosaic_0001>
module attributes {stable_mosaic.version = 11 : i64} {
  func.func @_fused_kernel(%arg0: i32, %arg1: i32, %arg2: memref<1x128x32xbf16, #tpu.memory_space<vmem>>, %arg3: memref<32x32xbf16, #tpu.memory_space<vmem>>, %arg4: memref<1x32xf32, #tpu.memory_space<vmem>>, %arg5: memref<32x2048xbf16, #tpu.memory_space<vmem>>, %arg6: memref<1x2048xf32, #tpu.memory_space<vmem>>, %arg7: memref<2048x18xf32, #tpu.memory_space<vmem>>, %arg8: memref<1x18xf32, #tpu.memory_space<vmem>>, %arg9: memref<1x1x18xf32, #tpu.memory_space<vmem>>, %arg10: memref<1x2048xf32, #tpu.memory_space<vmem>>) attributes {dimension_semantics = [#tpu.dimension_semantics<parallel>, #tpu.dimension_semantics<arbitrary>], iteration_bounds = array<i64: 2, 2>, scalar_prefetch = 0 : i64, scratch_operands = 1 : i64, tpu.core_type = #tpu.core_type<tc>, window_params = [{transform_indices = @transform_0, window_bounds = array<i64: 1, 128, 32>}, {pipeline_mode = #tpu.pipeline_mode<synchronous>, transform_indices = @transform_1, window_bounds = array<i64: 32, 32>}, {pipeline_mode = #tpu.pipeline_mode<synchronous>, transform_indices = @transform_2, window_bounds = array<i64: 1, 32>}, {pipeline_mode = #tpu.pipeline_mode<synchronous>, transform_indices = @transform_3, window_bounds = array<i64: 32, 2048>}, {pipeline_mode = #tpu.pipeline_mode<synchronous>, transform_indices = @transform_4, window_bounds = array<i64: 1, 2048>}, {pipeline_mode = #tpu.pipeline_mode<synchronous>, transform_indices = @transform_5, window_bounds = array<i64: 2048, 18>}, {pipeline_mode = #tpu.pipeline_mode<synchronous>, transform_indices = @transform_6, window_bounds = array<i64: 1, 18>}, {transform_indices = @transform_7, window_bounds = array<i64: 1, 1, 18>}]} {
    %c0_i32 = arith.constant 0 : i32
    %0 = arith.cmpi eq, %arg1, %c0_i32 : i32
    %1 = arith.extui %0 : i1 to i32
    %c0_i32_0 = arith.constant 0 : i32
    %2 = arith.cmpi ne, %1, %c0_i32_0 : i32
    scf.if %2 {
      %cst_19 = arith.constant 0.000000e+00 : f32
      %29 = vector.broadcast %cst_19 : f32 to vector<1x2048xf32>
      %c0_20 = arith.constant 0 : index
      %c0_21 = arith.constant 0 : index
      %30 = vector.load %arg10[%c0_20, %c0_21] : memref<1x2048xf32, #tpu.memory_space<vmem>>, vector<1x2048xf32>
      tpu.vector_store %arg10[%c0_20, %c0_21], %29 {strides = array<i32>} : memref<1x2048xf32, #tpu.memory_space<vmem>>, vector<1x2048xf32>,
    } else {
    }
    %c0 = arith.constant 0 : index
    %c0_1 = arith.constant 0 : index
    %c0_2 = arith.constant 0 : index
    %3 = vector.load %arg2[%c0, %c0_1, %c0_2] : memref<1x128x32xbf16, #tpu.memory_space<vmem>>, vector<1x128x32xbf16>
    %4 = vector.shape_cast %3 : vector<1x128x32xbf16> to vector<128x32xbf16>
    %c0_3 = arith.constant 0 : index
    %c0_4 = arith.constant 0 : index
    %5 = vector.load %arg3[%c0_3, %c0_4] : memref<32x32xbf16, #tpu.memory_space<vmem>>, vector<32x32xbf16>
    %cst = arith.constant dense<0.000000e+00> : vector<128x32xf32>
    %6 = tpu.matmul %4, %5, %cst {dimension_numbers = #tpu.dot_dimension_numbers<[1], [0], [0], [1], [0, 0, 1, 1], [], []>} : vector<128x32xbf16>, vector<32x32xbf16>, vector<128x32xf32> -> vector<128x32xf32>
    %c0_5 = arith.constant 0 : index
    %c0_6 = arith.constant 0 : index
    %7 = vector.load %arg4[%c0_5, %c0_6] : memref<1x32xf32, #tpu.memory_space<vmem>>, vector<1x32xf32>
    %8 = vector.broadcast %7 : vector<1x32xf32> to vector<128x32xf32>
    %9 = arith.addf %6, %8 : vector<128x32xf32>
    %cst_7 = arith.constant 0.000000e+00 : f32
    %10 = vector.broadcast %cst_7 : f32 to vector<128x32xf32>
    %11 = arith.maximumf %9, %10 : vector<128x32xf32>
    %12 = arith.truncf %11 : vector<128x32xf32> to vector<128x32xbf16>
    %c0_8 = arith.constant 0 : index
    %c0_9 = arith.constant 0 : index
    %13 = vector.load %arg5[%c0_8, %c0_9] : memref<32x2048xbf16, #tpu.memory_space<vmem>>, vector<32x2048xbf16>
    %cst_10 = arith.constant dense<0.000000e+00> : vector<128x2048xf32>
    %14 = tpu.matmul %12, %13, %cst_10 {dimension_numbers = #tpu.dot_dimension_numbers<[1], [0], [0], [1], [0, 0, 1, 1], [], []>} : vector<128x32xbf16>, vector<32x2048xbf16>, vector<128x2048xf32> -> vector<128x2048xf32>
    %c0_11 = arith.constant 0 : index
    %c0_12 = arith.constant 0 : index
    %15 = vector.load %arg6[%c0_11, %c0_12] : memref<1x2048xf32, #tpu.memory_space<vmem>>, vector<1x2048xf32>
    %16 = vector.broadcast %15 : vector<1x2048xf32> to vector<128x2048xf32>
    %17 = arith.addf %14, %16 : vector<128x2048xf32>
    %cst_13 = arith.constant 0.000000e+00 : f32
    %18 = vector.broadcast %cst_13 : f32 to vector<128x2048xf32>
    %19 = arith.maximumf %17, %18 : vector<128x2048xf32>
    %c1_i32 = arith.constant 1 : i32
    %20 = arith.cmpi ne, %arg1, %c1_i32 : i32
    %21 = arith.extui %20 : i1 to i32
    %c0_i32_14 = arith.constant 0 : i32
    %22 = arith.cmpi ne, %21, %c0_i32_14 : i32
    scf.if %22 {
      %c0_19 = arith.constant 0 : index
      %c0_20 = arith.constant 0 : index
      %29 = vector.load %arg10[%c0_19, %c0_20] : memref<1x2048xf32, #tpu.memory_space<vmem>>, vector<1x2048xf32>
      %cst_21 = arith.constant dense<0.000000e+00> : vector<2048xf32>
      %30 = vector.multi_reduction <add>, %19, %cst_21 [0] : vector<128x2048xf32> to vector<2048xf32>
      %31 = vector.shape_cast %30 : vector<2048xf32> to vector<1x2048xf32>
      %32 = arith.addf %29, %31 : vector<1x2048xf32>
      %c0_22 = arith.constant 0 : index
      %c0_23 = arith.constant 0 : index
      %33 = vector.load %arg10[%c0_22, %c0_23] : memref<1x2048xf32, #tpu.memory_space<vmem>>, vector<1x2048xf32>
      tpu.vector_store %arg10[%c0_22, %c0_23], %32 {strides = array<i32>} : memref<1x2048xf32, #tpu.memory_space<vmem>>, vector<1x2048xf32>,
    } else {
    }
    %c1_i32_15 = arith.constant 1 : i32
    %23 = arith.cmpi eq, %arg1, %c1_i32_15 : i32
    %24 = arith.extui %23 : i1 to i32
    %c0_i32_16 = arith.constant 0 : i32
    %25 = arith.cmpi ne, %24, %c0_i32_16 : i32
    scf.if %25 {
      %c128_i32 = arith.constant 128 : i32
      %29 = arith.muli %arg1, %c128_i32 : i32
      %30 = tpu.iota {dimensions = array<i32: 0>} : vector<128x1xi32>
      %31 = vector.broadcast %29 : i32 to vector<128x1xi32>
      %32 = arith.addi %31, %30 : vector<128x1xi32>
      %c0_19 = arith.constant 0 : index
      %c0_20 = arith.constant 0 : index
      %33 = vector.load %arg10[%c0_19, %c0_20] : memref<1x2048xf32, #tpu.memory_space<vmem>>, vector<1x2048xf32>
      %c225_i32 = arith.constant 225 : i32
      %34 = vector.broadcast %c225_i32 : i32 to vector<128x1xi32>
      %35 = arith.cmpi slt, %32, %34 : vector<128x1xi32>
      %cst_21 = arith.constant 0.000000e+00 : f32
      %36 = vector.shape_cast %35 : vector<128x1xi1> to vector<128x1xi1>
      %37 = vector.broadcast %36 : vector<128x1xi1> to vector<128x2048xi1>
      %38 = vector.broadcast %cst_21 : f32 to vector<128x2048xf32>
      %39 = arith.select %37, %19, %38 : vector<128x2048xi1>, vector<128x2048xf32>
      %cst_22 = arith.constant dense<0.000000e+00> : vector<2048xf32>
      %40 = vector.multi_reduction <add>, %39, %cst_22 [0] : vector<128x2048xf32> to vector<2048xf32>
      %41 = vector.shape_cast %40 : vector<2048xf32> to vector<1x2048xf32>
      %42 = arith.addf %33, %41 : vector<1x2048xf32>
      %c0_23 = arith.constant 0 : index
      %c0_24 = arith.constant 0 : index
      %43 = vector.load %arg10[%c0_23, %c0_24] : memref<1x2048xf32, #tpu.memory_space<vmem>>, vector<1x2048xf32>
      tpu.vector_store %arg10[%c0_23, %c0_24], %42 {strides = array<i32>} : memref<1x2048xf32, #tpu.memory_space<vmem>>, vector<1x2048xf32>,
    } else {
    }
    %c1_i32_17 = arith.constant 1 : i32
    %26 = arith.cmpi eq, %arg1, %c1_i32_17 : i32
    %27 = arith.extui %26 : i1 to i32
    %c0_i32_18 = arith.constant 0 : i32
    %28 = arith.cmpi ne, %27, %c0_i32_18 : i32
    scf.if %28 {
      %c0_19 = arith.constant 0 : index
      %c0_20 = arith.constant 0 : index
      %29 = vector.load %arg10[%c0_19, %c0_20] : memref<1x2048xf32, #tpu.memory_space<vmem>>, vector<1x2048xf32>
      %cst_21 = arith.constant 0.00444444455 : f32
      %30 = vector.broadcast %cst_21 : f32 to vector<1x2048xf32>
      %31 = arith.mulf %29, %30 : vector<1x2048xf32>
      %c0_22 = arith.constant 0 : index
      %c0_23 = arith.constant 0 : index
      %32 = vector.load %arg7[%c0_22, %c0_23] : memref<2048x18xf32, #tpu.memory_space<vmem>>, vector<2048x18xf32>
      %cst_24 = arith.constant dense<0.000000e+00> : vector<1x18xf32>
      %33 = tpu.matmul %31, %32, %cst_24 {dimension_numbers = #tpu.dot_dimension_numbers<[1], [0], [0], [1], [0, 0, 1, 1], [], []>} : vector<1x2048xf32>, vector<2048x18xf32>, vector<1x18xf32> -> vector<1x18xf32>
      %c0_25 = arith.constant 0 : index
      %c0_26 = arith.constant 0 : index
      %34 = vector.load %arg8[%c0_25, %c0_26] : memref<1x18xf32, #tpu.memory_space<vmem>>, vector<1x18xf32>
      %35 = arith.addf %33, %34 : vector<1x18xf32>
      %c0_27 = arith.constant 0 : index
      %c0_28 = arith.constant 0 : index
      %c0_29 = arith.constant 0 : index
      %36 = vector.load %arg9[%c0_27, %c0_28, %c0_29] : memref<1x1x18xf32, #tpu.memory_space<vmem>>, vector<1x1x18xf32>
      %37 = vector.shape_cast %36 : vector<1x1x18xf32> to vector<1x18xf32>
      %38 = vector.shape_cast %35 : vector<1x18xf32> to vector<1x1x18xf32>
      tpu.vector_store %arg9[%c0_27, %c0_28, %c0_29], %38 {strides = array<i32>} : memref<1x1x18xf32, #tpu.memory_space<vmem>>, vector<1x1x18xf32>,
    } else {
    }
    return
  }
  func.func @transform_0(%arg0: i32, %arg1: i32) -> (i32, i32, i32) {
    %c0_i32 = arith.constant 0 : i32
    %c0_i32_0 = arith.constant 0 : i32
    return %arg0, %arg1, %c0_i32 : i32, i32, i32
  }
  func.func @transform_1(%arg0: i32, %arg1: i32) -> (i32, i32) {
    %c0_i32 = arith.constant 0 : i32
    %c0_i32_0 = arith.constant 0 : i32
    %c0_i32_1 = arith.constant 0 : i32
    return %c0_i32, %c0_i32_0 : i32, i32
  }
  func.func @transform_2(%arg0: i32, %arg1: i32) -> (i32, i32) {
    %c0_i32 = arith.constant 0 : i32
    %c0_i32_0 = arith.constant 0 : i32
    %c0_i32_1 = arith.constant 0 : i32
    return %c0_i32, %c0_i32_0 : i32, i32
  }
  func.func @transform_3(%arg0: i32, %arg1: i32) -> (i32, i32) {
    %c0_i32 = arith.constant 0 : i32
    %c0_i32_0 = arith.constant 0 : i32
    %c0_i32_1 = arith.constant 0 : i32
    return %c0_i32, %c0_i32_0 : i32, i32
  }
  func.func @transform_4(%arg0: i32, %arg1: i32) -> (i32, i32) {
    %c0_i32 = arith.constant 0 : i32
    %c0_i32_0 = arith.constant 0 : i32
    %c0_i32_1 = arith.constant 0 : i32
    return %c0_i32, %c0_i32_0 : i32, i32
  }
  func.func @transform_5(%arg0: i32, %arg1: i32) -> (i32, i32) {
    %c0_i32 = arith.constant 0 : i32
    %c0_i32_0 = arith.constant 0 : i32
    %c0_i32_1 = arith.constant 0 : i32
    return %c0_i32, %c0_i32_0 : i32, i32
  }
  func.func @transform_6(%arg0: i32, %arg1: i32) -> (i32, i32) {
    %c0_i32 = arith.constant 0 : i32
    %c0_i32_0 = arith.constant 0 : i32
    %c0_i32_1 = arith.constant 0 : i32
    return %c0_i32, %c0_i32_0 : i32, i32
  }
  func.func @transform_7(%arg0: i32, %arg1: i32) -> (i32, i32, i32) {
    %c0_i32 = arith.constant 0 : i32
    %c0_i32_0 = arith.constant 0 : i32
    %c0_i32_1 = arith.constant 0 : i32
    return %arg0, %c0_i32, %c0_i32_0 : i32, i32, i32
  }
}

</mosaic_0001>

<bundles_post_ra>
// kernel: classifier_forward.1
= control target key start
LH: loop header
LB: loop body
LE: loop exit
PB: predicated region body
PF: predicated region fallthrough
CT: control target
= control target key end

     0   :  { %s4083_s24 = smov 0   ;;  %s4085_s25 = smov 0   ;;  %s8947_s0 = inlined_call_operand.vmem [shape: bf16[2,256,32], index: 0, kind: input, shape index: {}]   ;;  %s8948_s1 = inlined_call_operand.vmem [shape: bf16[32,32], index: 1, kind: input, shape index: {}]   ;;  %s8949_s2 = inlined_call_operand.vmem [shape: f32[1,32], index: 2, kind: input, shape index: {}]   ;;  %s8950_s3 = inlined_call_operand.vmem [shape: bf16[32,2048], index: 3, kind: input, shape index: {}]   ;;  %s8951_s4 = inlined_call_operand.vmem [shape: f32[1,2048], index: 4, kind: input, shape index: {}]   ;;  %s8952_s5 = inlined_call_operand.vmem [shape: f32[2048,18], index: 5, kind: input, shape index: {}]   ;;  %s8953_s6 = inlined_call_operand.vmem [shape: f32[1,18], index: 6, kind: input, shape index: {}]   ;;  %s8954_s7 = inlined_call_operand.vmem [shape: f32[2,1,18], index: 7, kind: output, shape index: {}]  }
   0x1   :  { %s4087_s26 = smov 0   ;;  %s4089_s27 = smov 0  }
   0x2   :  { %s4091_s28 = smov 0  }
   0x3 LB: > { %s26_s29 = sadd.s32 1, %s4032_s26  ;;  %s29_s30 = sadd.s32 1, %s4036_s27  ;;  %s4040_s28 = sphi %s4091_s28, %s17_s28   ;;  %s4036_s27 = sphi %s4089_s27, %s10774_s27   ;;  %s4032_s26 = sphi %s4087_s26, %s10773_s26   ;;  %s4028_s25 = sphi %s4085_s25, %s10772_s25   ;;  %s4024_s24 = sphi %s4083_s24, %s10771_s24  }
   0x4   : > { %p27_p0 = scmp.ge.s32.totalorder %s26_s29, 2  ;;  %p3598_p1 = scmp.ge.s32.totalorder %s4040_s28, 1 }
   0x5   : > { %p256_p2 = scmp.lt.s32.totalorder %s4040_s28, 5 }
   0x6   : > { %s10776_s29 = smov (%p27_p0, %s26_s29), 0  ;;  %s10778_s30 = smov (!%p27_p0, %s29_s30), %s4036_s27 }
   0x7   : > { %p257_p3 = pnand %p3598_p1, %p256_p2  ;;  %p31_p4 = scmp.ge.s32.totalorder %s10778_s30, 2 }
   0x9   : > { %s10780_s30 = smov (%p31_p4, %s10778_s30), 0  ;;  %260 = sbr.rel (%p257_p3) target bundleno = 1519 (0x5ef), region = 48 }
   0xe   : > { %s3599_s8 = sshll.u32 %s4024_s24, 4  ;;  %p291_p5 = scmp.lt.s32.totalorder %s4028_s25, 1 }
   0xf   : > { %p293_p6 = scmp.lt.s32.totalorder %s3599_s8, 31  ;;  %p3602_p7 = scmp.ne.s32.totalorder %s4024_s24, 0 }
  0x10   : > { %s10782_s25 = smov (!%p291_p5, %s4028_s25), 1 }
  0x11   : > { %s10784_s8 = smov (!%p293_p6, %s3599_s8), 31  ;;  %s3600_s9 = sshll.u32 %s10782_s25, 5 }
  0x12   : > { %s302_s12 = scalar_lea.vmem %s8954_s7, %s10782_s25  ;;  %s296_s13 = sadd.s32 %s3600_s9, %s10784_s8 }
  0x13   : > { %s3601_s14 = sshll.u32 %s296_s13, 2  ;;  %307 = sbr.rel (%p3602_p7) target bundleno = 27 (0x1b), region = 52 }
  0x14   : > { %s4126_s17 = scalar_lea.vmem %s8947_s0, %s3601_s14 }
  0x18   : > { %v4042_v0 = vmov 0.0  }
  0x19   : > { %308 = vst [vmem:[#allocation2] sm:$0xff] %v4042_v0 }
  0x1a   : > { %309 = vst [vmem:[#allocation2 + $0x8] sm:$0xff] %v4042_v0 }
  0x1b PF: > { %v3921_v1 = vld [vmem:[%s8948_s1 + $0x8] sm:$0xff]  ;;  %v3920_v2 = vld [vmem:[%s8948_s1] sm:$0xff]  ;;  %vm386_vm0 = vcmask 261120   ;;  %v3914_v4 = vld [vmem:[%s4126_s17 + $0x10] sm:$0xff]  ;;  %p3907_p8 = scmp.eq.s32.totalorder %s4024_s24, 1 }
  0x1c   : > { %417 = vmatpush.bf16.msra.mxu0 %v3921_v1  ;;  %3954 = vmatpush.bf16.msra.mxu1 %v3921_v1  ;;  %v3912_v3 = vld [vmem:[%s4126_s17] sm:$0xff]  ;;  %v3918_v8 = vld [vmem:[%s4126_s17 + $0x30] sm:$0xff]  ;;  %v3725_v10 = vld [vmem:[%s8950_s3 + $0x88] sm:$0xf] }
  0x1d   : > { %3955 = vmatpush.bf16.msra.mxu2 %v3921_v1  ;;  %3956 = vmatpush.bf16.msra.mxu3 %v3921_v1  ;;  %v3938_v5 = vld [vmem:[%s8950_s3 + $0x84] sm:$0xf]  ;;  %v3947_v11 = vld [vmem:[%s8950_s3 + $0xc4] sm:$0xf0]  ;;  %v3717_v12 = vld [vmem:[%s8950_s3 + $0x80] sm:$0xf] }
  0x1e   : > { %v3719_v6 = vld [vmem:[%s8950_s3 + $0xc0] sm:$0xf0]  ;;  %v3726_v13 = vor.u32 %v3947_v11, %v3725_v10  ;;  %v3946_v14 = vld [vmem:[%s8950_s3 + $0xbc] sm:$0xf0]  ;;  %v3939_v15 = vld [vmem:[%s8950_s3 + $0x8c] sm:$0xf] }
  0x1f   : > { %v3916_v7 = vld [vmem:[%s4126_s17 + $0x20] sm:$0xff]  ;;  %v3722_v9 = vor.u32 %v3938_v5, %v3719_v6  ;;  %v3727_v16 = vld [vmem:[%s8950_s3 + $0xc8] sm:$0xf0]  ;;  %v3661_v19 = vld [vmem:[%s8950_s3 + $0x8] sm:$0xf]  ;;  %v3718_v20 = vor.u32 %v3946_v14, %v3717_v12 }
  0x20   : > { %418 = vmatpush.bf16.msra.mxu0 %v3920_v2  ;;  %3957 = vmatpush.bf16.msra.mxu1 %v3920_v2  ;;  %v3922_v17 = vld [vmem:[%s8950_s3 + $0x4] sm:$0xf]  ;;  %v3730_v21 = vor.u32 %v3939_v15, %v3727_v16  ;;  %v3931_v22 = vld [vmem:[%s8950_s3 + $0x44] sm:$0xf0]  ;;  %v3915_v26 = vld [vmem:[%s4126_s17 + $0x18] sm:$0xff] }
  0x21   : > { %v3655_v18 = vld [vmem:[%s8950_s3 + $0x40] sm:$0xf0]  ;;  %3958 = vmatpush.bf16.msra.mxu2 %v3920_v2  ;;  %3959 = vmatpush.bf16.msra.mxu3 %v3920_v2  ;;  %v3662_v24 = vor.u32 %v3931_v22, %v3661_v19  ;;  %v3913_v25 = vld [vmem:[%s4126_s17 + $0x8] sm:$0xff]  ;;  %v3919_v28 = vld [vmem:[%s4126_s17 + $0x38] sm:$0xff] }
  0x22   : > { %v3658_v23 = vor.u32 %v3922_v17, %v3655_v18  ;;  %v3917_v27 = vld [vmem:[%s4126_s17 + $0x28] sm:$0xff]  ;;  %v3653_v29 = vld [vmem:[%s8950_s3] sm:$0xf]  ;;  %v3940_v35 = vld [vmem:[%s8950_s3 + $0x94] sm:$0xf] }
  0x23   : > { %3643 = vmatmul.msk.bf16.vlgmr.msra.gmra.mxu0 %vm386_vm0, %v3912_v3  ;;  %3645 = vmatmul.msk.bf16.vlgmr.msra.gmra.mxu1 %vm386_vm0, %v3914_v4  ;;  %v3930_v30 = vld [vmem:[%s8950_s3 + $0x3c] sm:$0xf0]  ;;  %v3923_v31 = vld [vmem:[%s8950_s3 + $0xc] sm:$0xf]  ;;  %v3735_v36 = vld [vmem:[%s8950_s3 + $0xd0] sm:$0xf0] }
  0x24   : > { %3647 = vmatmul.msk.bf16.vlgmr.msra.gmra.mxu2 %vm386_vm0, %v3916_v7  ;;  %3649 = vmatmul.msk.bf16.vlgmr.msra.gmra.mxu3 %vm386_vm0, %v3918_v8  ;;  %v3654_v32 = vor.u32 %v3930_v30, %v3653_v29  ;;  %v3663_v33 = vld [vmem:[%s8950_s3 + $0x48] sm:$0xf0]  ;;  %v3741_v37 = vld [vmem:[%s8950_s3 + $0x98] sm:$0xf]  ;;  %v3738_v38 = vor.u32 %v3940_v35, %v3735_v36  ;;  %v3733_v41 = vld [vmem:[%s8950_s3 + $0x90] sm:$0xf] }
  0x25   : > { %791 = vmatpush.bf16.msrb.mxu2 %v3722_v9  ;;  %840 = vmatpush.bf16.msrb.mxu3 %v3726_v13  ;;  %v3666_v34 = vor.u32 %v3923_v31, %v3663_v33  ;;  %v3949_v39 = vld [vmem:[%s8950_s3 + $0xd4] sm:$0xf0]  ;;  %v3948_v42 = vld [vmem:[%s8950_s3 + $0xcc] sm:$0xf0]  ;;  %v3941_v43 = vld [vmem:[%s8950_s3 + $0x9c] sm:$0xf] }
  0x26   : > { %742 = vmatpush.bf16.msrb.mxu1 %v3718_v20  ;;  %889 = vmatpush.bf16.msrb.mxu0 %v3730_v21  ;;  %v3742_v40 = vor.u32 %v3949_v39, %v3741_v37  ;;  %v3734_v44 = vor.u32 %v3948_v42, %v3733_v41  ;;  %v3743_v45 = vld [vmem:[%s8950_s3 + $0xd8] sm:$0xf0]  ;;  %v4226_v48 = vld [vmem:[%s8949_s2] ss:$0 sm:$0xff]  ;;  %v3924_v6 = vld [vmem:[%s8950_s3 + $0x14] sm:$0xf] }
  0x27   : > { %v3746_v46 = vor.u32 %v3941_v43, %v3743_v45  ;;  %v3671_v7 = vld [vmem:[%s8950_s3 + $0x50] sm:$0xf0]  ;;  %v3677_v8 = vld [vmem:[%s8950_s3 + $0x18] sm:$0xf]  ;;  %v3669_v11 = vld [vmem:[%s8950_s3 + $0x10] sm:$0xf] }
  0x28   : > { %v3674_v9 = vor.u32 %v3924_v6, %v3671_v7  ;;  %v3933_v10 = vld [vmem:[%s8950_s3 + $0x54] sm:$0xf0]  ;;  %v3932_v12 = vld [vmem:[%s8950_s3 + $0x4c] sm:$0xf0]  ;;  %v3925_v16 = vld [vmem:[%s8950_s3 + $0x1c] sm:$0xf] }
  0x29   : > { %792 = vmatpush.bf16.msrb.mxu2 %v3658_v23  ;;  %841 = vmatpush.bf16.msrb.mxu3 %v3662_v24  ;;  %v3678_v14 = vor.u32 %v3933_v10, %v3677_v8  ;;  %v3670_v15 = vor.u32 %v3932_v12, %v3669_v11  ;;  %v3679_v17 = vld [vmem:[%s8950_s3 + $0x58] sm:$0xf0] }
  0x2a   : > { %743 = vmatpush.bf16.msrb.mxu1 %v3654_v32  ;;  %890 = vmatpush.bf16.msrb.mxu0 %v3666_v34  ;;  %v3682_v18 = vor.u32 %v3925_v16, %v3679_v17 }
  0x2d   : > { %987 = vmatpush.bf16.msra.mxu2 %v3738_v38  ;;  %1036 = vmatpush.bf16.msra.mxu3 %v3742_v40 }
  0x2e   : > { %938 = vmatpush.bf16.msra.mxu1 %v3734_v44  ;;  %1085 = vmatpush.bf16.msra.mxu0 %v3746_v46  ;;  %v3942_v46 = vld [vmem:[%s8950_s3 + $0xa4] sm:$0xf] }
  0x31   : > { %988 = vmatpush.bf16.msra.mxu2 %v3674_v9  ;;  %1037 = vmatpush.bf16.msra.mxu3 %v3678_v14 }
  0x32   : > { %939 = vmatpush.bf16.msra.mxu1 %v3670_v15  ;;  %1086 = vmatpush.bf16.msra.mxu0 %v3682_v18 }
  0x33   : > { %3644 = vmatmul.msk.bf16.gmra.mxu0 %vm386_vm0, %v3913_v25  ;;  %3646 = vmatmul.msk.bf16.gmra.mxu1 %vm386_vm0, %v3915_v26 }
  0x34   : > { %3648 = vmatmul.msk.bf16.gmra.mxu2 %vm386_vm0, %v3917_v27  ;;  %3650 = vmatmul.msk.bf16.gmra.mxu3 %vm386_vm0, %v3919_v28 }
  0xa0   : > { %v420_v47 = vpop.f32.mrf.mxu0  ;;  %v430_v56 = vpop.f32.mrf.mxu1 }
  0xa1   : > { %v421_v49 = vadd.f32 %v4226_v48, %v420_v47  ;;  %v431_v0 = vadd.f32 %v4226_v48, %v430_v56  ;;  %v3751_v47 = vld [vmem:[%s8950_s3 + $0xe0] sm:$0xf0] }
  0xa3   : > { %v460_v52 = vmax.f32 %v421_v49, 0.0  ;;  %v464_v3 = vmax.f32 %v431_v0, 0.0  ;;  %v3757_v49 = vld [vmem:[%s8950_s3 + $0xa8] sm:$0xf]  ;;  %v3759_v0 = vld [vmem:[%s8950_s3 + $0xe8] sm:$0xf0] }
  0xa7   : > { %v440_v19 = vpop.f32.mrf.mxu2  ;;  %v450_v33 = vpop.f32.mrf.mxu3 }
  0xa8   : > { %v422_v50 = vpop.f32.mrf.mxu0  ;;  %v432_v63 = vpop.f32.mrf.mxu1  ;;  %v441_v26 = vadd.f32 %v4226_v48, %v440_v19  ;;  %v451_v40 = vadd.f32 %v4226_v48, %v450_v33 }
  0xa9   : > { %v423_v51 = vadd.f32 %v4226_v48, %v422_v50  ;;  %v433_v1 = vadd.f32 %v4226_v48, %v432_v63  ;;  %v3754_v50 = vor.u32 %v3942_v46, %v3751_v47 }
  0xaa   : > { %v468_v29 = vmax.f32 %v441_v26, 0.0  ;;  %v472_v43 = vmax.f32 %v451_v40, 0.0 }
  0xab   : > { %v461_v53 = vmax.f32 %v423_v51, 0.0  ;;  %v465_v4 = vmax.f32 %v433_v1, 0.0  ;;  %v3951_v51 = vld [vmem:[%s8950_s3 + $0xe4] sm:$0xf0] }
  0xad   : > { %v4230_v54 = vpack.c.bf16 %v461_v53, %v460_v52  ;;  %v4254_v5 = vpack.c.bf16 %v465_v4, %v464_v3  ;;  %v3758_v53 = vor.u32 %v3951_v51, %v3757_v49 }
  0xaf   : > { %3779 = vmatmul.msk.bf16.vlgmr.msrb.gmra.mxu1 %vm386_vm0, %v4230_v54  ;;  %3787 = vmatmul.msk.bf16.vlgmr.msrb.gmra.mxu2 %vm386_vm0, %v4230_v54  ;;  %v442_v25 = vpop.f32.mrf.mxu2  ;;  %v452_v39 = vpop.f32.mrf.mxu3 }
  0xb0   : > { %3795 = vmatmul.msk.bf16.vlgmr.msrb.gmra.mxu3 %vm386_vm0, %v4230_v54  ;;  %3803 = vmatmul.msk.bf16.vlgmr.msrb.gmra.mxu0 %vm386_vm0, %v4230_v54  ;;  %v425_v55 = vpop.f32.mrf.mxu0  ;;  %v435_v2 = vpop.f32.mrf.mxu1  ;;  %v443_v27 = vadd.f32 %v4226_v48, %v442_v25  ;;  %v453_v41 = vadd.f32 %v4226_v48, %v452_v39 }
  0xb1   : > { %v426_v57 = vadd.f32 %v4226_v48, %v425_v55  ;;  %v436_v20 = vadd.f32 %v4226_v48, %v435_v2  ;;  %1183 = vmatpush.bf16.msrb.mxu2 %v3754_v50  ;;  %1232 = vmatpush.bf16.msrb.mxu3 %v3758_v53  ;;  %v4375_v2 = vld [vmem:[%s8951_s4] sm:$0xff] }
  0xb2   : > { %v469_v30 = vmax.f32 %v443_v27, 0.0  ;;  %v473_v44 = vmax.f32 %v453_v41, 0.0  ;;  %v4378_v3 = vperm.slane %v4375_v2, 0  ;;  %v4381_v4 = vperm.slane %v4375_v2, 3 }
  0xb3   : > { %v462_v60 = vmax.f32 %v426_v57, 0.0  ;;  %v466_v22 = vmax.f32 %v436_v20, 0.0  ;;  %v3749_v57 = vld [vmem:[%s8950_s3 + $0xa0] sm:$0xf]  ;;  %v4395_v11 = vperm.slane %v4375_v2, 1 }
  0xb4   : > { %v4302_v31 = vpack.c.bf16 %v469_v30, %v468_v29  ;;  %v4326_v45 = vpack.c.bf16 %v473_v44, %v472_v43 }
  0xb7   : > { %v445_v28 = vpop.f32.mrf.mxu2  ;;  %v455_v42 = vpop.f32.mrf.mxu3 }
  0xb8   : > { %v427_v58 = vpop.f32.mrf.mxu0  ;;  %v437_v13 = vpop.f32.mrf.mxu1  ;;  %v446_v34 = vadd.f32 %v4226_v48, %v445_v28  ;;  %v456_v55 = vadd.f32 %v4226_v48, %v455_v42 }
  0xb9   : > { %v428_v59 = vadd.f32 %v4226_v48, %v427_v58  ;;  %v438_v21 = vadd.f32 %v4226_v48, %v437_v13  ;;  %v3950_v58 = vld [vmem:[%s8950_s3 + $0xdc] sm:$0xf0]  ;;  %v4403_v13 = vperm.slane %v4375_v2, 2 }
  0xba   : > { %v470_v36 = vmax.f32 %v446_v34, 0.0  ;;  %v3750_v63 = vor.u32 %v3950_v58, %v3749_v57 }
  0xbb   : > { %v463_v61 = vmax.f32 %v428_v59, 0.0  ;;  %v467_v23 = vmax.f32 %v438_v21, 0.0  ;;  %v3943_v59 = vld [vmem:[%s8950_s3 + $0xac] sm:$0xf] }
  0xbc   : > { %1134 = vmatpush.bf16.msrb.mxu1 %v3750_v63 }
  0xbd   : > { %v4242_v62 = vpack.c.bf16 %v463_v61, %v462_v60  ;;  %v4290_v24 = vpack.c.bf16 %v467_v23, %v466_v22  ;;  %v474_v60 = vmax.f32 %v456_v55, 0.0 }
  0xbf   : > { %3780 = vmatmul.msk.bf16.gmra.mxu1 %vm386_vm0, %v4242_v62  ;;  %3788 = vmatmul.msk.bf16.gmra.mxu2 %vm386_vm0, %v4242_v62  ;;  %v447_v32 = vpop.f32.mrf.mxu2  ;;  %v457_v52 = vpop.f32.mrf.mxu3 }
  0xc0   : > { %3796 = vmatmul.msk.bf16.gmra.mxu3 %vm386_vm0, %v4242_v62  ;;  %3804 = vmatmul.msk.bf16.gmra.mxu0 %vm386_vm0, %v4242_v62  ;;  %v448_v35 = vadd.f32 %v4226_v48, %v447_v32  ;;  %v458_v56 = vadd.f32 %v4226_v48, %v457_v52  ;;  %v3762_v48 = vor.u32 %v3943_v59, %v3759_v0 }
  0xc2   : > { %v471_v37 = vmax.f32 %v448_v35, 0.0  ;;  %v475_v61 = vmax.f32 %v458_v56, 0.0  ;;  %1281 = vmatpush.bf16.msrb.mxu0 %v3762_v48 }
  0xc4   : > { %v4314_v38 = vpack.c.bf16 %v471_v37, %v470_v36  ;;  %v4362_v1 = vpack.c.bf16 %v475_v61, %v474_v60 }
  0xcf   : > { %3781 = vmatmul.msk.bf16.gmra.mxu1 %vm386_vm0, %v4254_v5  ;;  %3789 = vmatmul.msk.bf16.gmra.mxu2 %vm386_vm0, %v4254_v5 }
  0xd0   : > { %3797 = vmatmul.msk.bf16.gmra.mxu3 %vm386_vm0, %v4254_v5  ;;  %3805 = vmatmul.msk.bf16.gmra.mxu0 %vm386_vm0, %v4254_v5 }
  0xdf   : > { %3782 = vmatmul.msk.bf16.gmra.mxu1 %vm386_vm0, %v4290_v24  ;;  %3790 = vmatmul.msk.bf16.gmra.mxu2 %vm386_vm0, %v4290_v24 }
  0xe0   : > { %3798 = vmatmul.msk.bf16.gmra.mxu3 %vm386_vm0, %v4290_v24  ;;  %3806 = vmatmul.msk.bf16.gmra.mxu0 %vm386_vm0, %v4290_v24 }
  0xef   : > { %3783 = vmatmul.msk.bf16.gmra.mxu1 %vm386_vm0, %v4302_v31  ;;  %3791 = vmatmul.msk.bf16.gmra.mxu2 %vm386_vm0, %v4302_v31 }
  0xf0   : > { %3799 = vmatmul.msk.bf16.gmra.mxu3 %vm386_vm0, %v4302_v31  ;;  %3807 = vmatmul.msk.bf16.gmra.mxu0 %vm386_vm0, %v4302_v31 }
  0xff   : > { %3784 = vmatmul.msk.bf16.gmra.mxu1 %vm386_vm0, %v4314_v38  ;;  %3792 = vmatmul.msk.bf16.gmra.mxu2 %vm386_vm0, %v4314_v38 }
 0x100   : > { %3800 = vmatmul.msk.bf16.gmra.mxu3 %vm386_vm0, %v4314_v38  ;;  %3808 = vmatmul.msk.bf16.gmra.mxu0 %vm386_vm0, %v4314_v38 }
 0x10f   : > { %3785 = vmatmul.msk.bf16.gmra.mxu1 %vm386_vm0, %v4326_v45  ;;  %3793 = vmatmul.msk.bf16.gmra.mxu2 %vm386_vm0, %v4326_v45 }
 0x110   : > { %3801 = vmatmul.msk.bf16.gmra.mxu3 %vm386_vm0, %v4326_v45  ;;  %3809 = vmatmul.msk.bf16.gmra.mxu0 %vm386_vm0, %v4326_v45 }
 0x11f   : > { %3786 = vmatmul.msk.bf16.gmra.mxu1 %vm386_vm0, %v4362_v1  ;;  %3794 = vmatmul.msk.bf16.gmra.mxu2 %vm386_vm0, %v4362_v1 }
 0x120   : > { %3802 = vmatmul.msk.bf16.gmra.mxu3 %vm386_vm0, %v4362_v1  ;;  %3810 = vmatmul.msk.bf16.gmra.mxu0 %vm386_vm0, %v4362_v1 }
 0x12c   : > { %v745_v6 = vpop.f32.mrf.mxu1 }
 0x12d   : > { %v4384_v7 = vadd.f32 %v745_v6, %v4378_v3  ;;  %v892_v8 = vpop.f32.mrf.mxu0 }
 0x12e   : > { %v4387_v9 = vadd.f32 %v892_v8, %v4381_v4 }
 0x12f   : > { %9191 = vst [vmem:[#allocation3_spill] sm:$0xff] %v4384_v7  ;;  %3811 = vmatmul.msk.bf16.vlgmr.msra.gmra.mxu1 %vm386_vm0, %v4230_v54  ;;  %3819 = vmatmul.msk.bf16.vlgmr.msra.gmra.mxu2 %vm386_vm0, %v4230_v54 }
 0x130   : > { %3827 = vmatmul.msk.bf16.vlgmr.msra.gmra.mxu3 %vm386_vm0, %v4230_v54  ;;  %3835 = vmatmul.msk.bf16.vlgmr.msra.gmra.mxu0 %vm386_vm0, %v4230_v54 }
 0x132   : > { %v794_v14 = vpop.f32.mrf.mxu2 }
 0x133   : > { %v4406_v15 = vadd.f32 %v794_v14, %v4395_v11  ;;  %v843_v16 = vpop.f32.mrf.mxu3 }
 0x134   : > { %v4409_v17 = vadd.f32 %v843_v16, %v4403_v13  ;;  %v747_v18 = vpop.f32.mrf.mxu1  ;;  %v3926_v16 = vld [vmem:[%s8950_s3 + $0x24] sm:$0xf] }
 0x135   : > { %v4413_v20 = vadd.f32 %v747_v18, %v4378_v3  ;;  %v894_v21 = vpop.f32.mrf.mxu0  ;;  %v3687_v18 = vld [vmem:[%s8950_s3 + $0x60] sm:$0xf0] }
 0x136   : > { %v4417_v23 = vadd.f32 %v894_v21, %v4381_v4  ;;  %v3690_v21 = vor.u32 %v3926_v16, %v3687_v18 }
 0x137   : > { %9192 = vst [vmem:[#allocation4_spill] sm:$0xff] %v4413_v20 }
 0x138   : > { %9193 = vst [vmem:[#allocation5_spill] sm:$0xff] %v4417_v23  ;;  %1184 = vmatpush.bf16.msrb.mxu2 %v3690_v21 }
 0x13a   : > { %v796_v27 = vpop.f32.mrf.mxu2 }
 0x13b   : > { %v4422_v28 = vadd.f32 %v796_v27, %v4395_v11  ;;  %v845_v29 = vpop.f32.mrf.mxu3  ;;  %v3693_v27 = vld [vmem:[%s8950_s3 + $0x28] sm:$0xf] }
 0x13c   : > { %v4425_v30 = vadd.f32 %v845_v29, %v4403_v13  ;;  %v750_v32 = vpop.f32.mrf.mxu1  ;;  %v3935_v29 = vld [vmem:[%s8950_s3 + $0x64] sm:$0xf0] }
 0x13d   : > { %9194 = vst [vmem:[#allocation6_spill] sm:$0xff] %v4422_v28  ;;  %v4429_v34 = vadd.f32 %v750_v32, %v4378_v3  ;;  %v897_v35 = vpop.f32.mrf.mxu0 }
 0x13e   : > { %9195 = vst [vmem:[#allocation7_spill] sm:$0xff] %v4425_v30  ;;  %v4433_v37 = vadd.f32 %v897_v35, %v4381_v4  ;;  %v3694_v35 = vor.u32 %v3935_v29, %v3693_v27  ;;  %v3685_v27 = vld [vmem:[%s8950_s3 + $0x20] sm:$0xf] }
 0x13f   : > { %3812 = vmatmul.msk.bf16.gmra.mxu1 %vm386_vm0, %v4242_v62  ;;  %3820 = vmatmul.msk.bf16.gmra.mxu2 %vm386_vm0, %v4242_v62  ;;  %v3934_v29 = vld [vmem:[%s8950_s3 + $0x5c] sm:$0xf0] }
 0x140   : > { %3828 = vmatmul.msk.bf16.gmra.mxu3 %vm386_vm0, %v4242_v62  ;;  %3836 = vmatmul.msk.bf16.gmra.mxu0 %vm386_vm0, %v4242_v62 }
 0x141   : > { %1233 = vmatpush.bf16.msrb.mxu3 %v3694_v35  ;;  %v3927_v35 = vld [vmem:[%s8950_s3 + $0x2c] sm:$0xf] }
 0x142   : > { %v799_v41 = vpop.f32.mrf.mxu2 }
 0x143   : > { %v4446_v42 = vadd.f32 %v799_v41, %v4395_v11  ;;  %v848_v43 = vpop.f32.mrf.mxu3 }
 0x144   : > { %v4449_v44 = vadd.f32 %v848_v43, %v4403_v13  ;;  %v752_v46 = vpop.f32.mrf.mxu1 }
 0x145   : > { %v4453_v49 = vadd.f32 %v752_v46, %v4378_v3  ;;  %v899_v50 = vpop.f32.mrf.mxu0 }
 0x146   : > { %v4457_v52 = vadd.f32 %v899_v50, %v4381_v4 }
 0x147   : > { %9196 = vst [vmem:[#allocation8_spill] sm:$0xff] %v4453_v49 }
 0x148   : > { %9197 = vst [vmem:[#allocation9_spill] sm:$0xff] %v4457_v52 }
 0x14a   : > { %v801_v56 = vpop.f32.mrf.mxu2 }
 0x14b   : > { %v4462_v57 = vadd.f32 %v801_v56, %v4395_v11  ;;  %v850_v58 = vpop.f32.mrf.mxu3 }
 0x14c   : > { %v4465_v59 = vadd.f32 %v850_v58, %v4403_v13  ;;  %v755_v60 = vpop.f32.mrf.mxu1 }
 0x14d   : > { %9198 = vst [vmem:[#allocation10_spill] sm:$0xff] %v4462_v57  ;;  %v4469_v63 = vadd.f32 %v755_v60, %v4378_v3  ;;  %v902_v0 = vpop.f32.mrf.mxu0 }
 0x14e   : > { %9199 = vst [vmem:[#allocation11_spill] sm:$0xff] %v4465_v59  ;;  %v4473_v6 = vadd.f32 %v902_v0, %v4381_v4 }
 0x14f   : > { %9200 = vst [vmem:[#allocation12_spill] sm:$0xff] %v4469_v63  ;;  %3813 = vmatmul.msk.bf16.gmra.mxu1 %vm386_vm0, %v4254_v5  ;;  %3821 = vmatmul.msk.bf16.gmra.mxu2 %vm386_vm0, %v4254_v5 }
 0x150   : > { %9201 = vst [vmem:[#allocation13_spill] sm:$0xff] %v4473_v6  ;;  %3829 = vmatmul.msk.bf16.gmra.mxu3 %vm386_vm0, %v4254_v5  ;;  %3837 = vmatmul.msk.bf16.gmra.mxu0 %vm386_vm0, %v4254_v5 }
 0x152   : > { %v804_v32 = vpop.f32.mrf.mxu2 }
 0x153   : > { %v4498_v41 = vadd.f32 %v804_v32, %v4395_v11  ;;  %v853_v43 = vpop.f32.mrf.mxu3  ;;  %v3686_v32 = vor.u32 %v3934_v29, %v3685_v27 }
 0x154   : > { %v4501_v46 = vadd.f32 %v853_v43, %v4403_v13  ;;  %v757_v50 = vpop.f32.mrf.mxu1  ;;  %v3695_v43 = vld [vmem:[%s8950_s3 + $0x68] sm:$0xf0] }
 0x155   : > { %9202 = vst [vmem:[#allocation14_spill] sm:$0xff] %v4498_v41  ;;  %v4505_v58 = vadd.f32 %v757_v50, %v4378_v3  ;;  %v904_v60 = vpop.f32.mrf.mxu0  ;;  %1135 = vmatpush.bf16.msrb.mxu1 %v3686_v32 }
 0x156   : > { %9203 = vst [vmem:[#allocation15_spill] sm:$0xff] %v4501_v46  ;;  %v4509_v16 = vadd.f32 %v904_v60, %v4381_v4  ;;  %v3698_v60 = vor.u32 %v3927_v35, %v3695_v43 }
 0x157   : > { %9204 = vst [vmem:[#allocation16_spill] sm:$0xff] %v4505_v58 }
 0x158   : > { %9205 = vst [vmem:[#allocation17_spill] sm:$0xff] %v4509_v16  ;;  %1282 = vmatpush.bf16.msrb.mxu0 %v3698_v60 }
 0x15a   : > { %v806_v50 = vpop.f32.mrf.mxu2 }
 0x15b   : > { %v4526_v21 = vadd.f32 %v806_v50, %v4395_v11  ;;  %v855_v18 = vpop.f32.mrf.mxu3 }
 0x15c   : > { %v4529_v14 = vadd.f32 %v855_v18, %v4403_v13  ;;  %v760_v0 = vpop.f32.mrf.mxu1 }
 0x15d   : > { %9206 = vst [vmem:[#allocation18_spill] sm:$0xff] %v4526_v21  ;;  %v4533_v29 = vadd.f32 %v760_v0, %v4378_v3  ;;  %v907_v56 = vpop.f32.mrf.mxu0 }
 0x15e   : > { %9207 = vst [vmem:[#allocation19_spill] sm:$0xff] %v4529_v14  ;;  %v4537_v35 = vadd.f32 %v907_v56, %v4381_v4 }
 0x15f   : > { %9208 = vst [vmem:[#allocation20_spill] sm:$0xff] %v4533_v29  ;;  %3814 = vmatmul.msk.bf16.gmra.mxu1 %vm386_vm0, %v4290_v24  ;;  %3822 = vmatmul.msk.bf16.gmra.mxu2 %vm386_vm0, %v4290_v24 }
 0x160   : > { %9209 = vst [vmem:[#allocation21_spill] sm:$0xff] %v4537_v35  ;;  %3830 = vmatmul.msk.bf16.gmra.mxu3 %vm386_vm0, %v4290_v24  ;;  %3838 = vmatmul.msk.bf16.gmra.mxu0 %vm386_vm0, %v4290_v24 }
 0x162   : > { %v809_v0 = vpop.f32.mrf.mxu2 }
 0x163   : > { %v4550_v56 = vadd.f32 %v809_v0, %v4395_v11  ;;  %v858_v32 = vpop.f32.mrf.mxu3 }
 0x164   : > { %v4553_v50 = vadd.f32 %v858_v32, %v4403_v13  ;;  %v762_v60 = vpop.f32.mrf.mxu1 }
 0x165   : > { %9210 = vst [vmem:[#allocation22_spill] sm:$0xff] %v4550_v56  ;;  %v4557_v8 = vadd.f32 %v762_v60, %v4378_v3  ;;  %v909_v18 = vpop.f32.mrf.mxu0 }
 0x166   : > { %9211 = vst [vmem:[#allocation23_spill] sm:$0xff] %v4553_v50  ;;  %v4561_v55 = vadd.f32 %v909_v18, %v4381_v4 }
 0x167   : > { %9212 = vst [vmem:[#allocation24_spill] sm:$0xff] %v4557_v8 }
 0x168   : > { %9213 = vst [vmem:[#allocation25_spill] sm:$0xff] %v4561_v55 }
 0x16a   : > { %v811_v61 = vpop.f32.mrf.mxu2 }
 0x16b   : > { %v4566_v32 = vadd.f32 %v811_v61, %v4395_v11  ;;  %v860_v53 = vpop.f32.mrf.mxu3 }
 0x16c   : > { %v4569_v43 = vadd.f32 %v860_v53, %v4403_v13  ;;  %v765_v60 = vpop.f32.mrf.mxu1 }
 0x16d   : > { %9214 = vst [vmem:[#allocation26_spill] sm:$0xff] %v4566_v32  ;;  %v4573_v27 = vadd.f32 %v765_v60, %v4378_v3  ;;  %v912_v18 = vpop.f32.mrf.mxu0 }
 0x16e   : > { %9215 = vst [vmem:[#allocation27_spill] sm:$0xff] %v4569_v43  ;;  %v4577_v48 = vadd.f32 %v912_v18, %v4381_v4 }
 0x16f   : > { %9216 = vst [vmem:[#allocation28_spill] sm:$0xff] %v4573_v27  ;;  %3815 = vmatmul.msk.bf16.gmra.mxu1 %vm386_vm0, %v4302_v31  ;;  %3823 = vmatmul.msk.bf16.gmra.mxu2 %vm386_vm0, %v4302_v31 }
 0x170   : > { %9217 = vst [vmem:[#allocation29_spill] sm:$0xff] %v4577_v48  ;;  %3831 = vmatmul.msk.bf16.gmra.mxu3 %vm386_vm0, %v4302_v31  ;;  %3839 = vmatmul.msk.bf16.gmra.mxu0 %vm386_vm0, %v4302_v31 }
 0x172   : > { %v814_v61 = vpop.f32.mrf.mxu2 }
 0x173   : > { %v4590_v60 = vadd.f32 %v814_v61, %v4395_v11  ;;  %v863_v18 = vpop.f32.mrf.mxu3 }
 0x174   : > { %v4593_v0 = vadd.f32 %v863_v18, %v4403_v13  ;;  %v767_v51 = vpop.f32.mrf.mxu1 }
 0x175   : > { %9218 = vst [vmem:[#allocation30_spill] sm:$0xff] %v4590_v60  ;;  %v4597_v47 = vadd.f32 %v767_v51, %v4378_v3  ;;  %v914_v53 = vpop.f32.mrf.mxu0 }
 0x176   : > { %9219 = vst [vmem:[#allocation31_spill] sm:$0xff] %v4593_v0  ;;  %v4601_v26 = vadd.f32 %v914_v53, %v4381_v4 }
 0x177   : > { %9220 = vst [vmem:[#allocation32_spill] sm:$0xff] %v4597_v47 }
 0x178   : > { %9221 = vst [vmem:[#allocation33_spill] sm:$0xff] %v4601_v26 }
 0x17a   : > { %v816_v36 = vpop.f32.mrf.mxu2 }
 0x17b   : > { %v4606_v18 = vadd.f32 %v816_v36, %v4395_v11  ;;  %v865_v22 = vpop.f32.mrf.mxu3 }
 0x17c   : > { %v4609_v40 = vadd.f32 %v865_v22, %v4403_v13  ;;  %v770_v51 = vpop.f32.mrf.mxu1 }
 0x17d   : > { %9222 = vst [vmem:[#allocation34_spill] sm:$0xff] %v4606_v18  ;;  %v4613_v39 = vadd.f32 %v770_v51, %v4378_v3  ;;  %v917_v53 = vpop.f32.mrf.mxu0 }
 0x17e   : > { %9223 = vst [vmem:[#allocation35_spill] sm:$0xff] %v4609_v40  ;;  %v4617_v12 = vadd.f32 %v917_v53, %v4381_v4 }
 0x17f   : > { %9224 = vst [vmem:[#allocation36_spill] sm:$0xff] %v4613_v39  ;;  %3816 = vmatmul.msk.bf16.gmra.mxu1 %vm386_vm0, %v4314_v38  ;;  %3824 = vmatmul.msk.bf16.gmra.mxu2 %vm386_vm0, %v4314_v38 }
 0x180   : > { %9225 = vst [vmem:[#allocation37_spill] sm:$0xff] %v4617_v12  ;;  %3832 = vmatmul.msk.bf16.gmra.mxu3 %vm386_vm0, %v4314_v38  ;;  %3840 = vmatmul.msk.bf16.gmra.mxu0 %vm386_vm0, %v4314_v38 }
 0x182   : > { %v819_v36 = vpop.f32.mrf.mxu2 }
 0x183   : > { %v4630_v51 = vadd.f32 %v819_v36, %v4395_v11  ;;  %v868_v53 = vpop.f32.mrf.mxu3  ;;  %v3773_v36 = vld [vmem:[%s8950_s3 + $0xb8] sm:$0xf] }
 0x184   : > { %v4633_v61 = vadd.f32 %v868_v53, %v4403_v13  ;;  %v772_v19 = vpop.f32.mrf.mxu1 }
 0x185   : > { %9226 = vst [vmem:[#allocation38_spill] sm:$0xff] %v4630_v51  ;;  %v4637_v25 = vadd.f32 %v772_v19, %v4378_v3  ;;  %v919_v22 = vpop.f32.mrf.mxu0 }
 0x186   : > { %9227 = vst [vmem:[#allocation39_spill] sm:$0xff] %v4633_v61  ;;  %v4641_v12 = vadd.f32 %v919_v22, %v4381_v4 }
 0x187   : > { %9228 = vst [vmem:[#allocation40_spill] sm:$0xff] %v4637_v25 }
 0x188   : > { %9229 = vst [vmem:[#allocation41_spill] sm:$0xff] %v4641_v12 }
 0x18a   : > { %v821_v26 = vpop.f32.mrf.mxu2 }
 0x18b   : > { %v4646_v53 = vadd.f32 %v821_v26, %v4395_v11  ;;  %v870_v40 = vpop.f32.mrf.mxu3  ;;  %v3953_v26 = vld [vmem:[%s8950_s3 + $0xf4] sm:$0xf0] }
 0x18c   : > { %v4649_v33 = vadd.f32 %v870_v40, %v4403_v13  ;;  %v775_v19 = vpop.f32.mrf.mxu1  ;;  %v3944_v40 = vld [vmem:[%s8950_s3 + $0xb4] sm:$0xf]  ;;  %v3774_v51 = vor.u32 %v3953_v26, %v3773_v36 }
 0x18d   : > { %9230 = vst [vmem:[#allocation42_spill] sm:$0xff] %v4646_v53  ;;  %v4653_v10 = vadd.f32 %v775_v19, %v4378_v3  ;;  %v922_v22 = vpop.f32.mrf.mxu0  ;;  %v3767_v19 = vld [vmem:[%s8950_s3 + $0xf0] sm:$0xf0] }
 0x18e   : > { %9231 = vst [vmem:[#allocation43_spill] sm:$0xff] %v4649_v33  ;;  %v4657_v39 = vadd.f32 %v922_v22, %v4381_v4  ;;  %v3770_v22 = vor.u32 %v3944_v40, %v3767_v19  ;;  %1428 = vmatpush.bf16.msra.mxu3 %v3774_v51  ;;  %v3952_v51 = vld [vmem:[%s8950_s3 + $0xec] sm:$0xf0] }
 0x18f   : > { %9232 = vst [vmem:[#allocation44_spill] sm:$0xff] %v4653_v10  ;;  %3817 = vmatmul.msk.bf16.gmra.mxu1 %vm386_vm0, %v4326_v45  ;;  %3825 = vmatmul.msk.bf16.gmra.mxu2 %vm386_vm0, %v4326_v45 }
 0x190   : > { %9233 = vst [vmem:[#allocation45_spill] sm:$0xff] %v4657_v39  ;;  %3833 = vmatmul.msk.bf16.gmra.mxu3 %vm386_vm0, %v4326_v45  ;;  %3841 = vmatmul.msk.bf16.gmra.mxu0 %vm386_vm0, %v4326_v45 }
 0x191   : > { %1379 = vmatpush.bf16.msra.mxu2 %v3770_v22  ;;  %v3945_v22 = vld [vmem:[%s8950_s3 + $0xbc] sm:$0xf] }
 0x192   : > { %v824_v61 = vpop.f32.mrf.mxu2 }
 0x193   : > { %v4682_v39 = vadd.f32 %v824_v61, %v4395_v11  ;;  %v873_v10 = vpop.f32.mrf.mxu3 }
 0x194   : > { %v4685_v12 = vadd.f32 %v873_v10, %v4403_v13  ;;  %v777_v33 = vpop.f32.mrf.mxu1  ;;  %v3765_v10 = vld [vmem:[%s8950_s3 + $0xb0] sm:$0xf] }
 0x195   : > { %9234 = vst [vmem:[#allocation46_spill] sm:$0xff] %v4682_v39  ;;  %v4689_v19 = vadd.f32 %v777_v33, %v4378_v3  ;;  %v924_v53 = vpop.f32.mrf.mxu0  ;;  %v3766_v33 = vor.u32 %v3952_v51, %v3765_v10 }
 0x196   : > { %9235 = vst [vmem:[#allocation47_spill] sm:$0xff] %v4685_v12  ;;  %v4693_v36 = vadd.f32 %v924_v53, %v4381_v4  ;;  %v3775_v53 = vld [vmem:[%s8950_s3 + $0xf8] sm:$0xf0] }
 0x197   : > { %9236 = vst [vmem:[#allocation48_spill] sm:$0xff] %v4689_v19  ;;  %v3778_v25 = vor.u32 %v3945_v22, %v3775_v53  ;;  %1330 = vmatpush.bf16.msra.mxu1 %v3766_v33 }
 0x198   : > { %9237 = vst [vmem:[#allocation49_spill] sm:$0xff] %v4693_v36 }
 0x199   : > { %1477 = vmatpush.bf16.msra.mxu0 %v3778_v25 }
 0x19a   : > { %v826_v61 = vpop.f32.mrf.mxu2 }
 0x19b   : > { %v4710_v26 = vadd.f32 %v826_v61, %v4395_v11  ;;  %v875_v40 = vpop.f32.mrf.mxu3 }
 0x19c   : > { %v4713_v36 = vadd.f32 %v875_v40, %v4403_v13  ;;  %v780_v19 = vpop.f32.mrf.mxu1 }
 0x19d   : > { %9238 = vst [vmem:[#allocation50_spill] sm:$0xff] %v4710_v26  ;;  %v4717_v51 = vadd.f32 %v780_v19, %v4378_v3  ;;  %v927_v12 = vpop.f32.mrf.mxu0  ;;  %v4753_v26 = vperm.slane %v4375_v2, 7 }
 0x19e   : > { %9239 = vst [vmem:[#allocation51_spill] sm:$0xff] %v4713_v36  ;;  %v4721_v22 = vadd.f32 %v927_v12, %v4381_v4  ;;  %v4750_v36 = vperm.slane %v4375_v2, 4 }
 0x19f   : > { %9240 = vst [vmem:[#allocation52_spill] sm:$0xff] %v4717_v51  ;;  %3818 = vmatmul.msk.bf16.gmra.mxu1 %vm386_vm0, %v4362_v1  ;;  %3826 = vmatmul.msk.bf16.gmra.mxu2 %vm386_vm0, %v4362_v1 }
 0x1a0   : > { %9241 = vst [vmem:[#allocation53_spill] sm:$0xff] %v4721_v22  ;;  %3834 = vmatmul.msk.bf16.gmra.mxu3 %vm386_vm0, %v4362_v1  ;;  %3842 = vmatmul.msk.bf16.gmra.mxu0 %vm386_vm0, %v4362_v1 }
 0x1a2   : > { %v829_v40 = vpop.f32.mrf.mxu2 }
 0x1a3   : > { %v4734_v12 = vadd.f32 %v829_v40, %v4395_v11  ;;  %v878_v19 = vpop.f32.mrf.mxu3 }
 0x1a4   : > { %v4737_v33 = vadd.f32 %v878_v19, %v4403_v13  ;;  %v782_v53 = vpop.f32.mrf.mxu1 }
 0x1a5   : > { %9242 = vst [vmem:[#allocation54_spill] sm:$0xff] %v4734_v12  ;;  %v4741_v39 = vadd.f32 %v782_v53, %v4378_v3  ;;  %v929_v25 = vpop.f32.mrf.mxu0 }
 0x1a6   : > { %9243 = vst [vmem:[#allocation55_spill] sm:$0xff] %v4737_v33  ;;  %v4745_v22 = vadd.f32 %v929_v25, %v4381_v4 }
 0x1a7   : > { %9244 = vst [vmem:[#allocation56_spill] sm:$0xff] %v4741_v39 }
 0x1a8   : > { %9245 = vst [vmem:[#allocation57_spill] sm:$0xff] %v4745_v22 }
 0x1aa   : > { %v831_v19 = vpop.f32.mrf.mxu2 }
 0x1ab   : > { %v4756_v3 = vadd.f32 %v831_v19, %v4395_v11  ;;  %v880_v53 = vpop.f32.mrf.mxu3  ;;  %v4775_v11 = vperm.slane %v4375_v2, 5 }
 0x1ac   : > { %v4759_v10 = vadd.f32 %v880_v53, %v4403_v13  ;;  %v941_v4 = vpop.f32.mrf.mxu1 }
 0x1ad   : > { %9246 = vst [vmem:[#allocation58_spill] sm:$0xff] %v4756_v3  ;;  %v4763_v51 = vadd.f32 %v941_v4, %v4750_v36  ;;  %v1088_v40 = vpop.f32.mrf.mxu0 }
 0x1ae   : > { %9247 = vst [vmem:[#allocation59_spill] sm:$0xff] %v4759_v10  ;;  %v4767_v22 = vadd.f32 %v1088_v40, %v4753_v26  ;;  %v4783_v40 = vperm.slane %v4375_v2, 6 }
 0x1af   : > { %9248 = vst [vmem:[#allocation60_spill] sm:$0xff] %v4763_v51  ;;  %3843 = vmatmul.msk.bf16.vlgmr.msrb.gmra.mxu1 %vm386_vm0, %v4230_v54  ;;  %3851 = vmatmul.msk.bf16.vlgmr.msrb.gmra.mxu2 %vm386_vm0, %v4230_v54 }
 0x1b0   : > { %9249 = vst [vmem:[#allocation61_spill] sm:$0xff] %v4767_v22  ;;  %3859 = vmatmul.msk.bf16.vlgmr.msrb.gmra.mxu3 %vm386_vm0, %v4230_v54  ;;  %3867 = vmatmul.msk.bf16.vlgmr.msrb.gmra.mxu0 %vm386_vm0, %v4230_v54 }
 0x1b2   : > { %v990_v19 = vpop.f32.mrf.mxu2 }
 0x1b3   : > { %v4786_v53 = vadd.f32 %v990_v19, %v4775_v11  ;;  %v1039_v4 = vpop.f32.mrf.mxu3 }
 0x1b4   : > { %v4789_v61 = vadd.f32 %v1039_v4, %v4783_v40  ;;  %v943_v25 = vpop.f32.mrf.mxu1 }
 0x1b5   : > { %v4793_v39 = vadd.f32 %v943_v25, %v4750_v36  ;;  %v1090_v10 = vpop.f32.mrf.mxu0 }
 0x1b6   : > { %v4797_v2 = vadd.f32 %v1090_v10, %v4753_v26 }
 0x1b7   : > { %9250 = vst [vmem:[#allocation62_spill] sm:$0xff] %v4793_v39 }
 0x1ba   : > { %v992_v12 = vpop.f32.mrf.mxu2 }
 0x1bb   : > { %v4802_v4 = vadd.f32 %v992_v12, %v4775_v11  ;;  %v1041_v18 = vpop.f32.mrf.mxu3 }
 0x1bc   : > { %v4805_v13 = vadd.f32 %v1041_v18, %v4783_v40  ;;  %v946_v25 = vpop.f32.mrf.mxu1 }
 0x1bd   : > { %9251 = vst [vmem:[#allocation63_spill] sm:$0xff] %v4802_v4  ;;  %v4809_v3 = vadd.f32 %v946_v25, %v4750_v36  ;;  %v1093_v10 = vpop.f32.mrf.mxu0 }
 0x1be   : > { %9252 = vst [vmem:[#allocation64_spill] sm:$0xff] %v4805_v13  ;;  %v4813_v33 = vadd.f32 %v1093_v10, %v4753_v26 }
 0x1bf   : > { %3844 = vmatmul.msk.bf16.gmra.mxu1 %vm386_vm0, %v4242_v62  ;;  %3852 = vmatmul.msk.bf16.gmra.mxu2 %vm386_vm0, %v4242_v62 }
 0x1c0   : > { %9253 = vst [vmem:[#allocation65_spill] sm:$0xff] %v4813_v33  ;;  %3860 = vmatmul.msk.bf16.gmra.mxu3 %vm386_vm0, %v4242_v62  ;;  %3868 = vmatmul.msk.bf16.gmra.mxu0 %vm386_vm0, %v4242_v62 }
 0x1c2   : > { %v995_v12 = vpop.f32.mrf.mxu2 }
 0x1c3   : > { %v4826_v25 = vadd.f32 %v995_v12, %v4775_v11  ;;  %v1044_v10 = vpop.f32.mrf.mxu3  ;;  %v3709_v12 = vld [vmem:[%s8950_s3 + $0x38] sm:$0xf] }
 0x1c4   : > { %v4829_v19 = vadd.f32 %v1044_v10, %v4783_v40  ;;  %v948_v48 = vpop.f32.mrf.mxu1 }
 0x1c5   : > { %v4833_v0 = vadd.f32 %v948_v48, %v4750_v36  ;;  %v1095_v18 = vpop.f32.mrf.mxu0 }
 0x1c6   : > { %9254 = vst [vmem:[#allocation66_spill] sm:$0xff] %v4829_v19  ;;  %v4837_v27 = vadd.f32 %v1095_v18, %v4753_v26 }
 0x1c7   : > { %9255 = vst [vmem:[#allocation67_spill] sm:$0xff] %v4833_v0 }
 0x1c8   : > { %9256 = vst [vmem:[#allocation68_spill] sm:$0xff] %v4837_v27 }
 0x1ca   : > { %v997_v43 = vpop.f32.mrf.mxu2 }
 0x1cb   : > { %v4842_v10 = vadd.f32 %v997_v43, %v4775_v11  ;;  %v1046_v32 = vpop.f32.mrf.mxu3  ;;  %v3937_v43 = vld [vmem:[%s8950_s3 + $0x74] sm:$0xf0] }
 0x1cc   : > { %v4845_v47 = vadd.f32 %v1046_v32, %v4783_v40  ;;  %v951_v48 = vpop.f32.mrf.mxu1  ;;  %v3928_v32 = vld [vmem:[%s8950_s3 + $0x34] sm:$0xf]  ;;  %v3710_v8 = vor.u32 %v3937_v43, %v3709_v12 }
 0x1cd   : > { %9257 = vst [vmem:[#allocation69_spill] sm:$0xff] %v4842_v10  ;;  %v4849_v60 = vadd.f32 %v951_v48, %v4750_v36  ;;  %v1098_v18 = vpop.f32.mrf.mxu0  ;;  %v3703_v48 = vld [vmem:[%s8950_s3 + $0x70] sm:$0xf0] }
 0x1ce   : > { %9258 = vst [vmem:[#allocation70_spill] sm:$0xff] %v4845_v47  ;;  %v4853_v55 = vadd.f32 %v1098_v18, %v4753_v26  ;;  %v3706_v18 = vor.u32 %v3928_v32, %v3703_v48  ;;  %1429 = vmatpush.bf16.msra.mxu3 %v3710_v8  ;;  %v3936_v8 = vld [vmem:[%s8950_s3 + $0x6c] sm:$0xf0] }
 0x1cf   : > { %9259 = vst [vmem:[#allocation71_spill] sm:$0xff] %v4849_v60  ;;  %3845 = vmatmul.msk.bf16.gmra.mxu1 %vm386_vm0, %v4254_v5  ;;  %3853 = vmatmul.msk.bf16.gmra.mxu2 %vm386_vm0, %v4254_v5 }
 0x1d0   : > { %9260 = vst [vmem:[#allocation72_spill] sm:$0xff] %v4853_v55  ;;  %3861 = vmatmul.msk.bf16.gmra.mxu3 %vm386_vm0, %v4254_v5  ;;  %3869 = vmatmul.msk.bf16.gmra.mxu0 %vm386_vm0, %v4254_v5 }
 0x1d1   : > { %1380 = vmatpush.bf16.msra.mxu2 %v3706_v18  ;;  %v3929_v18 = vld [vmem:[%s8950_s3 + $0x3c] sm:$0xf] }
 0x1d2   : > { %v1000_v35 = vpop.f32.mrf.mxu2 }
 0x1d3   : > { %v4878_v50 = vadd.f32 %v1000_v35, %v4775_v11  ;;  %v1049_v56 = vpop.f32.mrf.mxu3 }
 0x1d4   : > { %v4881_v29 = vadd.f32 %v1049_v56, %v4783_v40  ;;  %v953_v16 = vpop.f32.mrf.mxu1  ;;  %v3701_v56 = vld [vmem:[%s8950_s3 + $0x30] sm:$0xf] }
 0x1d5   : > { %9261 = vst [vmem:[#allocation73_spill] sm:$0xff] %v4878_v50  ;;  %v4885_v48 = vadd.f32 %v953_v16, %v4750_v36  ;;  %v1100_v14 = vpop.f32.mrf.mxu0  ;;  %v3702_v16 = vor.u32 %v3936_v8, %v3701_v56 }
 0x1d6   : > { %9262 = vst [vmem:[#allocation74_spill] sm:$0xff] %v4881_v29  ;;  %v4889_v12 = vadd.f32 %v1100_v14, %v4753_v26  ;;  %v3711_v14 = vld [vmem:[%s8950_s3 + $0x78] sm:$0xf0] }
 0x1d7   : > { %9263 = vst [vmem:[#allocation75_spill] sm:$0xff] %v4885_v48  ;;  %v3714_v21 = vor.u32 %v3929_v18, %v3711_v14  ;;  %1331 = vmatpush.bf16.msra.mxu1 %v3702_v16 }
 0x1d8   : > { %9264 = vst [vmem:[#allocation76_spill] sm:$0xff] %v4889_v12 }
 0x1d9   : > { %1478 = vmatpush.bf16.msra.mxu0 %v3714_v21 }
 0x1da   : > { %v1002_v35 = vpop.f32.mrf.mxu2 }
 0x1db   : > { %v4906_v43 = vadd.f32 %v1002_v35, %v4775_v11  ;;  %v1051_v32 = vpop.f32.mrf.mxu3 }
 0x1dc   : > { %v4909_v12 = vadd.f32 %v1051_v32, %v4783_v40  ;;  %v956_v48 = vpop.f32.mrf.mxu1 }
 0x1dd   : > { %9265 = vst [vmem:[#allocation77_spill] sm:$0xff] %v4906_v43  ;;  %v4913_v8 = vadd.f32 %v956_v48, %v4750_v36  ;;  %v1103_v58 = vpop.f32.mrf.mxu0 }
 0x1de   : > { %9266 = vst [vmem:[#allocation78_spill] sm:$0xff] %v4909_v12  ;;  %v4917_v18 = vadd.f32 %v1103_v58, %v4753_v26 }
 0x1df   : > { %9267 = vst [vmem:[#allocation79_spill] sm:$0xff] %v4913_v8  ;;  %3846 = vmatmul.msk.bf16.gmra.mxu1 %vm386_vm0, %v4290_v24  ;;  %3854 = vmatmul.msk.bf16.gmra.mxu2 %vm386_vm0, %v4290_v24 }
 0x1e0   : > { %9268 = vst [vmem:[#allocation80_spill] sm:$0xff] %v4917_v18  ;;  %3862 = vmatmul.msk.bf16.gmra.mxu3 %vm386_vm0, %v4290_v24  ;;  %3870 = vmatmul.msk.bf16.gmra.mxu0 %vm386_vm0, %v4290_v24 }
 0x1e2   : > { %v1005_v32 = vpop.f32.mrf.mxu2 }
 0x1e3   : > { %v4930_v58 = vadd.f32 %v1005_v32, %v4775_v11  ;;  %v1054_v48 = vpop.f32.mrf.mxu3 }
 0x1e4   : > { %v4933_v16 = vadd.f32 %v1054_v48, %v4783_v40  ;;  %v958_v14 = vpop.f32.mrf.mxu1 }
 0x1e5   : > { %9269 = vst [vmem:[#allocation81_spill] sm:$0xff] %v4930_v58  ;;  %v4937_v55 = vadd.f32 %v958_v14, %v4750_v36  ;;  %v1105_v21 = vpop.f32.mrf.mxu0 }
 0x1e6   : > { %9270 = vst [vmem:[#allocation82_spill] sm:$0xff] %v4933_v16  ;;  %v4941_v18 = vadd.f32 %v1105_v21, %v4753_v26 }
 0x1e7   : > { %9271 = vst [vmem:[#allocation83_spill] sm:$0xff] %v4937_v55 }
 0x1e8   : > { %9272 = vst [vmem:[#allocation84_spill] sm:$0xff] %v4941_v18 }
 0x1ea   : > { %v1007_v12 = vpop.f32.mrf.mxu2 }
 0x1eb   : > { %v4946_v48 = vadd.f32 %v1007_v12, %v4775_v11  ;;  %v1056_v43 = vpop.f32.mrf.mxu3 }
 0x1ec   : > { %v4949_v35 = vadd.f32 %v1056_v43, %v4783_v40  ;;  %v961_v14 = vpop.f32.mrf.mxu1 }
 0x1ed   : > { %9273 = vst [vmem:[#allocation85_spill] sm:$0xff] %v4946_v48  ;;  %v4953_v56 = vadd.f32 %v961_v14, %v4750_v36  ;;  %v1108_v21 = vpop.f32.mrf.mxu0 }
 0x1ee   : > { %9274 = vst [vmem:[#allocation86_spill] sm:$0xff] %v4949_v35  ;;  %v4957_v8 = vadd.f32 %v1108_v21, %v4753_v26 }
 0x1ef   : > { %9275 = vst [vmem:[#allocation87_spill] sm:$0xff] %v4953_v56  ;;  %3847 = vmatmul.msk.bf16.gmra.mxu1 %vm386_vm0, %v4302_v31  ;;  %3855 = vmatmul.msk.bf16.gmra.mxu2 %vm386_vm0, %v4302_v31 }
 0x1f0   : > { %9276 = vst [vmem:[#allocation88_spill] sm:$0xff] %v4957_v8  ;;  %3863 = vmatmul.msk.bf16.gmra.mxu3 %vm386_vm0, %v4302_v31  ;;  %3871 = vmatmul.msk.bf16.gmra.mxu0 %vm386_vm0, %v4302_v31 }
 0x1f2   : > { %v1010_v43 = vpop.f32.mrf.mxu2 }
 0x1f3   : > { %v4970_v14 = vadd.f32 %v1010_v43, %v4775_v11  ;;  %v1059_v21 = vpop.f32.mrf.mxu3 }
 0x1f4   : > { %v4973_v32 = vadd.f32 %v1059_v21, %v4783_v40  ;;  %v963_v16 = vpop.f32.mrf.mxu1 }
 0x1f5   : > { %9277 = vst [vmem:[#allocation89_spill] sm:$0xff] %v4970_v14  ;;  %v4977_v56 = vadd.f32 %v963_v16, %v4750_v36  ;;  %v1110_v12 = vpop.f32.mrf.mxu0 }
 0x1f6   : > { %9278 = vst [vmem:[#allocation90_spill] sm:$0xff] %v4973_v32  ;;  %v4981_v18 = vadd.f32 %v1110_v12, %v4753_v26 }
 0x1f7   : > { %9279 = vst [vmem:[#allocation91_spill] sm:$0xff] %v4977_v56 }
 0x1f8   : > { %9280 = vst [vmem:[#allocation92_spill] sm:$0xff] %v4981_v18 }
 0x1fa   : > { %v1012_v48 = vpop.f32.mrf.mxu2 }
 0x1fb   : > { %v4986_v21 = vadd.f32 %v1012_v48, %v4775_v11  ;;  %v1061_v55 = vpop.f32.mrf.mxu3 }
 0x1fc   : > { %v4989_v58 = vadd.f32 %v1061_v55, %v4783_v40  ;;  %v966_v16 = vpop.f32.mrf.mxu1 }
 0x1fd   : > { %9281 = vst [vmem:[#allocation93_spill] sm:$0xff] %v4986_v21  ;;  %v4993_v8 = vadd.f32 %v966_v16, %v4750_v36  ;;  %v1113_v12 = vpop.f32.mrf.mxu0 }
 0x1fe   : > { %9282 = vst [vmem:[#allocation94_spill] sm:$0xff] %v4989_v58  ;;  %v4997_v35 = vadd.f32 %v1113_v12, %v4753_v26 }
 0x1ff   : > { %9283 = vst [vmem:[#allocation95_spill] sm:$0xff] %v4993_v8  ;;  %3848 = vmatmul.msk.bf16.gmra.mxu1 %vm386_vm0, %v4314_v38  ;;  %3856 = vmatmul.msk.bf16.gmra.mxu2 %vm386_vm0, %v4314_v38 }
 0x200   : > { %9284 = vst [vmem:[#allocation96_spill] sm:$0xff] %v4997_v35  ;;  %3864 = vmatmul.msk.bf16.gmra.mxu3 %vm386_vm0, %v4314_v38  ;;  %3872 = vmatmul.msk.bf16.gmra.mxu0 %vm386_vm0, %v4314_v38 }
 0x202   : > { %v1015_v48 = vpop.f32.mrf.mxu2 }
 0x203   : > { %v5010_v16 = vadd.f32 %v1015_v48, %v4775_v11  ;;  %v1064_v12 = vpop.f32.mrf.mxu3 }
 0x204   : > { %v5013_v43 = vadd.f32 %v1064_v12, %v4783_v40  ;;  %v968_v32 = vpop.f32.mrf.mxu1 }
 0x205   : > { %9285 = vst [vmem:[#allocation97_spill] sm:$0xff] %v5010_v16  ;;  %v5017_v8 = vadd.f32 %v968_v32, %v4750_v36  ;;  %v1115_v55 = vpop.f32.mrf.mxu0 }
 0x206   : > { %9286 = vst [vmem:[#allocation98_spill] sm:$0xff] %v5013_v43  ;;  %v5021_v18 = vadd.f32 %v1115_v55, %v4753_v26 }
 0x207   : > { %9287 = vst [vmem:[#allocation99_spill] sm:$0xff] %v5017_v8 }
 0x208   : > { %9288 = vst [vmem:[#allocation100_spill] sm:$0xff] %v5021_v18 }
 0x20a   : > { %v1017_v21 = vpop.f32.mrf.mxu2 }
 0x20b   : > { %v5026_v12 = vadd.f32 %v1017_v21, %v4775_v11  ;;  %v1066_v56 = vpop.f32.mrf.mxu3 }
 0x20c   : > { %v5029_v14 = vadd.f32 %v1066_v56, %v4783_v40  ;;  %v971_v32 = vpop.f32.mrf.mxu1 }
 0x20d   : > { %9289 = vst [vmem:[#allocation101_spill] sm:$0xff] %v5026_v12  ;;  %v5033_v35 = vadd.f32 %v971_v32, %v4750_v36  ;;  %v1118_v55 = vpop.f32.mrf.mxu0 }
 0x20e   : > { %9290 = vst [vmem:[#allocation102_spill] sm:$0xff] %v5029_v14  ;;  %v5037_v58 = vadd.f32 %v1118_v55, %v4753_v26 }
 0x20f   : > { %9291 = vst [vmem:[#allocation103_spill] sm:$0xff] %v5033_v35  ;;  %3849 = vmatmul.msk.bf16.gmra.mxu1 %vm386_vm0, %v4326_v45  ;;  %3857 = vmatmul.msk.bf16.gmra.mxu2 %vm386_vm0, %v4326_v45 }
 0x210   : > { %9292 = vst [vmem:[#allocation104_spill] sm:$0xff] %v5037_v58  ;;  %3865 = vmatmul.msk.bf16.gmra.mxu3 %vm386_vm0, %v4326_v45  ;;  %3873 = vmatmul.msk.bf16.gmra.mxu0 %vm386_vm0, %v4326_v45 }
 0x212   : > { %v1020_v21 = vpop.f32.mrf.mxu2 }
 0x213   : > { %v5050_v32 = vadd.f32 %v1020_v21, %v4775_v11  ;;  %v1069_v55 = vpop.f32.mrf.mxu3 }
 0x214   : > { %v5053_v48 = vadd.f32 %v1069_v55, %v4783_v40  ;;  %v973_v43 = vpop.f32.mrf.mxu1 }
 0x215   : > { %9293 = vst [vmem:[#allocation105_spill] sm:$0xff] %v5050_v32  ;;  %v5057_v35 = vadd.f32 %v973_v43, %v4750_v36  ;;  %v1120_v56 = vpop.f32.mrf.mxu0 }
 0x216   : > { %9294 = vst [vmem:[#allocation106_spill] sm:$0xff] %v5053_v48  ;;  %v5061_v18 = vadd.f32 %v1120_v56, %v4753_v26 }
 0x217   : > { %9295 = vst [vmem:[#allocation107_spill] sm:$0xff] %v5057_v35 }
 0x218   : > { %9296 = vst [vmem:[#allocation108_spill] sm:$0xff] %v5061_v18 }
 0x21a   : > { %v1022_v12 = vpop.f32.mrf.mxu2 }
 0x21b   : > { %v5066_v55 = vadd.f32 %v1022_v12, %v4775_v11  ;;  %v1071_v8 = vpop.f32.mrf.mxu3 }
 0x21c   : > { %v5069_v16 = vadd.f32 %v1071_v8, %v4783_v40  ;;  %v976_v43 = vpop.f32.mrf.mxu1 }
 0x21d   : > { %9297 = vst [vmem:[#allocation109_spill] sm:$0xff] %v5066_v55  ;;  %v5073_v58 = vadd.f32 %v976_v43, %v4750_v36  ;;  %v1123_v56 = vpop.f32.mrf.mxu0 }
 0x21e   : > { %9298 = vst [vmem:[#allocation110_spill] sm:$0xff] %v5069_v16  ;;  %v5077_v14 = vadd.f32 %v1123_v56, %v4753_v26 }
 0x21f   : > { %9299 = vst [vmem:[#allocation111_spill] sm:$0xff] %v5073_v58  ;;  %3850 = vmatmul.msk.bf16.gmra.mxu1 %vm386_vm0, %v4362_v1  ;;  %3858 = vmatmul.msk.bf16.gmra.mxu2 %vm386_vm0, %v4362_v1 }
 0x220   : > { %9300 = vst [vmem:[#allocation112_spill] sm:$0xff] %v5077_v14  ;;  %3866 = vmatmul.msk.bf16.gmra.mxu3 %vm386_vm0, %v4362_v1  ;;  %3874 = vmatmul.msk.bf16.gmra.mxu0 %vm386_vm0, %v4362_v1 }
 0x222   : > { %v1025_v12 = vpop.f32.mrf.mxu2 }
 0x223   : > { %v5090_v43 = vadd.f32 %v1025_v12, %v4775_v11  ;;  %v1074_v56 = vpop.f32.mrf.mxu3  ;;  %v5106_v12 = vld [vmem:[%s8951_s4 + $0x8] sm:$0xff] }
 0x224   : > { %v5093_v21 = vadd.f32 %v1074_v56, %v4783_v40  ;;  %v978_v48 = vpop.f32.mrf.mxu1  ;;  %v5111_v32 = vperm.slane %v5106_v12, 0 }
 0x225   : > { %9301 = vst [vmem:[#allocation113_spill] sm:$0xff] %v5090_v43  ;;  %v5097_v58 = vadd.f32 %v978_v48, %v4750_v36  ;;  %v1125_v8 = vpop.f32.mrf.mxu0  ;;  %v5114_v48 = vperm.slane %v5106_v12, 3 }
 0x226   : > { %9302 = vst [vmem:[#allocation114_spill] sm:$0xff] %v5093_v21  ;;  %v5101_v18 = vadd.f32 %v1125_v8, %v4753_v26 }
 0x227   : > { %9303 = vst [vmem:[#allocation115_spill] sm:$0xff] %v5097_v58 }
 0x228   : > { %9304 = vst [vmem:[#allocation116_spill] sm:$0xff] %v5101_v18 }
 0x22a   : > { %v1027_v36 = vpop.f32.mrf.mxu2 }
 0x22b   : > { %v5117_v14 = vadd.f32 %v1027_v36, %v4775_v11  ;;  %v1076_v26 = vpop.f32.mrf.mxu3  ;;  %v5136_v11 = vperm.slane %v5106_v12, 1 }
 0x22c   : > { %v5120_v8 = vadd.f32 %v1076_v26, %v4783_v40  ;;  %v1137_v21 = vpop.f32.mrf.mxu1 }
 0x22d   : > { %9305 = vst [vmem:[#allocation117_spill] sm:$0xff] %v5117_v14  ;;  %v5124_v56 = vadd.f32 %v1137_v21, %v5111_v32  ;;  %v1284_v16 = vpop.f32.mrf.mxu0 }
 0x22e   : > { %9306 = vst [vmem:[#allocation118_spill] sm:$0xff] %v5120_v8  ;;  %v5128_v58 = vadd.f32 %v1284_v16, %v5114_v48  ;;  %v5144_v16 = vperm.slane %v5106_v12, 2 }
 0x22f   : > { %9307 = vst [vmem:[#allocation119_spill] sm:$0xff] %v5124_v56  ;;  %3875 = vmatmul.msk.bf16.vlgmr.msra.gmra.mxu1 %vm386_vm0, %v4230_v54  ;;  %3883 = vmatmul.msk.bf16.vlgmr.msra.gmra.mxu2 %vm386_vm0, %v4230_v54 }
 0x230   : > { %9308 = vst [vmem:[#allocation120_spill] sm:$0xff] %v5128_v58  ;;  %3891 = vmatmul.msk.bf16.vlgmr.msra.gmra.mxu3 %vm386_vm0, %v4230_v54  ;;  %3899 = vmatmul.msk.bf16.vlgmr.msra.gmra.mxu0 %vm386_vm0, %v4230_v54 }
 0x232   : > { %v1186_v21 = vpop.f32.mrf.mxu2 }
 0x233   : > { %v5147_v36 = vadd.f32 %v1186_v21, %v5136_v11  ;;  %v1235_v26 = vpop.f32.mrf.mxu3 }
 0x234   : > { %v5150_v55 = vadd.f32 %v1235_v26, %v5144_v16  ;;  %v1139_v18 = vpop.f32.mrf.mxu1 }
 0x235   : > { %9309 = vst [vmem:[#allocation121_spill] sm:$0xff] %v5147_v36  ;;  %v5154_v43 = vadd.f32 %v1139_v18, %v5111_v32  ;;  %v1286_v58 = vpop.f32.mrf.mxu0 }
 0x236   : > { %9310 = vst [vmem:[#allocation122_spill] sm:$0xff] %v5150_v55  ;;  %v5158_v56 = vadd.f32 %v1286_v58, %v5114_v48 }
 0x238   : > { %9311 = vst [vmem:[#allocation123_spill] sm:$0xff] %v5158_v56 }
 0x23a   : > { %v1188_v14 = vpop.f32.mrf.mxu2 }
 0x23b   : > { %v5163_v26 = vadd.f32 %v1188_v14, %v5136_v11  ;;  %v1237_v35 = vpop.f32.mrf.mxu3 }
 0x23c   : > { %v5166_v40 = vadd.f32 %v1237_v35, %v5144_v16  ;;  %v1142_v18 = vpop.f32.mrf.mxu1 }
 0x23d   : > { %9312 = vst [vmem:[#allocation124_spill] sm:$0xff] %v5163_v26  ;;  %v5170_v54 = vadd.f32 %v1142_v18, %v5111_v32  ;;  %v1289_v58 = vpop.f32.mrf.mxu0 }
 0x23e   : > { %9313 = vst [vmem:[#allocation125_spill] sm:$0xff] %v5166_v40  ;;  %v5174_v8 = vadd.f32 %v1289_v58, %v5114_v48 }
 0x23f   : > { %9314 = vst [vmem:[#allocation126_spill] sm:$0xff] %v5170_v54  ;;  %3876 = vmatmul.msk.bf16.gmra.mxu1 %vm386_vm0, %v4242_v62  ;;  %3884 = vmatmul.msk.bf16.gmra.mxu2 %vm386_vm0, %v4242_v62 }
 0x240   : > { %9315 = vst [vmem:[#allocation127_spill] sm:$0xff] %v5174_v8  ;;  %3892 = vmatmul.msk.bf16.gmra.mxu3 %vm386_vm0, %v4242_v62  ;;  %3900 = vmatmul.msk.bf16.gmra.mxu0 %vm386_vm0, %v4242_v62 }
 0x242   : > { %v1191_v14 = vpop.f32.mrf.mxu2 }
 0x243   : > { %v5187_v18 = vadd.f32 %v1191_v14, %v5136_v11  ;;  %v1240_v58 = vpop.f32.mrf.mxu3 }
 0x244   : > { %v5190_v21 = vadd.f32 %v1240_v58, %v5144_v16  ;;  %v1144_v55 = vpop.f32.mrf.mxu1 }
 0x245   : > { %9316 = vst [vmem:[#allocation128_spill] sm:$0xff] %v5187_v18  ;;  %v5194_v54 = vadd.f32 %v1144_v55, %v5111_v32  ;;  %v1291_v35 = vpop.f32.mrf.mxu0 }
 0x246   : > { %9317 = vst [vmem:[#allocation129_spill] sm:$0xff] %v5190_v21  ;;  %v5198_v56 = vadd.f32 %v1291_v35, %v5114_v48 }
 0x247   : > { %9318 = vst [vmem:[#allocation130_spill] sm:$0xff] %v5194_v54 }
 0x248   : > { %9319 = vst [vmem:[#allocation131_spill] sm:$0xff] %v5198_v56 }
 0x24a   : > { %v1193_v40 = vpop.f32.mrf.mxu2 }
 0x24b   : > { %v5203_v58 = vadd.f32 %v1193_v40, %v5136_v11  ;;  %v1242_v26 = vpop.f32.mrf.mxu3 }
 0x24c   : > { %v5206_v36 = vadd.f32 %v1242_v26, %v5144_v16  ;;  %v1147_v55 = vpop.f32.mrf.mxu1 }
 0x24d   : > { %9320 = vst [vmem:[#allocation132_spill] sm:$0xff] %v5203_v58  ;;  %v5210_v8 = vadd.f32 %v1147_v55, %v5111_v32  ;;  %v1294_v35 = vpop.f32.mrf.mxu0 }
 0x24e   : > { %9321 = vst [vmem:[#allocation133_spill] sm:$0xff] %v5206_v36  ;;  %v5214_v62 = vadd.f32 %v1294_v35, %v5114_v48 }
 0x24f   : > { %9322 = vst [vmem:[#allocation134_spill] sm:$0xff] %v5210_v8  ;;  %3877 = vmatmul.msk.bf16.gmra.mxu1 %vm386_vm0, %v4254_v5  ;;  %3885 = vmatmul.msk.bf16.gmra.mxu2 %vm386_vm0, %v4254_v5 }
 0x250   : > { %9323 = vst [vmem:[#allocation135_spill] sm:$0xff] %v5214_v62  ;;  %3893 = vmatmul.msk.bf16.gmra.mxu3 %vm386_vm0, %v4254_v5  ;;  %3901 = vmatmul.msk.bf16.gmra.mxu0 %vm386_vm0, %v4254_v5 }
 0x252   : > { %v1196_v26 = vpop.f32.mrf.mxu2 }
 0x253   : > { %v5227_v55 = vadd.f32 %v1196_v26, %v5136_v11  ;;  %v1245_v35 = vpop.f32.mrf.mxu3 }
 0x254   : > { %v5230_v14 = vadd.f32 %v1245_v35, %v5144_v16  ;;  %v1149_v21 = vpop.f32.mrf.mxu1 }
 0x255   : > { %9324 = vst [vmem:[#allocation136_spill] sm:$0xff] %v5227_v55  ;;  %v5234_v8 = vadd.f32 %v1149_v21, %v5111_v32  ;;  %v1296_v40 = vpop.f32.mrf.mxu0 }
 0x256   : > { %9325 = vst [vmem:[#allocation137_spill] sm:$0xff] %v5230_v14  ;;  %v5238_v56 = vadd.f32 %v1296_v40, %v5114_v48 }
 0x257   : > { %9326 = vst [vmem:[#allocation138_spill] sm:$0xff] %v5234_v8 }
 0x258   : > { %9327 = vst [vmem:[#allocation139_spill] sm:$0xff] %v5238_v56 }
 0x25a   : > { %v1198_v36 = vpop.f32.mrf.mxu2 }
 0x25b   : > { %v5243_v35 = vadd.f32 %v1198_v36, %v5136_v11  ;;  %v1247_v58 = vpop.f32.mrf.mxu3 }
 0x25c   : > { %v5246_v18 = vadd.f32 %v1247_v58, %v5144_v16  ;;  %v1152_v21 = vpop.f32.mrf.mxu1 }
 0x25d   : > { %9328 = vst [vmem:[#allocation140_spill] sm:$0xff] %v5243_v35  ;;  %v5250_v62 = vadd.f32 %v1152_v21, %v5111_v32  ;;  %v1299_v40 = vpop.f32.mrf.mxu0 }
 0x25e   : > { %9329 = vst [vmem:[#allocation141_spill] sm:$0xff] %v5246_v18  ;;  %v5254_v5 = vadd.f32 %v1299_v40, %v5114_v48 }
 0x25f   : > { %9330 = vst [vmem:[#allocation142_spill] sm:$0xff] %v5250_v62  ;;  %3878 = vmatmul.msk.bf16.gmra.mxu1 %vm386_vm0, %v4290_v24  ;;  %3886 = vmatmul.msk.bf16.gmra.mxu2 %vm386_vm0, %v4290_v24 }
 0x260   : > { %9331 = vst [vmem:[#allocation143_spill] sm:$0xff] %v5254_v5  ;;  %3894 = vmatmul.msk.bf16.gmra.mxu3 %vm386_vm0, %v4290_v24  ;;  %3902 = vmatmul.msk.bf16.gmra.mxu0 %vm386_vm0, %v4290_v24 }
 0x262   : > { %v1201_v58 = vpop.f32.mrf.mxu2 }
 0x263   : > { %v5267_v21 = vadd.f32 %v1201_v58, %v5136_v11  ;;  %v1250_v40 = vpop.f32.mrf.mxu3 }
 0x264   : > { %v5270_v26 = vadd.f32 %v1250_v40, %v5144_v16  ;;  %v1154_v14 = vpop.f32.mrf.mxu1 }
 0x265   : > { %9332 = vst [vmem:[#allocation144_spill] sm:$0xff] %v5267_v21  ;;  %v5274_v62 = vadd.f32 %v1154_v14, %v5111_v32  ;;  %v1301_v36 = vpop.f32.mrf.mxu0 }
 0x266   : > { %9333 = vst [vmem:[#allocation145_spill] sm:$0xff] %v5270_v26  ;;  %v5278_v56 = vadd.f32 %v1301_v36, %v5114_v48 }
 0x267   : > { %9334 = vst [vmem:[#allocation146_spill] sm:$0xff] %v5274_v62 }
 0x268   : > { %9335 = vst [vmem:[#allocation147_spill] sm:$0xff] %v5278_v56 }
 0x26a   : > { %v1203_v18 = vpop.f32.mrf.mxu2 }
 0x26b   : > { %v5283_v40 = vadd.f32 %v1203_v18, %v5136_v11  ;;  %v1252_v35 = vpop.f32.mrf.mxu3 }
 0x26c   : > { %v5286_v55 = vadd.f32 %v1252_v35, %v5144_v16  ;;  %v1157_v14 = vpop.f32.mrf.mxu1 }
 0x26d   : > { %9336 = vst [vmem:[#allocation148_spill] sm:$0xff] %v5283_v40  ;;  %v5290_v5 = vadd.f32 %v1157_v14, %v5111_v32  ;;  %v1304_v36 = vpop.f32.mrf.mxu0 }
 0x26e   : > { %9337 = vst [vmem:[#allocation149_spill] sm:$0xff] %v5286_v55  ;;  %v5294_v24 = vadd.f32 %v1304_v36, %v5114_v48 }
 0x26f   : > { %9338 = vst [vmem:[#allocation150_spill] sm:$0xff] %v5290_v5  ;;  %3879 = vmatmul.msk.bf16.gmra.mxu1 %vm386_vm0, %v4302_v31  ;;  %3887 = vmatmul.msk.bf16.gmra.mxu2 %vm386_vm0, %v4302_v31 }
 0x270   : > { %9339 = vst [vmem:[#allocation151_spill] sm:$0xff] %v5294_v24  ;;  %3895 = vmatmul.msk.bf16.gmra.mxu3 %vm386_vm0, %v4302_v31  ;;  %3903 = vmatmul.msk.bf16.gmra.mxu0 %vm386_vm0, %v4302_v31 }
 0x272   : > { %v1206_v35 = vpop.f32.mrf.mxu2 }
 0x273   : > { %v5307_v14 = vadd.f32 %v1206_v35, %v5136_v11  ;;  %v1255_v36 = vpop.f32.mrf.mxu3 }
 0x274   : > { %v5310_v58 = vadd.f32 %v1255_v36, %v5144_v16  ;;  %v1159_v26 = vpop.f32.mrf.mxu1 }
 0x275   : > { %9340 = vst [vmem:[#allocation152_spill] sm:$0xff] %v5307_v14  ;;  %v5314_v5 = vadd.f32 %v1159_v26, %v5111_v32  ;;  %v1306_v18 = vpop.f32.mrf.mxu0 }
 0x276   : > { %9341 = vst [vmem:[#allocation153_spill] sm:$0xff] %v5310_v58  ;;  %v5318_v56 = vadd.f32 %v1306_v18, %v5114_v48 }
 0x277   : > { %9342 = vst [vmem:[#allocation154_spill] sm:$0xff] %v5314_v5 }
 0x278   : > { %9343 = vst [vmem:[#allocation155_spill] sm:$0xff] %v5318_v56 }
 0x27a   : > { %v1208_v55 = vpop.f32.mrf.mxu2 }
 0x27b   : > { %v5323_v36 = vadd.f32 %v1208_v55, %v5136_v11  ;;  %v1257_v40 = vpop.f32.mrf.mxu3 }
 0x27c   : > { %v5326_v21 = vadd.f32 %v1257_v40, %v5144_v16  ;;  %v1162_v26 = vpop.f32.mrf.mxu1 }
 0x27d   : > { %9344 = vst [vmem:[#allocation156_spill] sm:$0xff] %v5323_v36  ;;  %v5330_v24 = vadd.f32 %v1162_v26, %v5111_v32  ;;  %v1309_v18 = vpop.f32.mrf.mxu0 }
 0x27e   : > { %9345 = vst [vmem:[#allocation157_spill] sm:$0xff] %v5326_v21  ;;  %v5334_v31 = vadd.f32 %v1309_v18, %v5114_v48 }
 0x27f   : > { %9346 = vst [vmem:[#allocation158_spill] sm:$0xff] %v5330_v24  ;;  %3880 = vmatmul.msk.bf16.gmra.mxu1 %vm386_vm0, %v4314_v38  ;;  %3888 = vmatmul.msk.bf16.gmra.mxu2 %vm386_vm0, %v4314_v38 }
 0x280   : > { %9347 = vst [vmem:[#allocation159_spill] sm:$0xff] %v5334_v31  ;;  %3896 = vmatmul.msk.bf16.gmra.mxu3 %vm386_vm0, %v4314_v38  ;;  %3904 = vmatmul.msk.bf16.gmra.mxu0 %vm386_vm0, %v4314_v38 }
 0x282   : > { %v1211_v40 = vpop.f32.mrf.mxu2 }
 0x283   : > { %v5347_v26 = vadd.f32 %v1211_v40, %v5136_v11  ;;  %v1260_v18 = vpop.f32.mrf.mxu3 }
 0x284   : > { %v5350_v35 = vadd.f32 %v1260_v18, %v5144_v16  ;;  %v1164_v58 = vpop.f32.mrf.mxu1 }
 0x285   : > { %9348 = vst [vmem:[#allocation160_spill] sm:$0xff] %v5347_v26  ;;  %v5354_v24 = vadd.f32 %v1164_v58, %v5111_v32  ;;  %v1311_v55 = vpop.f32.mrf.mxu0 }
 0x286   : > { %9349 = vst [vmem:[#allocation161_spill] sm:$0xff] %v5350_v35  ;;  %v5358_v56 = vadd.f32 %v1311_v55, %v5114_v48 }
 0x287   : > { %9350 = vst [vmem:[#allocation162_spill] sm:$0xff] %v5354_v24 }
 0x288   : > { %9351 = vst [vmem:[#allocation163_spill] sm:$0xff] %v5358_v56 }
 0x28a   : > { %v1213_v21 = vpop.f32.mrf.mxu2 }
 0x28b   : > { %v5363_v18 = vadd.f32 %v1213_v21, %v5136_v11  ;;  %v1262_v36 = vpop.f32.mrf.mxu3 }
 0x28c   : > { %v5366_v14 = vadd.f32 %v1262_v36, %v5144_v16  ;;  %v1167_v58 = vpop.f32.mrf.mxu1 }
 0x28d   : > { %9352 = vst [vmem:[#allocation164_spill] sm:$0xff] %v5363_v18  ;;  %v5370_v31 = vadd.f32 %v1167_v58, %v5111_v32  ;;  %v1314_v55 = vpop.f32.mrf.mxu0 }
 0x28e   : > { %9353 = vst [vmem:[#allocation165_spill] sm:$0xff] %v5366_v14  ;;  %v5374_v38 = vadd.f32 %v1314_v55, %v5114_v48 }
 0x28f   : > { %9354 = vst [vmem:[#allocation166_spill] sm:$0xff] %v5370_v31  ;;  %3881 = vmatmul.msk.bf16.gmra.mxu1 %vm386_vm0, %v4326_v45  ;;  %3889 = vmatmul.msk.bf16.gmra.mxu2 %vm386_vm0, %v4326_v45 }
 0x290   : > { %9355 = vst [vmem:[#allocation167_spill] sm:$0xff] %v5374_v38  ;;  %3897 = vmatmul.msk.bf16.gmra.mxu3 %vm386_vm0, %v4326_v45  ;;  %3905 = vmatmul.msk.bf16.gmra.mxu0 %vm386_vm0, %v4326_v45 }
 0x292   : > { %v1216_v36 = vpop.f32.mrf.mxu2 }
 0x293   : > { %v5387_v58 = vadd.f32 %v1216_v36, %v5136_v11  ;;  %v1265_v55 = vpop.f32.mrf.mxu3 }
 0x294   : > { %v5390_v40 = vadd.f32 %v1265_v55, %v5144_v16  ;;  %v1169_v35 = vpop.f32.mrf.mxu1 }
 0x295   : > { %9356 = vst [vmem:[#allocation168_spill] sm:$0xff] %v5387_v58  ;;  %v5394_v31 = vadd.f32 %v1169_v35, %v5111_v32  ;;  %v1316_v21 = vpop.f32.mrf.mxu0 }
 0x296   : > { %9357 = vst [vmem:[#allocation169_spill] sm:$0xff] %v5390_v40  ;;  %v5398_v56 = vadd.f32 %v1316_v21, %v5114_v48 }
 0x297   : > { %9358 = vst [vmem:[#allocation170_spill] sm:$0xff] %v5394_v31 }
 0x298   : > { %9359 = vst [vmem:[#allocation171_spill] sm:$0xff] %v5398_v56 }
 0x29a   : > { %v1218_v14 = vpop.f32.mrf.mxu2 }
 0x29b   : > { %v5403_v55 = vadd.f32 %v1218_v14, %v5136_v11  ;;  %v1267_v18 = vpop.f32.mrf.mxu3 }
 0x29c   : > { %v5406_v26 = vadd.f32 %v1267_v18, %v5144_v16  ;;  %v1172_v35 = vpop.f32.mrf.mxu1 }
 0x29d   : > { %9360 = vst [vmem:[#allocation172_spill] sm:$0xff] %v5403_v55  ;;  %v5410_v38 = vadd.f32 %v1172_v35, %v5111_v32  ;;  %v1319_v21 = vpop.f32.mrf.mxu0  ;;  %v5446_v55 = vperm.slane %v5106_v12, 7 }
 0x29e   : > { %9361 = vst [vmem:[#allocation173_spill] sm:$0xff] %v5406_v26  ;;  %v5414_v45 = vadd.f32 %v1319_v21, %v5114_v48  ;;  %v5443_v26 = vperm.slane %v5106_v12, 4 }
 0x29f   : > { %9362 = vst [vmem:[#allocation174_spill] sm:$0xff] %v5410_v38  ;;  %3882 = vmatmul.msk.bf16.gmra.mxu1 %vm386_vm0, %v4362_v1  ;;  %3890 = vmatmul.msk.bf16.gmra.mxu2 %vm386_vm0, %v4362_v1 }
 0x2a0   : > { %9363 = vst [vmem:[#allocation175_spill] sm:$0xff] %v5414_v45  ;;  %3898 = vmatmul.msk.bf16.gmra.mxu3 %vm386_vm0, %v4362_v1  ;;  %3906 = vmatmul.msk.bf16.gmra.mxu0 %vm386_vm0, %v4362_v1 }
 0x2a2   : > { %v1221_v18 = vpop.f32.mrf.mxu2 }
 0x2a3   : > { %v5427_v35 = vadd.f32 %v1221_v18, %v5136_v11  ;;  %v1270_v21 = vpop.f32.mrf.mxu3 }
 0x2a4   : > { %v5430_v36 = vadd.f32 %v1270_v21, %v5144_v16  ;;  %v1174_v40 = vpop.f32.mrf.mxu1 }
 0x2a5   : > { %9364 = vst [vmem:[#allocation176_spill] sm:$0xff] %v5427_v35  ;;  %v5434_v38 = vadd.f32 %v1174_v40, %v5111_v32  ;;  %v1321_v14 = vpop.f32.mrf.mxu0 }
 0x2a6   : > { %9365 = vst [vmem:[#allocation177_spill] sm:$0xff] %v5430_v36  ;;  %v5438_v56 = vadd.f32 %v1321_v14, %v5114_v48 }
 0x2a7   : > { %9366 = vst [vmem:[#allocation178_spill] sm:$0xff] %v5434_v38 }
 0x2a8   : > { %9367 = vst [vmem:[#allocation179_spill] sm:$0xff] %v5438_v56 }
 0x2aa   : > { %v1223_v21 = vpop.f32.mrf.mxu2 }
 0x2ab   : > { %v5449_v32 = vadd.f32 %v1223_v21, %v5136_v11  ;;  %v1272_v40 = vpop.f32.mrf.mxu3  ;;  %v5464_v11 = vperm.slane %v5106_v12, 5  ;;  %v5468_v21 = vperm.slane %v5106_v12, 6 }
 0x2ac   : > { %v5452_v45 = vadd.f32 %v1272_v40, %v5144_v16  ;;  %v1333_v48 = vpop.f32.mrf.mxu1 }
 0x2ad   : > { %9368 = vst [vmem:[#allocation180_spill] sm:$0xff] %v5449_v32  ;;  %v5456_v1 = vadd.f32 %v1333_v48, %v5443_v26  ;;  %v1480_v18 = vpop.f32.mrf.mxu0 }
 0x2ae   : > { %9369 = vst [vmem:[#allocation181_spill] sm:$0xff] %v5452_v45  ;;  %v5460_v56 = vadd.f32 %v1480_v18, %v5446_v55 }
 0x2b2   : > { %v1382_v40 = vpop.f32.mrf.mxu2 }
 0x2b3   : > { %v5471_v48 = vadd.f32 %v1382_v40, %v5464_v11  ;;  %v1431_v14 = vpop.f32.mrf.mxu3 }
 0x2b4   : > { %v5474_v58 = vadd.f32 %v1431_v14, %v5468_v21  ;;  %v1335_v18 = vpop.f32.mrf.mxu1 }
 0x2b5   : > { %v5478_v38 = vadd.f32 %v1335_v18, %v5443_v26  ;;  %v1482_v32 = vpop.f32.mrf.mxu0 }
 0x2b6   : > { %v5482_v12 = vadd.f32 %v1482_v32, %v5446_v55 }
 0x2b8   : > { %9370 = vst [vmem:[#allocation182_spill] sm:$0xff] %v5482_v12 }
 0x2ba   : > { %v1384_v35 = vpop.f32.mrf.mxu2 }
 0x2bb   : > { %v5487_v14 = vadd.f32 %v1384_v35, %v5464_v11  ;;  %v1433_v31 = vpop.f32.mrf.mxu3 }
 0x2bc   : > { %v5490_v45 = vadd.f32 %v1433_v31, %v5468_v21  ;;  %v1338_v18 = vpop.f32.mrf.mxu1 }
 0x2bd   : > { %v5494_v16 = vadd.f32 %v1338_v18, %v5443_v26  ;;  %v1485_v32 = vpop.f32.mrf.mxu0 }
 0x2be   : > { %v5498_v36 = vadd.f32 %v1485_v32, %v5446_v55 }
 0x2bf   : > { %9371 = vst [vmem:[#allocation183_spill] sm:$0xff] %v5494_v16 }
 0x2c0   : > { %9372 = vst [vmem:[#allocation184_spill] sm:$0xff] %v5498_v36 }
 0x2c2   : > { %v1387_v62 = vpop.f32.mrf.mxu2 }
 0x2c3   : > { %v5503_v31 = vadd.f32 %v1387_v62, %v5464_v11  ;;  %v1436_v8 = vpop.f32.mrf.mxu3 }
 0x2c4   : > { %v5506_v24 = vadd.f32 %v1436_v8, %v5468_v21  ;;  %v1340_v18 = vpop.f32.mrf.mxu1 }
 0x2c5   : > { %9373 = vst [vmem:[#allocation185_spill] sm:$0xff] %v5503_v31  ;;  %v5510_v5 = vadd.f32 %v1340_v18, %v5443_v26  ;;  %v1487_v32 = vpop.f32.mrf.mxu0 }
 0x2c6   : > { %9374 = vst [vmem:[#allocation186_spill] sm:$0xff] %v5506_v24  ;;  %v5514_v40 = vadd.f32 %v1487_v32, %v5446_v55 }
 0x2c7   : > { %9375 = vst [vmem:[#allocation187_spill] sm:$0xff] %v5510_v5 }
 0x2c8   : > { %9376 = vst [vmem:[#allocation188_spill] sm:$0xff] %v5514_v40 }
 0x2ca   : > { %v1389_v36 = vpop.f32.mrf.mxu2 }
 0x2cb   : > { %v5519_v8 = vadd.f32 %v1389_v36, %v5464_v11  ;;  %v1438_v16 = vpop.f32.mrf.mxu3 }
 0x2cc   : > { %v5522_v54 = vadd.f32 %v1438_v16, %v5468_v21  ;;  %v1343_v18 = vpop.f32.mrf.mxu1 }
 0x2cd   : > { %9377 = vst [vmem:[#allocation189_spill] sm:$0xff] %v5519_v8  ;;  %v5526_v12 = vadd.f32 %v1343_v18, %v5443_v26  ;;  %v1490_v32 = vpop.f32.mrf.mxu0 }
 0x2ce   : > { %9378 = vst [vmem:[#allocation190_spill] sm:$0xff] %v5522_v54  ;;  %v5530_v35 = vadd.f32 %v1490_v32, %v5446_v55 }
 0x2cf   : > { %9379 = vst [vmem:[#allocation191_spill] sm:$0xff] %v5526_v12 }
 0x2d0   : > { %9380 = vst [vmem:[#allocation192_spill] sm:$0xff] %v5530_v35 }
 0x2d2   : > { %v1392_v40 = vpop.f32.mrf.mxu2 }
 0x2d3   : > { %v5535_v16 = vadd.f32 %v1392_v40, %v5464_v11  ;;  %v1441_v5 = vpop.f32.mrf.mxu3 }
 0x2d4   : > { %v5538_v31 = vadd.f32 %v1441_v5, %v5468_v21  ;;  %v1345_v18 = vpop.f32.mrf.mxu1 }
 0x2d5   : > { %9381 = vst [vmem:[#allocation193_spill] sm:$0xff] %v5535_v16  ;;  %v5542_v24 = vadd.f32 %v1345_v18, %v5443_v26  ;;  %v1492_v32 = vpop.f32.mrf.mxu0 }
 0x2d6   : > { %9382 = vst [vmem:[#allocation194_spill] sm:$0xff] %v5538_v31  ;;  %v5546_v62 = vadd.f32 %v1492_v32, %v5446_v55 }
 0x2d7   : > { %9383 = vst [vmem:[#allocation195_spill] sm:$0xff] %v5542_v24 }
 0x2d8   : > { %9384 = vst [vmem:[#allocation196_spill] sm:$0xff] %v5546_v62 }
 0x2da   : > { %v1394_v35 = vpop.f32.mrf.mxu2 }
 0x2db   : > { %v5551_v5 = vadd.f32 %v1394_v35, %v5464_v11  ;;  %v1443_v12 = vpop.f32.mrf.mxu3 }
 0x2dc   : > { %v5554_v8 = vadd.f32 %v1443_v12, %v5468_v21  ;;  %v1348_v18 = vpop.f32.mrf.mxu1 }
 0x2dd   : > { %9385 = vst [vmem:[#allocation197_spill] sm:$0xff] %v5551_v5  ;;  %v5558_v54 = vadd.f32 %v1348_v18, %v5443_v26  ;;  %v1495_v32 = vpop.f32.mrf.mxu0 }
 0x2de   : > { %9386 = vst [vmem:[#allocation198_spill] sm:$0xff] %v5554_v8  ;;  %v5562_v36 = vadd.f32 %v1495_v32, %v5446_v55 }
 0x2df   : > { %9387 = vst [vmem:[#allocation199_spill] sm:$0xff] %v5558_v54 }
 0x2e0   : > { %9388 = vst [vmem:[#allocation200_spill] sm:$0xff] %v5562_v36 }
 0x2e2   : > { %v1397_v62 = vpop.f32.mrf.mxu2 }
 0x2e3   : > { %v5567_v12 = vadd.f32 %v1397_v62, %v5464_v11  ;;  %v1446_v24 = vpop.f32.mrf.mxu3 }
 0x2e4   : > { %v5570_v16 = vadd.f32 %v1446_v24, %v5468_v21  ;;  %v1350_v18 = vpop.f32.mrf.mxu1 }
 0x2e5   : > { %9389 = vst [vmem:[#allocation201_spill] sm:$0xff] %v5567_v12  ;;  %v5574_v31 = vadd.f32 %v1350_v18, %v5443_v26  ;;  %v1497_v32 = vpop.f32.mrf.mxu0 }
 0x2e6   : > { %9390 = vst [vmem:[#allocation202_spill] sm:$0xff] %v5570_v16  ;;  %v5578_v40 = vadd.f32 %v1497_v32, %v5446_v55 }
 0x2e7   : > { %9391 = vst [vmem:[#allocation203_spill] sm:$0xff] %v5574_v31 }
 0x2e8   : > { %9392 = vst [vmem:[#allocation204_spill] sm:$0xff] %v5578_v40 }
 0x2ea   : > { %v1399_v36 = vpop.f32.mrf.mxu2 }
 0x2eb   : > { %v5583_v24 = vadd.f32 %v1399_v36, %v5464_v11  ;;  %v1448_v54 = vpop.f32.mrf.mxu3 }
 0x2ec   : > { %v5586_v5 = vadd.f32 %v1448_v54, %v5468_v21  ;;  %v1353_v18 = vpop.f32.mrf.mxu1 }
 0x2ed   : > { %9393 = vst [vmem:[#allocation205_spill] sm:$0xff] %v5583_v24  ;;  %v5590_v8 = vadd.f32 %v1353_v18, %v5443_v26  ;;  %v1500_v32 = vpop.f32.mrf.mxu0 }
 0x2ee   : > { %9394 = vst [vmem:[#allocation206_spill] sm:$0xff] %v5586_v5  ;;  %v5594_v35 = vadd.f32 %v1500_v32, %v5446_v55 }
 0x2ef   : > { %9395 = vst [vmem:[#allocation207_spill] sm:$0xff] %v5590_v8 }
 0x2f0   : > { %9396 = vst [vmem:[#allocation208_spill] sm:$0xff] %v5594_v35 }
 0x2f2   : > { %v1402_v40 = vpop.f32.mrf.mxu2 }
 0x2f3   : > { %v5599_v54 = vadd.f32 %v1402_v40, %v5464_v11  ;;  %v1451_v31 = vpop.f32.mrf.mxu3 }
 0x2f4   : > { %v5602_v12 = vadd.f32 %v1451_v31, %v5468_v21  ;;  %v1355_v18 = vpop.f32.mrf.mxu1 }
 0x2f5   : > { %9397 = vst [vmem:[#allocation209_spill] sm:$0xff] %v5599_v54  ;;  %v5606_v16 = vadd.f32 %v1355_v18, %v5443_v26  ;;  %v1502_v32 = vpop.f32.mrf.mxu0 }
 0x2f6   : > { %9398 = vst [vmem:[#allocation210_spill] sm:$0xff] %v5602_v12  ;;  %v5610_v62 = vadd.f32 %v1502_v32, %v5446_v55 }
 0x2f7   : > { %9399 = vst [vmem:[#allocation211_spill] sm:$0xff] %v5606_v16 }
 0x2f8   : > { %9400 = vst [vmem:[#allocation212_spill] sm:$0xff] %v5610_v62 }
 0x2fa   : > { %v1404_v35 = vpop.f32.mrf.mxu2 }
 0x2fb   : > { %v5615_v31 = vadd.f32 %v1404_v35, %v5464_v11  ;;  %v1453_v8 = vpop.f32.mrf.mxu3 }
 0x2fc   : > { %v5618_v24 = vadd.f32 %v1453_v8, %v5468_v21  ;;  %v1358_v18 = vpop.f32.mrf.mxu1 }
 0x2fd   : > { %9401 = vst [vmem:[#allocation213_spill] sm:$0xff] %v5615_v31  ;;  %v5622_v5 = vadd.f32 %v1358_v18, %v5443_v26  ;;  %v1505_v32 = vpop.f32.mrf.mxu0 }
 0x2fe   : > { %9402 = vst [vmem:[#allocation214_spill] sm:$0xff] %v5618_v24  ;;  %v5626_v36 = vadd.f32 %v1505_v32, %v5446_v55 }
 0x2ff   : > { %9403 = vst [vmem:[#allocation215_spill] sm:$0xff] %v5622_v5 }
 0x300   : > { %9404 = vst [vmem:[#allocation216_spill] sm:$0xff] %v5626_v36 }
 0x302   : > { %v1407_v62 = vpop.f32.mrf.mxu2 }
 0x303   : > { %v5631_v8 = vadd.f32 %v1407_v62, %v5464_v11  ;;  %v1456_v16 = vpop.f32.mrf.mxu3 }
 0x304   : > { %v5634_v54 = vadd.f32 %v1456_v16, %v5468_v21  ;;  %v1360_v18 = vpop.f32.mrf.mxu1 }
 0x305   : > { %9405 = vst [vmem:[#allocation217_spill] sm:$0xff] %v5631_v8  ;;  %v5638_v12 = vadd.f32 %v1360_v18, %v5443_v26  ;;  %v1507_v32 = vpop.f32.mrf.mxu0 }
 0x306   : > { %9406 = vst [vmem:[#allocation218_spill] sm:$0xff] %v5634_v54  ;;  %v5642_v40 = vadd.f32 %v1507_v32, %v5446_v55 }
 0x307   : > { %9407 = vst [vmem:[#allocation219_spill] sm:$0xff] %v5638_v12 }
 0x308   : > { %9408 = vst [vmem:[#allocation220_spill] sm:$0xff] %v5642_v40 }
 0x30a   : > { %v1409_v36 = vpop.f32.mrf.mxu2 }
 0x30b   : > { %v5647_v16 = vadd.f32 %v1409_v36, %v5464_v11  ;;  %v1458_v5 = vpop.f32.mrf.mxu3 }
 0x30c   : > { %v5650_v31 = vadd.f32 %v1458_v5, %v5468_v21  ;;  %v1363_v18 = vpop.f32.mrf.mxu1 }
 0x30d   : > { %9409 = vst [vmem:[#allocation221_spill] sm:$0xff] %v5647_v16  ;;  %v5654_v24 = vadd.f32 %v1363_v18, %v5443_v26  ;;  %v1510_v32 = vpop.f32.mrf.mxu0 }
 0x30e   : > { %9410 = vst [vmem:[#allocation222_spill] sm:$0xff] %v5650_v31  ;;  %v5658_v35 = vadd.f32 %v1510_v32, %v5446_v55 }
 0x30f   : > { %9411 = vst [vmem:[#allocation223_spill] sm:$0xff] %v5654_v24 }
 0x310   : > { %9412 = vst [vmem:[#allocation224_spill] sm:$0xff] %v5658_v35 }
 0x312   : > { %v1412_v40 = vpop.f32.mrf.mxu2 }
 0x313   : > { %v5663_v5 = vadd.f32 %v1412_v40, %v5464_v11  ;;  %v1461_v12 = vpop.f32.mrf.mxu3 }
 0x314   : > { %v5666_v8 = vadd.f32 %v1461_v12, %v5468_v21  ;;  %v1365_v18 = vpop.f32.mrf.mxu1 }
 0x315   : > { %9413 = vst [vmem:[#allocation225_spill] sm:$0xff] %v5663_v5  ;;  %v5670_v54 = vadd.f32 %v1365_v18, %v5443_v26  ;;  %v1512_v32 = vpop.f32.mrf.mxu0 }
 0x316   : > { %9414 = vst [vmem:[#allocation226_spill] sm:$0xff] %v5666_v8  ;;  %v5674_v62 = vadd.f32 %v1512_v32, %v5446_v55 }
 0x317   : > { %9415 = vst [vmem:[#allocation227_spill] sm:$0xff] %v5670_v54 }
 0x318   : > { %9416 = vst [vmem:[#allocation228_spill] sm:$0xff] %v5674_v62 }
 0x31a   : > { %v1414_v35 = vpop.f32.mrf.mxu2 }
 0x31b   : > { %v5679_v12 = vadd.f32 %v1414_v35, %v5464_v11  ;;  %v1463_v24 = vpop.f32.mrf.mxu3 }
 0x31c   : > { %v5682_v16 = vadd.f32 %v1463_v24, %v5468_v21  ;;  %v1368_v18 = vpop.f32.mrf.mxu1 }
 0x31d   : > { %9417 = vst [vmem:[#allocation229_spill] sm:$0xff] %v5679_v12  ;;  %v5686_v31 = vadd.f32 %v1368_v18, %v5443_v26  ;;  %v1515_v32 = vpop.f32.mrf.mxu0 }
 0x31e   : > { %9418 = vst [vmem:[#allocation230_spill] sm:$0xff] %v5682_v16  ;;  %v5690_v36 = vadd.f32 %v1515_v32, %v5446_v55 }
 0x31f   : > { %9419 = vst [vmem:[#allocation231_spill] sm:$0xff] %v5686_v31 }
 0x320   : > { %9420 = vst [vmem:[#allocation232_spill] sm:$0xff] %v5690_v36 }
 0x322   : > { %v1417_v62 = vpop.f32.mrf.mxu2 }
 0x323   : > { %v5695_v24 = vadd.f32 %v1417_v62, %v5464_v11  ;;  %v1466_v54 = vpop.f32.mrf.mxu3 }
 0x324   : > { %v5698_v5 = vadd.f32 %v1466_v54, %v5468_v21  ;;  %v1370_v18 = vpop.f32.mrf.mxu1 }
 0x325   : > { %9421 = vst [vmem:[#allocation233_spill] sm:$0xff] %v5695_v24  ;;  %v5702_v8 = vadd.f32 %v1370_v18, %v5443_v26  ;;  %v1517_v32 = vpop.f32.mrf.mxu0 }
 0x326   : > { %9422 = vst [vmem:[#allocation234_spill] sm:$0xff] %v5698_v5  ;;  %v5706_v40 = vadd.f32 %v1517_v32, %v5446_v55 }
 0x327   : > { %9423 = vst [vmem:[#allocation235_spill] sm:$0xff] %v5702_v8 }
 0x328   : > { %9424 = vst [vmem:[#allocation236_spill] sm:$0xff] %v5706_v40 }
 0x32a   : > { %v1419_v36 = vpop.f32.mrf.mxu2  ;;  %1779 = sbr.rel (%p3907_p8) target bundleno = 976 (0x3d0), region = 56 }
 0x32b   : > { %v5711_v54 = vadd.f32 %v1419_v36, %v5464_v11  ;;  %v1468_v31 = vpop.f32.mrf.mxu3 }
 0x32c   : > { %v5714_v12 = vadd.f32 %v1468_v31, %v5468_v21 }
 0x32d   : > { %9425 = vst [vmem:[#allocation237_spill] sm:$0xff] %v5711_v54 }
 0x32e   : > { %9426 = vst [vmem:[#allocation238_spill] sm:$0xff] %v5714_v12 }
 0x32f   : > { %v9427_v55 = vmax.f32 %v4384_v7, 0.0  ;;  %v9428_v32 = vmax.f32 %v4413_v20, 0.0  ;;  %v9429_v35 = vmax.f32 %v4406_v15, 0.0  ;;  %v9430_v11 = vmax.f32 %v4422_v28, 0.0 }
 0x330   : > { %v9431_v21 = vmax.f32 %v4409_v17, 0.0  ;;  %v9432_v31 = vmax.f32 %v4425_v30, 0.0  ;;  %v9433_v18 = vmax.f32 %v4387_v9, 0.0  ;;  %v9434_v16 = vmax.f32 %v4417_v23, 0.0 }
 0x331   : > { %v1782_v62 = vadd.f32 %v9428_v32, %v9427_v55  ;;  %v1803_v36 = vadd.f32 %v9430_v11, %v9429_v35  ;;  %v9435_v7 = vmax.f32 %v4763_v51, 0.0  ;;  %v9436_v20 = vmax.f32 %v4793_v39, 0.0 }
 0x332   : > { %v1824_v26 = vadd.f32 %v9432_v31, %v9431_v21  ;;  %v1845_v40 = vadd.f32 %v9434_v16, %v9433_v18  ;;  %v9437_v32 = vmax.f32 %v4786_v53, 0.0  ;;  %v9438_v28 = vmax.f32 %v4802_v4, 0.0 }
 0x333   : > { %v1866_v55 = vadd.f32 %v9436_v20, %v9435_v7  ;;  %v9439_v11 = vmax.f32 %v4789_v61, 0.0  ;;  %v9440_v30 = vmax.f32 %v4805_v13, 0.0  ;;  %v9441_v31 = vmax.f32 %v4767_v22, 0.0 }
 0x334   : > { %v1887_v35 = vadd.f32 %v9438_v28, %v9437_v32  ;;  %v9442_v23 = vmax.f32 %v4797_v2, 0.0  ;;  %v9443_v18 = vmax.f32 %v4429_v34, 0.0  ;;  %v9444_v7 = vmax.f32 %v4446_v42, 0.0 }
 0x335   : > { %v1908_v21 = vadd.f32 %v9440_v30, %v9439_v11  ;;  %v9445_v39 = vmax.f32 %v4449_v44, 0.0  ;;  %v9446_v28 = vmax.f32 %v4433_v37, 0.0  ;;  %v9447_v13 = vmax.f32 %v4809_v3, 0.0 }
 0x336   : > { %v1929_v16 = vadd.f32 %v9442_v23, %v9441_v31  ;;  %v1783_v51 = vadd.f32 %v1782_v62, %v9443_v18  ;;  %v1804_v20 = vadd.f32 %v1803_v36, %v9444_v7  ;;  %v9448_v11 = vmax.f32 %v4826_v25, 0.0 }
 0x337   : > { %v1825_v4 = vadd.f32 %v1824_v26, %v9445_v39  ;;  %v1846_v32 = vadd.f32 %v1845_v40, %v9446_v28  ;;  %v1867_v30 = vadd.f32 %v1866_v55, %v9447_v13  ;;  %v9449_v23 = vmax.f32 %v4829_v19, 0.0 }
 0x338   : > { %v1888_v22 = vadd.f32 %v1887_v35, %v9448_v11  ;;  %v9450_v62 = vmax.f32 %v4813_v33, 0.0  ;;  %v9451_v36 = vmax.f32 %v4453_v49, 0.0  ;;  %v9452_v39 = vmax.f32 %v4462_v57, 0.0 }
 0x339   : > { %v1909_v31 = vadd.f32 %v1908_v21, %v9449_v23  ;;  %v9453_v40 = vmax.f32 %v4465_v59, 0.0  ;;  %v9454_v13 = vmax.f32 %v4457_v52, 0.0  ;;  %v9455_v35 = vmax.f32 %v4833_v0, 0.0 }
 0x33a   : > { %v1930_v18 = vadd.f32 %v1929_v16, %v9450_v62  ;;  %v1784_v7 = vadd.f32 %v1783_v51, %v9451_v36  ;;  %v1805_v26 = vadd.f32 %v1804_v20, %v9452_v39  ;;  %v9456_v21 = vmax.f32 %v4842_v10, 0.0 }
 0x33b   : > { %v1826_v28 = vadd.f32 %v1825_v4, %v9453_v40  ;;  %v1847_v55 = vadd.f32 %v1846_v32, %v9454_v13  ;;  %v1868_v11 = vadd.f32 %v1867_v30, %v9455_v35  ;;  %v9457_v16 = vmax.f32 %v4845_v47, 0.0 }
 0x33c   : > { %v1889_v23 = vadd.f32 %v1888_v22, %v9456_v21  ;;  %v9458_v51 = vmax.f32 %v4837_v27, 0.0  ;;  %v9459_v20 = vmax.f32 %v4469_v63, 0.0  ;;  %v9460_v4 = vmax.f32 %v4498_v41, 0.0  ;;  %v9466_v63 = vld [vmem:[#allocation72_spill] sm:$0xff] }
 0x33d   : > { %v1910_v62 = vadd.f32 %v1909_v31, %v9457_v16  ;;  %v9461_v32 = vmax.f32 %v4501_v46, 0.0  ;;  %v9462_v30 = vmax.f32 %v4473_v6, 0.0  ;;  %v9463_v22 = vmax.f32 %v4849_v60, 0.0  ;;  %v9468_v41 = vld [vmem:[#allocation16_spill] sm:$0xff]  ;;  %v9470_v46 = vld [vmem:[#allocation18_spill] sm:$0xff]  ;;  %v9472_v6 = vld [vmem:[#allocation19_spill] sm:$0xff] }
 0x33e   : > { %v1931_v36 = vadd.f32 %v1930_v18, %v9458_v51  ;;  %v1785_v39 = vadd.f32 %v1784_v7, %v9459_v20  ;;  %v1806_v40 = vadd.f32 %v1805_v26, %v9460_v4  ;;  %v9464_v31 = vmax.f32 %v4878_v50, 0.0  ;;  %v9474_v60 = vld [vmem:[#allocation17_spill] sm:$0xff]  ;;  %v9476_v50 = vld [vmem:[#allocation75_spill] sm:$0xff] }
 0x33f   : > { %v1827_v13 = vadd.f32 %v1826_v28, %v9461_v32  ;;  %v1848_v35 = vadd.f32 %v1847_v55, %v9462_v30  ;;  %v1869_v21 = vadd.f32 %v1868_v11, %v9463_v22  ;;  %v9465_v18 = vmax.f32 %v4881_v29, 0.0  ;;  %v9478_v29 = vld [vmem:[#allocation77_spill] sm:$0xff] }
 0x340   : > { %v1890_v16 = vadd.f32 %v1889_v23, %v9464_v31  ;;  %v9467_v7 = vmax.f32 %v9466_v63, 0.0  ;;  %v9469_v26 = vmax.f32 %v9468_v41, 0.0  ;;  %v9471_v28 = vmax.f32 %v9470_v46, 0.0  ;;  %v9480_v63 = vld [vmem:[#allocation78_spill] sm:$0xff]  ;;  %v9482_v41 = vld [vmem:[#allocation76_spill] sm:$0xff] }
 0x341   : > { %v1911_v51 = vadd.f32 %v1910_v62, %v9465_v18  ;;  %v9473_v55 = vmax.f32 %v9472_v6, 0.0  ;;  %v9475_v11 = vmax.f32 %v9474_v60, 0.0  ;;  %v9477_v23 = vmax.f32 %v9476_v50, 0.0  ;;  %v9484_v46 = vld [vmem:[#allocation20_spill] sm:$0xff]  ;;  %v9486_v6 = vld [vmem:[#allocation22_spill] sm:$0xff]  ;;  %v9488_v60 = vld [vmem:[#allocation23_spill] sm:$0xff] }
 0x342   : > { %v1932_v20 = vadd.f32 %v1931_v36, %v9467_v7  ;;  %v1786_v4 = vadd.f32 %v1785_v39, %v9469_v26  ;;  %v1807_v32 = vadd.f32 %v1806_v40, %v9471_v28  ;;  %v9479_v62 = vmax.f32 %v9478_v29, 0.0  ;;  %v9490_v50 = vld [vmem:[#allocation21_spill] sm:$0xff]  ;;  %v9492_v29 = vld [vmem:[#allocation79_spill] sm:$0xff] }
 0x343   : > { %v1828_v30 = vadd.f32 %v1827_v13, %v9473_v55  ;;  %v1849_v22 = vadd.f32 %v1848_v35, %v9475_v11  ;;  %v1870_v31 = vadd.f32 %v1869_v21, %v9477_v23  ;;  %v9481_v36 = vmax.f32 %v9480_v63, 0.0  ;;  %v9494_v63 = vld [vmem:[#allocation81_spill] sm:$0xff] }
 0x344   : > { %v1891_v18 = vadd.f32 %v1890_v16, %v9479_v62  ;;  %v9483_v39 = vmax.f32 %v9482_v41, 0.0  ;;  %v9485_v40 = vmax.f32 %v9484_v46, 0.0  ;;  %v9487_v13 = vmax.f32 %v9486_v6, 0.0  ;;  %v9496_v41 = vld [vmem:[#allocation82_spill] sm:$0xff]  ;;  %v9498_v46 = vld [vmem:[#allocation80_spill] sm:$0xff] }
 0x345   : > { %v1912_v7 = vadd.f32 %v1911_v51, %v9481_v36  ;;  %v9489_v35 = vmax.f32 %v9488_v60, 0.0  ;;  %v9491_v21 = vmax.f32 %v9490_v50, 0.0  ;;  %v9493_v16 = vmax.f32 %v9492_v29, 0.0  ;;  %v9500_v6 = vld [vmem:[#allocation24_spill] sm:$0xff]  ;;  %v9502_v60 = vld [vmem:[#allocation26_spill] sm:$0xff]  ;;  %v9504_v50 = vld [vmem:[#allocation27_spill] sm:$0xff] }
 0x346   : > { %v1933_v26 = vadd.f32 %v1932_v20, %v9483_v39  ;;  %v1787_v28 = vadd.f32 %v1786_v4, %v9485_v40  ;;  %v1808_v55 = vadd.f32 %v1807_v32, %v9487_v13  ;;  %v9495_v51 = vmax.f32 %v9494_v63, 0.0  ;;  %v9506_v29 = vld [vmem:[#allocation25_spill] sm:$0xff]  ;;  %v9508_v63 = vld [vmem:[#allocation83_spill] sm:$0xff] }
 0x347   : > { %v1829_v11 = vadd.f32 %v1828_v30, %v9489_v35  ;;  %v1850_v23 = vadd.f32 %v1849_v22, %v9491_v21  ;;  %v1871_v62 = vadd.f32 %v1870_v31, %v9493_v16  ;;  %v9497_v20 = vmax.f32 %v9496_v41, 0.0  ;;  %v9510_v41 = vld [vmem:[#allocation85_spill] sm:$0xff] }
 0x348   : > { %v1892_v36 = vadd.f32 %v1891_v18, %v9495_v51  ;;  %v9499_v4 = vmax.f32 %v9498_v46, 0.0  ;;  %v9501_v32 = vmax.f32 %v9500_v6, 0.0  ;;  %v9503_v30 = vmax.f32 %v9502_v60, 0.0  ;;  %v9512_v46 = vld [vmem:[#allocation86_spill] sm:$0xff]  ;;  %v9514_v6 = vld [vmem:[#allocation84_spill] sm:$0xff] }
 0x349   : > { %v1913_v39 = vadd.f32 %v1912_v7, %v9497_v20  ;;  %v9505_v22 = vmax.f32 %v9504_v50, 0.0  ;;  %v9507_v31 = vmax.f32 %v9506_v29, 0.0  ;;  %v9509_v18 = vmax.f32 %v9508_v63, 0.0  ;;  %v9516_v60 = vld [vmem:[#allocation28_spill] sm:$0xff]  ;;  %v9518_v50 = vld [vmem:[#allocation30_spill] sm:$0xff]  ;;  %v9520_v29 = vld [vmem:[#allocation31_spill] sm:$0xff] }
 0x34a   : > { %v1934_v40 = vadd.f32 %v1933_v26, %v9499_v4  ;;  %v1788_v13 = vadd.f32 %v1787_v28, %v9501_v32  ;;  %v1809_v35 = vadd.f32 %v1808_v55, %v9503_v30  ;;  %v9511_v7 = vmax.f32 %v9510_v41, 0.0  ;;  %v9522_v63 = vld [vmem:[#allocation29_spill] sm:$0xff]  ;;  %v9524_v41 = vld [vmem:[#allocation87_spill] sm:$0xff] }
 0x34b   : > { %v1830_v21 = vadd.f32 %v1829_v11, %v9505_v22  ;;  %v1851_v16 = vadd.f32 %v1850_v23, %v9507_v31  ;;  %v1872_v51 = vadd.f32 %v1871_v62, %v9509_v18  ;;  %v9513_v26 = vmax.f32 %v9512_v46, 0.0  ;;  %v9526_v46 = vld [vmem:[#allocation89_spill] sm:$0xff] }
 0x34c   : > { %v1893_v20 = vadd.f32 %v1892_v36, %v9511_v7  ;;  %v9515_v28 = vmax.f32 %v9514_v6, 0.0  ;;  %v9517_v55 = vmax.f32 %v9516_v60, 0.0  ;;  %v9519_v11 = vmax.f32 %v9518_v50, 0.0  ;;  %v9528_v6 = vld [vmem:[#allocation90_spill] sm:$0xff]  ;;  %v9530_v60 = vld [vmem:[#allocation88_spill] sm:$0xff] }
 0x34d   : > { %v1914_v4 = vadd.f32 %v1913_v39, %v9513_v26  ;;  %v9521_v23 = vmax.f32 %v9520_v29, 0.0  ;;  %v9523_v62 = vmax.f32 %v9522_v63, 0.0  ;;  %v9525_v36 = vmax.f32 %v9524_v41, 0.0  ;;  %v9532_v50 = vld [vmem:[#allocation32_spill] sm:$0xff]  ;;  %v9534_v29 = vld [vmem:[#allocation34_spill] sm:$0xff]  ;;  %v9536_v63 = vld [vmem:[#allocation35_spill] sm:$0xff] }
 0x34e   : > { %v1935_v32 = vadd.f32 %v1934_v40, %v9515_v28  ;;  %v1789_v30 = vadd.f32 %v1788_v13, %v9517_v55  ;;  %v1810_v22 = vadd.f32 %v1809_v35, %v9519_v11  ;;  %v9527_v39 = vmax.f32 %v9526_v46, 0.0  ;;  %v9538_v41 = vld [vmem:[#allocation33_spill] sm:$0xff]  ;;  %v9540_v46 = vld [vmem:[#allocation91_spill] sm:$0xff] }
 0x34f   : > { %v1831_v31 = vadd.f32 %v1830_v21, %v9521_v23  ;;  %v1852_v18 = vadd.f32 %v1851_v16, %v9523_v62  ;;  %v1873_v7 = vadd.f32 %v1872_v51, %v9525_v36  ;;  %v9529_v40 = vmax.f32 %v9528_v6, 0.0  ;;  %v9542_v6 = vld [vmem:[#allocation93_spill] sm:$0xff] }
 0x350   : > { %v1894_v26 = vadd.f32 %v1893_v20, %v9527_v39  ;;  %v9531_v13 = vmax.f32 %v9530_v60, 0.0  ;;  %v9533_v35 = vmax.f32 %v9532_v50, 0.0  ;;  %v9535_v21 = vmax.f32 %v9534_v29, 0.0  ;;  %v9544_v60 = vld [vmem:[#allocation94_spill] sm:$0xff]  ;;  %v9546_v50 = vld [vmem:[#allocation92_spill] sm:$0xff] }
 0x351   : > { %v1915_v28 = vadd.f32 %v1914_v4, %v9529_v40  ;;  %v9537_v16 = vmax.f32 %v9536_v63, 0.0  ;;  %v9539_v51 = vmax.f32 %v9538_v41, 0.0  ;;  %v9541_v20 = vmax.f32 %v9540_v46, 0.0  ;;  %v9548_v29 = vld [vmem:[#allocation36_spill] sm:$0xff]  ;;  %v9550_v63 = vld [vmem:[#allocation38_spill] sm:$0xff]  ;;  %v9552_v41 = vld [vmem:[#allocation39_spill] sm:$0xff] }
 0x352   : > { %v1936_v55 = vadd.f32 %v1935_v32, %v9531_v13  ;;  %v1790_v11 = vadd.f32 %v1789_v30, %v9533_v35  ;;  %v1811_v23 = vadd.f32 %v1810_v22, %v9535_v21  ;;  %v9543_v4 = vmax.f32 %v9542_v6, 0.0  ;;  %v9554_v46 = vld [vmem:[#allocation37_spill] sm:$0xff]  ;;  %v9556_v6 = vld [vmem:[#allocation95_spill] sm:$0xff] }
 0x353   : > { %v1832_v62 = vadd.f32 %v1831_v31, %v9537_v16  ;;  %v1853_v36 = vadd.f32 %v1852_v18, %v9539_v51  ;;  %v1874_v39 = vadd.f32 %v1873_v7, %v9541_v20  ;;  %v9545_v32 = vmax.f32 %v9544_v60, 0.0  ;;  %v9558_v60 = vld [vmem:[#allocation97_spill] sm:$0xff] }
 0x354   : > { %v1895_v40 = vadd.f32 %v1894_v26, %v9543_v4  ;;  %v9547_v30 = vmax.f32 %v9546_v50, 0.0  ;;  %v9549_v22 = vmax.f32 %v9548_v29, 0.0  ;;  %v9551_v31 = vmax.f32 %v9550_v63, 0.0  ;;  %v9560_v50 = vld [vmem:[#allocation98_spill] sm:$0xff]  ;;  %v9562_v29 = vld [vmem:[#allocation96_spill] sm:$0xff] }
 0x355   : > { %v1916_v13 = vadd.f32 %v1915_v28, %v9545_v32  ;;  %v9553_v18 = vmax.f32 %v9552_v41, 0.0  ;;  %v9555_v7 = vmax.f32 %v9554_v46, 0.0  ;;  %v9557_v26 = vmax.f32 %v9556_v6, 0.0  ;;  %v9564_v63 = vld [vmem:[#allocation40_spill] sm:$0xff]  ;;  %v9566_v41 = vld [vmem:[#allocation42_spill] sm:$0xff]  ;;  %v9568_v46 = vld [vmem:[#allocation43_spill] sm:$0xff] }
 0x356   : > { %v1937_v35 = vadd.f32 %v1936_v55, %v9547_v30  ;;  %v1791_v21 = vadd.f32 %v1790_v11, %v9549_v22  ;;  %v1812_v16 = vadd.f32 %v1811_v23, %v9551_v31  ;;  %v9559_v28 = vmax.f32 %v9558_v60, 0.0  ;;  %v9570_v6 = vld [vmem:[#allocation41_spill] sm:$0xff]  ;;  %v9572_v60 = vld [vmem:[#allocation99_spill] sm:$0xff] }
 0x357   : > { %v1833_v51 = vadd.f32 %v1832_v62, %v9553_v18  ;;  %v1854_v20 = vadd.f32 %v1853_v36, %v9555_v7  ;;  %v1875_v4 = vadd.f32 %v1874_v39, %v9557_v26  ;;  %v9561_v55 = vmax.f32 %v9560_v50, 0.0  ;;  %v9574_v50 = vld [vmem:[#allocation101_spill] sm:$0xff] }
 0x358   : > { %v1896_v32 = vadd.f32 %v1895_v40, %v9559_v28  ;;  %v9563_v11 = vmax.f32 %v9562_v29, 0.0  ;;  %v9565_v23 = vmax.f32 %v9564_v63, 0.0  ;;  %v9567_v62 = vmax.f32 %v9566_v41, 0.0  ;;  %v9576_v29 = vld [vmem:[#allocation102_spill] sm:$0xff]  ;;  %v9578_v63 = vld [vmem:[#allocation100_spill] sm:$0xff] }
 0x359   : > { %v1917_v30 = vadd.f32 %v1916_v13, %v9561_v55  ;;  %v9569_v36 = vmax.f32 %v9568_v46, 0.0  ;;  %v9571_v39 = vmax.f32 %v9570_v6, 0.0  ;;  %v9573_v40 = vmax.f32 %v9572_v60, 0.0  ;;  %v9580_v41 = vld [vmem:[#allocation44_spill] sm:$0xff]  ;;  %v9582_v46 = vld [vmem:[#allocation46_spill] sm:$0xff]  ;;  %v9584_v6 = vld [vmem:[#allocation47_spill] sm:$0xff] }
 0x35a   : > { %v1938_v22 = vadd.f32 %v1937_v35, %v9563_v11  ;;  %v1792_v31 = vadd.f32 %v1791_v21, %v9565_v23  ;;  %v1813_v18 = vadd.f32 %v1812_v16, %v9567_v62  ;;  %v9575_v13 = vmax.f32 %v9574_v50, 0.0  ;;  %v9586_v60 = vld [vmem:[#allocation45_spill] sm:$0xff]  ;;  %v9588_v50 = vld [vmem:[#allocation103_spill] sm:$0xff] }
 0x35b   : > { %v1834_v7 = vadd.f32 %v1833_v51, %v9569_v36  ;;  %v1855_v26 = vadd.f32 %v1854_v20, %v9571_v39  ;;  %v1876_v28 = vadd.f32 %v1875_v4, %v9573_v40  ;;  %v9577_v35 = vmax.f32 %v9576_v29, 0.0  ;;  %v9590_v29 = vld [vmem:[#allocation105_spill] sm:$0xff] }
 0x35c   : > { %v1897_v55 = vadd.f32 %v1896_v32, %v9575_v13  ;;  %v9579_v21 = vmax.f32 %v9578_v63, 0.0  ;;  %v9581_v16 = vmax.f32 %v9580_v41, 0.0  ;;  %v9583_v51 = vmax.f32 %v9582_v46, 0.0  ;;  %v9592_v63 = vld [vmem:[#allocation106_spill] sm:$0xff]  ;;  %v9594_v41 = vld [vmem:[#allocation104_spill] sm:$0xff] }
 0x35d   : > { %v1918_v11 = vadd.f32 %v1917_v30, %v9577_v35  ;;  %v9585_v20 = vmax.f32 %v9584_v6, 0.0  ;;  %v9587_v4 = vmax.f32 %v9586_v60, 0.0  ;;  %v9589_v32 = vmax.f32 %v9588_v50, 0.0  ;;  %v9596_v46 = vld [vmem:[#allocation48_spill] sm:$0xff]  ;;  %v9598_v6 = vld [vmem:[#allocation50_spill] sm:$0xff]  ;;  %v9600_v60 = vld [vmem:[#allocation51_spill] sm:$0xff] }
 0x35e   : > { %v1939_v23 = vadd.f32 %v1938_v22, %v9579_v21  ;;  %v1793_v62 = vadd.f32 %v1792_v31, %v9581_v16  ;;  %v1814_v36 = vadd.f32 %v1813_v18, %v9583_v51  ;;  %v9591_v30 = vmax.f32 %v9590_v29, 0.0  ;;  %v9602_v50 = vld [vmem:[#allocation49_spill] sm:$0xff]  ;;  %v9604_v29 = vld [vmem:[#allocation107_spill] sm:$0xff] }
 0x35f   : > { %v1835_v39 = vadd.f32 %v1834_v7, %v9585_v20  ;;  %v1856_v40 = vadd.f32 %v1855_v26, %v9587_v4  ;;  %v1877_v13 = vadd.f32 %v1876_v28, %v9589_v32  ;;  %v9593_v22 = vmax.f32 %v9592_v63, 0.0  ;;  %v9606_v63 = vld [vmem:[#allocation109_spill] sm:$0xff] }
 0x360   : > { %v1898_v35 = vadd.f32 %v1897_v55, %v9591_v30  ;;  %v9595_v31 = vmax.f32 %v9594_v41, 0.0  ;;  %v9597_v18 = vmax.f32 %v9596_v46, 0.0  ;;  %v9599_v7 = vmax.f32 %v9598_v6, 0.0  ;;  %v9608_v41 = vld [vmem:[#allocation110_spill] sm:$0xff]  ;;  %v9610_v46 = vld [vmem:[#allocation108_spill] sm:$0xff] }
 0x361   : > { %v1919_v21 = vadd.f32 %v1918_v11, %v9593_v22  ;;  %v9601_v26 = vmax.f32 %v9600_v60, 0.0  ;;  %v9603_v28 = vmax.f32 %v9602_v50, 0.0  ;;  %v9605_v55 = vmax.f32 %v9604_v29, 0.0  ;;  %v9612_v6 = vld [vmem:[#allocation52_spill] sm:$0xff]  ;;  %v9614_v60 = vld [vmem:[#allocation54_spill] sm:$0xff]  ;;  %v9616_v50 = vld [vmem:[#allocation55_spill] sm:$0xff] }
 0x362   : > { %v1940_v16 = vadd.f32 %v1939_v23, %v9595_v31  ;;  %v1794_v51 = vadd.f32 %v1793_v62, %v9597_v18  ;;  %v1815_v20 = vadd.f32 %v1814_v36, %v9599_v7  ;;  %v9607_v11 = vmax.f32 %v9606_v63, 0.0  ;;  %v9618_v29 = vld [vmem:[#allocation53_spill] sm:$0xff]  ;;  %v9620_v63 = vld [vmem:[#allocation111_spill] sm:$0xff] }
 0x363   : > { %v1836_v4 = vadd.f32 %v1835_v39, %v9601_v26  ;;  %v1857_v32 = vadd.f32 %v1856_v40, %v9603_v28  ;;  %v1878_v30 = vadd.f32 %v1877_v13, %v9605_v55  ;;  %v9609_v23 = vmax.f32 %v9608_v41, 0.0  ;;  %v9622_v41 = vld [vmem:[#allocation113_spill] sm:$0xff] }
 0x364   : > { %v1899_v22 = vadd.f32 %v1898_v35, %v9607_v11  ;;  %v9611_v62 = vmax.f32 %v9610_v46, 0.0  ;;  %v9613_v36 = vmax.f32 %v9612_v6, 0.0  ;;  %v9615_v39 = vmax.f32 %v9614_v60, 0.0  ;;  %v9624_v46 = vld [vmem:[#allocation114_spill] sm:$0xff]  ;;  %v9626_v6 = vld [vmem:[#allocation112_spill] sm:$0xff] }
 0x365   : > { %v1920_v31 = vadd.f32 %v1919_v21, %v9609_v23  ;;  %v9617_v40 = vmax.f32 %v9616_v50, 0.0  ;;  %v9619_v13 = vmax.f32 %v9618_v29, 0.0  ;;  %v9621_v35 = vmax.f32 %v9620_v63, 0.0  ;;  %v9628_v60 = vld [vmem:[#allocation56_spill] sm:$0xff]  ;;  %v9630_v50 = vld [vmem:[#allocation58_spill] sm:$0xff]  ;;  %v9632_v29 = vld [vmem:[#allocation59_spill] sm:$0xff] }
 0x366   : > { %v1941_v18 = vadd.f32 %v1940_v16, %v9611_v62  ;;  %v1795_v7 = vadd.f32 %v1794_v51, %v9613_v36  ;;  %v1816_v26 = vadd.f32 %v1815_v20, %v9615_v39  ;;  %v9623_v21 = vmax.f32 %v9622_v41, 0.0  ;;  %v9634_v63 = vld [vmem:[#allocation57_spill] sm:$0xff]  ;;  %v9636_v41 = vld [vmem:[#allocation115_spill] sm:$0xff] }
 0x367   : > { %v1837_v28 = vadd.f32 %v1836_v4, %v9617_v40  ;;  %v1858_v55 = vadd.f32 %v1857_v32, %v9619_v13  ;;  %v1879_v11 = vadd.f32 %v1878_v30, %v9621_v35  ;;  %v9625_v16 = vmax.f32 %v9624_v46, 0.0  ;;  %v9638_v46 = vld [vmem:[#allocation117_spill] sm:$0xff] }
 0x368   : > { %v1900_v23 = vadd.f32 %v1899_v22, %v9623_v21  ;;  %v9627_v51 = vmax.f32 %v9626_v6, 0.0  ;;  %v9629_v20 = vmax.f32 %v9628_v60, 0.0  ;;  %v9631_v4 = vmax.f32 %v9630_v50, 0.0  ;;  %v9640_v6 = vld [vmem:[#allocation118_spill] sm:$0xff]  ;;  %v9642_v60 = vld [vmem:[#allocation116_spill] sm:$0xff] }
 0x369   : > { %v1921_v62 = vadd.f32 %v1920_v31, %v9625_v16  ;;  %v9633_v32 = vmax.f32 %v9632_v29, 0.0  ;;  %v9635_v30 = vmax.f32 %v9634_v63, 0.0  ;;  %v9637_v22 = vmax.f32 %v9636_v41, 0.0 }
 0x36a   : > { %v1942_v36 = vadd.f32 %v1941_v18, %v9627_v51  ;;  %v1796_v39 = vadd.f32 %v1795_v7, %v9629_v20  ;;  %v1817_v40 = vadd.f32 %v1816_v26, %v9631_v4  ;;  %v9639_v31 = vmax.f32 %v9638_v46, 0.0 }
 0x36b   : > { %v1838_v13 = vadd.f32 %v1837_v28, %v9633_v32  ;;  %v1859_v35 = vadd.f32 %v1858_v55, %v9635_v30  ;;  %v1880_v21 = vadd.f32 %v1879_v11, %v9637_v22  ;;  %v9641_v18 = vmax.f32 %v9640_v6, 0.0 }
 0x36c   : > { %v1901_v16 = vadd.f32 %v1900_v23, %v9639_v31  ;;  %v9643_v7 = vmax.f32 %v9642_v60, 0.0  ;;  %v1797_v50 = vrot.slane %v1796_v39, 4  ;;  %v1818_v26 = vrot.slane %v1817_v40, 4 }
 0x36d   : > { %v1922_v51 = vadd.f32 %v1921_v62, %v9641_v18  ;;  %v1839_v4 = vrot.slane %v1838_v13, 4  ;;  %v1860_v29 = vrot.slane %v1859_v35, 4  ;;  %v1881_v28 = vrot.slane %v1880_v21, 4 }
 0x36e   : > { %v1943_v20 = vadd.f32 %v1942_v36, %v9643_v7  ;;  %v1902_v32 = vrot.slane %v1901_v16, 4  ;;  %v1798_v30 = vadd.f32 %v1797_v50, %v1796_v39  ;;  %v1819_v41 = vadd.f32 %v1818_v26, %v1817_v40 }
 0x36f   : > { %v1923_v63 = vrot.slane %v1922_v51, 4  ;;  %v1840_v11 = vadd.f32 %v1839_v4, %v1838_v13  ;;  %v1861_v22 = vadd.f32 %v1860_v29, %v1859_v35  ;;  %v1882_v46 = vadd.f32 %v1881_v28, %v1880_v21 }
 0x370   : > { %v1944_v55 = vrot.slane %v1943_v20, 4  ;;  %v1903_v23 = vadd.f32 %v1902_v32, %v1901_v16  ;;  %v1799_v62 = vrot.slane %v1798_v30, 2  ;;  %v1820_v18 = vrot.slane %v1819_v41, 2 }
 0x371   : > { %v1924_v31 = vadd.f32 %v1923_v63, %v1922_v51  ;;  %v1841_v60 = vrot.slane %v1840_v11, 2  ;;  %v1862_v36 = vrot.slane %v1861_v22, 2  ;;  %v1883_v7 = vrot.slane %v1882_v46, 2 }
 0x372   : > { %v1945_v6 = vadd.f32 %v1944_v55, %v1943_v20  ;;  %v1904_v27 = vrot.slane %v1903_v23, 2  ;;  %v1800_v0 = vadd.f32 %v1799_v62, %v1798_v30  ;;  %v1821_v52 = vadd.f32 %v1820_v18, %v1819_v41  ;;  %v9644_v41 = vld [vmem:[#allocation119_spill] sm:$0xff]  ;;  %v9653_v62 = vld [vmem:[#allocation125_spill] sm:$0xff] }
 0x373   : > { %v1925_v47 = vrot.slane %v1924_v31, 2  ;;  %v1842_v59 = vadd.f32 %v1841_v60, %v1840_v11  ;;  %v1863_v57 = vadd.f32 %v1862_v36, %v1861_v22  ;;  %v1884_v39 = vadd.f32 %v1883_v7, %v1882_v46  ;;  %v9647_v46 = vld [vmem:[#allocation121_spill] sm:$0xff]  ;;  %v9655_v36 = vld [vmem:[#allocation120_spill] sm:$0xff] }
 0x374   : > { %v1946_v10 = vrot.slane %v1945_v6, 2  ;;  %v1905_v40 = vadd.f32 %v1904_v27, %v1903_v23  ;;  %v1801_v21 = vrot.slane %v1800_v0, 1  ;;  %v1822_v16 = vrot.slane %v1821_v52, 1  ;;  %v9649_v23 = vld [vmem:[#allocation124_spill] sm:$0xff] }
 0x375   : > { %v1926_v13 = vadd.f32 %v1925_v47, %v1924_v31  ;;  %v1843_v51 = vrot.slane %v1842_v59, 1  ;;  %v1864_v20 = vrot.slane %v1863_v57, 1  ;;  %v1885_v50 = vrot.slane %v1884_v39, 1 }
 0x376   : > { %v1947_v35 = vadd.f32 %v1946_v10, %v1945_v6  ;;  %v1906_v26 = vrot.slane %v1905_v40, 1  ;;  %v5975_v28 = vadd.f32 %v1801_v21, %v1800_v0  ;;  %v5977_v32 = vadd.f32 %v1822_v16, %v1821_v52 }
 0x377   : > { %v1927_v4 = vrot.slane %v1926_v13, 1  ;;  %v5979_v63 = vadd.f32 %v1843_v51, %v1842_v59  ;;  %v5981_v55 = vadd.f32 %v1864_v20, %v1863_v57  ;;  %v5983_v30 = vadd.f32 %v1885_v50, %v1884_v39  ;;  %v9651_v57 = vld [vmem:[#allocation122_spill] sm:$0xff]  ;;  %v9657_v39 = vld [vmem:[#allocation123_spill] sm:$0xff] }
 0x378   : > { %v1948_v29 = vrot.slane %v1947_v35, 1  ;;  %v5985_v47 = vadd.f32 %v1906_v26, %v1905_v40  ;;  %v9645_v11 = vmax.f32 %v9644_v41, 0.0  ;;  %v9646_v22 = vmax.f32 %v5154_v43, 0.0 }
 0x379   : > { %v5987_v27 = vadd.f32 %v1927_v4, %v1926_v13  ;;  %v9648_v52 = vmax.f32 %v9647_v46, 0.0  ;;  %v9650_v59 = vmax.f32 %v9649_v23, 0.0  ;;  %v9652_v6 = vmax.f32 %v9651_v57, 0.0  ;;  %v9670_v57 = vld [vmem:[#allocation128_spill] sm:$0xff] }
 0x37a   : > { %v5989_v10 = vadd.f32 %v1948_v29, %v1947_v35  ;;  %v1950_v0 = vadd.f32 %v9646_v22, %v9645_v11  ;;  %v9654_v18 = vmax.f32 %v9653_v62, 0.0  ;;  %v9656_v7 = vmax.f32 %v9655_v36, 0.0  ;;  %v9666_v11 = vld [vmem:[#allocation182_spill] sm:$0xff] }
 0x37b   : > { %v1971_v31 = vadd.f32 %v9650_v59, %v9648_v52  ;;  %v9658_v40 = vmax.f32 %v9657_v39, 0.0  ;;  %v9659_v35 = vmax.f32 %v5456_v1, 0.0  ;;  %v9660_v21 = vmax.f32 %v5478_v38, 0.0  ;;  %v9668_v52 = vld [vmem:[#allocation126_spill] sm:$0xff]  ;;  %v9674_v39 = vld [vmem:[#allocation127_spill] sm:$0xff] }
 0x37c   : > { %v1992_v60 = vadd.f32 %v9654_v18, %v9652_v6  ;;  %v9661_v51 = vmax.f32 %v5471_v48, 0.0  ;;  %v9662_v20 = vmax.f32 %v5487_v14, 0.0  ;;  %v9663_v26 = vmax.f32 %v5474_v58, 0.0  ;;  %v9672_v18 = vld [vmem:[#allocation129_spill] sm:$0xff] }
 0x37d   : > { %v2013_v13 = vadd.f32 %v9658_v40, %v9656_v7  ;;  %v2034_v16 = vadd.f32 %v9660_v21, %v9659_v35  ;;  %v9664_v4 = vmax.f32 %v5490_v45, 0.0  ;;  %v9665_v41 = vmax.f32 %v5460_v56, 0.0  ;;  %v9676_v21 = vld [vmem:[#allocation183_spill] sm:$0xff] }
 0x37e   : > { %v2055_v50 = vadd.f32 %v9662_v20, %v9661_v51  ;;  %v9667_v22 = vmax.f32 %v9666_v11, 0.0  ;;  %v9669_v23 = vmax.f32 %v9668_v52, 0.0  ;;  %v9671_v6 = vmax.f32 %v9670_v57, 0.0  ;;  %v9680_v11 = vld [vmem:[#allocation186_spill] sm:$0xff]  ;;  %v9682_v52 = vld [vmem:[#allocation184_spill] sm:$0xff] }
 0x37f   : > { %v2076_v29 = vadd.f32 %v9664_v4, %v9663_v26  ;;  %v9673_v36 = vmax.f32 %v9672_v18, 0.0  ;;  %v9675_v40 = vmax.f32 %v9674_v39, 0.0  ;;  %v9677_v51 = vmax.f32 %v9676_v21, 0.0  ;;  %v9678_v26 = vld [vmem:[#allocation185_spill] sm:$0xff]  ;;  %v9684_v57 = vld [vmem:[#allocation130_spill] sm:$0xff]  ;;  %v9686_v18 = vld [vmem:[#allocation132_spill] sm:$0xff] }
 0x380   : > { %v2097_v46 = vadd.f32 %v9667_v22, %v9665_v41  ;;  %v1951_v59 = vadd.f32 %v1950_v0, %v9669_v23  ;;  %v1972_v62 = vadd.f32 %v1971_v31, %v9671_v6  ;;  %v9679_v4 = vmax.f32 %v9678_v26, 0.0  ;;  %v9688_v39 = vld [vmem:[#allocation133_spill] sm:$0xff]  ;;  %v9690_v21 = vld [vmem:[#allocation131_spill] sm:$0xff] }
 0x381   : > { %v1993_v7 = vadd.f32 %v1992_v60, %v9673_v36  ;;  %v2014_v35 = vadd.f32 %v2013_v13, %v9675_v40  ;;  %v2035_v20 = vadd.f32 %v2034_v16, %v9677_v51  ;;  %v9681_v41 = vmax.f32 %v9680_v11, 0.0  ;;  %v9692_v26 = vld [vmem:[#allocation187_spill] sm:$0xff]  ;;  %v9694_v11 = vld [vmem:[#allocation189_spill] sm:$0xff] }
 0x382   : > { %v2056_v49 = vadd.f32 %v2055_v50, %v9679_v4  ;;  %v9683_v0 = vmax.f32 %v9682_v52, 0.0  ;;  %v9685_v31 = vmax.f32 %v9684_v57, 0.0  ;;  %v9687_v60 = vmax.f32 %v9686_v18, 0.0  ;;  %v9696_v52 = vld [vmem:[#allocation190_spill] sm:$0xff]  ;;  %v9698_v57 = vld [vmem:[#allocation188_spill] sm:$0xff] }
 0x383   : > { %v2077_v22 = vadd.f32 %v2076_v29, %v9681_v41  ;;  %v9689_v13 = vmax.f32 %v9688_v39, 0.0  ;;  %v9691_v16 = vmax.f32 %v9690_v21, 0.0  ;;  %v9693_v50 = vmax.f32 %v9692_v26, 0.0  ;;  %v9700_v18 = vld [vmem:[#allocation134_spill] sm:$0xff]  ;;  %v9702_v39 = vld [vmem:[#allocation136_spill] sm:$0xff]  ;;  %v9704_v21 = vld [vmem:[#allocation137_spill] sm:$0xff] }
 0x384   : > { %v2098_v23 = vadd.f32 %v2097_v46, %v9683_v0  ;;  %v1952_v6 = vadd.f32 %v1951_v59, %v9685_v31  ;;  %v1973_v36 = vadd.f32 %v1972_v62, %v9687_v60  ;;  %v9695_v29 = vmax.f32 %v9694_v11, 0.0  ;;  %v9706_v26 = vld [vmem:[#allocation135_spill] sm:$0xff] }
 0x385   : > { %v1994_v40 = vadd.f32 %v1993_v7, %v9689_v13  ;;  %v2015_v51 = vadd.f32 %v2014_v35, %v9691_v16  ;;  %v2036_v4 = vadd.f32 %v2035_v20, %v9693_v50  ;;  %v9697_v46 = vmax.f32 %v9696_v52, 0.0  ;;  %v9708_v11 = vld [vmem:[#allocation191_spill] sm:$0xff]  ;;  %v9710_v52 = vld [vmem:[#allocation193_spill] sm:$0xff] }
 0x386   : > { %v2057_v41 = vadd.f32 %v2056_v49, %v9695_v29  ;;  %v9699_v59 = vmax.f32 %v9698_v57, 0.0  ;;  %v9701_v62 = vmax.f32 %v9700_v18, 0.0  ;;  %v9703_v7 = vmax.f32 %v9702_v39, 0.0  ;;  %v9712_v57 = vld [vmem:[#allocation194_spill] sm:$0xff]  ;;  %v9714_v18 = vld [vmem:[#allocation192_spill] sm:$0xff] }
 0x387   : > { %v2078_v0 = vadd.f32 %v2077_v22, %v9697_v46  ;;  %v9705_v35 = vmax.f32 %v9704_v21, 0.0  ;;  %v9707_v20 = vmax.f32 %v9706_v26, 0.0  ;;  %v9709_v49 = vmax.f32 %v9708_v11, 0.0  ;;  %v9716_v39 = vld [vmem:[#allocation138_spill] sm:$0xff]  ;;  %v9718_v21 = vld [vmem:[#allocation140_spill] sm:$0xff]  ;;  %v9720_v26 = vld [vmem:[#allocation141_spill] sm:$0xff] }
 0x388   : > { %v2099_v31 = vadd.f32 %v2098_v23, %v9699_v59  ;;  %v1953_v60 = vadd.f32 %v1952_v6, %v9701_v62  ;;  %v1974_v13 = vadd.f32 %v1973_v36, %v9703_v7  ;;  %v9711_v22 = vmax.f32 %v9710_v52, 0.0  ;;  %v9722_v11 = vld [vmem:[#allocation139_spill] sm:$0xff] }
 0x389   : > { %v1995_v16 = vadd.f32 %v1994_v40, %v9705_v35  ;;  %v2016_v50 = vadd.f32 %v2015_v51, %v9707_v20  ;;  %v2037_v29 = vadd.f32 %v2036_v4, %v9709_v49  ;;  %v9713_v23 = vmax.f32 %v9712_v57, 0.0  ;;  %v9724_v52 = vld [vmem:[#allocation195_spill] sm:$0xff]  ;;  %v9726_v57 = vld [vmem:[#allocation197_spill] sm:$0xff] }
 0x38a   : > { %v2058_v46 = vadd.f32 %v2057_v41, %v9711_v22  ;;  %v9715_v6 = vmax.f32 %v9714_v18, 0.0  ;;  %v9717_v36 = vmax.f32 %v9716_v39, 0.0  ;;  %v9719_v40 = vmax.f32 %v9718_v21, 0.0  ;;  %v9728_v18 = vld [vmem:[#allocation198_spill] sm:$0xff]  ;;  %v9730_v39 = vld [vmem:[#allocation196_spill] sm:$0xff] }
 0x38b   : > { %v2079_v59 = vadd.f32 %v2078_v0, %v9713_v23  ;;  %v9721_v51 = vmax.f32 %v9720_v26, 0.0  ;;  %v9723_v4 = vmax.f32 %v9722_v11, 0.0  ;;  %v9725_v41 = vmax.f32 %v9724_v52, 0.0  ;;  %v9732_v21 = vld [vmem:[#allocation142_spill] sm:$0xff]  ;;  %v9734_v26 = vld [vmem:[#allocation144_spill] sm:$0xff]  ;;  %v9736_v11 = vld [vmem:[#allocation145_spill] sm:$0xff] }
 0x38c   : > { %v2100_v62 = vadd.f32 %v2099_v31, %v9715_v6  ;;  %v1954_v7 = vadd.f32 %v1953_v60, %v9717_v36  ;;  %v1975_v35 = vadd.f32 %v1974_v13, %v9719_v40  ;;  %v9727_v0 = vmax.f32 %v9726_v57, 0.0  ;;  %v9738_v52 = vld [vmem:[#allocation143_spill] sm:$0xff] }
 0x38d   : > { %v1996_v20 = vadd.f32 %v1995_v16, %v9721_v51  ;;  %v2017_v49 = vadd.f32 %v2016_v50, %v9723_v4  ;;  %v2038_v22 = vadd.f32 %v2037_v29, %v9725_v41  ;;  %v9729_v31 = vmax.f32 %v9728_v18, 0.0  ;;  %v9740_v57 = vld [vmem:[#allocation199_spill] sm:$0xff]  ;;  %v9742_v18 = vld [vmem:[#allocation201_spill] sm:$0xff] }
 0x38e   : > { %v2059_v23 = vadd.f32 %v2058_v46, %v9727_v0  ;;  %v9731_v60 = vmax.f32 %v9730_v39, 0.0  ;;  %v9733_v13 = vmax.f32 %v9732_v21, 0.0  ;;  %v9735_v16 = vmax.f32 %v9734_v26, 0.0  ;;  %v9744_v39 = vld [vmem:[#allocation202_spill] sm:$0xff]  ;;  %v9746_v21 = vld [vmem:[#allocation200_spill] sm:$0xff] }
 0x38f   : > { %v2080_v6 = vadd.f32 %v2079_v59, %v9729_v31  ;;  %v9737_v50 = vmax.f32 %v9736_v11, 0.0  ;;  %v9739_v29 = vmax.f32 %v9738_v52, 0.0  ;;  %v9741_v46 = vmax.f32 %v9740_v57, 0.0  ;;  %v9748_v26 = vld [vmem:[#allocation146_spill] sm:$0xff]  ;;  %v9750_v11 = vld [vmem:[#allocation148_spill] sm:$0xff]  ;;  %v9752_v52 = vld [vmem:[#allocation149_spill] sm:$0xff] }
 0x390   : > { %v2101_v36 = vadd.f32 %v2100_v62, %v9731_v60  ;;  %v1955_v40 = vadd.f32 %v1954_v7, %v9733_v13  ;;  %v1976_v51 = vadd.f32 %v1975_v35, %v9735_v16  ;;  %v9743_v59 = vmax.f32 %v9742_v18, 0.0  ;;  %v9754_v57 = vld [vmem:[#allocation147_spill] sm:$0xff] }
 0x391   : > { %v1997_v4 = vadd.f32 %v1996_v20, %v9737_v50  ;;  %v2018_v41 = vadd.f32 %v2017_v49, %v9739_v29  ;;  %v2039_v0 = vadd.f32 %v2038_v22, %v9741_v46  ;;  %v9745_v62 = vmax.f32 %v9744_v39, 0.0  ;;  %v9756_v18 = vld [vmem:[#allocation203_spill] sm:$0xff]  ;;  %v9758_v39 = vld [vmem:[#allocation205_spill] sm:$0xff] }
 0x392   : > { %v2060_v31 = vadd.f32 %v2059_v23, %v9743_v59  ;;  %v9747_v7 = vmax.f32 %v9746_v21, 0.0  ;;  %v9749_v35 = vmax.f32 %v9748_v26, 0.0  ;;  %v9751_v20 = vmax.f32 %v9750_v11, 0.0  ;;  %v9760_v21 = vld [vmem:[#allocation206_spill] sm:$0xff]  ;;  %v9762_v26 = vld [vmem:[#allocation204_spill] sm:$0xff] }
 0x393   : > { %v2081_v60 = vadd.f32 %v2080_v6, %v9745_v62  ;;  %v9753_v49 = vmax.f32 %v9752_v52, 0.0  ;;  %v9755_v22 = vmax.f32 %v9754_v57, 0.0  ;;  %v9757_v23 = vmax.f32 %v9756_v18, 0.0  ;;  %v9764_v11 = vld [vmem:[#allocation150_spill] sm:$0xff]  ;;  %v9766_v52 = vld [vmem:[#allocation152_spill] sm:$0xff]  ;;  %v9768_v57 = vld [vmem:[#allocation153_spill] sm:$0xff] }
 0x394   : > { %v2102_v13 = vadd.f32 %v2101_v36, %v9747_v7  ;;  %v1956_v16 = vadd.f32 %v1955_v40, %v9749_v35  ;;  %v1977_v50 = vadd.f32 %v1976_v51, %v9751_v20  ;;  %v9759_v6 = vmax.f32 %v9758_v39, 0.0  ;;  %v9770_v18 = vld [vmem:[#allocation151_spill] sm:$0xff] }
 0x395   : > { %v1998_v29 = vadd.f32 %v1997_v4, %v9753_v49  ;;  %v2019_v46 = vadd.f32 %v2018_v41, %v9755_v22  ;;  %v2040_v59 = vadd.f32 %v2039_v0, %v9757_v23  ;;  %v9761_v36 = vmax.f32 %v9760_v21, 0.0  ;;  %v9772_v39 = vld [vmem:[#allocation207_spill] sm:$0xff]  ;;  %v9774_v21 = vld [vmem:[#allocation209_spill] sm:$0xff] }
 0x396   : > { %v2061_v62 = vadd.f32 %v2060_v31, %v9759_v6  ;;  %v9763_v40 = vmax.f32 %v9762_v26, 0.0  ;;  %v9765_v51 = vmax.f32 %v9764_v11, 0.0  ;;  %v9767_v4 = vmax.f32 %v9766_v52, 0.0  ;;  %v9776_v26 = vld [vmem:[#allocation210_spill] sm:$0xff]  ;;  %v9778_v11 = vld [vmem:[#allocation208_spill] sm:$0xff] }
 0x397   : > { %v2082_v7 = vadd.f32 %v2081_v60, %v9761_v36  ;;  %v9769_v41 = vmax.f32 %v9768_v57, 0.0  ;;  %v9771_v0 = vmax.f32 %v9770_v18, 0.0  ;;  %v9773_v31 = vmax.f32 %v9772_v39, 0.0  ;;  %v9780_v52 = vld [vmem:[#allocation154_spill] sm:$0xff]  ;;  %v9782_v57 = vld [vmem:[#allocation156_spill] sm:$0xff]  ;;  %v9784_v18 = vld [vmem:[#allocation157_spill] sm:$0xff] }
 0x398   : > { %v2103_v35 = vadd.f32 %v2102_v13, %v9763_v40  ;;  %v1957_v20 = vadd.f32 %v1956_v16, %v9765_v51  ;;  %v1978_v49 = vadd.f32 %v1977_v50, %v9767_v4  ;;  %v9775_v60 = vmax.f32 %v9774_v21, 0.0  ;;  %v9786_v39 = vld [vmem:[#allocation155_spill] sm:$0xff] }
 0x399   : > { %v1999_v22 = vadd.f32 %v1998_v29, %v9769_v41  ;;  %v2020_v23 = vadd.f32 %v2019_v46, %v9771_v0  ;;  %v2041_v6 = vadd.f32 %v2040_v59, %v9773_v31  ;;  %v9777_v13 = vmax.f32 %v9776_v26, 0.0  ;;  %v9788_v21 = vld [vmem:[#allocation211_spill] sm:$0xff]  ;;  %v9790_v26 = vld [vmem:[#allocation213_spill] sm:$0xff] }
 0x39a   : > { %v2062_v36 = vadd.f32 %v2061_v62, %v9775_v60  ;;  %v9779_v16 = vmax.f32 %v9778_v11, 0.0  ;;  %v9781_v50 = vmax.f32 %v9780_v52, 0.0  ;;  %v9783_v29 = vmax.f32 %v9782_v57, 0.0  ;;  %v9792_v11 = vld [vmem:[#allocation214_spill] sm:$0xff]  ;;  %v9794_v52 = vld [vmem:[#allocation212_spill] sm:$0xff] }
 0x39b   : > { %v2083_v40 = vadd.f32 %v2082_v7, %v9777_v13  ;;  %v9785_v46 = vmax.f32 %v9784_v18, 0.0  ;;  %v9787_v59 = vmax.f32 %v9786_v39, 0.0  ;;  %v9789_v62 = vmax.f32 %v9788_v21, 0.0  ;;  %v9796_v57 = vld [vmem:[#allocation158_spill] sm:$0xff]  ;;  %v9798_v18 = vld [vmem:[#allocation160_spill] sm:$0xff]  ;;  %v9800_v39 = vld [vmem:[#allocation161_spill] sm:$0xff] }
 0x39c   : > { %v2104_v51 = vadd.f32 %v2103_v35, %v9779_v16  ;;  %v1958_v4 = vadd.f32 %v1957_v20, %v9781_v50  ;;  %v1979_v41 = vadd.f32 %v1978_v49, %v9783_v29  ;;  %v9791_v7 = vmax.f32 %v9790_v26, 0.0  ;;  %v9802_v21 = vld [vmem:[#allocation159_spill] sm:$0xff] }
 0x39d   : > { %v2000_v0 = vadd.f32 %v1999_v22, %v9785_v46  ;;  %v2021_v31 = vadd.f32 %v2020_v23, %v9787_v59  ;;  %v2042_v60 = vadd.f32 %v2041_v6, %v9789_v62  ;;  %v9793_v35 = vmax.f32 %v9792_v11, 0.0  ;;  %v9804_v26 = vld [vmem:[#allocation215_spill] sm:$0xff]  ;;  %v9806_v11 = vld [vmem:[#allocation217_spill] sm:$0xff] }
 0x39e   : > { %v2063_v13 = vadd.f32 %v2062_v36, %v9791_v7  ;;  %v9795_v20 = vmax.f32 %v9794_v52, 0.0  ;;  %v9797_v49 = vmax.f32 %v9796_v57, 0.0  ;;  %v9799_v22 = vmax.f32 %v9798_v18, 0.0  ;;  %v9808_v52 = vld [vmem:[#allocation218_spill] sm:$0xff]  ;;  %v9810_v57 = vld [vmem:[#allocation216_spill] sm:$0xff] }
 0x39f   : > { %v2084_v16 = vadd.f32 %v2083_v40, %v9793_v35  ;;  %v9801_v23 = vmax.f32 %v9800_v39, 0.0  ;;  %v9803_v6 = vmax.f32 %v9802_v21, 0.0  ;;  %v9805_v36 = vmax.f32 %v9804_v26, 0.0  ;;  %v9812_v18 = vld [vmem:[#allocation162_spill] sm:$0xff]  ;;  %v9814_v39 = vld [vmem:[#allocation164_spill] sm:$0xff]  ;;  %v9816_v21 = vld [vmem:[#allocation165_spill] sm:$0xff] }
 0x3a0   : > { %v2105_v50 = vadd.f32 %v2104_v51, %v9795_v20  ;;  %v1959_v29 = vadd.f32 %v1958_v4, %v9797_v49  ;;  %v1980_v46 = vadd.f32 %v1979_v41, %v9799_v22  ;;  %v9807_v40 = vmax.f32 %v9806_v11, 0.0  ;;  %v9818_v26 = vld [vmem:[#allocation163_spill] sm:$0xff] }
 0x3a1   : > { %v2001_v59 = vadd.f32 %v2000_v0, %v9801_v23  ;;  %v2022_v62 = vadd.f32 %v2021_v31, %v9803_v6  ;;  %v2043_v7 = vadd.f32 %v2042_v60, %v9805_v36  ;;  %v9809_v51 = vmax.f32 %v9808_v52, 0.0  ;;  %v9820_v11 = vld [vmem:[#allocation219_spill] sm:$0xff]  ;;  %v9822_v52 = vld [vmem:[#allocation221_spill] sm:$0xff] }
 0x3a2   : > { %v2064_v35 = vadd.f32 %v2063_v13, %v9807_v40  ;;  %v9811_v4 = vmax.f32 %v9810_v57, 0.0  ;;  %v9813_v41 = vmax.f32 %v9812_v18, 0.0  ;;  %v9815_v0 = vmax.f32 %v9814_v39, 0.0  ;;  %v9824_v57 = vld [vmem:[#allocation222_spill] sm:$0xff]  ;;  %v9826_v18 = vld [vmem:[#allocation220_spill] sm:$0xff] }
 0x3a3   : > { %v2085_v20 = vadd.f32 %v2084_v16, %v9809_v51  ;;  %v9817_v31 = vmax.f32 %v9816_v21, 0.0  ;;  %v9819_v60 = vmax.f32 %v9818_v26, 0.0  ;;  %v9821_v13 = vmax.f32 %v9820_v11, 0.0  ;;  %v9828_v39 = vld [vmem:[#allocation166_spill] sm:$0xff]  ;;  %v9830_v21 = vld [vmem:[#allocation168_spill] sm:$0xff]  ;;  %v9832_v26 = vld [vmem:[#allocation169_spill] sm:$0xff] }
 0x3a4   : > { %v2106_v49 = vadd.f32 %v2105_v50, %v9811_v4  ;;  %v1960_v22 = vadd.f32 %v1959_v29, %v9813_v41  ;;  %v1981_v23 = vadd.f32 %v1980_v46, %v9815_v0  ;;  %v9823_v16 = vmax.f32 %v9822_v52, 0.0  ;;  %v9834_v11 = vld [vmem:[#allocation167_spill] sm:$0xff] }
 0x3a5   : > { %v2002_v6 = vadd.f32 %v2001_v59, %v9817_v31  ;;  %v2023_v36 = vadd.f32 %v2022_v62, %v9819_v60  ;;  %v2044_v40 = vadd.f32 %v2043_v7, %v9821_v13  ;;  %v9825_v50 = vmax.f32 %v9824_v57, 0.0  ;;  %v9836_v52 = vld [vmem:[#allocation223_spill] sm:$0xff]  ;;  %v9838_v57 = vld [vmem:[#allocation225_spill] sm:$0xff] }
 0x3a6   : > { %v2065_v51 = vadd.f32 %v2064_v35, %v9823_v16  ;;  %v9827_v29 = vmax.f32 %v9826_v18, 0.0  ;;  %v9829_v46 = vmax.f32 %v9828_v39, 0.0  ;;  %v9831_v59 = vmax.f32 %v9830_v21, 0.0  ;;  %v9840_v18 = vld [vmem:[#allocation226_spill] sm:$0xff]  ;;  %v9842_v39 = vld [vmem:[#allocation224_spill] sm:$0xff] }
 0x3a7   : > { %v2086_v4 = vadd.f32 %v2085_v20, %v9825_v50  ;;  %v9833_v62 = vmax.f32 %v9832_v26, 0.0  ;;  %v9835_v7 = vmax.f32 %v9834_v11, 0.0  ;;  %v9837_v35 = vmax.f32 %v9836_v52, 0.0  ;;  %v9844_v21 = vld [vmem:[#allocation170_spill] sm:$0xff]  ;;  %v9846_v26 = vld [vmem:[#allocation172_spill] sm:$0xff]  ;;  %v9848_v11 = vld [vmem:[#allocation173_spill] sm:$0xff] }
 0x3a8   : > { %v2107_v41 = vadd.f32 %v2106_v49, %v9827_v29  ;;  %v1961_v0 = vadd.f32 %v1960_v22, %v9829_v46  ;;  %v1982_v31 = vadd.f32 %v1981_v23, %v9831_v59  ;;  %v9839_v20 = vmax.f32 %v9838_v57, 0.0  ;;  %v9850_v52 = vld [vmem:[#allocation171_spill] sm:$0xff] }
 0x3a9   : > { %v2003_v60 = vadd.f32 %v2002_v6, %v9833_v62  ;;  %v2024_v13 = vadd.f32 %v2023_v36, %v9835_v7  ;;  %v2045_v16 = vadd.f32 %v2044_v40, %v9837_v35  ;;  %v9841_v49 = vmax.f32 %v9840_v18, 0.0  ;;  %v9852_v57 = vld [vmem:[#allocation227_spill] sm:$0xff]  ;;  %v9854_v18 = vld [vmem:[#allocation229_spill] sm:$0xff] }
 0x3aa   : > { %v2066_v50 = vadd.f32 %v2065_v51, %v9839_v20  ;;  %v9843_v22 = vmax.f32 %v9842_v39, 0.0  ;;  %v9845_v23 = vmax.f32 %v9844_v21, 0.0  ;;  %v9847_v6 = vmax.f32 %v9846_v26, 0.0  ;;  %v9856_v39 = vld [vmem:[#allocation230_spill] sm:$0xff]  ;;  %v9858_v21 = vld [vmem:[#allocation228_spill] sm:$0xff] }
 0x3ab   : > { %v2087_v29 = vadd.f32 %v2086_v4, %v9841_v49  ;;  %v9849_v36 = vmax.f32 %v9848_v11, 0.0  ;;  %v9851_v40 = vmax.f32 %v9850_v52, 0.0  ;;  %v9853_v51 = vmax.f32 %v9852_v57, 0.0  ;;  %v9860_v26 = vld [vmem:[#allocation174_spill] sm:$0xff]  ;;  %v9862_v11 = vld [vmem:[#allocation176_spill] sm:$0xff]  ;;  %v9864_v52 = vld [vmem:[#allocation177_spill] sm:$0xff] }
 0x3ac   : > { %v2108_v46 = vadd.f32 %v2107_v41, %v9843_v22  ;;  %v1962_v59 = vadd.f32 %v1961_v0, %v9845_v23  ;;  %v1983_v62 = vadd.f32 %v1982_v31, %v9847_v6  ;;  %v9855_v4 = vmax.f32 %v9854_v18, 0.0  ;;  %v9866_v57 = vld [vmem:[#allocation175_spill] sm:$0xff] }
 0x3ad   : > { %v2004_v7 = vadd.f32 %v2003_v60, %v9849_v36  ;;  %v2025_v35 = vadd.f32 %v2024_v13, %v9851_v40  ;;  %v2046_v20 = vadd.f32 %v2045_v16, %v9853_v51  ;;  %v9857_v41 = vmax.f32 %v9856_v39, 0.0  ;;  %v9868_v18 = vld [vmem:[#allocation231_spill] sm:$0xff] }
 0x3ae   : > { %v2067_v49 = vadd.f32 %v2066_v50, %v9855_v4  ;;  %v9859_v0 = vmax.f32 %v9858_v21, 0.0  ;;  %v9861_v31 = vmax.f32 %v9860_v26, 0.0  ;;  %v9863_v60 = vmax.f32 %v9862_v11, 0.0  ;;  %v9872_v21 = vld [vmem:[#allocation232_spill] sm:$0xff]  ;;  %v9874_v26 = vld [vmem:[#allocation178_spill] sm:$0xff] }
 0x3af   : > { %v2088_v22 = vadd.f32 %v2087_v29, %v9857_v41  ;;  %v9865_v13 = vmax.f32 %v9864_v52, 0.0  ;;  %v9867_v16 = vmax.f32 %v9866_v57, 0.0  ;;  %v9869_v50 = vmax.f32 %v9868_v18, 0.0  ;;  %v9876_v11 = vld [vmem:[#allocation180_spill] sm:$0xff]  ;;  %v9878_v52 = vld [vmem:[#allocation181_spill] sm:$0xff]  ;;  %v9880_v57 = vld [vmem:[#allocation179_spill] sm:$0xff] }
 0x3b0   : > { %v2109_v23 = vadd.f32 %v2108_v46, %v9859_v0  ;;  %v1963_v6 = vadd.f32 %v1962_v59, %v9861_v31  ;;  %v1984_v36 = vadd.f32 %v1983_v62, %v9863_v60  ;;  %v9870_v29 = vmax.f32 %v5695_v24, 0.0 }
 0x3b1   : > { %v2005_v40 = vadd.f32 %v2004_v7, %v9865_v13  ;;  %v2026_v51 = vadd.f32 %v2025_v35, %v9867_v16  ;;  %v2047_v4 = vadd.f32 %v2046_v20, %v9869_v50  ;;  %v9871_v46 = vmax.f32 %v5698_v5, 0.0 }
 0x3b2   : > { %v2068_v39 = vadd.f32 %v2067_v49, %v9870_v29  ;;  %v9873_v59 = vmax.f32 %v9872_v21, 0.0  ;;  %v9875_v62 = vmax.f32 %v9874_v26, 0.0  ;;  %v9877_v7 = vmax.f32 %v9876_v11, 0.0 }
 0x3b3   : > { %v2089_v41 = vadd.f32 %v2088_v22, %v9871_v46  ;;  %v9879_v35 = vmax.f32 %v9878_v52, 0.0  ;;  %v9881_v20 = vmax.f32 %v9880_v57, 0.0  ;;  %v9882_v49 = vmax.f32 %v5702_v8, 0.0  ;;  %v9885_v46 = vld [vmem:[#allocation236_spill] sm:$0xff] }
 0x3b4   : > { %v2110_v0 = vadd.f32 %v2109_v23, %v9873_v59  ;;  %v1964_v31 = vadd.f32 %v1963_v6, %v9875_v62  ;;  %v1985_v60 = vadd.f32 %v1984_v36, %v9877_v7  ;;  %v9883_v22 = vmax.f32 %v5711_v54, 0.0 }
 0x3b5   : > { %v2006_v13 = vadd.f32 %v2005_v40, %v9879_v35  ;;  %v2027_v16 = vadd.f32 %v2026_v51, %v9881_v20  ;;  %v2048_v18 = vadd.f32 %v2047_v4, %v9882_v49  ;;  %v9884_v23 = vmax.f32 %v5714_v12, 0.0 }
 0x3b6   : > { %v2069_v50 = vadd.f32 %v2068_v39, %v9883_v22  ;;  %v9886_v6 = vmax.f32 %v9885_v46, 0.0  ;;  %v1965_v59 = vrot.slane %v1964_v31, 4  ;;  %v1986_v36 = vrot.slane %v1985_v60, 4 }
 0x3b7   : > { %v2090_v29 = vadd.f32 %v2089_v41, %v9884_v23  ;;  %v2007_v26 = vrot.slane %v2006_v13, 4  ;;  %v2028_v62 = vrot.slane %v2027_v16, 4  ;;  %v2049_v40 = vrot.slane %v2048_v18, 4 }
 0x3b8   : > { %v2111_v21 = vadd.f32 %v2110_v0, %v9886_v6  ;;  %v2070_v11 = vrot.slane %v2069_v50, 4  ;;  %v1966_v52 = vadd.f32 %v1965_v59, %v1964_v31  ;;  %v1987_v35 = vadd.f32 %v1986_v36, %v1985_v60 }
 0x3b9   : > { %v2091_v7 = vrot.slane %v2090_v29, 4  ;;  %v2008_v4 = vadd.f32 %v2007_v26, %v2006_v13  ;;  %v2029_v57 = vadd.f32 %v2028_v62, %v2027_v16  ;;  %v2050_v20 = vadd.f32 %v2049_v40, %v2048_v18 }
 0x3ba   : > { %v2112_v51 = vrot.slane %v2111_v21, 4  ;;  %v2071_v39 = vadd.f32 %v2070_v11, %v2069_v50  ;;  %v1967_v41 = vrot.slane %v1966_v52, 2  ;;  %v1988_v23 = vrot.slane %v1987_v35, 2 }
 0x3bb   : > { %v2092_v49 = vadd.f32 %v2091_v7, %v2090_v29  ;;  %v2009_v46 = vrot.slane %v2008_v4, 2  ;;  %v2030_v0 = vrot.slane %v2029_v57, 2  ;;  %v2051_v6 = vrot.slane %v2050_v20, 2 }
 0x3bc   : > { %v2113_v22 = vadd.f32 %v2112_v51, %v2111_v21  ;;  %v2072_v12 = vrot.slane %v2071_v39, 2  ;;  %v1968_v5 = vadd.f32 %v1967_v41, %v1966_v52  ;;  %v1989_v24 = vadd.f32 %v1988_v23, %v1987_v35 }
 0x3bd   : > { %v2093_v54 = vrot.slane %v2092_v49, 2  ;;  %v2010_v33 = vadd.f32 %v2009_v46, %v2008_v4  ;;  %v2031_v19 = vadd.f32 %v2030_v0, %v2029_v57  ;;  %v2052_v31 = vadd.f32 %v2051_v6, %v2050_v20  ;;  %v1781_v6 = vld [vmem:[#allocation2 + $0x8] sm:$0xff] }
 0x3be   : > { %v2114_v8 = vrot.slane %v2113_v22, 2  ;;  %v2073_v60 = vadd.f32 %v2072_v12, %v2071_v39  ;;  %v1969_v18 = vrot.slane %v1968_v5, 1  ;;  %v1990_v50 = vrot.slane %v1989_v24, 1 }
 0x3bf   : > { %v2094_v13 = vadd.f32 %v2093_v54, %v2092_v49  ;;  %v2011_v29 = vrot.slane %v2010_v33, 1  ;;  %v2032_v21 = vrot.slane %v2031_v19, 1  ;;  %v2053_v59 = vrot.slane %v2052_v31, 1 }
 0x3c0   : > { %v2115_v16 = vadd.f32 %v2114_v8, %v2113_v22  ;;  %v2074_v36 = vrot.slane %v2073_v60, 1  ;;  %v1970_v40 = vadd.f32 %v1969_v18, %v1968_v5  ;;  %v1991_v11 = vadd.f32 %v1990_v50, %v1989_v24 }
 0x3c1   : > { %v2095_v26 = vrot.slane %v2094_v13, 1  ;;  %v2012_v7 = vadd.f32 %v2011_v29, %v2010_v33  ;;  %v2033_v51 = vadd.f32 %v2032_v21, %v2031_v19  ;;  %v2054_v52 = vadd.f32 %v2053_v59, %v2052_v31 }
 0x3c2   : > { %v2116_v62 = vrot.slane %v2115_v16, 1  ;;  %v2075_v35 = vadd.f32 %v2074_v36, %v2073_v60  ;;  %v2134_v12 = vrot.slane %v5977_v32, 7  ;;  %v2135_v8 = vrot.slane %v5979_v63, 6 }
 0x3c3   : > { %v2096_v4 = vadd.f32 %v2095_v26, %v2094_v13  ;;  %v2136_v54 = vrot.slane %v5981_v55, 5  ;;  %v2137_v20 = vrot.slane %v5983_v30, 4  ;;  %v2138_v39 = vrot.slane %v5985_v47, 3  ;;  %v1780_v47 = vld [vmem:[#allocation2] sm:$0xff] }
 0x3c4   : > { %v2117_v57 = vadd.f32 %v2116_v62, %v2115_v16  ;;  %v2139_v49 = vrot.slane %v5987_v27, 2  ;;  %v2140_v5 = vrot.slane %v5989_v10, 1  ;;  %v2141_v33 = vrot.slane %v1991_v11, 7 }
 0x3c5   : > { %v2142_v19 = vrot.slane %v2012_v7, 6  ;;  %v2143_v24 = vrot.slane %v2033_v51, 5  ;;  %v2144_v22 = vrot.slane %v2054_v52, 4  ;;  %v2145_v41 = vrot.slane %v2075_v35, 3 }
 0x3c6   : > { %v2146_v23 = vrot.slane %v2096_v4, 2  ;;  %v2147_v46 = vrot.slane %v2117_v57, 1  ;;  %vm2148_vm1 = vcmask 1040384   ;;  %vm2150_vm2 = vcmask 1042434  }
 0x3c7   : > { %v2149_v32 = vsel %vm2148_vm1, %v5975_v28, %v2134_v12  ;;  %v2151_v63 = vsel %vm2150_vm2, %v2135_v8, %v2136_v54  ;;  %vm2152_vm3 = vcmask 1041408   ;;  %vm2154_vm4 = vcmask 1044484  }
 0x3c8   : > { %v2153_v55 = vsel %vm2152_vm3, %v2149_v32, %v2151_v63  ;;  %v2155_v30 = vsel %vm2154_vm4, %v2137_v20, %v2138_v39  ;;  %vm2156_vm5 = vcmask 1046534   ;;  %vm2158_vm6 = vcmask 1045508  }
 0x3c9   : > { %v2157_v27 = vsel %vm2156_vm5, %v2139_v49, %v2140_v5  ;;  %vm2160_vm7 = vcmask 1043456   ;;  %v2162_v10 = vsel %vm2148_vm1, %v1970_v40, %v2141_v33  ;;  %v2163_v0 = vsel %vm2150_vm2, %v2142_v19, %v2143_v24 }
 0x3ca   : > { %v2159_v31 = vsel %vm2158_vm6, %v2155_v30, %v2157_v27  ;;  %v2164_v60 = vsel %vm2152_vm3, %v2162_v10, %v2163_v0  ;;  %v2165_v13 = vsel %vm2154_vm4, %v2144_v22, %v2145_v41  ;;  %v2166_v16 = vsel %vm2156_vm5, %v2146_v23, %v2147_v46 }
 0x3cb   : > { %v2161_v18 = vsel %vm2160_vm7, %v2153_v55, %v2159_v31  ;;  %v2167_v50 = vsel %vm2158_vm6, %v2165_v13, %v2166_v16 }
 0x3cc   : > { %v2168_v28 = vsel %vm2160_vm7, %v2164_v60, %v2167_v50  ;;  %v2171_v29 = vadd.f32 %v2161_v18, %v1780_v47 }
 0x3cd   : > { %v2172_v21 = vadd.f32 %v2168_v28, %v1781_v6 }
 0x3ce   : > { %2173 = vst [vmem:[#allocation2] sm:$0xff] %v2171_v29 }
 0x3cf   : > { %2174 = vst [vmem:[#allocation2 + $0x8] sm:$0xff] %v2172_v21 }
 0x3d0 PF: > { %p3908_p9 = scmp.ne.s32.totalorder %s4024_s24, 1 }
 0x3d2   : > { %2178 = sbr.rel (%p3908_p9) target bundleno = 1519 (0x5ef), region = 60 }
 0x3d7   : > { %v2932_v59 = vld [vmem:[%s8952_s5 + $0x78] sm:$0xff]  ;;  %v2931_v26 = vld [vmem:[%s8952_s5 + $0x70] sm:$0xff]  ;;  %v2930_v7 = vld [vmem:[%s8952_s5 + $0x68] sm:$0xff]  ;;  %v2180_v54 = vlaneseq  ;;  %s3909_s9 = sshll.u32 %s4024_s24, 7 }
 0x3d8   : > { %v2964_v36 = vld [vmem:[%s8952_s5 + $0x178] sm:$0xff]  ;;  %3208 = vmatpush.msra.mxu0 %v2932_v59  ;;  %v2963_v40 = vld [vmem:[%s8952_s5 + $0x170] sm:$0xff]  ;;  %v2962_v52 = vld [vmem:[%s8952_s5 + $0x168] sm:$0xff]  ;;  %v6347_v0 = vstv %s3909_s9 }
 0x3d9   : > { %3248 = vmatpush.msra.mxu2 %v2964_v36  ;;  %v2948_v62 = vld [vmem:[%s8952_s5 + $0xf8] sm:$0xff]  ;;  %v2947_v51 = vld [vmem:[%s8952_s5 + $0xf0] sm:$0xff]  ;;  %v2946_v4 = vld [vmem:[%s8952_s5 + $0xe8] sm:$0xff]  ;;  %v2181_v41 = vshrl.u32 %v2180_v54, 7 }
 0x3da   : > { %v2980_v11 = vld [vmem:[%s8952_s5 + $0x1f8] sm:$0xff]  ;;  %3228 = vmatpush.msra.mxu1 %v2948_v62  ;;  %3209 = vmatpush.msra.mxu0 %v2931_v26  ;;  %v2979_v35 = vld [vmem:[%s8952_s5 + $0x1f0] sm:$0xff]  ;;  %v2929_v57 = vld [vmem:[%s8952_s5 + $0x60] sm:$0xff] }
 0x3db   : > { %3268 = vmatpush.msra.mxu3 %v2980_v11  ;;  %3249 = vmatpush.msra.mxu2 %v2963_v40  ;;  %v2961_v12 = vld [vmem:[%s8952_s5 + $0x160] sm:$0xff]  ;;  %v2978_v8 = vld [vmem:[%s8952_s5 + $0x1e8] sm:$0xff]  ;;  %v2928_v49 = vld [vmem:[%s8952_s5 + $0x58] sm:$0xff]  ;;  %v2182_v10 = vadd.s32 8, %v2181_v41  ;;  %v2183_v60 = vadd.s32 16, %v2181_v41  ;;  %v2184_v18 = vadd.s32 24, %v2181_v41  ;;  %v6368_v62 = vadd.s32 %v6347_v0, %v2181_v41 }
 0x3dc   : > { %3229 = vmatpush.msra.mxu1 %v2947_v51  ;;  %3210 = vmatpush.msra.mxu0 %v2930_v7  ;;  %v2945_v20 = vld [vmem:[%s8952_s5 + $0xe0] sm:$0xff]  ;;  %v2960_v5 = vld [vmem:[%s8952_s5 + $0x158] sm:$0xff]  ;;  %v2927_v24 = vld [vmem:[%s8952_s5 + $0x50] sm:$0xff]  ;;  %v2185_v50 = vadd.s32 32, %v2181_v41  ;;  %v2186_v28 = vadd.s32 40, %v2181_v41  ;;  %v2187_v59 = vadd.s32 48, %v2181_v41 }
 0x3dd   : > { %3269 = vmatpush.msra.mxu3 %v2979_v35  ;;  %3250 = vmatpush.msra.mxu2 %v2962_v52  ;;  %v2977_v39 = vld [vmem:[%s8952_s5 + $0x1e0] sm:$0xff]  ;;  %v2944_v33 = vld [vmem:[%s8952_s5 + $0xd8] sm:$0xff]  ;;  %v2959_v22 = vld [vmem:[%s8952_s5 + $0x150] sm:$0xff]  ;;  %v2188_v36 = vadd.s32 56, %v2181_v41  ;;  %v2189_v26 = vadd.s32 64, %v2181_v41  ;;  %v2190_v7 = vadd.s32 72, %v2181_v41  ;;  %v6377_v35 = vadd.s32 %v6347_v0, %v2182_v10 }
 0x3de   : > { %3230 = vmatpush.msra.mxu1 %v2946_v4  ;;  %3211 = vmatpush.msra.mxu0 %v2929_v57  ;;  %v2976_v19 = vld [vmem:[%s8952_s5 + $0x1d8] sm:$0xff]  ;;  %v2943_v23 = vld [vmem:[%s8952_s5 + $0xd0] sm:$0xff]  ;;  %v2926_v32 = vld [vmem:[%s8952_s5 + $0x48] sm:$0xff]  ;;  %v2191_v51 = vadd.s32 80, %v2181_v41  ;;  %v2192_v52 = vadd.s32 88, %v2181_v41  ;;  %v2195_v54 = vadd.s32 112, %v2181_v41 }
 0x3df   : > { %3270 = vmatpush.msra.mxu3 %v2978_v8  ;;  %3251 = vmatpush.msra.mxu2 %v2961_v12  ;;  %v2975_v46 = vld [vmem:[%s8952_s5 + $0x1d0] sm:$0xff]  ;;  %v2958_v63 = vld [vmem:[%s8952_s5 + $0x148] sm:$0xff]  ;;  %v2925_v47 = vld [vmem:[%s8952_s5 + $0x40] sm:$0xff]  ;;  %v2193_v12 = vadd.s32 96, %v2181_v41  ;;  %v2194_v8 = vadd.s32 104, %v2181_v41  ;;  %vm2216_vm8 = vcmp.lt.s32.totalorder %v6368_v62, 225 }
 0x3e0   : > { %3231 = vmatpush.msra.mxu1 %v2945_v20  ;;  %3212 = vmatpush.msra.mxu0 %v2928_v49  ;;  %v2942_v55 = vld [vmem:[%s8952_s5 + $0xc8] sm:$0xff]  ;;  %v2957_v27 = vld [vmem:[%s8952_s5 + $0x140] sm:$0xff]  ;;  %v2924_v13 = vld [vmem:[%s8952_s5 + $0x38] sm:$0xff]  ;;  %v6386_v20 = vadd.s32 %v6347_v0, %v2183_v60  ;;  %vm2217_vm9 = vcmp.lt.s32.totalorder %v6377_v35, 225  ;;  %v9955_v35 = vmax.f32 %v4449_v44, 0.0 }
 0x3e1   : > { %3271 = vmatpush.msra.mxu3 %v2977_v39  ;;  %3252 = vmatpush.msra.mxu2 %v2960_v5  ;;  %v2974_v30 = vld [vmem:[%s8952_s5 + $0x1c8] sm:$0xff]  ;;  %v2941_v6 = vld [vmem:[%s8952_s5 + $0xc0] sm:$0xff]  ;;  %v2956_v16 = vld [vmem:[%s8952_s5 + $0x138] sm:$0xff]  ;;  %v2196_v5 = vadd.s32 120, %v2181_v41  ;;  %v6410_v41 = vadd.s32 %v6347_v0, %v2187_v59  ;;  %v6445_v60 = vadd.s32 %v6347_v0, %v2194_v8  ;;  %v9889_v59 = vmax.f32 %v4406_v15, 0.0 }
 0x3e2   : > { %3232 = vmatpush.msra.mxu1 %v2944_v33  ;;  %3213 = vmatpush.msra.mxu0 %v2927_v24  ;;  %v2973_v31 = vld [vmem:[%s8952_s5 + $0x1c0] sm:$0xff]  ;;  %v2940_v29 = vld [vmem:[%s8952_s5 + $0xb8] sm:$0xff]  ;;  %v2923_v40 = vld [vmem:[%s8952_s5 + $0x30] sm:$0xff]  ;;  %v6395_v33 = vadd.s32 %v6347_v0, %v2184_v18  ;;  %v6401_v24 = vadd.s32 %v6347_v0, %v2186_v28  ;;  %vm2218_vm10 = vcmp.lt.s32.totalorder %v6386_v20, 225 }
 0x3e3   : > { %3272 = vmatpush.msra.mxu3 %v2976_v19  ;;  %3253 = vmatpush.msra.mxu2 %v2959_v22  ;;  %v2972_v21 = vld [vmem:[%s8952_s5 + $0x1b8] sm:$0xff]  ;;  %v2955_v11 = vld [vmem:[%s8952_s5 + $0x130] sm:$0xff]  ;;  %v2922_v39 = vld [vmem:[%s8952_s5 + $0x28] sm:$0xff]  ;;  %v6398_v19 = vadd.s32 %v6347_v0, %v2185_v50  ;;  %v6458_v50 = vadd.s32 %v6347_v0, %v2196_v5  ;;  %vm2222_vm14 = vcmp.lt.s32.totalorder %v6410_v41, 225  ;;  %vm2229_vm5 = vcmp.lt.s32.totalorder %v6445_v60, 225 }
 0x3e4   : > { %3233 = vmatpush.msra.mxu1 %v2943_v23  ;;  %3214 = vmatpush.msra.mxu0 %v2926_v32  ;;  %v2939_v4 = vld [vmem:[%s8952_s5 + $0xb0] sm:$0xff]  ;;  %v2954_v49 = vld [vmem:[%s8952_s5 + $0x128] sm:$0xff]  ;;  %v6416_v32 = vadd.s32 %v6347_v0, %v2189_v26  ;;  %v2937_v10 = vld [vmem:[%s8952_s5 + $0xa0] sm:$0xff]  ;;  %v9890_v26 = vmax.f32 %v4409_v17, 0.0  ;;  %vm2219_vm11 = vcmp.lt.s32.totalorder %v6395_v33, 225  ;;  %vm2221_vm13 = vcmp.lt.s32.totalorder %v6401_v24, 225 }
 0x3e5   : > { %3273 = vmatpush.msra.mxu3 %v2975_v46  ;;  %3254 = vmatpush.msra.mxu2 %v2958_v63  ;;  %v2971_v57 = vld [vmem:[%s8952_s5 + $0x1b0] sm:$0xff]  ;;  %v2938_v22 = vld [vmem:[%s8952_s5 + $0xa8] sm:$0xff]  ;;  %v6413_v46 = vadd.s32 %v6347_v0, %v2188_v36  ;;  %v2921_v63 = vld [vmem:[%s8952_s5 + $0x20] sm:$0xff]  ;;  %v6468_v36 = vsel %vm2216_vm8, %v9889_v59, 0.0  ;;  %vm2220_vm12 = vcmp.lt.s32.totalorder %v6398_v19, 225  ;;  %vm2231_vm7 = vcmp.lt.s32.totalorder %v6458_v50, 225 }
 0x3e6   : > { %3234 = vmatpush.msra.mxu1 %v2942_v55  ;;  %3215 = vmatpush.msra.mxu0 %v2925_v47  ;;  %v2970_v23 = vld [vmem:[%s8952_s5 + $0x1a8] sm:$0xff]  ;;  %v2953_v55 = vld [vmem:[%s8952_s5 + $0x120] sm:$0xff]  ;;  %v6429_v47 = vadd.s32 %v6347_v0, %v2191_v51  ;;  %v2952_v18 = vld [vmem:[%s8952_s5 + $0x118] sm:$0xff]  ;;  %vm2224_vm0 = vcmp.lt.s32.totalorder %v6416_v32, 225 }
 0x3e7   : > { %3274 = vmatpush.msra.mxu3 %v2974_v30  ;;  %3255 = vmatpush.msra.mxu2 %v2957_v27  ;;  %v6426_v30 = vadd.s32 %v6347_v0, %v2190_v7  ;;  %v6432_v27 = vadd.s32 %v6347_v0, %v2192_v52  ;;  %v9887_v28 = vld [vmem:[#allocation3_spill] sm:$0xff]  ;;  %v2968_v15 = vld [vmem:[%s8952_s5 + $0x198] sm:$0xff]  ;;  %v2966_v62 = vld [vmem:[%s8952_s5 + $0x188] sm:$0xff]  ;;  %vm2223_vm15 = vcmp.lt.s32.totalorder %v6413_v46, 225 }
 0x3e8   : > { %3235 = vmatpush.msra.mxu1 %v2941_v6  ;;  %3216 = vmatpush.msra.mxu0 %v2924_v13  ;;  %v2969_v6 = vld [vmem:[%s8952_s5 + $0x1a0] sm:$0xff]  ;;  %v6448_v13 = vadd.s32 %v6347_v0, %v2195_v54  ;;  %v9892_v17 = vld [vmem:[#allocation60_spill] sm:$0xff]  ;;  %v2919_v8 = vld [vmem:[%s8952_s5 + $0x10] sm:$0xff]  ;;  %vm2226_vm2 = vcmp.lt.s32.totalorder %v6429_v47, 225 }
 0x3e9   : > { %3275 = vmatpush.msra.mxu3 %v2973_v31  ;;  %3256 = vmatpush.msra.mxu2 %v2956_v16  ;;  %v6442_v31 = vadd.s32 %v6347_v0, %v2193_v12  ;;  %v2920_v16 = vld [vmem:[%s8952_s5 + $0x18] sm:$0xff]  ;;  %v9893_v51 = vmax.f32 %v9892_v17, 0.0  ;;  %v9895_v12 = vmax.f32 %v4789_v61, 0.0  ;;  %v9896_v54 = vld [vmem:[#allocation61_spill] sm:$0xff]  ;;  %v2967_v59 = vld [vmem:[%s8952_s5 + $0x190] sm:$0xff]  ;;  %vm2225_vm1 = vcmp.lt.s32.totalorder %v6426_v30, 225 }
 0x3ea   : > { %3236 = vmatpush.msra.mxu1 %v2940_v29  ;;  %3217 = vmatpush.msra.mxu0 %v2923_v40  ;;  %v9888_v29 = vmax.f32 %v9887_v28, 0.0  ;;  %v6474_v40 = vsel %vm2216_vm8, %v9890_v26, 0.0  ;;  %v2936_v0 = vld [vmem:[%s8952_s5 + $0x98] sm:$0xff]  ;;  %v3023_v33 = vld [vmem:[%s8952_s5 + $0x350] sm:$0xff]  ;;  %v3021_v19 = vld [vmem:[%s8952_s5 + $0x340] sm:$0xff]  ;;  %vm2227_vm3 = vcmp.lt.s32.totalorder %v6432_v27, 225 }
 0x3eb   : > { %3276 = vmatpush.msra.mxu3 %v2972_v21  ;;  %3257 = vmatpush.msra.mxu2 %v2955_v11  ;;  %v9891_v11 = vmax.f32 %v4387_v9, 0.0  ;;  %v6492_v52 = vsel %vm2216_vm8, %v9893_v51, 0.0  ;;  %v6504_v9 = vsel %vm2216_vm8, %v9895_v12, 0.0  ;;  %v9907_v26 = vld [vmem:[#allocation120_spill] sm:$0xff]  ;;  %v9910_v51 = vmax.f32 %v5456_v1, 0.0  ;;  %v2918_v1 = vld [vmem:[%s8952_s5 + $0x8] sm:$0xff] }
 0x3ec   : > { %3237 = vmatpush.msra.mxu1 %v2939_v4  ;;  %3218 = vmatpush.msra.mxu0 %v2922_v39  ;;  %v2264_v21 = vsel %vm2216_vm8, %v9888_v29, 0.0  ;;  %v9894_v4 = vmax.f32 %v4786_v53, 0.0  ;;  %v2951_v53 = vld [vmem:[%s8952_s5 + $0x110] sm:$0xff]  ;;  %v9897_v39 = vmax.f32 %v9896_v54, 0.0  ;;  %v9914_v12 = vld [vmem:[#allocation4_spill] sm:$0xff]  ;;  %v3017_v41 = vld [vmem:[%s8952_s5 + $0x320] sm:$0xff] }
 0x3ed   : > { %3277 = vmatpush.msra.mxu3 %v2971_v57  ;;  %3258 = vmatpush.msra.mxu2 %v2954_v49  ;;  %v6486_v7 = vsel %vm2216_vm8, %v9891_v11, 0.0  ;;  %v9898_v49 = vld [vmem:[#allocation119_spill] sm:$0xff]  ;;  %v9908_v11 = vmax.f32 %v9907_v26, 0.0  ;;  %v9915_v54 = vmax.f32 %v9914_v12, 0.0  ;;  %v9926_v12 = vld [vmem:[#allocation62_spill] sm:$0xff]  ;;  %v3013_v32 = vld [vmem:[%s8952_s5 + $0x300] sm:$0xff] }
 0x3ee   : > { %3238 = vmatpush.msra.mxu1 %v2938_v22  ;;  %3219 = vmatpush.msra.mxu0 %v2921_v63  ;;  %v6498_v57 = vsel %vm2216_vm8, %v9894_v4, 0.0  ;;  %v6517_v61 = vsel %vm2216_vm8, %v9897_v39, 0.0  ;;  %v9899_v5 = vmax.f32 %v9898_v49, 0.0  ;;  %v2935_v29 = vld [vmem:[%s8952_s5 + $0x90] sm:$0xff]  ;;  %v2950_v49 = vld [vmem:[%s8952_s5 + $0x108] sm:$0xff]  ;;  %vm2228_vm4 = vcmp.lt.s32.totalorder %v6442_v31, 225 }
 0x3ef   : > { %3278 = vmatpush.msra.mxu3 %v2970_v23  ;;  %3259 = vmatpush.msra.mxu2 %v2953_v55  ;;  %v9901_v23 = vld [vmem:[#allocation121_spill] sm:$0xff]  ;;  %v6547_v17 = vsel %vm2216_vm8, %v9908_v11, 0.0  ;;  %v2280_v39 = vsel %vm2217_vm9, %v9915_v54, 0.0  ;;  %v9927_v54 = vmax.f32 %v9926_v12, 0.0  ;;  %v3019_v24 = vld [vmem:[%s8952_s5 + $0x330] sm:$0xff]  ;;  %vm2230_vm6 = vcmp.lt.s32.totalorder %v6448_v13, 225 }
 0x3f0   : > { %3239 = vmatpush.msra.mxu1 %v2937_v10  ;;  %v6523_v22 = vsel %vm2216_vm8, %v9899_v5, 0.0  ;;  %v9902_v63 = vmax.f32 %v9901_v23, 0.0  ;;  %v9904_v10 = vld [vmem:[#allocation122_spill] sm:$0xff]  ;;  %3220 = vmatpush.msra.mxu0 %v2920_v16  ;;  %9909 = vst [vmem:[#allocation242_spill] sm:$0xff] %v6547_v17  ;;  %v6553_v16 = vsel %vm2216_vm8, %v9910_v51, 0.0  ;;  %v9918_v23 = vmax.f32 %v5460_v56, 0.0 }
 0x3f1   : > { %3279 = vmatpush.msra.mxu3 %v2969_v6  ;;  %9900 = vst [vmem:[#allocation239_spill] sm:$0xff] %v6523_v22  ;;  %v9905_v6 = vmax.f32 %v9904_v10, 0.0  ;;  %3260 = vmatpush.msra.mxu2 %v2952_v18  ;;  %v9912_v18 = vmax.f32 %v5471_v48, 0.0  ;;  %v9916_v48 = vmax.f32 %v5474_v58, 0.0  ;;  %v2934_v56 = vld [vmem:[%s8952_s5 + $0x88] sm:$0xff]  ;;  %v9924_v11 = vld [vmem:[#allocation5_spill] sm:$0xff] }
 0x3f2   : > { %v6529_v55 = vsel %vm2216_vm8, %v9902_v63, 0.0  ;;  %9911 = vst [vmem:[#allocation243_spill] sm:$0xff] %v6553_v16  ;;  %3240 = vmatpush.msra.mxu1 %v2936_v0  ;;  %v6581_v0 = vsel %vm2216_vm8, %v9918_v23, 0.0  ;;  %3221 = vmatpush.msra.mxu0 %v2919_v8  ;;  %v9925_v51 = vmax.f32 %v9924_v11, 0.0  ;;  %v6611_v8 = vsel %vm2217_vm9, %v9927_v54, 0.0  ;;  %v2949_v11 = vld [vmem:[%s8952_s5 + $0x100] sm:$0xff] }
 0x3f3   : > { %9903 = vst [vmem:[#allocation240_spill] sm:$0xff] %v6529_v55  ;;  %v6535_v28 = vsel %vm2216_vm8, %v9905_v6, 0.0  ;;  %v6559_v4 = vsel %vm2216_vm8, %v9912_v18, 0.0  ;;  %3280 = vmatpush.msra.mxu3 %v2968_v15  ;;  %v6575_v5 = vsel %vm2216_vm8, %v9916_v48, 0.0  ;;  %v9920_v15 = vld [vmem:[#allocation6_spill] sm:$0xff]  ;;  %v9922_v6 = vld [vmem:[#allocation7_spill] sm:$0xff]  ;;  %3261 = vmatpush.msra.mxu2 %v2951_v53 }
 0x3f4   : > { %9906 = vst [vmem:[#allocation241_spill] sm:$0xff] %v6535_v28  ;;  %v9921_v63 = vmax.f32 %v9920_v15, 0.0  ;;  %v9923_v26 = vmax.f32 %v9922_v6, 0.0  ;;  %v6605_v18 = vsel %vm2217_vm9, %v9925_v51, 0.0  ;;  %v9928_v53 = vld [vmem:[#allocation63_spill] sm:$0xff]  ;;  %v9930_v15 = vld [vmem:[#allocation64_spill] sm:$0xff]  ;;  %3241 = vmatpush.msra.mxu1 %v2935_v29  ;;  %3222 = vmatpush.msra.mxu0 %v2918_v1 }
 0x3f5   : > { %9913 = vst [vmem:[#allocation244_spill] sm:$0xff] %v6559_v4  ;;  %v9929_v48 = vmax.f32 %v9928_v53, 0.0  ;;  %3281 = vmatpush.msra.mxu3 %v2967_v59  ;;  %v9932_v51 = vmax.f32 %v4797_v2, 0.0  ;;  %v9933_v54 = vmax.f32 %v5154_v43, 0.0  ;;  %v9935_v59 = vld [vmem:[#allocation124_spill] sm:$0xff]  ;;  %3262 = vmatpush.msra.mxu2 %v2950_v49  ;;  %v9946_v49 = vmax.f32 %v4429_v34, 0.0 }
 0x3f6   : > { %9917 = vst [vmem:[#allocation245_spill] sm:$0xff] %v6575_v5  ;;  %v6587_v10 = vsel %vm2217_vm9, %v9921_v63, 0.0  ;;  %v6593_v58 = vsel %vm2217_vm9, %v9923_v26, 0.0  ;;  %v9931_v63 = vmax.f32 %v9930_v15, 0.0  ;;  %v2917_v26 = vld [vmem:[%s8952_s5] sm:$0xff]  ;;  %v9936_v53 = vmax.f32 %v9935_v59, 0.0  ;;  %3242 = vmatpush.msra.mxu1 %v2934_v56 }
 0x3f7   : > { %9919 = vst [vmem:[#allocation246_spill] sm:$0xff] %v6581_v0  ;;  %v6617_v23 = vsel %vm2217_vm9, %v9929_v48, 0.0  ;;  %v6636_v12 = vsel %vm2217_vm9, %v9932_v51, 0.0  ;;  %v6642_v29 = vsel %vm2217_vm9, %v9933_v54, 0.0  ;;  %v2520_v15 = vadd.f32 %v2280_v39, %v2264_v21  ;;  %v2996_v2 = vld [vmem:[%s8952_s5 + $0x278] sm:$0xff]  ;;  %v9941_v59 = vld [vmem:[#allocation123_spill] sm:$0xff]  ;;  %3282 = vmatpush.msra.mxu3 %v2966_v62  ;;  %3223 = vmatpush.msra.mxu0 %v2917_v26 }
 0x3f8   : > { %v6623_v6 = vsel %vm2217_vm9, %v9931_v63, 0.0  ;;  %9934 = vst [vmem:[#allocation247_spill] sm:$0xff] %v6642_v29  ;;  %v6648_v48 = vsel %vm2217_vm9, %v9936_v53, 0.0  ;;  %v3028_v43 = vld [vmem:[%s8952_s5 + $0x378] sm:$0xff]  ;;  %v9938_v63 = vld [vmem:[#allocation125_spill] sm:$0xff]  ;;  %v9942_v53 = vmax.f32 %v9941_v59, 0.0  ;;  %3263 = vmatpush.msra.mxu2 %v2949_v11  ;;  %v2625_v50 = vadd.f32 %v6617_v23, %v6498_v57 }
 0x3f9   : > { %9937 = vst [vmem:[#allocation248_spill] sm:$0xff] %v6648_v48  ;;  %v9939_v51 = vmax.f32 %v9938_v63, 0.0  ;;  %v9944_v39 = vmax.f32 %v5478_v38, 0.0  ;;  %v2296_v63 = vsel %vm2218_vm10, %v9946_v49, 0.0  ;;  %v2965_v59 = vld [vmem:[%s8952_s5 + $0x180] sm:$0xff]  ;;  %v9947_v38 = vmax.f32 %v5487_v14, 0.0  ;;  %3288 = vmatpush.msrb.mxu0 %v2996_v2 }
 0x3fa   : > { %v6666_v21 = vsel %vm2217_vm9, %v9942_v53, 0.0  ;;  %v9949_v34 = vmax.f32 %v5490_v45, 0.0  ;;  %v9951_v62 = vld [vmem:[#allocation182_spill] sm:$0xff]  ;;  %v9954_v0 = vmax.f32 %v4446_v42, 0.0  ;;  %v2995_v45 = vld [vmem:[%s8952_s5 + $0x270] sm:$0xff]  ;;  %v9956_v42 = vmax.f32 %v4433_v37, 0.0  ;;  %3328 = vmatpush.msrb.mxu2 %v3028_v43  ;;  %3283 = vmatpush.msra.mxu3 %v2965_v59 }
 0x3fb   : > { %v6660_v54 = vsel %vm2217_vm9, %v9939_v51, 0.0  ;;  %9943 = vst [vmem:[#allocation250_spill] sm:$0xff] %v6666_v21  ;;  %v6672_v1 = vsel %vm2217_vm9, %v9944_v39, 0.0  ;;  %v2933_v51 = vld [vmem:[%s8952_s5 + $0x80] sm:$0xff]  ;;  %v6688_v53 = vsel %vm2217_vm9, %v9947_v38, 0.0  ;;  %v9952_v39 = vmax.f32 %v9951_v62, 0.0  ;;  %3289 = vmatpush.msrb.mxu0 %v2995_v45 }
 0x3fc   : > { %9940 = vst [vmem:[#allocation249_spill] sm:$0xff] %v6660_v54  ;;  %v6694_v56 = vsel %vm2217_vm9, %v9949_v34, 0.0  ;;  %v6706_v14 = vsel %vm2218_vm10, %v9954_v0, 0.0  ;;  %v3012_v38 = vld [vmem:[%s8952_s5 + $0x2f8] sm:$0xff]  ;;  %v6718_v34 = vsel %vm2218_vm10, %v9955_v35, 0.0  ;;  %v6724_v0 = vsel %vm2218_vm10, %v9956_v42, 0.0  ;;  %3243 = vmatpush.msra.mxu1 %v2933_v51 }
 0x3fd   : > { %9945 = vst [vmem:[#allocation251_spill] sm:$0xff] %v6672_v1  ;;  %v6700_v49 = vsel %vm2217_vm9, %v9952_v39, 0.0  ;;  %v9957_v26 = vmax.f32 %v4809_v3, 0.0  ;;  %v9958_v62 = vmax.f32 %v4826_v25, 0.0  ;;  %v3027_v37 = vld [vmem:[%s8952_s5 + $0x370] sm:$0xff]  ;;  %v3044_v3 = vld [vmem:[%s8952_s5 + $0x3f8] sm:$0xff] }
 0x3fe   : > { %9948 = vst [vmem:[#allocation252_spill] sm:$0xff] %v6688_v53  ;;  %v9959_v39 = vld [vmem:[#allocation66_spill] sm:$0xff]  ;;  %v9961_v42 = vld [vmem:[#allocation65_spill] sm:$0xff]  ;;  %v9963_v43 = vld [vmem:[#allocation128_spill] sm:$0xff]  ;;  %3308 = vmatpush.msrb.mxu1 %v3012_v38  ;;  %3329 = vmatpush.msrb.mxu2 %v3027_v37  ;;  %vm2886_vm8 = vcmask 1040384   ;;  %vm2888_vm9 = vcmask 1042434  }
 0x3ff   : > { %9950 = vst [vmem:[#allocation253_spill] sm:$0xff] %v6694_v56  ;;  %v6730_v11 = vsel %vm2218_vm10, %v9957_v26, 0.0  ;;  %v6736_v44 = vsel %vm2218_vm10, %v9958_v62, 0.0  ;;  %v9960_v35 = vmax.f32 %v9959_v39, 0.0  ;;  %v9962_v26 = vmax.f32 %v9961_v42, 0.0  ;;  %v2994_v39 = vld [vmem:[%s8952_s5 + $0x268] sm:$0xff]  ;;  %3348 = vmatpush.msrb.mxu3 %v3044_v3 }
 0x400   : > { %9953 = vst [vmem:[#allocation254_spill] sm:$0xff] %v6700_v49  ;;  %v9964_v62 = vmax.f32 %v9963_v43, 0.0  ;;  %v2521_v56 = vadd.f32 %v2520_v15, %v2296_v63  ;;  %v9966_v42 = vld [vmem:[#allocation126_spill] sm:$0xff]  ;;  %v9969_v5 = vld [vmem:[#allocation129_spill] sm:$0xff]  ;;  %v9972_v63 = vld [vmem:[#allocation127_spill] sm:$0xff]  ;;  %3290 = vmatpush.msrb.mxu0 %v2994_v39 }
 0x401   : > { %v6749_v25 = vsel %vm2218_vm10, %v9960_v35, 0.0  ;;  %v6755_v2 = vsel %vm2218_vm10, %v9962_v26, 0.0  ;;  %v3011_v35 = vld [vmem:[%s8952_s5 + $0x2f0] sm:$0xff]  ;;  %v9967_v26 = vmax.f32 %v9966_v42, 0.0  ;;  %v9973_v51 = vmax.f32 %v9972_v63, 0.0  ;;  %v9983_v45 = vld [vmem:[#allocation186_spill] sm:$0xff] }
 0x402   : > { %v6761_v49 = vsel %vm2218_vm10, %v9964_v62, 0.0  ;;  %v9970_v62 = vmax.f32 %v9969_v5, 0.0  ;;  %v3026_v5 = vld [vmem:[%s8952_s5 + $0x368] sm:$0xff]  ;;  %v9984_v38 = vmax.f32 %v9983_v45, 0.0  ;;  %v9986_v4 = vld [vmem:[#allocation184_spill] sm:$0xff]  ;;  %v9993_v37 = vld [vmem:[#allocation9_spill] sm:$0xff]  ;;  %3309 = vmatpush.msrb.mxu1 %v3011_v35 }
 0x403   : > { %9965 = vst [vmem:[#allocation255_spill] sm:$0xff] %v6761_v49  ;;  %v6773_v43 = vsel %vm2218_vm10, %v9967_v26, 0.0  ;;  %v6785_v59 = vsel %vm2218_vm10, %v9973_v51, 0.0  ;;  %v9975_v49 = vld [vmem:[#allocation8_spill] sm:$0xff]  ;;  %v3043_v26 = vld [vmem:[%s8952_s5 + $0x3f0] sm:$0xff]  ;;  %v9987_v1 = vmax.f32 %v9986_v4, 0.0  ;;  %3330 = vmatpush.msrb.mxu2 %v3026_v5 }
 0x404   : > { %9968 = vst [vmem:[#allocation256_spill] sm:$0xff] %v6773_v43  ;;  %v6779_v15 = vsel %vm2218_vm10, %v9970_v62, 0.0  ;;  %v9976_v53 = vmax.f32 %v9975_v49, 0.0  ;;  %v9977_v62 = vld [vmem:[#allocation183_spill] sm:$0xff]  ;;  %v9980_v49 = vld [vmem:[#allocation185_spill] sm:$0xff]  ;;  %v9994_v3 = vmax.f32 %v9993_v37, 0.0  ;;  %3349 = vmatpush.msrb.mxu3 %v3043_v26 }
 0x405   : > { %9971 = vst [vmem:[#allocation257_spill] sm:$0xff] %v6779_v15  ;;  %v9978_v63 = vmax.f32 %v9977_v62, 0.0  ;;  %v6813_v15 = vsel %vm2218_vm10, %v9984_v38, 0.0  ;;  %v6819_v62 = vsel %vm2218_vm10, %v9987_v1, 0.0  ;;  %v9991_v4 = vld [vmem:[#allocation11_spill] sm:$0xff]  ;;  %v10001_v35 = vld [vmem:[#allocation68_spill] sm:$0xff] }
 0x406   : > { %9974 = vst [vmem:[#allocation258_spill] sm:$0xff] %v6785_v59  ;;  %v2312_v42 = vsel %vm2219_vm11, %v9976_v53, 0.0  ;;  %v9981_v59 = vmax.f32 %v9980_v49, 0.0  ;;  %v9989_v49 = vld [vmem:[#allocation10_spill] sm:$0xff]  ;;  %v9992_v20 = vmax.f32 %v9991_v4, 0.0  ;;  %v10006_v17 = vld [vmem:[#allocation132_spill] sm:$0xff] }
 0x407   : > { %v6801_v51 = vsel %vm2218_vm10, %v9978_v63, 0.0  ;;  %9985 = vst [vmem:[#allocation261_spill] sm:$0xff] %v6813_v15  ;;  %v2993_v63 = vld [vmem:[%s8952_s5 + $0x260] sm:$0xff]  ;;  %v9990_v45 = vmax.f32 %v9989_v49, 0.0  ;;  %v9995_v15 = vld [vmem:[#allocation67_spill] sm:$0xff]  ;;  %v3042_v4 = vld [vmem:[%s8952_s5 + $0x3e8] sm:$0xff]  ;;  %v2522_v21 = vadd.f32 %v2521_v56, %v2312_v42 }
 0x408   : > { %9979 = vst [vmem:[#allocation259_spill] sm:$0xff] %v6801_v51  ;;  %v6807_v53 = vsel %vm2218_vm10, %v9981_v59, 0.0  ;;  %v3010_v59 = vld [vmem:[%s8952_s5 + $0x2e8] sm:$0xff]  ;;  %v6837_v1 = vsel %vm2219_vm11, %v9992_v20, 0.0  ;;  %v9997_v20 = vld [vmem:[#allocation69_spill] sm:$0xff]  ;;  %v10002_v51 = vmax.f32 %v10001_v35, 0.0  ;;  %3291 = vmatpush.msrb.mxu0 %v2993_v63  ;;  %3350 = vmatpush.msrb.mxu3 %v3042_v4 }
 0x409   : > { %9982 = vst [vmem:[#allocation260_spill] sm:$0xff] %v6807_v53  ;;  %v6831_v38 = vsel %vm2219_vm11, %v9990_v45, 0.0  ;;  %v9996_v53 = vmax.f32 %v9995_v15, 0.0  ;;  %v3025_v45 = vld [vmem:[%s8952_s5 + $0x360] sm:$0xff]  ;;  %v9998_v37 = vmax.f32 %v9997_v20, 0.0  ;;  %v2992_v20 = vld [vmem:[%s8952_s5 + $0x258] sm:$0xff]  ;;  %3310 = vmatpush.msrb.mxu1 %v3010_v59 }
 0x40a   : > { %9988 = vst [vmem:[#allocation262_spill] sm:$0xff] %v6819_v62  ;;  %v6843_v62 = vsel %vm2219_vm11, %v9994_v3, 0.0  ;;  %v6874_v16 = vsel %vm2219_vm11, %v10002_v51, 0.0  ;;  %v10007_v51 = vmax.f32 %v10006_v17, 0.0  ;;  %v10009_v42 = vld [vmem:[#allocation133_spill] sm:$0xff]  ;;  %v10012_v54 = vld [vmem:[#allocation131_spill] sm:$0xff]  ;;  %3331 = vmatpush.msrb.mxu2 %v3025_v45  ;;  %3292 = vmatpush.msrb.mxu0 %v2992_v20 }
 0x40b   : > { %v6849_v49 = vsel %vm2219_vm11, %v9996_v53, 0.0  ;;  %v6862_v15 = vsel %vm2219_vm11, %v9998_v37, 0.0  ;;  %v9999_v53 = vld [vmem:[#allocation70_spill] sm:$0xff]  ;;  %v3009_v37 = vld [vmem:[%s8952_s5 + $0x2e0] sm:$0xff]  ;;  %v10010_v5 = vmax.f32 %v10009_v42, 0.0  ;;  %v10013_v28 = vmax.f32 %v10012_v54, 0.0 }
 0x40c   : > { %v10000_v3 = vmax.f32 %v9999_v53, 0.0  ;;  %v10003_v53 = vld [vmem:[#allocation130_spill] sm:$0xff]  ;;  %v6892_v56 = vsel %vm2219_vm11, %v10007_v51, 0.0  ;;  %v3024_v17 = vld [vmem:[%s8952_s5 + $0x358] sm:$0xff]  ;;  %v10015_v51 = vld [vmem:[#allocation187_spill] sm:$0xff]  ;;  %3311 = vmatpush.msrb.mxu1 %v3009_v37  ;;  %vm2890_vm10 = vcmask 1041408  }
 0x40d   : > { %10008 = vst [vmem:[#allocation264_spill] sm:$0xff] %v6892_v56  ;;  %v6898_v26 = vsel %vm2219_vm11, %v10010_v5, 0.0  ;;  %v10016_v42 = vmax.f32 %v10015_v51, 0.0  ;;  %v10018_v54 = vld [vmem:[#allocation189_spill] sm:$0xff]  ;;  %v10021_v63 = vld [vmem:[#allocation190_spill] sm:$0xff]  ;;  %v10024_v56 = vld [vmem:[#allocation12_spill] sm:$0xff]  ;;  %3332 = vmatpush.msrb.mxu2 %v3024_v17 }
 0x40e   : > { %v6868_v39 = vsel %vm2219_vm11, %v10000_v3, 0.0  ;;  %v10004_v3 = vmax.f32 %v10003_v53, 0.0  ;;  %10011 = vst [vmem:[#allocation265_spill] sm:$0xff] %v6898_v26  ;;  %v6904_v53 = vsel %vm2219_vm11, %v10013_v28, 0.0  ;;  %v10019_v26 = vmax.f32 %v10018_v54, 0.0  ;;  %v10026_v54 = vld [vmem:[#allocation188_spill] sm:$0xff] }
 0x40f   : > { %10014 = vst [vmem:[#allocation266_spill] sm:$0xff] %v6904_v53  ;;  %v6916_v5 = vsel %vm2219_vm11, %v10016_v42, 0.0  ;;  %v10022_v59 = vmax.f32 %v10021_v63, 0.0  ;;  %v10025_v48 = vmax.f32 %v10024_v56, 0.0  ;;  %v2991_v42 = vld [vmem:[%s8952_s5 + $0x250] sm:$0xff]  ;;  %v10027_v63 = vmax.f32 %v10026_v54, 0.0  ;;  %3333 = vmatpush.msrb.mxu2 %v3023_v33 }
 0x410   : > { %v6886_v35 = vsel %vm2219_vm11, %v10004_v3, 0.0  ;;  %v3041_v3 = vld [vmem:[%s8952_s5 + $0x3e0] sm:$0xff]  ;;  %10017 = vst [vmem:[#allocation267_spill] sm:$0xff] %v6916_v5  ;;  %v6922_v28 = vsel %vm2219_vm11, %v10019_v26, 0.0  ;;  %v3008_v26 = vld [vmem:[%s8952_s5 + $0x2d8] sm:$0xff]  ;;  %v10029_v56 = vld [vmem:[#allocation14_spill] sm:$0xff]  ;;  %3293 = vmatpush.msrb.mxu0 %v2991_v42 }
 0x411   : > { %10005 = vst [vmem:[#allocation263_spill] sm:$0xff] %v6886_v35  ;;  %v6928_v53 = vsel %vm2219_vm11, %v10022_v59, 0.0  ;;  %v2328_v51 = vsel %vm2220_vm12, %v10025_v48, 0.0  ;;  %v6944_v59 = vsel %vm2219_vm11, %v10027_v63, 0.0  ;;  %v10031_v45 = vld [vmem:[#allocation15_spill] sm:$0xff]  ;;  %v10033_v5 = vld [vmem:[#allocation13_spill] sm:$0xff]  ;;  %3351 = vmatpush.msrb.mxu3 %v3041_v3  ;;  %3312 = vmatpush.msrb.mxu1 %v3008_v26 }
 0x412   : > { %10020 = vst [vmem:[#allocation268_spill] sm:$0xff] %v6922_v28  ;;  %v10032_v4 = vmax.f32 %v10031_v45, 0.0  ;;  %v10034_v55 = vmax.f32 %v10033_v5, 0.0  ;;  %v10035_v63 = vld [vmem:[#allocation71_spill] sm:$0xff]  ;;  %v10039_v37 = vld [vmem:[#allocation74_spill] sm:$0xff]  ;;  %v6989_v35 = vadd.f32 %v2522_v21, %v2328_v51  ;;  %v10047_v17 = vld [vmem:[#allocation136_spill] sm:$0xff] }
 0x413   : > { %10023 = vst [vmem:[#allocation269_spill] sm:$0xff] %v6928_v53  ;;  %v10030_v53 = vmax.f32 %v10029_v56, 0.0  ;;  %v10036_v56 = vmax.f32 %v10035_v63, 0.0  ;;  %v2990_v63 = vld [vmem:[%s8952_s5 + $0x248] sm:$0xff]  ;;  %v10048_v3 = vmax.f32 %v10047_v17, 0.0  ;;  %v10050_v29 = vld [vmem:[#allocation137_spill] sm:$0xff] }
 0x414   : > { %10028 = vst [vmem:[#allocation270_spill] sm:$0xff] %v6944_v59  ;;  %v6956_v28 = vsel %vm2220_vm12, %v10032_v4, 0.0  ;;  %v6962_v54 = vsel %vm2220_vm12, %v10034_v55, 0.0  ;;  %v10037_v55 = vld [vmem:[#allocation73_spill] sm:$0xff]  ;;  %v10040_v4 = vmax.f32 %v10039_v37, 0.0  ;;  %v10051_v22 = vmax.f32 %v10050_v29, 0.0  ;;  %3294 = vmatpush.msrb.mxu0 %v2990_v63 }
 0x415   : > { %v6950_v48 = vsel %vm2220_vm12, %v10030_v53, 0.0  ;;  %v3040_v53 = vld [vmem:[%s8952_s5 + $0x3d8] sm:$0xff]  ;;  %v6975_v5 = vsel %vm2220_vm12, %v10036_v56, 0.0  ;;  %v10038_v45 = vmax.f32 %v10037_v55, 0.0  ;;  %v3007_v56 = vld [vmem:[%s8952_s5 + $0x2d0] sm:$0xff]  ;;  %v7013_v51 = vsel %vm2220_vm12, %v10048_v3, 0.0 }
 0x416   : > { %v6987_v59 = vsel %vm2220_vm12, %v10040_v4, 0.0  ;;  %v10041_v55 = vld [vmem:[#allocation72_spill] sm:$0xff]  ;;  %v10044_v4 = vld [vmem:[#allocation134_spill] sm:$0xff]  ;;  %10049 = vst [vmem:[#allocation273_spill] sm:$0xff] %v7013_v51  ;;  %v10056_v29 = vld [vmem:[#allocation191_spill] sm:$0xff]  ;;  %3352 = vmatpush.msrb.mxu3 %v3040_v53  ;;  %3313 = vmatpush.msrb.mxu1 %v3007_v56  ;;  %vm2892_vm11 = vcmask 1044484  }
 0x417   : > { %v6981_v20 = vsel %vm2220_vm12, %v10038_v45, 0.0  ;;  %v10042_v45 = vmax.f32 %v10041_v55, 0.0  ;;  %v10045_v43 = vmax.f32 %v10044_v4, 0.0  ;;  %v7019_v55 = vsel %vm2220_vm12, %v10051_v22, 0.0  ;;  %v10053_v4 = vld [vmem:[#allocation135_spill] sm:$0xff]  ;;  %v10059_v42 = vld [vmem:[#allocation193_spill] sm:$0xff] }
 0x418   : > { %10052 = vst [vmem:[#allocation274_spill] sm:$0xff] %v7019_v55  ;;  %v10054_v17 = vmax.f32 %v10053_v4, 0.0  ;;  %v10057_v51 = vmax.f32 %v10056_v29, 0.0  ;;  %v10060_v26 = vmax.f32 %v10059_v42, 0.0  ;;  %v10065_v29 = vld [vmem:[#allocation192_spill] sm:$0xff]  ;;  %v10070_v53 = vld [vmem:[#allocation18_spill] sm:$0xff] }
 0x419   : > { %v7001_v37 = vsel %vm2220_vm12, %v10042_v45, 0.0  ;;  %v7007_v21 = vsel %vm2220_vm12, %v10045_v43, 0.0  ;;  %v3022_v45 = vld [vmem:[%s8952_s5 + $0x348] sm:$0xff]  ;;  %v3039_v43 = vld [vmem:[%s8952_s5 + $0x3d0] sm:$0xff]  ;;  %v10066_v42 = vmax.f32 %v10065_v29, 0.0  ;;  %v10082_v56 = vld [vmem:[#allocation77_spill] sm:$0xff] }
 0x41a   : > { %10043 = vst [vmem:[#allocation271_spill] sm:$0xff] %v7001_v37  ;;  %v7031_v3 = vsel %vm2220_vm12, %v10054_v17, 0.0  ;;  %v7037_v22 = vsel %vm2220_vm12, %v10057_v51, 0.0  ;;  %v7043_v55 = vsel %vm2220_vm12, %v10060_v26, 0.0  ;;  %v2989_v17 = vld [vmem:[%s8952_s5 + $0x240] sm:$0xff]  ;;  %v3006_v51 = vld [vmem:[%s8952_s5 + $0x2c8] sm:$0xff]  ;;  %3334 = vmatpush.msrb.mxu2 %v3022_v45  ;;  %3353 = vmatpush.msrb.mxu3 %v3039_v43 }
 0x41b   : > { %10046 = vst [vmem:[#allocation272_spill] sm:$0xff] %v7007_v21  ;;  %v10062_v21 = vld [vmem:[#allocation194_spill] sm:$0xff]  ;;  %v7061_v26 = vsel %vm2220_vm12, %v10066_v42, 0.0  ;;  %v10076_v42 = vld [vmem:[#allocation17_spill] sm:$0xff]  ;;  %v10094_v43 = vld [vmem:[#allocation140_spill] sm:$0xff]  ;;  %3295 = vmatpush.msrb.mxu0 %v2989_v17  ;;  %3314 = vmatpush.msrb.mxu1 %v3006_v51 }
 0x41c   : > { %10055 = vst [vmem:[#allocation275_spill] sm:$0xff] %v7031_v3  ;;  %v10063_v37 = vmax.f32 %v10062_v21, 0.0  ;;  %v10068_v21 = vld [vmem:[#allocation16_spill] sm:$0xff]  ;;  %v10106_v51 = vld [vmem:[#allocation197_spill] sm:$0xff]  ;;  %3335 = vmatpush.msrb.mxu2 %v3021_v19  ;;  %v3015_v46 = vld [vmem:[%s8952_s5 + $0x310] sm:$0xff] }
 0x41d   : > { %10058 = vst [vmem:[#allocation276_spill] sm:$0xff] %v7037_v22  ;;  %v10073_v22 = vld [vmem:[#allocation19_spill] sm:$0xff]  ;;  %v10306_v30 = vld [vmem:[#allocation37_spill] sm:$0xff] }
 0x41e   : > { %10061 = vst [vmem:[#allocation277_spill] sm:$0xff] %v7043_v55  ;;  %v7049_v4 = vsel %vm2220_vm12, %v10063_v37, 0.0  ;;  %v10069_v55 = vmax.f32 %v10068_v21, 0.0  ;;  %v10071_v37 = vmax.f32 %v10070_v53, 0.0  ;;  %v10074_v3 = vmax.f32 %v10073_v22, 0.0  ;;  %v10352_v47 = vld [vmem:[#allocation41_spill] sm:$0xff] }
 0x41f   : > { %10064 = vst [vmem:[#allocation278_spill] sm:$0xff] %v7049_v4  ;;  %v10077_v21 = vmax.f32 %v10076_v42, 0.0  ;;  %v10399_v27 = vld [vmem:[#allocation45_spill] sm:$0xff]  ;;  %vm2894_vm12 = vcmask 1046534  }
 0x420   : > { %10067 = vst [vmem:[#allocation279_spill] sm:$0xff] %v7061_v26  ;;  %v7067_v33 = vsel %vm2221_vm13, %v10069_v55, 0.0  ;;  %v7073_v4 = vsel %vm2221_vm13, %v10071_v37, 0.0  ;;  %v7079_v29 = vsel %vm2221_vm13, %v10074_v3, 0.0  ;;  %v3038_v55 = vld [vmem:[%s8952_s5 + $0x3c8] sm:$0xff]  ;;  %v10079_v3 = vld [vmem:[#allocation75_spill] sm:$0xff] }
 0x421   : > { %10072 = vst [vmem:[#allocation280_spill] sm:$0xff] %v7073_v4  ;;  %v7092_v22 = vsel %vm2221_vm13, %v10077_v21, 0.0  ;;  %v10080_v53 = vmax.f32 %v10079_v3, 0.0  ;;  %v10083_v37 = vmax.f32 %v10082_v56, 0.0  ;;  %v2988_v21 = vld [vmem:[%s8952_s5 + $0x238] sm:$0xff]  ;;  %v3005_v3 = vld [vmem:[%s8952_s5 + $0x2c0] sm:$0xff]  ;;  %3354 = vmatpush.msrb.mxu3 %v3038_v55 }
 0x422   : > { %10075 = vst [vmem:[#allocation281_spill] sm:$0xff] %v7079_v29  ;;  %v10085_v29 = vld [vmem:[#allocation78_spill] sm:$0xff]  ;;  %3296 = vmatpush.msrb.mxu0 %v2988_v21  ;;  %3315 = vmatpush.msrb.mxu1 %v3005_v3  ;;  %v10129_v3 = vld [vmem:[#allocation81_spill] sm:$0xff] }
 0x423   : > { %10078 = vst [vmem:[#allocation282_spill] sm:$0xff] %v7092_v22  ;;  %v7098_v63 = vsel %vm2221_vm13, %v10080_v53, 0.0  ;;  %v7104_v26 = vsel %vm2221_vm13, %v10083_v37, 0.0  ;;  %v10086_v4 = vmax.f32 %v10085_v29, 0.0  ;;  %v10088_v53 = vld [vmem:[#allocation76_spill] sm:$0xff]  ;;  %v10091_v29 = vld [vmem:[#allocation138_spill] sm:$0xff] }
 0x424   : > { %10081 = vst [vmem:[#allocation283_spill] sm:$0xff] %v7098_v63  ;;  %v10089_v56 = vmax.f32 %v10088_v53, 0.0  ;;  %v10097_v63 = vld [vmem:[#allocation141_spill] sm:$0xff]  ;;  %v10117_v55 = vld [vmem:[#allocation22_spill] sm:$0xff] }
 0x425   : > { %10084 = vst [vmem:[#allocation284_spill] sm:$0xff] %v7104_v26  ;;  %v7110_v42 = vsel %vm2221_vm13, %v10086_v4, 0.0  ;;  %v10092_v26 = vmax.f32 %v10091_v29, 0.0  ;;  %v10095_v4 = vmax.f32 %v10094_v43, 0.0  ;;  %v10098_v22 = vmax.f32 %v10097_v63, 0.0  ;;  %v10100_v29 = vld [vmem:[#allocation139_spill] sm:$0xff] }
 0x426   : > { %10087 = vst [vmem:[#allocation285_spill] sm:$0xff] %v7110_v42  ;;  %v7122_v37 = vsel %vm2221_vm13, %v10089_v56, 0.0  ;;  %v3020_v56 = vld [vmem:[%s8952_s5 + $0x338] sm:$0xff]  ;;  %v10101_v43 = vmax.f32 %v10100_v29, 0.0  ;;  %v10103_v63 = vld [vmem:[#allocation195_spill] sm:$0xff]  ;;  %v10446_v31 = vld [vmem:[#allocation49_spill] sm:$0xff] }
 0x427   : > { %10090 = vst [vmem:[#allocation286_spill] sm:$0xff] %v7122_v37  ;;  %v7128_v45 = vsel %vm2221_vm13, %v10092_v26, 0.0  ;;  %v7134_v42 = vsel %vm2221_vm13, %v10095_v4, 0.0  ;;  %v7140_v53 = vsel %vm2221_vm13, %v10098_v22, 0.0  ;;  %v3037_v26 = vld [vmem:[%s8952_s5 + $0x3c0] sm:$0xff]  ;;  %v10107_v22 = vmax.f32 %v10106_v51, 0.0  ;;  %3336 = vmatpush.msrb.mxu2 %v3020_v56 }
 0x428   : > { %10093 = vst [vmem:[#allocation287_spill] sm:$0xff] %v7128_v45  ;;  %v7152_v4 = vsel %vm2221_vm13, %v10101_v43, 0.0  ;;  %v10109_v45 = vld [vmem:[#allocation198_spill] sm:$0xff]  ;;  %v2987_v43 = vld [vmem:[%s8952_s5 + $0x230] sm:$0xff]  ;;  %3355 = vmatpush.msrb.mxu3 %v3037_v26  ;;  %v10141_v26 = vld [vmem:[#allocation144_spill] sm:$0xff] }
 0x429   : > { %10096 = vst [vmem:[#allocation288_spill] sm:$0xff] %v7134_v42  ;;  %v10104_v42 = vmax.f32 %v10103_v63, 0.0  ;;  %v10110_v37 = vmax.f32 %v10109_v45, 0.0  ;;  %v10112_v63 = vld [vmem:[#allocation196_spill] sm:$0xff]  ;;  %3297 = vmatpush.msrb.mxu0 %v2987_v43  ;;  %3337 = vmatpush.msrb.mxu2 %v3019_v24  ;;  %v10493_v60 = vld [vmem:[#allocation53_spill] sm:$0xff] }
 0x42a   : > { %10099 = vst [vmem:[#allocation289_spill] sm:$0xff] %v7140_v53  ;;  %v7164_v53 = vsel %vm2221_vm13, %v10107_v22, 0.0  ;;  %v10113_v51 = vmax.f32 %v10112_v63, 0.0  ;;  %v10115_v45 = vld [vmem:[#allocation20_spill] sm:$0xff]  ;;  %v10540_v13 = vld [vmem:[#allocation57_spill] sm:$0xff] }
 0x42b   : > { %10102 = vst [vmem:[#allocation290_spill] sm:$0xff] %v7152_v4  ;;  %v7158_v17 = vsel %vm2221_vm13, %v10104_v42, 0.0  ;;  %v7170_v29 = vsel %vm2221_vm13, %v10110_v37, 0.0  ;;  %v3004_v42 = vld [vmem:[%s8952_s5 + $0x2b8] sm:$0xff]  ;;  %v10118_v37 = vmax.f32 %v10117_v55, 0.0 }
 0x42c   : > { %10105 = vst [vmem:[#allocation291_spill] sm:$0xff] %v7158_v17  ;;  %v7182_v22 = vsel %vm2221_vm13, %v10113_v51, 0.0  ;;  %v10120_v17 = vld [vmem:[#allocation23_spill] sm:$0xff]  ;;  %v10123_v51 = vld [vmem:[#allocation21_spill] sm:$0xff]  ;;  %3316 = vmatpush.msrb.mxu1 %v3004_v42  ;;  %vm2896_vm13 = vcmask 1045508  }
 0x42d   : > { %10108 = vst [vmem:[#allocation292_spill] sm:$0xff] %v7164_v53  ;;  %v10116_v53 = vmax.f32 %v10115_v45, 0.0  ;;  %v10121_v4 = vmax.f32 %v10120_v17, 0.0  ;;  %v10124_v45 = vmax.f32 %v10123_v51, 0.0  ;;  %v10153_v42 = vld [vmem:[#allocation201_spill] sm:$0xff] }
 0x42e   : > { %10111 = vst [vmem:[#allocation293_spill] sm:$0xff] %v7170_v29  ;;  %v7194_v29 = vsel %vm2222_vm14, %v10118_v37, 0.0  ;;  %v10130_v37 = vmax.f32 %v10129_v3, 0.0 }
 0x42f   : > { %10114 = vst [vmem:[#allocation294_spill] sm:$0xff] %v7182_v22  ;;  %v7188_v19 = vsel %vm2222_vm14, %v10116_v53, 0.0  ;;  %v7200_v63 = vsel %vm2222_vm14, %v10121_v4, 0.0  ;;  %v3036_v53 = vld [vmem:[%s8952_s5 + $0x3b8] sm:$0xff]  ;;  %v7213_v17 = vsel %vm2222_vm14, %v10124_v45, 0.0  ;;  %v10126_v4 = vld [vmem:[#allocation79_spill] sm:$0xff] }
 0x430   : > { %10119 = vst [vmem:[#allocation295_spill] sm:$0xff] %v7194_v29  ;;  %v10127_v55 = vmax.f32 %v10126_v4, 0.0  ;;  %v7225_v22 = vsel %vm2222_vm14, %v10130_v37, 0.0  ;;  %v2986_v45 = vld [vmem:[%s8952_s5 + $0x228] sm:$0xff]  ;;  %v3003_v4 = vld [vmem:[%s8952_s5 + $0x2b0] sm:$0xff]  ;;  %3356 = vmatpush.msrb.mxu3 %v3036_v53 }
 0x431   : > { %10122 = vst [vmem:[#allocation296_spill] sm:$0xff] %v7200_v63  ;;  %v10132_v63 = vld [vmem:[#allocation82_spill] sm:$0xff]  ;;  %3298 = vmatpush.msrb.mxu0 %v2986_v45  ;;  %3317 = vmatpush.msrb.mxu1 %v3003_v4  ;;  %v10176_v4 = vld [vmem:[#allocation85_spill] sm:$0xff] }
 0x432   : > { %10125 = vst [vmem:[#allocation297_spill] sm:$0xff] %v7213_v17  ;;  %v7219_v21 = vsel %vm2222_vm14, %v10127_v55, 0.0  ;;  %v10133_v29 = vmax.f32 %v10132_v63, 0.0  ;;  %v10135_v55 = vld [vmem:[#allocation80_spill] sm:$0xff]  ;;  %v10138_v63 = vld [vmem:[#allocation142_spill] sm:$0xff] }
 0x433   : > { %10128 = vst [vmem:[#allocation298_spill] sm:$0xff] %v7219_v21  ;;  %v10136_v3 = vmax.f32 %v10135_v55, 0.0  ;;  %v10144_v21 = vld [vmem:[#allocation145_spill] sm:$0xff]  ;;  %v10164_v53 = vld [vmem:[#allocation26_spill] sm:$0xff] }
 0x434   : > { %10131 = vst [vmem:[#allocation299_spill] sm:$0xff] %v7225_v22  ;;  %v7231_v51 = vsel %vm2222_vm14, %v10133_v29, 0.0  ;;  %v10139_v22 = vmax.f32 %v10138_v63, 0.0  ;;  %v10142_v29 = vmax.f32 %v10141_v26, 0.0  ;;  %v10145_v17 = vmax.f32 %v10144_v21, 0.0  ;;  %v10147_v63 = vld [vmem:[#allocation143_spill] sm:$0xff] }
 0x435   : > { %10134 = vst [vmem:[#allocation300_spill] sm:$0xff] %v7231_v51  ;;  %v7243_v37 = vsel %vm2222_vm14, %v10136_v3, 0.0  ;;  %v3018_v3 = vld [vmem:[%s8952_s5 + $0x328] sm:$0xff]  ;;  %v10148_v26 = vmax.f32 %v10147_v63, 0.0  ;;  %v10150_v21 = vld [vmem:[#allocation199_spill] sm:$0xff] }
 0x436   : > { %10137 = vst [vmem:[#allocation301_spill] sm:$0xff] %v7243_v37  ;;  %v7249_v56 = vsel %vm2222_vm14, %v10139_v22, 0.0  ;;  %v7255_v51 = vsel %vm2222_vm14, %v10142_v29, 0.0  ;;  %v7261_v55 = vsel %vm2222_vm14, %v10145_v17, 0.0  ;;  %v3035_v22 = vld [vmem:[%s8952_s5 + $0x3b0] sm:$0xff]  ;;  %v10154_v17 = vmax.f32 %v10153_v42, 0.0  ;;  %3338 = vmatpush.msrb.mxu2 %v3018_v3 }
 0x437   : > { %10140 = vst [vmem:[#allocation302_spill] sm:$0xff] %v7249_v56  ;;  %v7273_v29 = vsel %vm2222_vm14, %v10148_v26, 0.0  ;;  %v10156_v56 = vld [vmem:[#allocation202_spill] sm:$0xff]  ;;  %v2985_v26 = vld [vmem:[%s8952_s5 + $0x220] sm:$0xff]  ;;  %3357 = vmatpush.msrb.mxu3 %v3035_v22  ;;  %v10188_v22 = vld [vmem:[#allocation148_spill] sm:$0xff] }
 0x438   : > { %10143 = vst [vmem:[#allocation303_spill] sm:$0xff] %v7255_v51  ;;  %v10151_v51 = vmax.f32 %v10150_v21, 0.0  ;;  %v10157_v37 = vmax.f32 %v10156_v56, 0.0  ;;  %v10159_v21 = vld [vmem:[#allocation200_spill] sm:$0xff]  ;;  %3299 = vmatpush.msrb.mxu0 %v2985_v26  ;;  %3339 = vmatpush.msrb.mxu2 %v3017_v41 }
 0x439   : > { %10146 = vst [vmem:[#allocation304_spill] sm:$0xff] %v7261_v55  ;;  %v7285_v55 = vsel %vm2222_vm14, %v10154_v17, 0.0  ;;  %v10160_v42 = vmax.f32 %v10159_v21, 0.0  ;;  %v10162_v56 = vld [vmem:[#allocation24_spill] sm:$0xff] }
 0x43a   : > { %10149 = vst [vmem:[#allocation305_spill] sm:$0xff] %v7273_v29  ;;  %v7279_v43 = vsel %vm2222_vm14, %v10151_v51, 0.0  ;;  %v7291_v63 = vsel %vm2222_vm14, %v10157_v37, 0.0  ;;  %v3002_v51 = vld [vmem:[%s8952_s5 + $0x2a8] sm:$0xff]  ;;  %v10165_v37 = vmax.f32 %v10164_v53, 0.0 }
 0x43b   : > { %10152 = vst [vmem:[#allocation306_spill] sm:$0xff] %v7279_v43  ;;  %v7303_v17 = vsel %vm2222_vm14, %v10160_v42, 0.0  ;;  %v10167_v43 = vld [vmem:[#allocation27_spill] sm:$0xff]  ;;  %v10170_v42 = vld [vmem:[#allocation25_spill] sm:$0xff]  ;;  %3318 = vmatpush.msrb.mxu1 %v3002_v51  ;;  %vm2898_vm14 = vcmask 1043456  }
 0x43c   : > { %10155 = vst [vmem:[#allocation307_spill] sm:$0xff] %v7285_v55  ;;  %v10163_v55 = vmax.f32 %v10162_v56, 0.0  ;;  %v10168_v29 = vmax.f32 %v10167_v43, 0.0  ;;  %v10171_v56 = vmax.f32 %v10170_v42, 0.0  ;;  %v10200_v51 = vld [vmem:[#allocation205_spill] sm:$0xff] }
 0x43d   : > { %10158 = vst [vmem:[#allocation308_spill] sm:$0xff] %v7291_v63  ;;  %v7315_v63 = vsel %vm2223_vm15, %v10165_v37, 0.0  ;;  %v10177_v37 = vmax.f32 %v10176_v4, 0.0 }
 0x43e   : > { %10161 = vst [vmem:[#allocation309_spill] sm:$0xff] %v7303_v17  ;;  %v7309_v24 = vsel %vm2223_vm15, %v10163_v55, 0.0  ;;  %v7321_v21 = vsel %vm2223_vm15, %v10168_v29, 0.0  ;;  %v3034_v55 = vld [vmem:[%s8952_s5 + $0x3a8] sm:$0xff]  ;;  %v7334_v43 = vsel %vm2223_vm15, %v10171_v56, 0.0  ;;  %v10173_v29 = vld [vmem:[#allocation83_spill] sm:$0xff] }
 0x43f   : > { %10166 = vst [vmem:[#allocation310_spill] sm:$0xff] %v7315_v63  ;;  %v10174_v53 = vmax.f32 %v10173_v29, 0.0  ;;  %v7346_v17 = vsel %vm2223_vm15, %v10177_v37, 0.0  ;;  %v2984_v56 = vld [vmem:[%s8952_s5 + $0x218] sm:$0xff]  ;;  %v3001_v29 = vld [vmem:[%s8952_s5 + $0x2a0] sm:$0xff]  ;;  %3358 = vmatpush.msrb.mxu3 %v3034_v55  ;;  %v10211_v55 = vld [vmem:[#allocation30_spill] sm:$0xff] }
 0x440   : > { %10169 = vst [vmem:[#allocation311_spill] sm:$0xff] %v7321_v21  ;;  %v10179_v21 = vld [vmem:[#allocation86_spill] sm:$0xff]  ;;  %3300 = vmatpush.msrb.mxu0 %v2984_v56  ;;  %3319 = vmatpush.msrb.mxu1 %v3001_v29  ;;  %v10223_v29 = vld [vmem:[#allocation89_spill] sm:$0xff] }
 0x441   : > { %10172 = vst [vmem:[#allocation312_spill] sm:$0xff] %v7334_v43  ;;  %v7340_v45 = vsel %vm2223_vm15, %v10174_v53, 0.0  ;;  %v10180_v63 = vmax.f32 %v10179_v21, 0.0  ;;  %v10182_v53 = vld [vmem:[#allocation84_spill] sm:$0xff]  ;;  %v10185_v21 = vld [vmem:[#allocation146_spill] sm:$0xff] }
 0x442   : > { %10175 = vst [vmem:[#allocation313_spill] sm:$0xff] %v7340_v45  ;;  %v10183_v4 = vmax.f32 %v10182_v53, 0.0  ;;  %v10191_v45 = vld [vmem:[#allocation149_spill] sm:$0xff] }
 0x443   : > { %10178 = vst [vmem:[#allocation314_spill] sm:$0xff] %v7346_v17  ;;  %v7352_v42 = vsel %vm2223_vm15, %v10180_v63, 0.0  ;;  %v10186_v17 = vmax.f32 %v10185_v21, 0.0  ;;  %v10189_v63 = vmax.f32 %v10188_v22, 0.0  ;;  %v10192_v43 = vmax.f32 %v10191_v45, 0.0  ;;  %v10194_v21 = vld [vmem:[#allocation147_spill] sm:$0xff] }
 0x444   : > { %10181 = vst [vmem:[#allocation315_spill] sm:$0xff] %v7352_v42  ;;  %v7364_v37 = vsel %vm2223_vm15, %v10183_v4, 0.0  ;;  %v3016_v4 = vld [vmem:[%s8952_s5 + $0x318] sm:$0xff]  ;;  %v10195_v22 = vmax.f32 %v10194_v21, 0.0  ;;  %v10197_v45 = vld [vmem:[#allocation203_spill] sm:$0xff] }
 0x445   : > { %10184 = vst [vmem:[#allocation316_spill] sm:$0xff] %v7364_v37  ;;  %v7370_v3 = vsel %vm2223_vm15, %v10186_v17, 0.0  ;;  %v7376_v42 = vsel %vm2223_vm15, %v10189_v63, 0.0  ;;  %v7382_v53 = vsel %vm2223_vm15, %v10192_v43, 0.0  ;;  %v3033_v17 = vld [vmem:[%s8952_s5 + $0x3a0] sm:$0xff]  ;;  %v10201_v43 = vmax.f32 %v10200_v51, 0.0  ;;  %3340 = vmatpush.msrb.mxu2 %v3016_v4 }
 0x446   : > { %10187 = vst [vmem:[#allocation317_spill] sm:$0xff] %v7370_v3  ;;  %v7394_v63 = vsel %vm2223_vm15, %v10195_v22, 0.0  ;;  %v10203_v3 = vld [vmem:[#allocation206_spill] sm:$0xff]  ;;  %v2983_v22 = vld [vmem:[%s8952_s5 + $0x210] sm:$0xff]  ;;  %3359 = vmatpush.msrb.mxu3 %v3033_v17  ;;  %v10235_v17 = vld [vmem:[#allocation152_spill] sm:$0xff] }
 0x447   : > { %10190 = vst [vmem:[#allocation318_spill] sm:$0xff] %v7376_v42  ;;  %v10198_v42 = vmax.f32 %v10197_v45, 0.0  ;;  %v10204_v37 = vmax.f32 %v10203_v3, 0.0  ;;  %v10206_v45 = vld [vmem:[#allocation204_spill] sm:$0xff]  ;;  %3301 = vmatpush.msrb.mxu0 %v2983_v22  ;;  %3341 = vmatpush.msrb.mxu2 %v3015_v46 }
 0x448   : > { %10193 = vst [vmem:[#allocation319_spill] sm:$0xff] %v7382_v53  ;;  %v7406_v53 = vsel %vm2223_vm15, %v10201_v43, 0.0  ;;  %v10207_v51 = vmax.f32 %v10206_v45, 0.0  ;;  %v10209_v3 = vld [vmem:[#allocation28_spill] sm:$0xff] }
 0x449   : > { %10196 = vst [vmem:[#allocation320_spill] sm:$0xff] %v7394_v63  ;;  %v7400_v26 = vsel %vm2223_vm15, %v10198_v42, 0.0  ;;  %v7412_v21 = vsel %vm2223_vm15, %v10204_v37, 0.0  ;;  %v3000_v42 = vld [vmem:[%s8952_s5 + $0x298] sm:$0xff]  ;;  %v10212_v37 = vmax.f32 %v10211_v55, 0.0 }
 0x44a   : > { %10199 = vst [vmem:[#allocation321_spill] sm:$0xff] %v7400_v26  ;;  %v7424_v43 = vsel %vm2223_vm15, %v10207_v51, 0.0  ;;  %v10214_v26 = vld [vmem:[#allocation31_spill] sm:$0xff]  ;;  %v10217_v51 = vld [vmem:[#allocation29_spill] sm:$0xff]  ;;  %3320 = vmatpush.msrb.mxu1 %v3000_v42  ;;  %vm3528_vm15 = vcmask 139264  }
 0x44b   : > { %10202 = vst [vmem:[#allocation322_spill] sm:$0xff] %v7406_v53  ;;  %v10210_v53 = vmax.f32 %v10209_v3, 0.0  ;;  %v10215_v63 = vmax.f32 %v10214_v26, 0.0  ;;  %v10218_v3 = vmax.f32 %v10217_v51, 0.0  ;;  %v10247_v42 = vld [vmem:[#allocation209_spill] sm:$0xff] }
 0x44c   : > { %10205 = vst [vmem:[#allocation323_spill] sm:$0xff] %v7412_v21  ;;  %v7436_v21 = vsel %vm2224_vm0, %v10212_v37, 0.0  ;;  %v10224_v37 = vmax.f32 %v10223_v29, 0.0 }
 0x44d   : > { %10208 = vst [vmem:[#allocation324_spill] sm:$0xff] %v7424_v43  ;;  %v7430_v41 = vsel %vm2224_vm0, %v10210_v53, 0.0  ;;  %v7442_v45 = vsel %vm2224_vm0, %v10215_v63, 0.0  ;;  %v3032_v53 = vld [vmem:[%s8952_s5 + $0x398] sm:$0xff]  ;;  %v7455_v26 = vsel %vm2224_vm0, %v10218_v3, 0.0  ;;  %v10220_v63 = vld [vmem:[#allocation87_spill] sm:$0xff] }
 0x44e   : > { %10213 = vst [vmem:[#allocation325_spill] sm:$0xff] %v7436_v21  ;;  %v10221_v55 = vmax.f32 %v10220_v63, 0.0  ;;  %v7467_v43 = vsel %vm2224_vm0, %v10224_v37, 0.0  ;;  %v2982_v3 = vld [vmem:[%s8952_s5 + $0x208] sm:$0xff]  ;;  %v2999_v63 = vld [vmem:[%s8952_s5 + $0x290] sm:$0xff]  ;;  %3360 = vmatpush.msrb.mxu3 %v3032_v53 }
 0x44f   : > { %10216 = vst [vmem:[#allocation326_spill] sm:$0xff] %v7442_v45  ;;  %v10226_v45 = vld [vmem:[#allocation90_spill] sm:$0xff]  ;;  %3302 = vmatpush.msrb.mxu0 %v2982_v3  ;;  %3321 = vmatpush.msrb.mxu1 %v2999_v63  ;;  %v10269_v63 = vld [vmem:[#allocation93_spill] sm:$0xff] }
 0x450   : > { %10219 = vst [vmem:[#allocation327_spill] sm:$0xff] %v7455_v26  ;;  %v7461_v56 = vsel %vm2224_vm0, %v10221_v55, 0.0  ;;  %v10227_v21 = vmax.f32 %v10226_v45, 0.0  ;;  %v10229_v55 = vld [vmem:[#allocation88_spill] sm:$0xff]  ;;  %v10232_v45 = vld [vmem:[#allocation150_spill] sm:$0xff] }
 0x451   : > { %10222 = vst [vmem:[#allocation328_spill] sm:$0xff] %v7461_v56  ;;  %v10230_v29 = vmax.f32 %v10229_v55, 0.0  ;;  %v10238_v56 = vld [vmem:[#allocation153_spill] sm:$0xff]  ;;  %v10258_v53 = vld [vmem:[#allocation34_spill] sm:$0xff] }
 0x452   : > { %10225 = vst [vmem:[#allocation329_spill] sm:$0xff] %v7467_v43  ;;  %v7473_v51 = vsel %vm2224_vm0, %v10227_v21, 0.0  ;;  %v10233_v43 = vmax.f32 %v10232_v45, 0.0  ;;  %v10236_v21 = vmax.f32 %v10235_v17, 0.0  ;;  %v10239_v26 = vmax.f32 %v10238_v56, 0.0  ;;  %v10241_v45 = vld [vmem:[#allocation151_spill] sm:$0xff] }
 0x453   : > { %10228 = vst [vmem:[#allocation330_spill] sm:$0xff] %v7473_v51  ;;  %v7485_v37 = vsel %vm2224_vm0, %v10230_v29, 0.0  ;;  %v3014_v29 = vld [vmem:[%s8952_s5 + $0x308] sm:$0xff]  ;;  %v10242_v17 = vmax.f32 %v10241_v45, 0.0  ;;  %v10244_v56 = vld [vmem:[#allocation207_spill] sm:$0xff] }
 0x454   : > { %10231 = vst [vmem:[#allocation331_spill] sm:$0xff] %v7485_v37  ;;  %v7491_v4 = vsel %vm2224_vm0, %v10233_v43, 0.0  ;;  %v7497_v51 = vsel %vm2224_vm0, %v10236_v21, 0.0  ;;  %v7503_v55 = vsel %vm2224_vm0, %v10239_v26, 0.0  ;;  %v3031_v43 = vld [vmem:[%s8952_s5 + $0x390] sm:$0xff]  ;;  %v10248_v26 = vmax.f32 %v10247_v42, 0.0  ;;  %3342 = vmatpush.msrb.mxu2 %v3014_v29 }
 0x455   : > { %10234 = vst [vmem:[#allocation332_spill] sm:$0xff] %v7491_v4  ;;  %v7515_v21 = vsel %vm2224_vm0, %v10242_v17, 0.0  ;;  %v10250_v4 = vld [vmem:[#allocation210_spill] sm:$0xff]  ;;  %v2981_v17 = vld [vmem:[%s8952_s5 + $0x200] sm:$0xff]  ;;  %3361 = vmatpush.msrb.mxu3 %v3031_v43 }
 0x456   : > { %10237 = vst [vmem:[#allocation333_spill] sm:$0xff] %v7497_v51  ;;  %v10245_v51 = vmax.f32 %v10244_v56, 0.0  ;;  %v10251_v37 = vmax.f32 %v10250_v4, 0.0  ;;  %v10253_v56 = vld [vmem:[#allocation208_spill] sm:$0xff]  ;;  %v10282_v29 = vld [vmem:[#allocation157_spill] sm:$0xff]  ;;  %3303 = vmatpush.msrb.mxu0 %v2981_v17  ;;  %v10294_v17 = vld [vmem:[#allocation214_spill] sm:$0xff]  ;;  %3343 = vmatpush.msrb.mxu2 %v3013_v32 }
 0x457   : > { %10240 = vst [vmem:[#allocation334_spill] sm:$0xff] %v7503_v55  ;;  %v7527_v55 = vsel %vm2224_vm0, %v10248_v26, 0.0  ;;  %v10254_v42 = vmax.f32 %v10253_v56, 0.0  ;;  %v10256_v4 = vld [vmem:[#allocation32_spill] sm:$0xff]  ;;  %v10283_v43 = vmax.f32 %v10282_v29, 0.0  ;;  %v10304_v32 = vld [vmem:[#allocation39_spill] sm:$0xff] }
 0x458   : > { %10243 = vst [vmem:[#allocation335_spill] sm:$0xff] %v7515_v21  ;;  %v7521_v22 = vsel %vm2224_vm0, %v10245_v51, 0.0  ;;  %v7533_v45 = vsel %vm2224_vm0, %v10251_v37, 0.0  ;;  %v2998_v51 = vld [vmem:[%s8952_s5 + $0x288] sm:$0xff]  ;;  %v10259_v37 = vmax.f32 %v10258_v53, 0.0 }
 0x459   : > { %10246 = vst [vmem:[#allocation336_spill] sm:$0xff] %v7521_v22  ;;  %v7545_v26 = vsel %vm2224_vm0, %v10254_v42, 0.0  ;;  %v10261_v22 = vld [vmem:[#allocation35_spill] sm:$0xff]  ;;  %v10264_v42 = vld [vmem:[#allocation33_spill] sm:$0xff]  ;;  %3322 = vmatpush.msrb.mxu1 %v2998_v51  ;;  %v10295_v51 = vmax.f32 %v10294_v17, 0.0 }
 0x45a   : > { %10249 = vst [vmem:[#allocation337_spill] sm:$0xff] %v7527_v55  ;;  %v10257_v55 = vmax.f32 %v10256_v4, 0.0  ;;  %v10262_v21 = vmax.f32 %v10261_v22, 0.0  ;;  %v10265_v4 = vmax.f32 %v10264_v42, 0.0 }
 0x45b   : > { %10252 = vst [vmem:[#allocation338_spill] sm:$0xff] %v7533_v45  ;;  %v7557_v45 = vsel %vm2225_vm1, %v10259_v37, 0.0  ;;  %v10270_v37 = vmax.f32 %v10269_v63, 0.0 }
 0x45c   : > { %10255 = vst [vmem:[#allocation339_spill] sm:$0xff] %v7545_v26  ;;  %v7551_v46 = vsel %vm2225_vm1, %v10257_v55, 0.0  ;;  %v7563_v56 = vsel %vm2225_vm1, %v10262_v21, 0.0  ;;  %v3030_v55 = vld [vmem:[%s8952_s5 + $0x388] sm:$0xff]  ;;  %v7576_v22 = vsel %vm2225_vm1, %v10265_v4, 0.0  ;;  %v10266_v21 = vld [vmem:[#allocation91_spill] sm:$0xff] }
 0x45d   : > { %10260 = vst [vmem:[#allocation340_spill] sm:$0xff] %v7557_v45  ;;  %v10267_v53 = vmax.f32 %v10266_v21, 0.0  ;;  %v7588_v26 = vsel %vm2225_vm1, %v10270_v37, 0.0  ;;  %v10274_v4 = vld [vmem:[#allocation92_spill] sm:$0xff]  ;;  %3362 = vmatpush.msrb.mxu3 %v3030_v55  ;;  %v10305_v55 = vmax.f32 %v10304_v32, 0.0 }
 0x45e   : > { %10263 = vst [vmem:[#allocation341_spill] sm:$0xff] %v7563_v56  ;;  %v10272_v56 = vld [vmem:[#allocation94_spill] sm:$0xff]  ;;  %v10275_v21 = vmax.f32 %v10274_v4, 0.0  ;;  %v7618_v4 = vsel %vm2225_vm1, %v10283_v43, 0.0 }
 0x45f   : > { %v7582_v3 = vsel %vm2225_vm1, %v10267_v53, 0.0  ;;  %10271 = vst [vmem:[#allocation343_spill] sm:$0xff] %v7588_v26  ;;  %v10273_v45 = vmax.f32 %v10272_v56, 0.0  ;;  %v10279_v26 = vld [vmem:[#allocation156_spill] sm:$0xff] }
 0x460   : > { %10268 = vst [vmem:[#allocation342_spill] sm:$0xff] %v7582_v3  ;;  %v7600_v53 = vsel %vm2225_vm1, %v10275_v21, 0.0  ;;  %v10276_v3 = vld [vmem:[#allocation154_spill] sm:$0xff]  ;;  %v10280_v56 = vmax.f32 %v10279_v26, 0.0  ;;  %v10285_v21 = vld [vmem:[#allocation155_spill] sm:$0xff] }
 0x461   : > { %v7594_v42 = vsel %vm2225_vm1, %v10273_v45, 0.0  ;;  %v10277_v63 = vmax.f32 %v10276_v3, 0.0  ;;  %10284 = vst [vmem:[#allocation346_spill] sm:$0xff] %v7618_v4  ;;  %v10286_v3 = vmax.f32 %v10285_v21, 0.0  ;;  %v7642_v21 = vsel %vm2225_vm1, %v10295_v51, 0.0 }
 0x462   : > { %v7612_v45 = vsel %vm2225_vm1, %v10280_v56, 0.0  ;;  %10296 = vst [vmem:[#allocation350_spill] sm:$0xff] %v7642_v21  ;;  %v10314_v21 = vld [vmem:[#allocation98_spill] sm:$0xff] }
 0x463   : > { %v7606_v37 = vsel %vm2225_vm1, %v10277_v63, 0.0  ;;  %10281 = vst [vmem:[#allocation345_spill] sm:$0xff] %v7612_v45  ;;  %v7624_v63 = vsel %vm2225_vm1, %v10286_v3, 0.0  ;;  %v10291_v45 = vld [vmem:[#allocation213_spill] sm:$0xff]  ;;  %v10297_v3 = vld [vmem:[#allocation212_spill] sm:$0xff] }
 0x464   : > { %10278 = vst [vmem:[#allocation344_spill] sm:$0xff] %v7606_v37  ;;  %v10288_v37 = vld [vmem:[#allocation211_spill] sm:$0xff]  ;;  %v10292_v29 = vmax.f32 %v10291_v45, 0.0 }
 0x465   : > { %10287 = vst [vmem:[#allocation347_spill] sm:$0xff] %v7624_v63  ;;  %v10289_v26 = vmax.f32 %v10288_v37, 0.0  ;;  %v10298_v37 = vmax.f32 %v10297_v3, 0.0  ;;  %v7666_v3 = vsel %vm2226_vm2, %v10305_v55, 0.0  ;;  %v10315_v63 = vmax.f32 %v10314_v21, 0.0 }
 0x466   : > { %v7636_v43 = vsel %vm2225_vm1, %v10292_v29, 0.0 }
 0x467   : > { %v7630_v56 = vsel %vm2225_vm1, %v10289_v26, 0.0  ;;  %10293 = vst [vmem:[#allocation349_spill] sm:$0xff] %v7636_v43  ;;  %v7648_v26 = vsel %vm2225_vm1, %v10298_v37, 0.0  ;;  %v10302_v43 = vld [vmem:[#allocation38_spill] sm:$0xff] }
 0x468   : > { %10290 = vst [vmem:[#allocation348_spill] sm:$0xff] %v7630_v56  ;;  %v10300_v56 = vld [vmem:[#allocation36_spill] sm:$0xff]  ;;  %v10303_v17 = vmax.f32 %v10302_v43, 0.0 }
 0x469   : > { %10299 = vst [vmem:[#allocation351_spill] sm:$0xff] %v7648_v26  ;;  %v10301_v45 = vmax.f32 %v10300_v56, 0.0  ;;  %v10307_v56 = vmax.f32 %v10306_v30, 0.0  ;;  %v10311_v26 = vld [vmem:[#allocation97_spill] sm:$0xff]  ;;  %v7691_v30 = vsel %vm2226_vm2, %v10315_v63, 0.0 }
 0x46a   : > { %v7660_v51 = vsel %vm2226_vm2, %v10303_v17, 0.0  ;;  %v10312_v32 = vmax.f32 %v10311_v26, 0.0  ;;  %10316 = vst [vmem:[#allocation354_spill] sm:$0xff] %v7691_v30  ;;  %v10326_v63 = vld [vmem:[#allocation161_spill] sm:$0xff] }
 0x46b   : > { %v7654_v29 = vsel %vm2226_vm2, %v10301_v45, 0.0  ;;  %v7673_v37 = vsel %vm2226_vm2, %v10307_v56, 0.0  ;;  %v10308_v45 = vld [vmem:[#allocation95_spill] sm:$0xff]  ;;  %v10317_v56 = vld [vmem:[#allocation96_spill] sm:$0xff]  ;;  %v10327_v30 = vmax.f32 %v10326_v63, 0.0 }
 0x46c   : > { %v10309_v43 = vmax.f32 %v10308_v45, 0.0  ;;  %v7685_v55 = vsel %vm2226_vm2, %v10312_v32, 0.0  ;;  %v10318_v4 = vmax.f32 %v10317_v56, 0.0  ;;  %v10323_v32 = vld [vmem:[#allocation160_spill] sm:$0xff] }
 0x46d   : > { %10313 = vst [vmem:[#allocation353_spill] sm:$0xff] %v7685_v55  ;;  %v10324_v55 = vmax.f32 %v10323_v32, 0.0  ;;  %v7715_v56 = vsel %vm2226_vm2, %v10327_v30, 0.0  ;;  %v10338_v30 = vld [vmem:[#allocation218_spill] sm:$0xff] }
 0x46e   : > { %v7679_v17 = vsel %vm2226_vm2, %v10309_v43, 0.0  ;;  %v7697_v45 = vsel %vm2226_vm2, %v10318_v4, 0.0  ;;  %v10320_v43 = vld [vmem:[#allocation158_spill] sm:$0xff]  ;;  %10328 = vst [vmem:[#allocation358_spill] sm:$0xff] %v7715_v56  ;;  %v10329_v4 = vld [vmem:[#allocation159_spill] sm:$0xff]  ;;  %v10339_v56 = vmax.f32 %v10338_v30, 0.0 }
 0x46f   : > { %10310 = vst [vmem:[#allocation352_spill] sm:$0xff] %v7679_v17  ;;  %v10321_v17 = vmax.f32 %v10320_v43, 0.0  ;;  %v7709_v21 = vsel %vm2226_vm2, %v10324_v55, 0.0  ;;  %v10335_v55 = vld [vmem:[#allocation217_spill] sm:$0xff] }
 0x470   : > { %10319 = vst [vmem:[#allocation355_spill] sm:$0xff] %v7697_v45  ;;  %v10330_v45 = vmax.f32 %v10329_v4, 0.0  ;;  %v7739_v4 = vsel %vm2226_vm2, %v10339_v56, 0.0  ;;  %v10349_v56 = vld [vmem:[#allocation43_spill] sm:$0xff] }
 0x471   : > { %v7703_v26 = vsel %vm2226_vm2, %v10321_v17, 0.0  ;;  %10325 = vst [vmem:[#allocation357_spill] sm:$0xff] %v7709_v21  ;;  %v10332_v17 = vld [vmem:[#allocation215_spill] sm:$0xff]  ;;  %v10336_v21 = vmax.f32 %v10335_v55, 0.0 }
 0x472   : > { %10322 = vst [vmem:[#allocation356_spill] sm:$0xff] %v7703_v26  ;;  %v7721_v43 = vsel %vm2226_vm2, %v10330_v45, 0.0  ;;  %v10333_v26 = vmax.f32 %v10332_v17, 0.0  ;;  %v10341_v45 = vld [vmem:[#allocation216_spill] sm:$0xff] }
 0x473   : > { %10331 = vst [vmem:[#allocation359_spill] sm:$0xff] %v7721_v43  ;;  %v7733_v63 = vsel %vm2226_vm2, %v10336_v21, 0.0  ;;  %v10342_v43 = vmax.f32 %v10341_v45, 0.0  ;;  %v10346_v21 = vld [vmem:[#allocation42_spill] sm:$0xff] }
 0x474   : > { %v7727_v32 = vsel %vm2226_vm2, %v10333_v26, 0.0  ;;  %10337 = vst [vmem:[#allocation361_spill] sm:$0xff] %v7733_v63  ;;  %v10344_v26 = vld [vmem:[#allocation40_spill] sm:$0xff]  ;;  %v10347_v63 = vmax.f32 %v10346_v21, 0.0 }
 0x475   : > { %10334 = vst [vmem:[#allocation360_spill] sm:$0xff] %v7727_v32  ;;  %v7745_v17 = vsel %vm2226_vm2, %v10342_v43, 0.0  ;;  %v10345_v32 = vmax.f32 %v10344_v26, 0.0  ;;  %v10353_v43 = vmax.f32 %v10352_v47, 0.0  ;;  %v10355_v26 = vld [vmem:[#allocation99_spill] sm:$0xff] }
 0x476   : > { %10340 = vst [vmem:[#allocation362_spill] sm:$0xff] %v7739_v4  ;;  %v7757_v30 = vsel %vm2227_vm3, %v10347_v63, 0.0  ;;  %v10350_v4 = vmax.f32 %v10349_v56, 0.0  ;;  %v10356_v21 = vmax.f32 %v10355_v26, 0.0 }
 0x477   : > { %10343 = vst [vmem:[#allocation363_spill] sm:$0xff] %v7745_v17  ;;  %v7751_v55 = vsel %vm2227_vm3, %v10345_v32, 0.0  ;;  %v7770_v32 = vsel %vm2227_vm3, %v10353_v43, 0.0  ;;  %v10358_v17 = vld [vmem:[#allocation101_spill] sm:$0xff]  ;;  %v10364_v43 = vld [vmem:[#allocation100_spill] sm:$0xff] }
 0x478   : > { %10348 = vst [vmem:[#allocation364_spill] sm:$0xff] %v7757_v30  ;;  %v7763_v45 = vsel %vm2227_vm3, %v10350_v4, 0.0  ;;  %v7776_v63 = vsel %vm2227_vm3, %v10356_v21, 0.0  ;;  %v10359_v56 = vmax.f32 %v10358_v17, 0.0  ;;  %v10367_v21 = vld [vmem:[#allocation162_spill] sm:$0xff] }
 0x479   : > { %10351 = vst [vmem:[#allocation365_spill] sm:$0xff] %v7763_v45  ;;  %v10361_v45 = vld [vmem:[#allocation102_spill] sm:$0xff] }
 0x47a   : > { %10354 = vst [vmem:[#allocation366_spill] sm:$0xff] %v7770_v32  ;;  %v7782_v4 = vsel %vm2227_vm3, %v10359_v56, 0.0  ;;  %v10362_v30 = vmax.f32 %v10361_v45, 0.0  ;;  %v10365_v32 = vmax.f32 %v10364_v43, 0.0  ;;  %v10370_v56 = vld [vmem:[#allocation164_spill] sm:$0xff] }
 0x47b   : > { %10357 = vst [vmem:[#allocation367_spill] sm:$0xff] %v7776_v63  ;;  %v10368_v63 = vmax.f32 %v10367_v21, 0.0 }
 0x47c   : > { %10360 = vst [vmem:[#allocation368_spill] sm:$0xff] %v7782_v4  ;;  %v7788_v47 = vsel %vm2227_vm3, %v10362_v30, 0.0  ;;  %v7794_v26 = vsel %vm2227_vm3, %v10365_v32, 0.0  ;;  %v10371_v4 = vmax.f32 %v10370_v56, 0.0  ;;  %v10373_v30 = vld [vmem:[#allocation165_spill] sm:$0xff]  ;;  %v10376_v32 = vld [vmem:[#allocation163_spill] sm:$0xff] }
 0x47d   : > { %10363 = vst [vmem:[#allocation369_spill] sm:$0xff] %v7788_v47  ;;  %v7800_v17 = vsel %vm2227_vm3, %v10368_v63, 0.0  ;;  %v10374_v47 = vmax.f32 %v10373_v30, 0.0  ;;  %v10379_v63 = vld [vmem:[#allocation219_spill] sm:$0xff] }
 0x47e   : > { %10366 = vst [vmem:[#allocation370_spill] sm:$0xff] %v7794_v26  ;;  %v7806_v45 = vsel %vm2227_vm3, %v10371_v4, 0.0  ;;  %v10377_v26 = vmax.f32 %v10376_v32, 0.0  ;;  %v10382_v4 = vld [vmem:[#allocation221_spill] sm:$0xff] }
 0x47f   : > { %10369 = vst [vmem:[#allocation371_spill] sm:$0xff] %v7800_v17  ;;  %v7812_v43 = vsel %vm2227_vm3, %v10374_v47, 0.0  ;;  %v10380_v17 = vmax.f32 %v10379_v63, 0.0  ;;  %v10385_v47 = vld [vmem:[#allocation222_spill] sm:$0xff] }
 0x480   : > { %10372 = vst [vmem:[#allocation372_spill] sm:$0xff] %v7806_v45  ;;  %v7818_v21 = vsel %vm2227_vm3, %v10377_v26, 0.0  ;;  %v10383_v45 = vmax.f32 %v10382_v4, 0.0  ;;  %v10388_v26 = vld [vmem:[#allocation220_spill] sm:$0xff] }
 0x481   : > { %10375 = vst [vmem:[#allocation373_spill] sm:$0xff] %v7812_v43  ;;  %v7824_v56 = vsel %vm2227_vm3, %v10380_v17, 0.0  ;;  %v10386_v43 = vmax.f32 %v10385_v47, 0.0  ;;  %v10391_v17 = vld [vmem:[#allocation44_spill] sm:$0xff] }
 0x482   : > { %10378 = vst [vmem:[#allocation374_spill] sm:$0xff] %v7818_v21  ;;  %v7830_v30 = vsel %vm2227_vm3, %v10383_v45, 0.0  ;;  %v10389_v21 = vmax.f32 %v10388_v26, 0.0  ;;  %v10393_v45 = vld [vmem:[#allocation46_spill] sm:$0xff] }
 0x483   : > { %10381 = vst [vmem:[#allocation375_spill] sm:$0xff] %v7824_v56  ;;  %v7836_v32 = vsel %vm2227_vm3, %v10386_v43, 0.0  ;;  %v10392_v56 = vmax.f32 %v10391_v17, 0.0  ;;  %v10396_v43 = vld [vmem:[#allocation47_spill] sm:$0xff] }
 0x484   : > { %10384 = vst [vmem:[#allocation376_spill] sm:$0xff] %v7830_v30  ;;  %v7842_v63 = vsel %vm2227_vm3, %v10389_v21, 0.0  ;;  %v10394_v30 = vmax.f32 %v10393_v45, 0.0  ;;  %v10400_v21 = vmax.f32 %v10399_v27, 0.0  ;;  %v10402_v17 = vld [vmem:[#allocation103_spill] sm:$0xff] }
 0x485   : > { %10387 = vst [vmem:[#allocation377_spill] sm:$0xff] %v7836_v32  ;;  %v7848_v4 = vsel %vm2228_vm4, %v10392_v56, 0.0  ;;  %v10397_v32 = vmax.f32 %v10396_v43, 0.0  ;;  %v10403_v45 = vmax.f32 %v10402_v17, 0.0 }
 0x486   : > { %10390 = vst [vmem:[#allocation378_spill] sm:$0xff] %v7842_v63  ;;  %v7854_v47 = vsel %vm2228_vm4, %v10394_v30, 0.0  ;;  %v7867_v56 = vsel %vm2228_vm4, %v10400_v21, 0.0  ;;  %v10405_v63 = vld [vmem:[#allocation105_spill] sm:$0xff]  ;;  %v10411_v21 = vld [vmem:[#allocation104_spill] sm:$0xff] }
 0x487   : > { %10395 = vst [vmem:[#allocation379_spill] sm:$0xff] %v7854_v47  ;;  %v7860_v26 = vsel %vm2228_vm4, %v10397_v32, 0.0  ;;  %v7873_v30 = vsel %vm2228_vm4, %v10403_v45, 0.0  ;;  %v10406_v43 = vmax.f32 %v10405_v63, 0.0  ;;  %v10414_v45 = vld [vmem:[#allocation166_spill] sm:$0xff] }
 0x488   : > { %10398 = vst [vmem:[#allocation380_spill] sm:$0xff] %v7860_v26  ;;  %v10408_v26 = vld [vmem:[#allocation106_spill] sm:$0xff] }
 0x489   : > { %10401 = vst [vmem:[#allocation381_spill] sm:$0xff] %v7867_v56  ;;  %v7879_v32 = vsel %vm2228_vm4, %v10406_v43, 0.0  ;;  %v10409_v47 = vmax.f32 %v10408_v26, 0.0  ;;  %v10412_v56 = vmax.f32 %v10411_v21, 0.0  ;;  %v10417_v43 = vld [vmem:[#allocation168_spill] sm:$0xff] }
 0x48a   : > { %10404 = vst [vmem:[#allocation382_spill] sm:$0xff] %v7873_v30  ;;  %v10415_v30 = vmax.f32 %v10414_v45, 0.0 }
 0x48b   : > { %10407 = vst [vmem:[#allocation383_spill] sm:$0xff] %v7879_v32  ;;  %v7885_v27 = vsel %vm2228_vm4, %v10409_v47, 0.0  ;;  %v7891_v17 = vsel %vm2228_vm4, %v10412_v56, 0.0  ;;  %v10418_v32 = vmax.f32 %v10417_v43, 0.0  ;;  %v10420_v47 = vld [vmem:[#allocation169_spill] sm:$0xff]  ;;  %v10423_v56 = vld [vmem:[#allocation167_spill] sm:$0xff] }
 0x48c   : > { %10410 = vst [vmem:[#allocation384_spill] sm:$0xff] %v7885_v27  ;;  %v7897_v63 = vsel %vm2228_vm4, %v10415_v30, 0.0  ;;  %v10421_v27 = vmax.f32 %v10420_v47, 0.0  ;;  %v10426_v30 = vld [vmem:[#allocation223_spill] sm:$0xff] }
 0x48d   : > { %10413 = vst [vmem:[#allocation385_spill] sm:$0xff] %v7891_v17  ;;  %v7903_v26 = vsel %vm2228_vm4, %v10418_v32, 0.0  ;;  %v10424_v17 = vmax.f32 %v10423_v56, 0.0  ;;  %v10429_v32 = vld [vmem:[#allocation225_spill] sm:$0xff] }
 0x48e   : > { %10416 = vst [vmem:[#allocation386_spill] sm:$0xff] %v7897_v63  ;;  %v7909_v21 = vsel %vm2228_vm4, %v10421_v27, 0.0  ;;  %v10427_v63 = vmax.f32 %v10426_v30, 0.0  ;;  %v10432_v27 = vld [vmem:[#allocation226_spill] sm:$0xff] }
 0x48f   : > { %10419 = vst [vmem:[#allocation387_spill] sm:$0xff] %v7903_v26  ;;  %v7915_v45 = vsel %vm2228_vm4, %v10424_v17, 0.0  ;;  %v10430_v26 = vmax.f32 %v10429_v32, 0.0  ;;  %v10435_v17 = vld [vmem:[#allocation224_spill] sm:$0xff] }
 0x490   : > { %10422 = vst [vmem:[#allocation388_spill] sm:$0xff] %v7909_v21  ;;  %v7921_v43 = vsel %vm2228_vm4, %v10427_v63, 0.0  ;;  %v10433_v21 = vmax.f32 %v10432_v27, 0.0  ;;  %v10438_v63 = vld [vmem:[#allocation48_spill] sm:$0xff] }
 0x491   : > { %10425 = vst [vmem:[#allocation389_spill] sm:$0xff] %v7915_v45  ;;  %v7927_v47 = vsel %vm2228_vm4, %v10430_v26, 0.0  ;;  %v10436_v45 = vmax.f32 %v10435_v17, 0.0  ;;  %v10440_v26 = vld [vmem:[#allocation50_spill] sm:$0xff] }
 0x492   : > { %10428 = vst [vmem:[#allocation390_spill] sm:$0xff] %v7921_v43  ;;  %v7933_v56 = vsel %vm2228_vm4, %v10433_v21, 0.0  ;;  %v10439_v43 = vmax.f32 %v10438_v63, 0.0  ;;  %v10443_v21 = vld [vmem:[#allocation51_spill] sm:$0xff] }
 0x493   : > { %10431 = vst [vmem:[#allocation391_spill] sm:$0xff] %v7927_v47  ;;  %v7939_v30 = vsel %vm2228_vm4, %v10436_v45, 0.0  ;;  %v10441_v47 = vmax.f32 %v10440_v26, 0.0  ;;  %v10447_v45 = vmax.f32 %v10446_v31, 0.0 }
 0x494   : > { %10434 = vst [vmem:[#allocation392_spill] sm:$0xff] %v7933_v56  ;;  %v7945_v32 = vsel %vm2229_vm5, %v10439_v43, 0.0  ;;  %v10444_v56 = vmax.f32 %v10443_v21, 0.0  ;;  %v10449_v43 = vld [vmem:[#allocation107_spill] sm:$0xff] }
 0x495   : > { %10437 = vst [vmem:[#allocation393_spill] sm:$0xff] %v7939_v30  ;;  %v7951_v27 = vsel %vm2229_vm5, %v10441_v47, 0.0  ;;  %v7963_v63 = vsel %vm2229_vm5, %v10447_v45, 0.0  ;;  %v10450_v30 = vmax.f32 %v10449_v43, 0.0  ;;  %v10452_v47 = vld [vmem:[#allocation109_spill] sm:$0xff]  ;;  %v10458_v45 = vld [vmem:[#allocation108_spill] sm:$0xff] }
 0x496   : > { %10442 = vst [vmem:[#allocation394_spill] sm:$0xff] %v7951_v27  ;;  %v7957_v17 = vsel %vm2229_vm5, %v10444_v56, 0.0  ;;  %v10453_v27 = vmax.f32 %v10452_v47, 0.0  ;;  %v10455_v56 = vld [vmem:[#allocation110_spill] sm:$0xff] }
 0x497   : > { %10445 = vst [vmem:[#allocation395_spill] sm:$0xff] %v7957_v17  ;;  %v7969_v26 = vsel %vm2229_vm5, %v10450_v30, 0.0  ;;  %v10456_v17 = vmax.f32 %v10455_v56, 0.0  ;;  %v10461_v30 = vld [vmem:[#allocation170_spill] sm:$0xff] }
 0x498   : > { %10448 = vst [vmem:[#allocation396_spill] sm:$0xff] %v7963_v63  ;;  %v7975_v21 = vsel %vm2229_vm5, %v10453_v27, 0.0  ;;  %v10459_v63 = vmax.f32 %v10458_v45, 0.0  ;;  %v10464_v27 = vld [vmem:[#allocation172_spill] sm:$0xff] }
 0x499   : > { %10451 = vst [vmem:[#allocation397_spill] sm:$0xff] %v7969_v26  ;;  %v7981_v31 = vsel %vm2229_vm5, %v10456_v17, 0.0  ;;  %v10462_v26 = vmax.f32 %v10461_v30, 0.0  ;;  %v10467_v17 = vld [vmem:[#allocation173_spill] sm:$0xff] }
 0x49a   : > { %10454 = vst [vmem:[#allocation398_spill] sm:$0xff] %v7975_v21  ;;  %v7987_v43 = vsel %vm2229_vm5, %v10459_v63, 0.0  ;;  %v10465_v21 = vmax.f32 %v10464_v27, 0.0  ;;  %v10470_v63 = vld [vmem:[#allocation171_spill] sm:$0xff] }
 0x49b   : > { %10457 = vst [vmem:[#allocation399_spill] sm:$0xff] %v7981_v31  ;;  %v7993_v47 = vsel %vm2229_vm5, %v10462_v26, 0.0  ;;  %v10468_v31 = vmax.f32 %v10467_v17, 0.0  ;;  %v10473_v26 = vld [vmem:[#allocation227_spill] sm:$0xff] }
 0x49c   : > { %10460 = vst [vmem:[#allocation400_spill] sm:$0xff] %v7987_v43  ;;  %v7999_v56 = vsel %vm2229_vm5, %v10465_v21, 0.0  ;;  %v10471_v43 = vmax.f32 %v10470_v63, 0.0  ;;  %v10476_v21 = vld [vmem:[#allocation229_spill] sm:$0xff] }
 0x49d   : > { %10463 = vst [vmem:[#allocation401_spill] sm:$0xff] %v7993_v47  ;;  %v8005_v45 = vsel %vm2229_vm5, %v10468_v31, 0.0  ;;  %v10474_v47 = vmax.f32 %v10473_v26, 0.0  ;;  %v10479_v31 = vld [vmem:[#allocation230_spill] sm:$0xff] }
 0x49e   : > { %10466 = vst [vmem:[#allocation402_spill] sm:$0xff] %v7999_v56  ;;  %v8011_v30 = vsel %vm2229_vm5, %v10471_v43, 0.0  ;;  %v10477_v56 = vmax.f32 %v10476_v21, 0.0  ;;  %v10482_v43 = vld [vmem:[#allocation228_spill] sm:$0xff] }
 0x49f   : > { %10469 = vst [vmem:[#allocation403_spill] sm:$0xff] %v8005_v45  ;;  %v8017_v27 = vsel %vm2229_vm5, %v10474_v47, 0.0  ;;  %v10480_v45 = vmax.f32 %v10479_v31, 0.0  ;;  %v10485_v47 = vld [vmem:[#allocation52_spill] sm:$0xff] }
 0x4a0   : > { %10472 = vst [vmem:[#allocation404_spill] sm:$0xff] %v8011_v30  ;;  %v8023_v17 = vsel %vm2229_vm5, %v10477_v56, 0.0  ;;  %v10483_v30 = vmax.f32 %v10482_v43, 0.0  ;;  %v10487_v56 = vld [vmem:[#allocation54_spill] sm:$0xff] }
 0x4a1   : > { %10475 = vst [vmem:[#allocation405_spill] sm:$0xff] %v8017_v27  ;;  %v8029_v63 = vsel %vm2229_vm5, %v10480_v45, 0.0  ;;  %v10486_v27 = vmax.f32 %v10485_v47, 0.0  ;;  %v10490_v45 = vld [vmem:[#allocation55_spill] sm:$0xff] }
 0x4a2   : > { %10478 = vst [vmem:[#allocation406_spill] sm:$0xff] %v8023_v17  ;;  %v8035_v26 = vsel %vm2229_vm5, %v10483_v30, 0.0  ;;  %v10488_v17 = vmax.f32 %v10487_v56, 0.0  ;;  %v10494_v30 = vmax.f32 %v10493_v60, 0.0 }
 0x4a3   : > { %10481 = vst [vmem:[#allocation407_spill] sm:$0xff] %v8029_v63  ;;  %v8041_v21 = vsel %vm2230_vm6, %v10486_v27, 0.0  ;;  %v10491_v63 = vmax.f32 %v10490_v45, 0.0  ;;  %v10496_v27 = vld [vmem:[#allocation111_spill] sm:$0xff] }
 0x4a4   : > { %10484 = vst [vmem:[#allocation408_spill] sm:$0xff] %v8035_v26  ;;  %v8047_v31 = vsel %vm2230_vm6, %v10488_v17, 0.0  ;;  %v8059_v47 = vsel %vm2230_vm6, %v10494_v30, 0.0  ;;  %v10497_v26 = vmax.f32 %v10496_v27, 0.0  ;;  %v10499_v17 = vld [vmem:[#allocation113_spill] sm:$0xff]  ;;  %v10505_v30 = vld [vmem:[#allocation112_spill] sm:$0xff] }
 0x4a5   : > { %10489 = vst [vmem:[#allocation409_spill] sm:$0xff] %v8047_v31  ;;  %v8053_v43 = vsel %vm2230_vm6, %v10491_v63, 0.0  ;;  %v10500_v31 = vmax.f32 %v10499_v17, 0.0  ;;  %v10502_v63 = vld [vmem:[#allocation114_spill] sm:$0xff] }
 0x4a6   : > { %10492 = vst [vmem:[#allocation410_spill] sm:$0xff] %v8053_v43  ;;  %v8065_v56 = vsel %vm2230_vm6, %v10497_v26, 0.0  ;;  %v10503_v43 = vmax.f32 %v10502_v63, 0.0  ;;  %v10508_v26 = vld [vmem:[#allocation174_spill] sm:$0xff] }
 0x4a7   : > { %10495 = vst [vmem:[#allocation411_spill] sm:$0xff] %v8059_v47  ;;  %v8071_v45 = vsel %vm2230_vm6, %v10500_v31, 0.0  ;;  %v10506_v47 = vmax.f32 %v10505_v30, 0.0  ;;  %v10511_v31 = vld [vmem:[#allocation176_spill] sm:$0xff] }
 0x4a8   : > { %10498 = vst [vmem:[#allocation412_spill] sm:$0xff] %v8065_v56  ;;  %v8077_v60 = vsel %vm2230_vm6, %v10503_v43, 0.0  ;;  %v10509_v56 = vmax.f32 %v10508_v26, 0.0  ;;  %v10514_v43 = vld [vmem:[#allocation177_spill] sm:$0xff] }
 0x4a9   : > { %10501 = vst [vmem:[#allocation413_spill] sm:$0xff] %v8071_v45  ;;  %v8083_v27 = vsel %vm2230_vm6, %v10506_v47, 0.0  ;;  %v10512_v45 = vmax.f32 %v10511_v31, 0.0  ;;  %v10517_v47 = vld [vmem:[#allocation175_spill] sm:$0xff] }
 0x4aa   : > { %10504 = vst [vmem:[#allocation414_spill] sm:$0xff] %v8077_v60  ;;  %v8089_v17 = vsel %vm2230_vm6, %v10509_v56, 0.0  ;;  %v10515_v60 = vmax.f32 %v10514_v43, 0.0  ;;  %v10520_v56 = vld [vmem:[#allocation231_spill] sm:$0xff] }
 0x4ab   : > { %10507 = vst [vmem:[#allocation415_spill] sm:$0xff] %v8083_v27  ;;  %v8095_v63 = vsel %vm2230_vm6, %v10512_v45, 0.0  ;;  %v10518_v27 = vmax.f32 %v10517_v47, 0.0  ;;  %v10523_v45 = vld [vmem:[#allocation233_spill] sm:$0xff] }
 0x4ac   : > { %10510 = vst [vmem:[#allocation416_spill] sm:$0xff] %v8089_v17  ;;  %v8101_v30 = vsel %vm2230_vm6, %v10515_v60, 0.0  ;;  %v10521_v17 = vmax.f32 %v10520_v56, 0.0  ;;  %v10526_v60 = vld [vmem:[#allocation234_spill] sm:$0xff] }
 0x4ad   : > { %10513 = vst [vmem:[#allocation417_spill] sm:$0xff] %v8095_v63  ;;  %v8107_v26 = vsel %vm2230_vm6, %v10518_v27, 0.0  ;;  %v10524_v63 = vmax.f32 %v10523_v45, 0.0  ;;  %v10529_v27 = vld [vmem:[#allocation232_spill] sm:$0xff] }
 0x4ae   : > { %10516 = vst [vmem:[#allocation418_spill] sm:$0xff] %v8101_v30  ;;  %v8113_v31 = vsel %vm2230_vm6, %v10521_v17, 0.0  ;;  %v10527_v30 = vmax.f32 %v10526_v60, 0.0  ;;  %v10532_v17 = vld [vmem:[#allocation56_spill] sm:$0xff] }
 0x4af   : > { %10519 = vst [vmem:[#allocation419_spill] sm:$0xff] %v8107_v26  ;;  %v8119_v43 = vsel %vm2230_vm6, %v10524_v63, 0.0  ;;  %v10530_v26 = vmax.f32 %v10529_v27, 0.0  ;;  %v10534_v63 = vld [vmem:[#allocation58_spill] sm:$0xff] }
 0x4b0   : > { %10522 = vst [vmem:[#allocation420_spill] sm:$0xff] %v8113_v31  ;;  %v8125_v47 = vsel %vm2230_vm6, %v10527_v30, 0.0  ;;  %v10533_v31 = vmax.f32 %v10532_v17, 0.0  ;;  %v10537_v30 = vld [vmem:[#allocation59_spill] sm:$0xff] }
 0x4b1   : > { %10525 = vst [vmem:[#allocation421_spill] sm:$0xff] %v8119_v43  ;;  %v8131_v56 = vsel %vm2230_vm6, %v10530_v26, 0.0  ;;  %v10535_v43 = vmax.f32 %v10534_v63, 0.0  ;;  %v10541_v26 = vmax.f32 %v10540_v13, 0.0 }
 0x4b2   : > { %10528 = vst [vmem:[#allocation422_spill] sm:$0xff] %v8125_v47  ;;  %v8137_v45 = vsel %vm2231_vm7, %v10533_v31, 0.0  ;;  %v10538_v47 = vmax.f32 %v10537_v30, 0.0  ;;  %v10543_v31 = vld [vmem:[#allocation115_spill] sm:$0xff] }
 0x4b3   : > { %10531 = vst [vmem:[#allocation423_spill] sm:$0xff] %v8131_v56  ;;  %v8143_v60 = vsel %vm2231_vm7, %v10535_v43, 0.0  ;;  %v8155_v17 = vsel %vm2231_vm7, %v10541_v26, 0.0  ;;  %v10544_v56 = vmax.f32 %v10543_v31, 0.0  ;;  %v10546_v43 = vld [vmem:[#allocation117_spill] sm:$0xff]  ;;  %v10552_v26 = vld [vmem:[#allocation116_spill] sm:$0xff] }
 0x4b4   : > { %10536 = vst [vmem:[#allocation424_spill] sm:$0xff] %v8143_v60  ;;  %v8149_v27 = vsel %vm2231_vm7, %v10538_v47, 0.0  ;;  %v10547_v60 = vmax.f32 %v10546_v43, 0.0  ;;  %v10549_v47 = vld [vmem:[#allocation118_spill] sm:$0xff] }
 0x4b5   : > { %10539 = vst [vmem:[#allocation425_spill] sm:$0xff] %v8149_v27  ;;  %v8161_v63 = vsel %vm2231_vm7, %v10544_v56, 0.0  ;;  %v10550_v27 = vmax.f32 %v10549_v47, 0.0  ;;  %v10555_v56 = vld [vmem:[#allocation178_spill] sm:$0xff] }
 0x4b6   : > { %10542 = vst [vmem:[#allocation426_spill] sm:$0xff] %v8155_v17  ;;  %v8167_v30 = vsel %vm2231_vm7, %v10547_v60, 0.0  ;;  %v10553_v17 = vmax.f32 %v10552_v26, 0.0  ;;  %v10558_v60 = vld [vmem:[#allocation180_spill] sm:$0xff] }
 0x4b7   : > { %10545 = vst [vmem:[#allocation427_spill] sm:$0xff] %v8161_v63  ;;  %v8173_v13 = vsel %vm2231_vm7, %v10550_v27, 0.0  ;;  %v10556_v63 = vmax.f32 %v10555_v56, 0.0  ;;  %v10561_v27 = vld [vmem:[#allocation181_spill] sm:$0xff] }
 0x4b8   : > { %10548 = vst [vmem:[#allocation428_spill] sm:$0xff] %v8167_v30  ;;  %v8179_v31 = vsel %vm2231_vm7, %v10553_v17, 0.0  ;;  %v10559_v30 = vmax.f32 %v10558_v60, 0.0  ;;  %v10564_v17 = vld [vmem:[#allocation179_spill] sm:$0xff] }
 0x4b9   : > { %10551 = vst [vmem:[#allocation429_spill] sm:$0xff] %v8173_v13  ;;  %v8185_v43 = vsel %vm2231_vm7, %v10556_v63, 0.0  ;;  %v10562_v13 = vmax.f32 %v10561_v27, 0.0  ;;  %v10567_v63 = vld [vmem:[#allocation235_spill] sm:$0xff] }
 0x4ba   : > { %10554 = vst [vmem:[#allocation430_spill] sm:$0xff] %v8179_v31  ;;  %v8191_v47 = vsel %vm2231_vm7, %v10559_v30, 0.0  ;;  %v10565_v31 = vmax.f32 %v10564_v17, 0.0  ;;  %v10569_v30 = vld [vmem:[#allocation237_spill] sm:$0xff] }
 0x4bb   : > { %10557 = vst [vmem:[#allocation431_spill] sm:$0xff] %v8185_v43  ;;  %v8197_v26 = vsel %vm2231_vm7, %v10562_v13, 0.0  ;;  %v10568_v43 = vmax.f32 %v10567_v63, 0.0  ;;  %v10571_v13 = vld [vmem:[#allocation238_spill] sm:$0xff] }
 0x4bc   : > { %10560 = vst [vmem:[#allocation432_spill] sm:$0xff] %v8191_v47  ;;  %v8203_v56 = vsel %vm2231_vm7, %v10565_v31, 0.0  ;;  %v10570_v47 = vmax.f32 %v10569_v30, 0.0  ;;  %v10573_v31 = vld [vmem:[#allocation236_spill] sm:$0xff]  ;;  %v2541_v30 = vadd.f32 %v6587_v10, %v6468_v36 }
 0x4bd   : > { %10563 = vst [vmem:[#allocation433_spill] sm:$0xff] %v8197_v26  ;;  %v8209_v60 = vsel %vm2231_vm7, %v10568_v43, 0.0  ;;  %v10572_v26 = vmax.f32 %v10571_v13, 0.0  ;;  %v2524_v43 = vadd.f32 %v6989_v35, %v7067_v33  ;;  %v2583_v13 = vadd.f32 %v6605_v18, %v6486_v7 }
 0x4be   : > { %10566 = vst [vmem:[#allocation434_spill] sm:$0xff] %v8203_v56  ;;  %v8215_v27 = vsel %vm2231_vm7, %v10570_v47, 0.0  ;;  %v10574_v56 = vmax.f32 %v10573_v31, 0.0  ;;  %v2562_v47 = vadd.f32 %v6593_v58, %v6474_v40  ;;  %v2542_v33 = vadd.f32 %v2541_v30, %v6706_v14  ;;  %v10580_v31 = vld [vmem:[#allocation284_spill] sm:$0xff]  ;;  %v10582_v30 = vld [vmem:[#allocation295_spill] sm:$0xff] }
 0x4bf   : > { %v8221_v17 = vsel %vm2231_vm7, %v10572_v26, 0.0  ;;  %v2604_v26 = vadd.f32 %v6611_v8, %v6492_v52  ;;  %v2525_v35 = vadd.f32 %v2524_v43, %v7188_v19  ;;  %v2667_v40 = vadd.f32 %v6636_v12, %v6517_v61  ;;  %v10577_v19 = vld [vmem:[#allocation271_spill] sm:$0xff]  ;;  %v10581_v43 = vld [vmem:[#allocation285_spill] sm:$0xff] }
 0x4c0   : > { %v8227_v63 = vsel %vm2231_vm7, %v10574_v56, 0.0  ;;  %v2646_v56 = vadd.f32 %v6623_v6, %v6504_v9  ;;  %v2563_v36 = vadd.f32 %v2562_v47, %v6718_v34  ;;  %v2584_v7 = vadd.f32 %v2583_v13, %v6724_v0  ;;  %v10583_v47 = vld [vmem:[#allocation296_spill] sm:$0xff]  ;;  %v10584_v13 = vld [vmem:[#allocation286_spill] sm:$0xff] }
 0x4c1   : > { %v2605_v10 = vadd.f32 %v2604_v26, %v6730_v11  ;;  %v2626_v52 = vadd.f32 %v2625_v50, %v6736_v44  ;;  %v2526_v58 = vadd.f32 %v2525_v35, %v7309_v24  ;;  %v2543_v9 = vadd.f32 %v2542_v33, %v6831_v38  ;;  %v10578_v24 = vld [vmem:[#allocation282_spill] sm:$0xff]  ;;  %v10585_v50 = vld [vmem:[#allocation297_spill] sm:$0xff] }
 0x4c2   : > { %v2647_v57 = vadd.f32 %v2646_v56, %v6749_v25  ;;  %v2564_v18 = vadd.f32 %v2563_v36, %v6837_v1  ;;  %v2668_v8 = vadd.f32 %v2667_v40, %v6755_v2  ;;  %v2585_v23 = vadd.f32 %v2584_v7, %v6843_v62  ;;  %v10575_v1 = vld [vmem:[#allocation280_spill] sm:$0xff]  ;;  %v10586_v35 = vld [vmem:[#allocation298_spill] sm:$0xff]  ;;  %v10587_v36 = vld [vmem:[#allocation299_spill] sm:$0xff] }
 0x4c3   : > { %v2606_v61 = vadd.f32 %v2605_v10, %v6849_v49  ;;  %v2627_v6 = vadd.f32 %v2626_v52, %v6862_v15  ;;  %v2527_v14 = vadd.f32 %v2526_v58, %v7430_v41  ;;  %v2544_v34 = vadd.f32 %v2543_v9, %v6950_v48  ;;  %v10576_v15 = vld [vmem:[#allocation281_spill] sm:$0xff]  ;;  %v10579_v41 = vld [vmem:[#allocation283_spill] sm:$0xff]  ;;  %v10588_v7 = vld [vmem:[#allocation300_spill] sm:$0xff] }
 0x4c4   : > { %v2648_v12 = vadd.f32 %v2647_v57, %v6868_v39  ;;  %v2565_v0 = vadd.f32 %v2564_v18, %v6956_v28  ;;  %v2669_v11 = vadd.f32 %v2668_v8, %v6874_v16  ;;  %v2586_v44 = vadd.f32 %v2585_v23, %v6962_v54  ;;  %v10589_v57 = vld [vmem:[#allocation310_spill] sm:$0xff]  ;;  %v10590_v9 = vld [vmem:[#allocation311_spill] sm:$0xff]  ;;  %v10591_v18 = vld [vmem:[#allocation301_spill] sm:$0xff] }
 0x4c5   : > { %v2607_v25 = vadd.f32 %v2606_v61, %v6975_v5  ;;  %v2628_v2 = vadd.f32 %v2627_v6, %v6981_v20  ;;  %v2528_v38 = vadd.f32 %v2527_v14, %v7551_v46  ;;  %v2545_v49 = vadd.f32 %v2544_v34, %v10575_v1  ;;  %v10592_v23 = vld [vmem:[#allocation312_spill] sm:$0xff]  ;;  %v10593_v6 = vld [vmem:[#allocation313_spill] sm:$0xff]  ;;  %v10594_v14 = vld [vmem:[#allocation314_spill] sm:$0xff] }
 0x4c6   : > { %v2649_v62 = vadd.f32 %v2648_v12, %v6987_v59  ;;  %v2566_v39 = vadd.f32 %v2565_v0, %v10576_v15  ;;  %v2670_v48 = vadd.f32 %v2669_v11, %v10577_v19  ;;  %v2587_v28 = vadd.f32 %v2586_v44, %v10578_v24  ;;  %v10595_v0 = vld [vmem:[#allocation315_spill] sm:$0xff] }
 0x4c7   : > { %v2608_v16 = vadd.f32 %v2607_v25, %v10579_v41  ;;  %v2629_v54 = vadd.f32 %v2628_v2, %v10580_v31  ;;  %v2529_v20 = vadd.f32 %v2528_v38, %v7654_v29  ;;  %v2546_v59 = vadd.f32 %v2545_v49, %v10582_v30  ;;  %v10596_v25 = vld [vmem:[#allocation325_spill] sm:$0xff]  ;;  %v10598_v38 = vld [vmem:[#allocation316_spill] sm:$0xff]  ;;  %v10599_v49 = vld [vmem:[#allocation327_spill] sm:$0xff] }
 0x4c8   : > { %v2650_v5 = vadd.f32 %v2649_v62, %v10581_v43  ;;  %v2567_v46 = vadd.f32 %v2566_v39, %v10583_v47  ;;  %v2671_v26 = vadd.f32 %v2670_v48, %v10584_v13  ;;  %v2588_v56 = vadd.f32 %v2587_v28, %v10585_v50  ;;  %v10597_v62 = vld [vmem:[#allocation326_spill] sm:$0xff]  ;;  %v10600_v39 = vld [vmem:[#allocation328_spill] sm:$0xff]  ;;  %v10601_v48 = vld [vmem:[#allocation329_spill] sm:$0xff] }
 0x4c9   : > { %v2609_v33 = vadd.f32 %v2608_v16, %v10586_v35  ;;  %v2630_v40 = vadd.f32 %v2629_v54, %v10587_v36  ;;  %v2530_v52 = vadd.f32 %v2529_v20, %v7751_v55  ;;  %v2547_v58 = vadd.f32 %v2546_v59, %v10589_v57  ;;  %v10602_v28 = vld [vmem:[#allocation330_spill] sm:$0xff]  ;;  %v10603_v31 = vld [vmem:[#allocation340_spill] sm:$0xff]  ;;  %v10604_v43 = vld [vmem:[#allocation341_spill] sm:$0xff] }
 0x4ca   : > { %v2651_v10 = vadd.f32 %v2650_v5, %v10588_v7  ;;  %v2568_v29 = vadd.f32 %v2567_v46, %v10590_v9  ;;  %v2672_v8 = vadd.f32 %v2671_v26, %v10591_v18  ;;  %v2589_v61 = vadd.f32 %v2588_v56, %v10592_v23  ;;  %v10605_v5 = vld [vmem:[#allocation331_spill] sm:$0xff]  ;;  %v10606_v59 = vld [vmem:[#allocation342_spill] sm:$0xff]  ;;  %v10608_v36 = vld [vmem:[#allocation352_spill] sm:$0xff] }
 0x4cb   : > { %v2610_v12 = vadd.f32 %v2609_v33, %v10593_v6  ;;  %v2631_v34 = vadd.f32 %v2630_v40, %v10594_v14  ;;  %v2531_v44 = vadd.f32 %v2530_v52, %v7848_v4  ;;  %v2548_v2 = vadd.f32 %v2547_v58, %v10596_v25  ;;  %v10607_v46 = vld [vmem:[#allocation343_spill] sm:$0xff]  ;;  %v10609_v7 = vld [vmem:[#allocation353_spill] sm:$0xff]  ;;  %v10611_v58 = vld [vmem:[#allocation364_spill] sm:$0xff] }
 0x4cc   : > { %v2652_v11 = vadd.f32 %v2651_v10, %v10595_v0  ;;  %v2569_v55 = vadd.f32 %v2568_v29, %v10597_v62  ;;  %v2673_v1 = vadd.f32 %v2672_v8, %v10598_v38  ;;  %v2590_v15 = vadd.f32 %v2589_v61, %v10599_v49  ;;  %v10610_v10 = vld [vmem:[#allocation354_spill] sm:$0xff]  ;;  %v10612_v9 = vld [vmem:[#allocation365_spill] sm:$0xff]  ;;  %v10613_v29 = vld [vmem:[#allocation355_spill] sm:$0xff] }
 0x4cd   : > { %v2611_v19 = vadd.f32 %v2610_v12, %v10600_v39  ;;  %v2632_v24 = vadd.f32 %v2631_v34, %v10601_v48  ;;  %v2532_v16 = vadd.f32 %v2531_v44, %v7945_v32  ;;  %v2549_v54 = vadd.f32 %v2548_v2, %v10603_v31  ;;  %v10614_v18 = vld [vmem:[#allocation366_spill] sm:$0xff]  ;;  %v10615_v8 = vld [vmem:[#allocation367_spill] sm:$0xff]  ;;  %v10616_v23 = vld [vmem:[#allocation368_spill] sm:$0xff] }
 0x4ce   : > { %v2653_v41 = vadd.f32 %v2652_v11, %v10602_v28  ;;  %v2570_v4 = vadd.f32 %v2569_v55, %v10604_v43  ;;  %v2674_v20 = vadd.f32 %v2673_v1, %v10605_v5  ;;  %v2591_v30 = vadd.f32 %v2590_v15, %v7576_v22  ;;  %v10617_v61 = vld [vmem:[#allocation369_spill] sm:$0xff]  ;;  %v10618_v14 = vld [vmem:[#allocation379_spill] sm:$0xff]  ;;  %v10619_v0 = vld [vmem:[#allocation380_spill] sm:$0xff] }
 0x4cf   : > { %v2612_v47 = vadd.f32 %v2611_v19, %v10606_v59  ;;  %v2633_v13 = vadd.f32 %v2632_v24, %v10607_v46  ;;  %v2533_v50 = vadd.f32 %v2532_v16, %v8041_v21  ;;  %v2550_v56 = vadd.f32 %v2549_v54, %v7660_v51  ;;  %v10621_v25 = vld [vmem:[#allocation381_spill] sm:$0xff]  ;;  %v10622_v62 = vld [vmem:[#allocation382_spill] sm:$0xff]  ;;  %v10623_v38 = vld [vmem:[#allocation383_spill] sm:$0xff] }
 0x4d0   : > { %v2654_v26 = vadd.f32 %v2653_v41, %v7594_v42  ;;  %v2571_v32 = vadd.f32 %v2570_v4, %v7666_v3  ;;  %v2675_v35 = vadd.f32 %v2674_v20, %v7600_v53  ;;  %v2592_v33 = vadd.f32 %v2591_v30, %v7673_v37  ;;  %v10624_v49 = vld [vmem:[#allocation384_spill] sm:$0xff]  ;;  %v10625_v19 = vld [vmem:[#allocation394_spill] sm:$0xff]  ;;  %v10626_v24 = vld [vmem:[#allocation395_spill] sm:$0xff] }
 0x4d1   : > { %v2613_v40 = vadd.f32 %v2612_v47, %v10608_v36  ;;  %v2634_v22 = vadd.f32 %v2633_v13, %v10609_v7  ;;  %v2534_v57 = vadd.f32 %v2533_v50, %v8137_v45  ;;  %v2551_v42 = vadd.f32 %v2550_v56, %v10611_v58  ;;  %v10620_v45 = vld [vmem:[#allocation370_spill] sm:$0xff]  ;;  %v10627_v41 = vld [vmem:[#allocation385_spill] sm:$0xff]  ;;  %v10628_v31 = vld [vmem:[#allocation396_spill] sm:$0xff] }
 0x4d2   : > { %v2655_v52 = vadd.f32 %v2654_v26, %v10610_v10  ;;  %v2572_v21 = vadd.f32 %v2571_v32, %v10612_v9  ;;  %v2676_v51 = vadd.f32 %v2675_v35, %v10613_v29  ;;  %v2593_v3 = vadd.f32 %v2592_v33, %v10614_v18  ;;  %v10629_v43 = vld [vmem:[#allocation397_spill] sm:$0xff]  ;;  %v10630_v5 = vld [vmem:[#allocation398_spill] sm:$0xff]  ;;  %v10631_v30 = vld [vmem:[#allocation399_spill] sm:$0xff] }
 0x4d3   : > { %v2614_v53 = vadd.f32 %v2613_v40, %v10615_v8  ;;  %v2635_v37 = vadd.f32 %v2634_v22, %v10616_v23  ;;  %v2535_v12 = vrot.slane %v2534_v57, 4  ;;  %v2552_v34 = vadd.f32 %v2551_v42, %v10618_v14  ;;  %v10632_v46 = vld [vmem:[#allocation409_spill] sm:$0xff]  ;;  %v10633_v26 = vld [vmem:[#allocation410_spill] sm:$0xff]  ;;  %v10634_v56 = vld [vmem:[#allocation400_spill] sm:$0xff] }
 0x4d4   : > { %v2656_v6 = vadd.f32 %v2655_v52, %v10617_v61  ;;  %v2573_v11 = vadd.f32 %v2572_v21, %v10619_v0  ;;  %v2677_v44 = vadd.f32 %v2676_v51, %v10620_v45  ;;  %v2594_v2 = vadd.f32 %v2593_v3, %v10621_v25  ;;  %v10635_v35 = vld [vmem:[#allocation411_spill] sm:$0xff]  ;;  %v10636_v36 = vld [vmem:[#allocation412_spill] sm:$0xff]  ;;  %v10637_v7 = vld [vmem:[#allocation413_spill] sm:$0xff] }
 0x4d5   : > { %v2615_v55 = vadd.f32 %v2614_v53, %v10622_v62  ;;  %v2636_v1 = vadd.f32 %v2635_v37, %v10623_v38  ;;  %v2536_v39 = vadd.f32 %v2535_v12, %v2534_v57  ;;  %v2553_v48 = vadd.f32 %v2552_v34, %v10625_v19  ;;  %v10638_v10 = vld [vmem:[#allocation414_spill] sm:$0xff]  ;;  %v10639_v58 = vld [vmem:[#allocation424_spill] sm:$0xff]  ;;  %v10640_v9 = vld [vmem:[#allocation425_spill] sm:$0xff] }
 0x4d6   : > { %v2657_v15 = vadd.f32 %v2656_v6, %v10624_v49  ;;  %v2574_v28 = vadd.f32 %v2573_v11, %v10626_v24  ;;  %v2678_v16 = vadd.f32 %v2677_v44, %v10627_v41  ;;  %v2595_v54 = vadd.f32 %v2594_v2, %v10628_v31  ;;  %v10641_v29 = vld [vmem:[#allocation415_spill] sm:$0xff]  ;;  %v10642_v18 = vld [vmem:[#allocation426_spill] sm:$0xff]  ;;  %v10644_v23 = vld [vmem:[#allocation428_spill] sm:$0xff] }
 0x4d7   : > { %v2616_v4 = vadd.f32 %v2615_v55, %v10629_v43  ;;  %v2637_v20 = vadd.f32 %v2636_v1, %v10630_v5  ;;  %v2537_v47 = vrot.slane %v2536_v39, 2  ;;  %v2554_v13 = vadd.f32 %v2553_v48, %v10632_v46  ;;  %v10643_v8 = vld [vmem:[#allocation427_spill] sm:$0xff]  ;;  %v10645_v61 = vld [vmem:[#allocation429_spill] sm:$0xff]  ;;  %v10646_v0 = vld [vmem:[#allocation430_spill] sm:$0xff] }
 0x4d8   : > { %v2658_v59 = vadd.f32 %v2657_v15, %v10631_v30  ;;  %v2575_v50 = vadd.f32 %v2574_v28, %v10633_v26  ;;  %v2679_v32 = vadd.f32 %v2678_v16, %v10634_v56  ;;  %v2596_v33 = vadd.f32 %v2595_v54, %v10635_v35  ;;  %v10647_v41 = vld [vmem:[#allocation239_spill] sm:$0xff] }
 0x4d9   : > { %v2617_v40 = vadd.f32 %v2616_v4, %v10636_v36  ;;  %v2638_v22 = vadd.f32 %v2637_v20, %v10637_v7  ;;  %v2538_v57 = vadd.f32 %v2537_v47, %v2536_v39  ;;  %v2555_v42 = vadd.f32 %v2554_v13, %v10639_v58  ;;  %v10648_v16 = vld [vmem:[#allocation247_spill] sm:$0xff]  ;;  %v10649_v47 = vld [vmem:[#allocation256_spill] sm:$0xff] }
 0x4da   : > { %v2659_v52 = vadd.f32 %v2658_v59, %v10638_v10  ;;  %v2576_v21 = vadd.f32 %v2575_v50, %v10640_v9  ;;  %v2680_v51 = vadd.f32 %v2679_v32, %v10641_v29  ;;  %v2597_v3 = vadd.f32 %v2596_v33, %v10642_v18  ;;  %v10650_v36 = vld [vmem:[#allocation263_spill] sm:$0xff]  ;;  %v10651_v9 = vld [vmem:[#allocation272_spill] sm:$0xff] }
 0x4db   : > { %v2618_v53 = vadd.f32 %v2617_v40, %v10643_v8  ;;  %v2639_v37 = vadd.f32 %v2638_v22, %v10644_v23  ;;  %v2539_v12 = vrot.slane %v2538_v57, 1  ;;  %v2556_v14 = vrot.slane %v2555_v42, 4 }
 0x4dc   : > { %v2660_v6 = vadd.f32 %v2659_v52, %v10645_v61  ;;  %v2577_v34 = vrot.slane %v2576_v21, 4  ;;  %v2681_v11 = vadd.f32 %v2680_v51, %v10646_v0  ;;  %v2598_v45 = vrot.slane %v2597_v3, 4  ;;  %v10654_v61 = vld [vmem:[#allocation248_spill] sm:$0xff]  ;;  %v10657_v0 = vld [vmem:[#allocation242_spill] sm:$0xff] }
 0x4dd   : > { %v2619_v44 = vrot.slane %v2618_v53, 4  ;;  %v2640_v25 = vrot.slane %v2639_v37, 4  ;;  %v8353_v62 = vadd.f32 %v2539_v12, %v2538_v57  ;;  %v2557_v55 = vadd.f32 %v2556_v14, %v2555_v42  ;;  %v10655_v12 = vld [vmem:[#allocation241_spill] sm:$0xff] }
 0x4de   : > { %v2661_v2 = vrot.slane %v2660_v6, 4  ;;  %v2578_v38 = vadd.f32 %v2577_v34, %v2576_v21  ;;  %v2682_v1 = vrot.slane %v2681_v11, 4  ;;  %v2599_v49 = vadd.f32 %v2598_v45, %v2597_v3  ;;  %v10656_v14 = vld [vmem:[#allocation249_spill] sm:$0xff] }
 0x4df   : > { %v2620_v15 = vadd.f32 %v2619_v44, %v2618_v53  ;;  %v2641_v39 = vadd.f32 %v2640_v25, %v2639_v37  ;;  %v2558_v48 = vrot.slane %v2557_v55, 2  ;;  %v2688_v31 = vadd.f32 %v10648_v16, %v10647_v41  ;;  %v10652_v53 = vld [vmem:[#allocation287_spill] sm:$0xff]  ;;  %v10653_v37 = vld [vmem:[#allocation240_spill] sm:$0xff]  ;;  %v10667_v41 = vld [vmem:[#allocation257_spill] sm:$0xff] }
 0x4e0   : > { %v2662_v19 = vadd.f32 %v2661_v2, %v2660_v6  ;;  %v2579_v24 = vrot.slane %v2578_v38, 2  ;;  %v2683_v28 = vadd.f32 %v2682_v1, %v2681_v11  ;;  %v2600_v54 = vrot.slane %v2599_v49, 2  ;;  %v10658_v11 = vld [vmem:[#allocation250_spill] sm:$0xff]  ;;  %v10659_v44 = vld [vmem:[#allocation243_spill] sm:$0xff] }
 0x4e1   : > { %v2621_v43 = vrot.slane %v2620_v15, 2  ;;  %v2642_v4 = vrot.slane %v2641_v39, 2  ;;  %v2559_v20 = vadd.f32 %v2558_v48, %v2557_v55  ;;  %v2689_v46 = vadd.f32 %v2688_v31, %v10649_v47  ;;  %v10660_v25 = vld [vmem:[#allocation251_spill] sm:$0xff]  ;;  %v10661_v55 = vld [vmem:[#allocation244_spill] sm:$0xff]  ;;  %v10668_v31 = vld [vmem:[#allocation246_spill] sm:$0xff] }
 0x4e2   : > { %v2663_v5 = vrot.slane %v2662_v19, 2  ;;  %v2580_v30 = vadd.f32 %v2579_v24, %v2578_v38  ;;  %v2684_v59 = vrot.slane %v2683_v28, 2  ;;  %v2601_v13 = vadd.f32 %v2600_v54, %v2599_v49  ;;  %v10662_v38 = vld [vmem:[#allocation252_spill] sm:$0xff]  ;;  %v10663_v49 = vld [vmem:[#allocation245_spill] sm:$0xff]  ;;  %v10666_v24 = vld [vmem:[#allocation255_spill] sm:$0xff] }
 0x4e3   : > { %v2622_v26 = vadd.f32 %v2621_v43, %v2620_v15  ;;  %v2643_v50 = vadd.f32 %v2642_v4, %v2641_v39  ;;  %v2560_v32 = vrot.slane %v2559_v20, 1  ;;  %v2690_v40 = vadd.f32 %v2689_v46, %v10650_v36  ;;  %v10664_v15 = vld [vmem:[#allocation253_spill] sm:$0xff]  ;;  %v10669_v54 = vld [vmem:[#allocation254_spill] sm:$0xff] }
 0x4e4   : > { %v2664_v56 = vadd.f32 %v2663_v5, %v2662_v19  ;;  %v2581_v35 = vrot.slane %v2580_v30, 1  ;;  %v2685_v33 = vadd.f32 %v2684_v59, %v2683_v28  ;;  %v2602_v7 = vrot.slane %v2601_v13, 1  ;;  %v10665_v19 = vld [vmem:[#allocation302_spill] sm:$0xff]  ;;  %v10672_v59 = vld [vmem:[#allocation260_spill] sm:$0xff]  ;;  %v10673_v46 = vld [vmem:[#allocation261_spill] sm:$0xff] }
 0x4e5   : > { %v2623_v22 = vrot.slane %v2622_v26, 1  ;;  %v2644_v10 = vrot.slane %v2643_v50, 1  ;;  %v8359_v57 = vadd.f32 %v2560_v32, %v2559_v20  ;;  %v2691_v21 = vadd.f32 %v2690_v40, %v10651_v9  ;;  %v10670_v4 = vld [vmem:[#allocation258_spill] sm:$0xff]  ;;  %v10671_v20 = vld [vmem:[#allocation259_spill] sm:$0xff] }
 0x4e6   : > { %v2665_v52 = vrot.slane %v2664_v56, 1  ;;  %v8361_v58 = vadd.f32 %v2581_v35, %v2580_v30  ;;  %v2686_v42 = vrot.slane %v2685_v33, 1  ;;  %v8364_v29 = vadd.f32 %v2602_v7, %v2601_v13  ;;  %v10676_v35 = vld [vmem:[#allocation265_spill] sm:$0xff]  ;;  %v10677_v36 = vld [vmem:[#allocation262_spill] sm:$0xff] }
 0x4e7   : > { %v8366_v51 = vadd.f32 %v2623_v22, %v2622_v26  ;;  %v8368_v18 = vadd.f32 %v2644_v10, %v2643_v50  ;;  %v2692_v23 = vadd.f32 %v2691_v21, %v10652_v53  ;;  %v2709_v6 = vadd.f32 %v10654_v61, %v10653_v37  ;;  %v10674_v26 = vld [vmem:[#allocation317_spill] sm:$0xff]  ;;  %v10678_v7 = vld [vmem:[#allocation266_spill] sm:$0xff]  ;;  %v10679_v10 = vld [vmem:[#allocation267_spill] sm:$0xff] }
 0x4e8   : > { %v8370_v3 = vadd.f32 %v2665_v52, %v2664_v56  ;;  %v8372_v8 = vadd.f32 %v2686_v42, %v2685_v33  ;;  %v2730_v34 = vadd.f32 %v10656_v14, %v10655_v12  ;;  %v2751_v45 = vadd.f32 %v10658_v11, %v10657_v0  ;;  %v10675_v56 = vld [vmem:[#allocation264_spill] sm:$0xff]  ;;  %v10681_v21 = vld [vmem:[#allocation269_spill] sm:$0xff]  ;;  %v10684_v12 = vld [vmem:[#allocation274_spill] sm:$0xff] }
 0x4e9   : > { %v2772_v2 = vadd.f32 %v10660_v25, %v10659_v44  ;;  %v2793_v1 = vadd.f32 %v10662_v38, %v10661_v55  ;;  %v2814_v39 = vadd.f32 %v10664_v15, %v10663_v49  ;;  %v2693_v48 = vadd.f32 %v2692_v23, %v10665_v19  ;;  %v10680_v42 = vld [vmem:[#allocation268_spill] sm:$0xff]  ;;  %v10683_v61 = vld [vmem:[#allocation273_spill] sm:$0xff]  ;;  %v10686_v11 = vld [vmem:[#allocation275_spill] sm:$0xff] }
 0x4ea   : > { %v2710_v28 = vadd.f32 %v2709_v6, %v10666_v24  ;;  %v2731_v16 = vadd.f32 %v2730_v34, %v10667_v41  ;;  %v2835_v43 = vadd.f32 %v10669_v54, %v10668_v31  ;;  %v2752_v5 = vadd.f32 %v2751_v45, %v10670_v4  ;;  %v10682_v23 = vld [vmem:[#allocation332_spill] sm:$0xff]  ;;  %v10685_v34 = vld [vmem:[#allocation270_spill] sm:$0xff]  ;;  %v10695_v54 = vld [vmem:[#allocation291_spill] sm:$0xff] }
 0x4eb   : > { %v2773_v30 = vadd.f32 %v2772_v2, %v10671_v20  ;;  %v2794_v47 = vadd.f32 %v2793_v1, %v10672_v59  ;;  %v2815_v13 = vadd.f32 %v2814_v39, %v10673_v46  ;;  %v2694_v50 = vadd.f32 %v2693_v48, %v10674_v26  ;;  %v10687_v44 = vld [vmem:[#allocation276_spill] sm:$0xff]  ;;  %v10688_v2 = vld [vmem:[#allocation277_spill] sm:$0xff]  ;;  %v10689_v38 = vld [vmem:[#allocation278_spill] sm:$0xff] }
 0x4ec   : > { %v2711_v32 = vadd.f32 %v2710_v28, %v10675_v56  ;;  %v2732_v33 = vadd.f32 %v2731_v16, %v10676_v35  ;;  %v2836_v40 = vadd.f32 %v2835_v43, %v10677_v36  ;;  %v2753_v22 = vadd.f32 %v2752_v5, %v10678_v7  ;;  %v10690_v49 = vld [vmem:[#allocation344_spill] sm:$0xff]  ;;  %v10692_v48 = vld [vmem:[#allocation289_spill] sm:$0xff]  ;;  %v10693_v28 = vld [vmem:[#allocation279_spill] sm:$0xff] }
 0x4ed   : > { %v2774_v52 = vadd.f32 %v2773_v30, %v10679_v10  ;;  %v2795_v9 = vadd.f32 %v2794_v47, %v10680_v42  ;;  %v2816_v53 = vadd.f32 %v2815_v13, %v10681_v21  ;;  %v2695_v37 = vadd.f32 %v2694_v50, %v10682_v23  ;;  %v10691_v39 = vld [vmem:[#allocation288_spill] sm:$0xff]  ;;  %v10694_v16 = vld [vmem:[#allocation290_spill] sm:$0xff]  ;;  %v10697_v20 = vld [vmem:[#allocation293_spill] sm:$0xff] }
 0x4ee   : > { %v2712_v6 = vadd.f32 %v2711_v32, %v10683_v61  ;;  %v2733_v14 = vadd.f32 %v2732_v33, %v10684_v12  ;;  %v2837_v0 = vadd.f32 %v2836_v40, %v10685_v34  ;;  %v2754_v45 = vadd.f32 %v2753_v22, %v10686_v11  ;;  %v10696_v4 = vld [vmem:[#allocation292_spill] sm:$0xff]  ;;  %v10699_v46 = vld [vmem:[#allocation303_spill] sm:$0xff]  ;;  %v10701_v56 = vld [vmem:[#allocation294_spill] sm:$0xff] }
 0x4ef   : > { %v2775_v25 = vadd.f32 %v2774_v52, %v10687_v44  ;;  %v2796_v55 = vadd.f32 %v2795_v9, %v10688_v2  ;;  %v2817_v1 = vadd.f32 %v2816_v53, %v10689_v38  ;;  %v2696_v15 = vadd.f32 %v2695_v37, %v10690_v49  ;;  %v10698_v59 = vld [vmem:[#allocation356_spill] sm:$0xff]  ;;  %v10702_v35 = vld [vmem:[#allocation305_spill] sm:$0xff]  ;;  %v10703_v36 = vld [vmem:[#allocation306_spill] sm:$0xff] }
 0x4f0   : > { %v2713_v19 = vadd.f32 %v2712_v6, %v10691_v39  ;;  %v2734_v24 = vadd.f32 %v2733_v14, %v10692_v48  ;;  %v2838_v41 = vadd.f32 %v2837_v0, %v10693_v28  ;;  %v2755_v31 = vadd.f32 %v2754_v45, %v10694_v16  ;;  %v10700_v26 = vld [vmem:[#allocation304_spill] sm:$0xff]  ;;  %v10704_v7 = vld [vmem:[#allocation307_spill] sm:$0xff]  ;;  %v10707_v21 = vld [vmem:[#allocation318_spill] sm:$0xff] }
 0x4f1   : > { %v2776_v43 = vadd.f32 %v2775_v25, %v10695_v54  ;;  %v2797_v5 = vadd.f32 %v2796_v55, %v10696_v4  ;;  %v2818_v30 = vadd.f32 %v2817_v1, %v10697_v20  ;;  %v2697_v47 = vadd.f32 %v2696_v15, %v10698_v59  ;;  %v10705_v10 = vld [vmem:[#allocation308_spill] sm:$0xff]  ;;  %v10706_v42 = vld [vmem:[#allocation371_spill] sm:$0xff]  ;;  %v10709_v61 = vld [vmem:[#allocation309_spill] sm:$0xff] }
 0x4f2   : > { %v2714_v13 = vadd.f32 %v2713_v19, %v10699_v46  ;;  %v2735_v50 = vadd.f32 %v2734_v24, %v10700_v26  ;;  %v2839_v32 = vadd.f32 %v2838_v41, %v10701_v56  ;;  %v2756_v33 = vadd.f32 %v2755_v31, %v10702_v35  ;;  %v10708_v23 = vld [vmem:[#allocation319_spill] sm:$0xff]  ;;  %v10710_v12 = vld [vmem:[#allocation320_spill] sm:$0xff]  ;;  %v10711_v34 = vld [vmem:[#allocation321_spill] sm:$0xff] }
 0x4f3   : > { %v2777_v40 = vadd.f32 %v2776_v43, %v10703_v36  ;;  %v2798_v22 = vadd.f32 %v2797_v5, %v10704_v7  ;;  %v2819_v52 = vadd.f32 %v2818_v30, %v10705_v10  ;;  %v2698_v9 = vadd.f32 %v2697_v47, %v10706_v42  ;;  %v10712_v11 = vld [vmem:[#allocation322_spill] sm:$0xff]  ;;  %v10713_v44 = vld [vmem:[#allocation323_spill] sm:$0xff]  ;;  %v10715_v38 = vld [vmem:[#allocation333_spill] sm:$0xff] }
 0x4f4   : > { %v2715_v53 = vadd.f32 %v2714_v13, %v10707_v21  ;;  %v2736_v37 = vadd.f32 %v2735_v50, %v10708_v23  ;;  %v2840_v6 = vadd.f32 %v2839_v32, %v10709_v61  ;;  %v2757_v14 = vadd.f32 %v2756_v33, %v10710_v12  ;;  %v10714_v2 = vld [vmem:[#allocation386_spill] sm:$0xff]  ;;  %v10717_v39 = vld [vmem:[#allocation324_spill] sm:$0xff]  ;;  %v10718_v48 = vld [vmem:[#allocation335_spill] sm:$0xff] }
 0x4f5   : > { %v2778_v0 = vadd.f32 %v2777_v40, %v10711_v34  ;;  %v2799_v45 = vadd.f32 %v2798_v22, %v10712_v11  ;;  %v2820_v25 = vadd.f32 %v2819_v52, %v10713_v44  ;;  %v2699_v55 = vadd.f32 %v2698_v9, %v10714_v2  ;;  %v10716_v49 = vld [vmem:[#allocation334_spill] sm:$0xff]  ;;  %v10719_v28 = vld [vmem:[#allocation336_spill] sm:$0xff]  ;;  %v10720_v16 = vld [vmem:[#allocation337_spill] sm:$0xff] }
 0x4f6   : > { %v2716_v1 = vadd.f32 %v2715_v53, %v10715_v38  ;;  %v2737_v15 = vadd.f32 %v2736_v37, %v10716_v49  ;;  %v2841_v19 = vadd.f32 %v2840_v6, %v10717_v39  ;;  %v2758_v24 = vadd.f32 %v2757_v14, %v10718_v48  ;;  %v10721_v54 = vld [vmem:[#allocation338_spill] sm:$0xff]  ;;  %v10722_v4 = vld [vmem:[#allocation401_spill] sm:$0xff]  ;;  %v10725_v46 = vld [vmem:[#allocation339_spill] sm:$0xff] }
 0x4f7   : > { %v2779_v41 = vadd.f32 %v2778_v0, %v10719_v28  ;;  %v2800_v31 = vadd.f32 %v2799_v45, %v10720_v16  ;;  %v2821_v43 = vadd.f32 %v2820_v25, %v10721_v54  ;;  %v2700_v5 = vadd.f32 %v2699_v55, %v10722_v4  ;;  %v10723_v20 = vld [vmem:[#allocation345_spill] sm:$0xff]  ;;  %v10724_v59 = vld [vmem:[#allocation346_spill] sm:$0xff]  ;;  %v10726_v26 = vld [vmem:[#allocation347_spill] sm:$0xff] }
 0x4f8   : > { %v2717_v30 = vadd.f32 %v2716_v1, %v10723_v20  ;;  %v2738_v47 = vadd.f32 %v2737_v15, %v10724_v59  ;;  %v2842_v13 = vadd.f32 %v2841_v19, %v10725_v46  ;;  %v2759_v50 = vadd.f32 %v2758_v24, %v10726_v26  ;;  %v10727_v56 = vld [vmem:[#allocation348_spill] sm:$0xff]  ;;  %v10728_v35 = vld [vmem:[#allocation349_spill] sm:$0xff]  ;;  %v10729_v36 = vld [vmem:[#allocation350_spill] sm:$0xff] }
 0x4f9   : > { %v2780_v32 = vadd.f32 %v2779_v41, %v10727_v56  ;;  %v2801_v33 = vadd.f32 %v2800_v31, %v10728_v35  ;;  %v2822_v40 = vadd.f32 %v2821_v43, %v10729_v36  ;;  %v10730_v7 = vld [vmem:[#allocation416_spill] sm:$0xff]  ;;  %v10731_v10 = vld [vmem:[#allocation357_spill] sm:$0xff]  ;;  %v10732_v42 = vld [vmem:[#allocation358_spill] sm:$0xff] }
 0x4fa   : > { %v2701_v22 = vadd.f32 %v2700_v5, %v10730_v7  ;;  %v2718_v52 = vadd.f32 %v2717_v30, %v10731_v10  ;;  %v2739_v9 = vadd.f32 %v2738_v47, %v10732_v42  ;;  %v10733_v21 = vld [vmem:[#allocation351_spill] sm:$0xff]  ;;  %v10735_v61 = vld [vmem:[#allocation360_spill] sm:$0xff]  ;;  %v10736_v12 = vld [vmem:[#allocation361_spill] sm:$0xff] }
 0x4fb   : > { %v2843_v53 = vadd.f32 %v2842_v13, %v10733_v21  ;;  %v10734_v23 = vld [vmem:[#allocation359_spill] sm:$0xff]  ;;  %v2781_v6 = vadd.f32 %v2780_v32, %v10735_v61  ;;  %v2802_v14 = vadd.f32 %v2801_v33, %v10736_v12  ;;  %v10737_v34 = vld [vmem:[#allocation362_spill] sm:$0xff]  ;;  %v10739_v44 = vld [vmem:[#allocation372_spill] sm:$0xff] }
 0x4fc   : > { %v2760_v37 = vadd.f32 %v2759_v50, %v10734_v23  ;;  %v2823_v0 = vadd.f32 %v2822_v40, %v10737_v34  ;;  %v10738_v11 = vld [vmem:[#allocation431_spill] sm:$0xff]  ;;  %v2719_v25 = vadd.f32 %v2718_v52, %v10739_v44  ;;  %v10740_v2 = vld [vmem:[#allocation373_spill] sm:$0xff]  ;;  %v10742_v49 = vld [vmem:[#allocation374_spill] sm:$0xff] }
 0x4fd   : > { %v2702_v45 = vadd.f32 %v2701_v22, %v10738_v11  ;;  %v2740_v55 = vadd.f32 %v2739_v9, %v10740_v2  ;;  %v10741_v38 = vld [vmem:[#allocation363_spill] sm:$0xff]  ;;  %v10744_v48 = vld [vmem:[#allocation376_spill] sm:$0xff]  ;;  %v10745_v28 = vld [vmem:[#allocation377_spill] sm:$0xff] }
 0x4fe   : > { %v2844_v1 = vadd.f32 %v2843_v53, %v10741_v38  ;;  %v2761_v15 = vadd.f32 %v2760_v37, %v10742_v49  ;;  %v10743_v39 = vld [vmem:[#allocation375_spill] sm:$0xff]  ;;  %v2803_v24 = vadd.f32 %v2802_v14, %v10744_v48  ;;  %v2824_v41 = vadd.f32 %v2823_v0, %v10745_v28  ;;  %v10747_v43 = vld [vmem:[#allocation388_spill] sm:$0xff]  ;;  %v10748_v5 = vld [vmem:[#allocation378_spill] sm:$0xff] }
 0x4ff   : > { %v2782_v19 = vadd.f32 %v2781_v6, %v10743_v39  ;;  %v2703_v16 = vrot.slane %v2702_v45, 4  ;;  %v10746_v31 = vld [vmem:[#allocation387_spill] sm:$0xff]  ;;  %v2741_v4 = vadd.f32 %v2740_v55, %v10747_v43  ;;  %v10749_v30 = vld [vmem:[#allocation389_spill] sm:$0xff]  ;;  %v10750_v47 = vld [vmem:[#allocation390_spill] sm:$0xff] }
 0x500   : > { %v2720_v54 = vadd.f32 %v2719_v25, %v10746_v31  ;;  %v2845_v20 = vadd.f32 %v2844_v1, %v10748_v5  ;;  %v2762_v59 = vadd.f32 %v2761_v15, %v10749_v30  ;;  %v10751_v13 = vld [vmem:[#allocation391_spill] sm:$0xff]  ;;  %v10752_v50 = vld [vmem:[#allocation392_spill] sm:$0xff]  ;;  %v10753_v35 = vld [vmem:[#allocation402_spill] sm:$0xff] }
 0x501   : > { %v2783_v46 = vadd.f32 %v2782_v19, %v10750_v47  ;;  %v2804_v26 = vadd.f32 %v2803_v24, %v10751_v13  ;;  %v2825_v56 = vadd.f32 %v2824_v41, %v10752_v50  ;;  %v2704_v32 = vadd.f32 %v2703_v16, %v2702_v45  ;;  %v10754_v36 = vld [vmem:[#allocation403_spill] sm:$0xff]  ;;  %v10755_v7 = vld [vmem:[#allocation393_spill] sm:$0xff]  ;;  %v10756_v10 = vld [vmem:[#allocation404_spill] sm:$0xff] }
 0x502   : > { %v2721_v33 = vadd.f32 %v2720_v54, %v10753_v35  ;;  %v2742_v40 = vadd.f32 %v2741_v4, %v10754_v36  ;;  %v2846_v22 = vadd.f32 %v2845_v20, %v10755_v7  ;;  %v2763_v52 = vadd.f32 %v2762_v59, %v10756_v10  ;;  %v10757_v42 = vld [vmem:[#allocation405_spill] sm:$0xff]  ;;  %v10758_v21 = vld [vmem:[#allocation406_spill] sm:$0xff]  ;;  %v10759_v23 = vld [vmem:[#allocation407_spill] sm:$0xff] }
 0x503   : > { %v2784_v9 = vadd.f32 %v2783_v46, %v10757_v42  ;;  %v2805_v53 = vadd.f32 %v2804_v26, %v10758_v21  ;;  %v2826_v37 = vadd.f32 %v2825_v56, %v10759_v23  ;;  %v2997_v61 = vld [vmem:[%s8952_s5 + $0x280] sm:$0xff]  ;;  %v2705_v12 = vrot.slane %v2704_v32, 2  ;;  %v10761_v0 = vld [vmem:[#allocation418_spill] sm:$0xff]  ;;  %v10762_v45 = vld [vmem:[#allocation408_spill] sm:$0xff] }
 0x504   : > { %v3029_v6 = vld [vmem:[%s8952_s5 + $0x380] sm:$0xff]  ;;  %v2743_v11 = vadd.f32 %v2742_v40, %v10761_v0  ;;  %v2847_v44 = vadd.f32 %v2846_v22, %v10762_v45  ;;  %3323 = vmatpush.msrb.mxu1 %v2997_v61  ;;  %v10763_v25 = vld [vmem:[#allocation419_spill] sm:$0xff]  ;;  %v10764_v55 = vld [vmem:[#allocation420_spill] sm:$0xff]  ;;  %v2873_v61 = vrot.slane %v8361_v58, 6 }
 0x505   : > { %v10760_v14 = vld [vmem:[#allocation417_spill] sm:$0xff]  ;;  %3363 = vmatpush.msrb.mxu3 %v3029_v6  ;;  %v2764_v2 = vadd.f32 %v2763_v52, %v10763_v25  ;;  %v2785_v38 = vadd.f32 %v2784_v9, %v10764_v55  ;;  %v10766_v15 = vld [vmem:[#allocation422_spill] sm:$0xff]  ;;  %v2706_v19 = vadd.f32 %v2705_v12, %v2704_v32  ;;  %v10767_v48 = vld [vmem:[#allocation432_spill] sm:$0xff]  ;;  %v2872_v52 = vrot.slane %v8359_v57, 7 }
 0x506   : > { %v2722_v34 = vadd.f32 %v2721_v33, %v10760_v14  ;;  %v10765_v1 = vld [vmem:[#allocation421_spill] sm:$0xff]  ;;  %v2827_v39 = vadd.f32 %v2826_v37, %v10766_v15  ;;  %v10769_v16 = vld [vmem:[#allocation423_spill] sm:$0xff]  ;;  %v10770_v54 = vld [vmem:[#allocation434_spill] sm:$0xff]  ;;  %v2875_v15 = vrot.slane %v8366_v51, 4 }
 0x507   : > { %v2806_v49 = vadd.f32 %v2805_v53, %v10765_v1  ;;  %v10768_v28 = vld [vmem:[#allocation433_spill] sm:$0xff]  ;;  %v2848_v31 = vadd.f32 %v2847_v44, %v10769_v16  ;;  %v2765_v43 = vadd.f32 %v2764_v2, %v10770_v54  ;;  %v2786_v4 = vadd.f32 %v2785_v38, %v8209_v60 }
 0x508   : > { %v2723_v24 = vadd.f32 %v2722_v34, %v10767_v48  ;;  %v2744_v41 = vadd.f32 %v2743_v11, %v10768_v28  ;;  %v2828_v20 = vadd.f32 %v2827_v39, %v8221_v17  ;;  %v2707_v30 = vrot.slane %v2706_v19, 1 }
 0x509   : > { %v2807_v5 = vadd.f32 %v2806_v49, %v8215_v27  ;;  %v2849_v46 = vadd.f32 %v2848_v31, %v8227_v63  ;;  %v2766_v13 = vrot.slane %v2765_v43, 4  ;;  %v2787_v26 = vrot.slane %v2786_v4, 4 }
 0x50a   : > { %v2724_v59 = vrot.slane %v2723_v24, 4  ;;  %v2745_v47 = vrot.slane %v2744_v41, 4  ;;  %v2829_v56 = vrot.slane %v2828_v20, 4  ;;  %v8503_v32 = vadd.f32 %v2707_v30, %v2706_v19 }
 0x50b   : > { %v2808_v50 = vrot.slane %v2807_v5, 4  ;;  %v2850_v36 = vrot.slane %v2849_v46, 4  ;;  %v2767_v40 = vadd.f32 %v2766_v13, %v2765_v43  ;;  %v2788_v60 = vadd.f32 %v2787_v26, %v2786_v4 }
 0x50c   : > { %v2725_v35 = vadd.f32 %v2724_v59, %v2723_v24  ;;  %v2746_v33 = vadd.f32 %v2745_v47, %v2744_v41  ;;  %v2830_v27 = vadd.f32 %v2829_v56, %v2828_v20  ;;  %v2874_v44 = vrot.slane %v8364_v29, 5 }
 0x50d   : > { %v2809_v7 = vadd.f32 %v2808_v50, %v2807_v5  ;;  %v2851_v10 = vadd.f32 %v2850_v36, %v2849_v46  ;;  %v2768_v42 = vrot.slane %v2767_v40, 2  ;;  %v2789_v63 = vrot.slane %v2788_v60, 2 }
 0x50e   : > { %v2726_v22 = vrot.slane %v2725_v35, 2  ;;  %v2747_v17 = vrot.slane %v2746_v33, 2  ;;  %v2831_v21 = vrot.slane %v2830_v27, 2  ;;  %v2876_v28 = vrot.slane %v8368_v18, 3  ;;  %v2214_v18 = vld [vmem:[#allocation2] sm:$0xff] }
 0x50f   : > { %v2810_v9 = vrot.slane %v2809_v7, 2  ;;  %v2852_v37 = vrot.slane %v2851_v10, 2  ;;  %v2769_v6 = vadd.f32 %v2768_v42, %v2767_v40  ;;  %v2790_v12 = vadd.f32 %v2789_v63, %v2788_v60  ;;  %v2215_v60 = vld [vmem:[#allocation2 + $0x8] sm:$0xff]  ;;  %v3059_v42 = vld [vmem:[%s8952_s5 + $0x470] sm:$0xff]  ;;  %v3076_v63 = vld [vmem:[%s8952_s5 + $0x4f8] sm:$0xff] }
 0x510   : > { %v2727_v53 = vadd.f32 %v2726_v22, %v2725_v35  ;;  %v2748_v23 = vadd.f32 %v2747_v17, %v2746_v33  ;;  %v2832_v34 = vadd.f32 %v2831_v21, %v2830_v27  ;;  %v2877_v41 = vrot.slane %v8370_v3, 2  ;;  %v3060_v22 = vld [vmem:[%s8952_s5 + $0x478] sm:$0xff] }
 0x511   : > { %v2811_v14 = vadd.f32 %v2810_v9, %v2809_v7  ;;  %v2853_v45 = vadd.f32 %v2852_v37, %v2851_v10  ;;  %v2770_v25 = vrot.slane %v2769_v6, 1  ;;  %v2791_v57 = vrot.slane %v2790_v12, 1  ;;  %v3092_v17 = vld [vmem:[%s8952_s5 + $0x578] sm:$0xff]  ;;  %v3091_v9 = vld [vmem:[%s8952_s5 + $0x570] sm:$0xff]  ;;  %v3090_v37 = vld [vmem:[%s8952_s5 + $0x568] sm:$0xff] }
 0x512   : > { %v2728_v0 = vrot.slane %v2727_v53, 1  ;;  %v2749_v11 = vrot.slane %v2748_v23, 1  ;;  %v2833_v55 = vrot.slane %v2832_v34, 1  ;;  %v2878_v29 = vrot.slane %v8372_v8, 1  ;;  %v3108_v21 = vld [vmem:[%s8952_s5 + $0x5f8] sm:$0xff] }
 0x513   : > { %v2812_v2 = vrot.slane %v2811_v14, 1  ;;  %v2854_v49 = vrot.slane %v2853_v45, 1  ;;  %v2771_v39 = vadd.f32 %v2770_v25, %v2769_v6  ;;  %v2792_v58 = vadd.f32 %v2791_v57, %v2790_v12  ;;  %v3057_v6 = vld [vmem:[%s8952_s5 + $0x460] sm:$0xff]  ;;  %v3074_v12 = vld [vmem:[%s8952_s5 + $0x4e8] sm:$0xff] }
 0x514   : > { %v2729_v38 = vadd.f32 %v2728_v0, %v2727_v53  ;;  %v2750_v1 = vadd.f32 %v2749_v11, %v2748_v23  ;;  %v2834_v48 = vadd.f32 %v2833_v55, %v2832_v34  ;;  %v2887_v51 = vsel %vm2886_vm8, %v8353_v62, %v2872_v52  ;;  %v3058_v53 = vld [vmem:[%s8952_s5 + $0x468] sm:$0xff]  ;;  %v3075_v23 = vld [vmem:[%s8952_s5 + $0x4f0] sm:$0xff]  ;;  %v3056_v11 = vld [vmem:[%s8952_s5 + $0x458] sm:$0xff] }
 0x515   : > { %v2813_v19 = vadd.f32 %v2812_v2, %v2811_v14  ;;  %v2855_v24 = vadd.f32 %v2854_v49, %v2853_v45  ;;  %v2881_v54 = vrot.slane %v2771_v39, 5  ;;  %v2882_v43 = vrot.slane %v2792_v58, 4  ;;  %v3089_v14 = vld [vmem:[%s8952_s5 + $0x560] sm:$0xff]  ;;  %v3106_v34 = vld [vmem:[%s8952_s5 + $0x5e8] sm:$0xff]  ;;  %v3055_v55 = vld [vmem:[%s8952_s5 + $0x450] sm:$0xff] }
 0x516   : > { %v2879_v16 = vrot.slane %v2729_v38, 7  ;;  %v2880_v31 = vrot.slane %v2750_v1, 6  ;;  %v2884_v5 = vrot.slane %v2834_v48, 2  ;;  %v2889_v30 = vsel %vm2888_vm9, %v2873_v61, %v2874_v44  ;;  %v3107_v61 = vld [vmem:[%s8952_s5 + $0x5f0] sm:$0xff]  ;;  %v3073_v45 = vld [vmem:[%s8952_s5 + $0x4e0] sm:$0xff]  ;;  %v3088_v44 = vld [vmem:[%s8952_s5 + $0x558] sm:$0xff] }
 0x517   : > { %v2883_v4 = vrot.slane %v2813_v19, 3  ;;  %v2885_v20 = vrot.slane %v2855_v24, 1  ;;  %v2893_v59 = vsel %vm2892_vm11, %v2875_v15, %v2876_v28  ;;  %v2891_v3 = vsel %vm2890_vm10, %v2887_v51, %v2889_v30  ;;  %v3105_v57 = vld [vmem:[%s8952_s5 + $0x5e0] sm:$0xff]  ;;  %v3072_v38 = vld [vmem:[%s8952_s5 + $0x4d8] sm:$0xff]  ;;  %v3087_v1 = vld [vmem:[%s8952_s5 + $0x550] sm:$0xff] }
 0x518   : > { %v2895_v8 = vsel %vm2894_vm12, %v2877_v41, %v2878_v29  ;;  %v2900_v47 = vsel %vm2886_vm8, %v8503_v32, %v2879_v16  ;;  %v2901_v13 = vsel %vm2888_vm9, %v2880_v31, %v2881_v54  ;;  %v3104_v15 = vld [vmem:[%s8952_s5 + $0x5d8] sm:$0xff]  ;;  %v3054_v39 = vld [vmem:[%s8952_s5 + $0x448] sm:$0xff]  ;;  %v3071_v58 = vld [vmem:[%s8952_s5 + $0x4d0] sm:$0xff] }
 0x519   : > { %v2897_v46 = vsel %vm2896_vm13, %v2893_v59, %v2895_v8  ;;  %v2903_v26 = vsel %vm2892_vm11, %v2882_v43, %v2883_v4  ;;  %v2904_v50 = vsel %vm2894_vm12, %v2884_v5, %v2885_v20  ;;  %v2902_v62 = vsel %vm2890_vm10, %v2900_v47, %v2901_v13  ;;  %v3086_v19 = vld [vmem:[%s8952_s5 + $0x548] sm:$0xff]  ;;  %v3103_v48 = vld [vmem:[%s8952_s5 + $0x5d0] sm:$0xff]  ;;  %v3053_v24 = vld [vmem:[%s8952_s5 + $0x440] sm:$0xff] }
 0x51a   : > { %v2899_v56 = vsel %vm2898_vm14, %v2891_v3, %v2897_v46  ;;  %v2905_v35 = vsel %vm2896_vm13, %v2903_v26, %v2904_v50  ;;  %v3070_v28 = vld [vmem:[%s8952_s5 + $0x4c8] sm:$0xff]  ;;  %v3085_v41 = vld [vmem:[%s8952_s5 + $0x540] sm:$0xff]  ;;  %v3052_v16 = vld [vmem:[%s8952_s5 + $0x438] sm:$0xff] }
 0x51b   : > { %v2906_v33 = vsel %vm2898_vm14, %v2902_v62, %v2905_v35  ;;  %v2909_v36 = vadd.f32 %v2899_v56, %v2214_v18  ;;  %v3102_v29 = vld [vmem:[%s8952_s5 + $0x5c8] sm:$0xff]  ;;  %v3069_v31 = vld [vmem:[%s8952_s5 + $0x4c0] sm:$0xff]  ;;  %v3084_v54 = vld [vmem:[%s8952_s5 + $0x538] sm:$0xff] }
 0x51c   : > { %v8518_v7 = vadd.f32 %v2906_v33, %v2215_v60  ;;  %v3101_v43 = vld [vmem:[%s8952_s5 + $0x5c0] sm:$0xff]  ;;  %v3051_v4 = vld [vmem:[%s8952_s5 + $0x430] sm:$0xff]  ;;  %v3068_v5 = vld [vmem:[%s8952_s5 + $0x4b8] sm:$0xff] }
 0x51d   : > { %2911 = vst [vmem:[#allocation2] sm:$0xff] %v2909_v36  ;;  %v8516_v40 = vmul.f32 0.0044444446, %v2909_v36  ;;  %v3083_v20 = vld [vmem:[%s8952_s5 + $0x530] sm:$0xff]  ;;  %v3100_v51 = vld [vmem:[%s8952_s5 + $0x5b8] sm:$0xff]  ;;  %v3050_v30 = vld [vmem:[%s8952_s5 + $0x428] sm:$0xff] }
 0x51e   : > { %2912 = vst [vmem:[#allocation2 + $0x8] sm:$0xff] %v8518_v7  ;;  %v3067_v59 = vld [vmem:[%s8952_s5 + $0x4b0] sm:$0xff]  ;;  %v3082_v18 = vld [vmem:[%s8952_s5 + $0x528] sm:$0xff]  ;;  %v3049_v8 = vld [vmem:[%s8952_s5 + $0x420] sm:$0xff]  ;;  %v8692_v60 = vmul.f32 0.0044444446, %v8518_v7 }
 0x51f   : > { %v3176_v27 = vperm.slane %v8516_v40, 0  ;;  %v3178_v32 = vperm.slane %v8516_v40, 2  ;;  %v3177_v10 = vperm.slane %v8516_v40, 1  ;;  %v3179_v52 = vperm.slane %v8516_v40, 3  ;;  %v3099_v3 = vld [vmem:[%s8952_s5 + $0x5b0] sm:$0xff]  ;;  %v3066_v47 = vld [vmem:[%s8952_s5 + $0x4a8] sm:$0xff] }
 0x520   : > { %v3182_v0 = vperm.slane %v8516_v40, 6  ;;  %v3180_v25 = vperm.slane %v8516_v40, 4  ;;  %v3183_v2 = vperm.slane %v8516_v40, 7  ;;  %v3181_v49 = vperm.slane %v8516_v40, 5  ;;  %v3081_v46 = vld [vmem:[%s8952_s5 + $0x520] sm:$0xff]  ;;  %v3098_v13 = vld [vmem:[%s8952_s5 + $0x5a8] sm:$0xff] }
 0x521   : > { %3224 = vmatmul.f32.vlgmr.msra.gmra.mxu0 %v3176_v27  ;;  %3264 = vmatmul.f32.vlgmr.msra.gmra.mxu2 %v3178_v32  ;;  %v3048_v26 = vld [vmem:[%s8952_s5 + $0x418] sm:$0xff]  ;;  %v3065_v50 = vld [vmem:[%s8952_s5 + $0x4a0] sm:$0xff]  ;;  %v3047_v35 = vld [vmem:[%s8952_s5 + $0x410] sm:$0xff] }
 0x522   : > { %3368 = vmatpush.msra.mxu0 %v3060_v22  ;;  %3408 = vmatpush.msra.mxu2 %v3092_v17  ;;  %v3080_v56 = vld [vmem:[%s8952_s5 + $0x518] sm:$0xff]  ;;  %v3097_v62 = vld [vmem:[%s8952_s5 + $0x5a0] sm:$0xff]  ;;  %v3079_v36 = vld [vmem:[%s8952_s5 + $0x510] sm:$0xff] }
 0x523   : > { %3244 = vmatmul.f32.vlgmr.msra.gmra.mxu1 %v3177_v10  ;;  %3284 = vmatmul.f32.vlgmr.msra.gmra.mxu3 %v3179_v52  ;;  %v3064_v33 = vld [vmem:[%s8952_s5 + $0x498] sm:$0xff]  ;;  %v3046_v27 = vld [vmem:[%s8952_s5 + $0x408] sm:$0xff]  ;;  %v3063_v32 = vld [vmem:[%s8952_s5 + $0x490] sm:$0xff] }
 0x524   : > { %3369 = vmatpush.msra.mxu0 %v3059_v42  ;;  %3388 = vmatpush.msra.mxu1 %v3076_v63  ;;  %v3096_v40 = vld [vmem:[%s8952_s5 + $0x598] sm:$0xff]  ;;  %v3078_v22 = vld [vmem:[%s8952_s5 + $0x508] sm:$0xff]  ;;  %v3095_v7 = vld [vmem:[%s8952_s5 + $0x590] sm:$0xff]  ;;  %v3184_v63 = vperm.slane %v8692_v60, 0 }
 0x525   : > { %3409 = vmatpush.msra.mxu2 %v3091_v9  ;;  %3428 = vmatpush.msra.mxu3 %v3108_v21  ;;  %v3045_v17 = vld [vmem:[%s8952_s5 + $0x400] sm:$0xff]  ;;  %v3062_v10 = vld [vmem:[%s8952_s5 + $0x488] sm:$0xff]  ;;  %v3186_v9 = vperm.slane %v8692_v60, 2  ;;  %v3124_v21 = vld [vmem:[%s8952_s5 + $0x678] sm:$0xff] }
 0x526   : > { %3370 = vmatpush.msra.mxu0 %v3058_v53  ;;  %3389 = vmatpush.msra.mxu1 %v3075_v23  ;;  %v3077_v52 = vld [vmem:[%s8952_s5 + $0x500] sm:$0xff]  ;;  %v3094_v42 = vld [vmem:[%s8952_s5 + $0x588] sm:$0xff]  ;;  %v3156_v53 = vld [vmem:[%s8952_s5 + $0x778] sm:$0xff] }
 0x527   : > { %3410 = vmatpush.msra.mxu2 %v3090_v37  ;;  %3429 = vmatpush.msra.mxu3 %v3107_v61  ;;  %v3061_v23 = vld [vmem:[%s8952_s5 + $0x480] sm:$0xff]  ;;  %v3185_v61 = vperm.slane %v8692_v60, 1 }
 0x528   : > { %3371 = vmatpush.msra.mxu0 %v3057_v6  ;;  %3390 = vmatpush.msra.mxu1 %v3074_v12  ;;  %v3093_v37 = vld [vmem:[%s8952_s5 + $0x580] sm:$0xff]  ;;  %v3187_v6 = vperm.slane %v8692_v60, 3  ;;  %v3123_v12 = vld [vmem:[%s8952_s5 + $0x670] sm:$0xff] }
 0x529   : > { %3411 = vmatpush.msra.mxu2 %v3089_v14  ;;  %3430 = vmatpush.msra.mxu3 %v3106_v34  ;;  %v3140_v14 = vld [vmem:[%s8952_s5 + $0x6f8] sm:$0xff]  ;;  %v3155_v34 = vld [vmem:[%s8952_s5 + $0x770] sm:$0xff] }
 0x52a   : > { %3344 = vmatmul.f32.vlgmr.msrb.gmra.mxu2 %v3182_v0  ;;  %3372 = vmatpush.msra.mxu0 %v3056_v11  ;;  %v3172_v0 = vld [vmem:[%s8952_s5 + $0x7f8] sm:$0xff]  ;;  %v3122_v11 = vld [vmem:[%s8952_s5 + $0x668] sm:$0xff] }
 0x52b   : > { %3391 = vmatpush.msra.mxu1 %v3073_v45  ;;  %3412 = vmatpush.msra.mxu2 %v3088_v44  ;;  %v3139_v45 = vld [vmem:[%s8952_s5 + $0x6f0] sm:$0xff]  ;;  %v3154_v44 = vld [vmem:[%s8952_s5 + $0x768] sm:$0xff] }
 0x52c   : > { %3431 = vmatpush.msra.mxu3 %v3105_v57  ;;  %3304 = vmatmul.f32.vlgmr.msrb.gmra.mxu0 %v3180_v25  ;;  %v3171_v25 = vld [vmem:[%s8952_s5 + $0x7f0] sm:$0xff]  ;;  %v3121_v57 = vld [vmem:[%s8952_s5 + $0x660] sm:$0xff] }
 0x52d   : > { %3364 = vmatmul.f32.vlgmr.msrb.gmra.mxu3 %v3183_v2  ;;  %3373 = vmatpush.msra.mxu0 %v3055_v55  ;;  %v3138_v2 = vld [vmem:[%s8952_s5 + $0x6e8] sm:$0xff]  ;;  %v3153_v55 = vld [vmem:[%s8952_s5 + $0x760] sm:$0xff] }
 0x52e   : > { %3392 = vmatpush.msra.mxu1 %v3072_v38  ;;  %3413 = vmatpush.msra.mxu2 %v3087_v1  ;;  %v3170_v38 = vld [vmem:[%s8952_s5 + $0x7e8] sm:$0xff]  ;;  %v3120_v1 = vld [vmem:[%s8952_s5 + $0x658] sm:$0xff] }
 0x52f   : > { %3432 = vmatpush.msra.mxu3 %v3104_v15  ;;  %3324 = vmatmul.f32.vlgmr.msrb.gmra.mxu1 %v3181_v49  ;;  %v3137_v49 = vld [vmem:[%s8952_s5 + $0x6e0] sm:$0xff]  ;;  %v3152_v15 = vld [vmem:[%s8952_s5 + $0x758] sm:$0xff] }
 0x530   : > { %3374 = vmatpush.msra.mxu0 %v3054_v39  ;;  %3393 = vmatpush.msra.mxu1 %v3071_v58  ;;  %v3169_v39 = vld [vmem:[%s8952_s5 + $0x7e0] sm:$0xff]  ;;  %v3119_v58 = vld [vmem:[%s8952_s5 + $0x650] sm:$0xff] }
 0x531   : > { %3414 = vmatpush.msra.mxu2 %v3086_v19  ;;  %3433 = vmatpush.msra.mxu3 %v3103_v48  ;;  %v3136_v19 = vld [vmem:[%s8952_s5 + $0x6d8] sm:$0xff]  ;;  %v3151_v48 = vld [vmem:[%s8952_s5 + $0x750] sm:$0xff] }
 0x532   : > { %3375 = vmatpush.msra.mxu0 %v3053_v24  ;;  %3394 = vmatpush.msra.mxu1 %v3070_v28  ;;  %v3168_v24 = vld [vmem:[%s8952_s5 + $0x7d8] sm:$0xff]  ;;  %v3118_v28 = vld [vmem:[%s8952_s5 + $0x648] sm:$0xff] }
 0x533   : > { %3415 = vmatpush.msra.mxu2 %v3085_v41  ;;  %3434 = vmatpush.msra.mxu3 %v3102_v29  ;;  %v3135_v41 = vld [vmem:[%s8952_s5 + $0x6d0] sm:$0xff]  ;;  %v3150_v29 = vld [vmem:[%s8952_s5 + $0x748] sm:$0xff] }
 0x534   : > { %3376 = vmatpush.msra.mxu0 %v3052_v16  ;;  %3395 = vmatpush.msra.mxu1 %v3069_v31  ;;  %v3167_v16 = vld [vmem:[%s8952_s5 + $0x7d0] sm:$0xff]  ;;  %v3117_v31 = vld [vmem:[%s8952_s5 + $0x640] sm:$0xff] }
 0x535   : > { %3416 = vmatpush.msra.mxu2 %v3084_v54  ;;  %3435 = vmatpush.msra.mxu3 %v3101_v43  ;;  %v3134_v54 = vld [vmem:[%s8952_s5 + $0x6c8] sm:$0xff]  ;;  %v3149_v43 = vld [vmem:[%s8952_s5 + $0x740] sm:$0xff] }
 0x536   : > { %3377 = vmatpush.msra.mxu0 %v3051_v4  ;;  %3396 = vmatpush.msra.mxu1 %v3068_v5  ;;  %v3166_v4 = vld [vmem:[%s8952_s5 + $0x7c8] sm:$0xff]  ;;  %v3116_v5 = vld [vmem:[%s8952_s5 + $0x638] sm:$0xff] }
 0x537   : > { %3417 = vmatpush.msra.mxu2 %v3083_v20  ;;  %3436 = vmatpush.msra.mxu3 %v3100_v51  ;;  %v3133_v20 = vld [vmem:[%s8952_s5 + $0x6c0] sm:$0xff]  ;;  %v3148_v51 = vld [vmem:[%s8952_s5 + $0x738] sm:$0xff] }
 0x538   : > { %3378 = vmatpush.msra.mxu0 %v3050_v30  ;;  %3397 = vmatpush.msra.mxu1 %v3067_v59  ;;  %v3165_v30 = vld [vmem:[%s8952_s5 + $0x7c0] sm:$0xff]  ;;  %v3115_v59 = vld [vmem:[%s8952_s5 + $0x630] sm:$0xff] }
 0x539   : > { %3418 = vmatpush.msra.mxu2 %v3082_v18  ;;  %3437 = vmatpush.msra.mxu3 %v3099_v3  ;;  %v3132_v18 = vld [vmem:[%s8952_s5 + $0x6b8] sm:$0xff]  ;;  %v3147_v3 = vld [vmem:[%s8952_s5 + $0x730] sm:$0xff] }
 0x53a   : > { %3379 = vmatpush.msra.mxu0 %v3049_v8  ;;  %3398 = vmatpush.msra.mxu1 %v3066_v47  ;;  %v3164_v8 = vld [vmem:[%s8952_s5 + $0x7b8] sm:$0xff]  ;;  %v3114_v47 = vld [vmem:[%s8952_s5 + $0x628] sm:$0xff] }
 0x53b   : > { %3419 = vmatpush.msra.mxu2 %v3081_v46  ;;  %3438 = vmatpush.msra.mxu3 %v3098_v13  ;;  %v3131_v46 = vld [vmem:[%s8952_s5 + $0x6b0] sm:$0xff]  ;;  %v3146_v13 = vld [vmem:[%s8952_s5 + $0x728] sm:$0xff] }
 0x53c   : > { %3380 = vmatpush.msra.mxu0 %v3048_v26  ;;  %3399 = vmatpush.msra.mxu1 %v3065_v50  ;;  %v3163_v26 = vld [vmem:[%s8952_s5 + $0x7b0] sm:$0xff]  ;;  %v3113_v50 = vld [vmem:[%s8952_s5 + $0x620] sm:$0xff] }
 0x53d   : > { %3420 = vmatpush.msra.mxu2 %v3080_v56  ;;  %3439 = vmatpush.msra.mxu3 %v3097_v62  ;;  %v3130_v56 = vld [vmem:[%s8952_s5 + $0x6a8] sm:$0xff]  ;;  %v3145_v62 = vld [vmem:[%s8952_s5 + $0x720] sm:$0xff] }
 0x53e   : > { %3381 = vmatpush.msra.mxu0 %v3047_v35  ;;  %3400 = vmatpush.msra.mxu1 %v3064_v33  ;;  %v3162_v35 = vld [vmem:[%s8952_s5 + $0x7a8] sm:$0xff]  ;;  %v3112_v33 = vld [vmem:[%s8952_s5 + $0x618] sm:$0xff] }
 0x53f   : > { %3421 = vmatpush.msra.mxu2 %v3079_v36  ;;  %3440 = vmatpush.msra.mxu3 %v3096_v40  ;;  %v3129_v36 = vld [vmem:[%s8952_s5 + $0x6a0] sm:$0xff]  ;;  %v3144_v40 = vld [vmem:[%s8952_s5 + $0x718] sm:$0xff] }
 0x540   : > { %3382 = vmatpush.msra.mxu0 %v3046_v27  ;;  %3401 = vmatpush.msra.mxu1 %v3063_v32  ;;  %v3161_v27 = vld [vmem:[%s8952_s5 + $0x7a0] sm:$0xff]  ;;  %v3111_v32 = vld [vmem:[%s8952_s5 + $0x610] sm:$0xff] }
 0x541   : > { %3422 = vmatpush.msra.mxu2 %v3078_v22  ;;  %3441 = vmatpush.msra.mxu3 %v3095_v7  ;;  %v3128_v22 = vld [vmem:[%s8952_s5 + $0x698] sm:$0xff]  ;;  %v3143_v7 = vld [vmem:[%s8952_s5 + $0x710] sm:$0xff] }
 0x542   : > { %3383 = vmatpush.msra.mxu0 %v3045_v17  ;;  %3402 = vmatpush.msra.mxu1 %v3062_v10  ;;  %v3160_v17 = vld [vmem:[%s8952_s5 + $0x798] sm:$0xff]  ;;  %v3110_v10 = vld [vmem:[%s8952_s5 + $0x608] sm:$0xff] }
 0x543   : > { %3423 = vmatpush.msra.mxu2 %v3077_v52  ;;  %3442 = vmatpush.msra.mxu3 %v3094_v42  ;;  %v3127_v52 = vld [vmem:[%s8952_s5 + $0x690] sm:$0xff]  ;;  %v3142_v42 = vld [vmem:[%s8952_s5 + $0x708] sm:$0xff] }
 0x544   : > { %3384 = vmatmul.f32.vlgmr.msra.gmra.mxu0 %v3184_v63  ;;  %3424 = vmatmul.f32.vlgmr.msra.gmra.mxu2 %v3186_v9  ;;  %v3159_v63 = vld [vmem:[%s8952_s5 + $0x790] sm:$0xff]  ;;  %v3109_v9 = vld [vmem:[%s8952_s5 + $0x600] sm:$0xff] }
 0x545   : > { %3448 = vmatpush.msrb.mxu0 %v3124_v21  ;;  %3488 = vmatpush.msrb.mxu2 %v3156_v53  ;;  %v3126_v21 = vld [vmem:[%s8952_s5 + $0x688] sm:$0xff]  ;;  %v3141_v53 = vld [vmem:[%s8952_s5 + $0x700] sm:$0xff] }
 0x546   : > { %3403 = vmatpush.msra.mxu1 %v3061_v23  ;;  %3443 = vmatpush.msra.mxu3 %v3093_v37  ;;  %v3158_v23 = vld [vmem:[%s8952_s5 + $0x788] sm:$0xff]  ;;  %v3188_v37 = vperm.slane %v8692_v60, 4 }
 0x547   : > { %3404 = vmatmul.f32.vlgmr.msra.gmra.mxu1 %v3185_v61  ;;  %3444 = vmatmul.f32.vlgmr.msra.gmra.mxu3 %v3187_v6  ;;  %v3190_v61 = vperm.slane %v8692_v60, 6  ;;  %v3125_v6 = vld [vmem:[%s8952_s5 + $0x680] sm:$0xff] }
 0x548   : > { %3449 = vmatpush.msrb.mxu0 %v3123_v12  ;;  %3468 = vmatpush.msrb.mxu1 %v3140_v14  ;;  %v3157_v12 = vld [vmem:[%s8952_s5 + $0x780] sm:$0xff]  ;;  %v3189_v14 = vperm.slane %v8692_v60, 5 }
 0x549   : > { %3489 = vmatpush.msrb.mxu2 %v3155_v34  ;;  %3508 = vmatpush.msrb.mxu3 %v3172_v0  ;;  %v3191_v34 = vperm.slane %v8692_v60, 7  ;;  %v3173_v0 = vld [vmem:[%s8953_s6] sm:$0x1] }
 0x54a   : > { %3450 = vmatpush.msrb.mxu0 %v3122_v11  ;;  %3469 = vmatpush.msrb.mxu1 %v3139_v45 }
 0x54b   : > { %3490 = vmatpush.msrb.mxu2 %v3154_v44  ;;  %3509 = vmatpush.msrb.mxu3 %v3171_v25 }
 0x54c   : > { %3451 = vmatpush.msrb.mxu0 %v3121_v57  ;;  %3470 = vmatpush.msrb.mxu1 %v3138_v2 }
 0x54d   : > { %3491 = vmatpush.msrb.mxu2 %v3153_v55  ;;  %3510 = vmatpush.msrb.mxu3 %v3170_v38 }
 0x54e   : > { %3452 = vmatpush.msrb.mxu0 %v3120_v1  ;;  %3471 = vmatpush.msrb.mxu1 %v3137_v49 }
 0x54f   : > { %3492 = vmatpush.msrb.mxu2 %v3152_v15  ;;  %3511 = vmatpush.msrb.mxu3 %v3169_v39 }
 0x550   : > { %3453 = vmatpush.msrb.mxu0 %v3119_v58  ;;  %3472 = vmatpush.msrb.mxu1 %v3136_v19 }
 0x551   : > { %3493 = vmatpush.msrb.mxu2 %v3151_v48  ;;  %3512 = vmatpush.msrb.mxu3 %v3168_v24 }
 0x552   : > { %3454 = vmatpush.msrb.mxu0 %v3118_v28  ;;  %3473 = vmatpush.msrb.mxu1 %v3135_v41 }
 0x553   : > { %3494 = vmatpush.msrb.mxu2 %v3150_v29  ;;  %3513 = vmatpush.msrb.mxu3 %v3167_v16 }
 0x554   : > { %3455 = vmatpush.msrb.mxu0 %v3117_v31  ;;  %3474 = vmatpush.msrb.mxu1 %v3134_v54 }
 0x555   : > { %3495 = vmatpush.msrb.mxu2 %v3149_v43  ;;  %3514 = vmatpush.msrb.mxu3 %v3166_v4 }
 0x556   : > { %3456 = vmatpush.msrb.mxu0 %v3116_v5  ;;  %3475 = vmatpush.msrb.mxu1 %v3133_v20 }
 0x557   : > { %3496 = vmatpush.msrb.mxu2 %v3148_v51  ;;  %3515 = vmatpush.msrb.mxu3 %v3165_v30 }
 0x558   : > { %3457 = vmatpush.msrb.mxu0 %v3115_v59  ;;  %3476 = vmatpush.msrb.mxu1 %v3132_v18 }
 0x559   : > { %3497 = vmatpush.msrb.mxu2 %v3147_v3  ;;  %3516 = vmatpush.msrb.mxu3 %v3164_v8 }
 0x55a   : > { %3458 = vmatpush.msrb.mxu0 %v3114_v47  ;;  %3477 = vmatpush.msrb.mxu1 %v3131_v46 }
 0x55b   : > { %3498 = vmatpush.msrb.mxu2 %v3146_v13  ;;  %3517 = vmatpush.msrb.mxu3 %v3163_v26 }
 0x55c   : > { %3459 = vmatpush.msrb.mxu0 %v3113_v50  ;;  %3478 = vmatpush.msrb.mxu1 %v3130_v56 }
 0x55d   : > { %3499 = vmatpush.msrb.mxu2 %v3145_v62  ;;  %3518 = vmatpush.msrb.mxu3 %v3162_v35 }
 0x55e   : > { %3460 = vmatpush.msrb.mxu0 %v3112_v33  ;;  %3479 = vmatpush.msrb.mxu1 %v3129_v36 }
 0x55f   : > { %3500 = vmatpush.msrb.mxu2 %v3144_v40  ;;  %3519 = vmatpush.msrb.mxu3 %v3161_v27 }
 0x560   : > { %3461 = vmatpush.msrb.mxu0 %v3111_v32  ;;  %3480 = vmatpush.msrb.mxu1 %v3128_v22 }
 0x561   : > { %3501 = vmatpush.msrb.mxu2 %v3143_v7  ;;  %3520 = vmatpush.msrb.mxu3 %v3160_v17 }
 0x562   : > { %3462 = vmatpush.msrb.mxu0 %v3110_v10  ;;  %3481 = vmatpush.msrb.mxu1 %v3127_v52 }
 0x563   : > { %3502 = vmatpush.msrb.mxu2 %v3142_v42  ;;  %3521 = vmatpush.msrb.mxu3 %v3159_v63 }
 0x564   : > { %3463 = vmatpush.msrb.mxu0 %v3109_v9  ;;  %3482 = vmatpush.msrb.mxu1 %v3126_v21 }
 0x565   : > { %3503 = vmatpush.msrb.mxu2 %v3141_v53  ;;  %3522 = vmatpush.msrb.mxu3 %v3158_v23 }
 0x566   : > { %3464 = vmatmul.f32.vlgmr.msrb.gmra.mxu0 %v3188_v37  ;;  %3504 = vmatmul.f32.vlgmr.msrb.gmra.mxu2 %v3190_v61 }
 0x567   : > { %3483 = vmatpush.msrb.mxu1 %v3125_v6  ;;  %3523 = vmatpush.msrb.mxu3 %v3157_v12 }
 0x568   : > { %3484 = vmatmul.f32.vlgmr.msrb.gmra.mxu1 %v3189_v14  ;;  %3524 = vmatmul.f32.vlgmr.msrb.gmra.mxu3 %v3191_v34 }
 0x59e   : > { %v3225_v11 = vpop.f32.mrf.mxu0 }
 0x59f   : > { %v3226_v45 = vadd.f32 %v3225_v11, %v3173_v0 }
 0x5a0   : > { %v3245_v44 = vpop.f32.mrf.mxu1 }
 0x5a1   : > { %v3246_v25 = vadd.f32 %v3245_v44, %v3226_v45 }
 0x5a4   : > { %v3265_v57 = vpop.f32.mrf.mxu2 }
 0x5a5   : > { %v3266_v2 = vadd.f32 %v3265_v57, %v3246_v25 }
 0x5a6   : > { %v3285_v55 = vpop.f32.mrf.mxu3 }
 0x5a7   : > { %v3286_v60 = vadd.f32 %v3285_v55, %v3266_v2 }
 0x5a9   : > { %v3305_v38 = vpop.f32.mrf.mxu0 }
 0x5aa   : > { %v3306_v1 = vadd.f32 %v3305_v38, %v3286_v60 }
 0x5ac   : > { %v3325_v49 = vpop.f32.mrf.mxu1 }
 0x5ad   : > { %v3326_v15 = vadd.f32 %v3325_v49, %v3306_v1  ;;  %v3345_v39 = vpop.f32.mrf.mxu2 }
 0x5af   : > { %v3346_v58 = vadd.f32 %v3345_v39, %v3326_v15 }
 0x5b0   : > { %v3365_v19 = vpop.f32.mrf.mxu3 }
 0x5b1   : > { %v3366_v24 = vadd.f32 %v3365_v19, %v3346_v58 }
 0x5c1   : > { %v3385_v48 = vpop.f32.mrf.mxu0 }
 0x5c2   : > { %v3386_v28 = vadd.f32 %v3385_v48, %v3366_v24 }
 0x5c4   : > { %v3405_v41 = vpop.f32.mrf.mxu1 }
 0x5c5   : > { %v3406_v16 = vadd.f32 %v3405_v41, %v3386_v28 }
 0x5c7   : > { %v3425_v29 = vpop.f32.mrf.mxu2 }
 0x5c8   : > { %v3426_v31 = vadd.f32 %v3425_v29, %v3406_v16 }
 0x5ca   : > { %v3445_v54 = vpop.f32.mrf.mxu3 }
 0x5cb   : > { %v3446_v43 = vadd.f32 %v3445_v54, %v3426_v31 }
 0x5e3   : > { %v3465_v4 = vpop.f32.mrf.mxu0 }
 0x5e4   : > { %v3466_v5 = vadd.f32 %v3465_v4, %v3446_v43 }
 0x5e5   : > { %v3485_v20 = vpop.f32.mrf.mxu1 }
 0x5e6   : > { %v3486_v51 = vadd.f32 %v3485_v20, %v3466_v5 }
 0x5e9   : > { %v3505_v30 = vpop.f32.mrf.mxu2 }
 0x5ea   : > { %v3506_v59 = vadd.f32 %v3505_v30, %v3486_v51 }
 0x5eb   : > { %v3525_v18 = vpop.f32.mrf.mxu3 }
 0x5ec   : > { %v3526_v3 = vadd.f32 %v3525_v18, %v3506_v59 }
 0x5ee   : > { %3529 = vst.msk [vmem:[%s302_s12] sm:$0x1] %vm3528_vm15, %v3526_v3 }
 0x5ef PF: > { %s17_s28 = sadd.s32 1, %s4040_s28   ;;  %s10771_s24 = smov %s4032_s26 }
 0x5f0   : > { %p14_p10 = scmp.ge.s32.totalorder %s17_s28, 6   ;;  %s10772_s25 = smov %s4036_s27 }
 0x5f1   : > { %s10773_s26 = smov %s10776_s29  ;;  %s10774_s27 = smov %s10780_s30 }
 0x5f2   :  { %16 = sbr.rel (!%p14_p10) target bundleno = 3 (0x3), region = 90 }

</bundles_post_ra>
